<compile_context>
chip_gen: v7x
topology: tpu7x:2x2x1
jax: 0.10.0
libtpu: 0.0.40
codegen_flags: <defaults>
</compile_context>

<pallas_src>
import functools
import numpy as np

import jax
import jax.numpy as jnp
from jax.experimental import pallas as pl
from jax.experimental.pallas import tpu as pltpu

C_K, C_V, C_S, NUM_QUERIES = 8, 120, 64, 4
HIDDEN = 256
VISION_HIDDEN = 128


def _bf16_eup_supported():
    """bf16 transcendentals are fast on v6e/v7x EUP; keep f32 on v5e/older."""
    try:
        kind = jax.devices()[0].device_kind.lower()
    except Exception:
        return False
    return any(tag in kind for tag in ("v6", "v7", "7x"))


def _smem_col(ref, start, n):
    """Read n consecutive f32 scalars from a 1-D SMEM ref into an (n, 1) vector."""
    rows = jax.lax.broadcasted_iota(jnp.int32, (n, 1), 0)
    col = jnp.zeros((n, 1), jnp.float32)
    for i in range(n):
        col = col + jnp.where(rows == i, ref[start + i], 0.0)
    return col


# ----------------------------- generic matmul ------------------------------

def _linear_kernel(x_ref, w_ref, b_ref, o_ref, *, activation):
    y = jnp.dot(x_ref[...], w_ref[...], preferred_element_type=jnp.float32)
    y = y + b_ref[...]
    if activation == "relu":
        y = jnp.maximum(y, 0.0)
    o_ref[...] = y.astype(o_ref.dtype)


def pallas_linear(x, w, b, activation=None, block_m=512, out_dtype=jnp.float32):
    """y = x @ w + b (optional relu).  bf16 MXU matmul, f32 accumulate."""
    M, K = x.shape
    N = w.shape[1]
    bm = M if M <= block_m else block_m
    b2 = b.reshape(1, N).astype(jnp.float32)
    return pl.pallas_call(
        functools.partial(_linear_kernel, activation=activation),
        out_shape=jax.ShapeDtypeStruct((M, N), out_dtype),
        grid=(pl.cdiv(M, bm),),
        in_specs=[
            pl.BlockSpec((bm, K), lambda i: (i, 0)),
            pl.BlockSpec((K, N), lambda i: (0, 0)),
            pl.BlockSpec((1, N), lambda i: (0, 0)),
        ],
        out_specs=pl.BlockSpec((bm, N), lambda i: (i, 0)),
        compiler_params=pltpu.CompilerParams(
            dimension_semantics=("parallel",),
            vmem_limit_bytes=32 * 1024 * 1024),
    )(x.astype(jnp.bfloat16), w.astype(jnp.bfloat16), b2)


def conv2d_nhwc(x, w, b, stride, padding, out_dtype=jnp.bfloat16):
    """Conv2d via bf16 im2col; the matmul runs in the pallas_linear kernel."""
    # TODO(synk): for large frames, the 8x8 conv1 im2col should be replaced by
    # an in-kernel shifted-slice conv to avoid the 64x read amplification.
    B, H, W, Cin = x.shape
    KH, KW, _, Cout = w.shape
    x = x.astype(jnp.bfloat16)
    xp = jnp.pad(x, ((0, 0), (padding, padding), (padding, padding), (0, 0)))
    Ho = (H + 2 * padding - KH) // stride + 1
    Wo = (W + 2 * padding - KW) // stride + 1
    cols = []
    for i in range(KH):
        for j in range(KW):
            cols.append(xp[:, i:i + stride * (Ho - 1) + 1:stride,
                           j:j + stride * (Wo - 1) + 1:stride, :])
    patches = jnp.concatenate(cols, axis=-1)               # (B,Ho,Wo,KH*KW*Cin)
    xm = patches.reshape(B * Ho * Wo, KH * KW * Cin)
    wm = w.reshape(KH * KW * Cin, Cout)
    ym = pallas_linear(xm, wm, b, out_dtype=out_dtype)
    return ym.reshape(B, Ho, Wo, Cout)


# ---------------------- fused ConvLSTM recurrence kernel --------------------

def _convlstm_kernel(xg_ref, h0_ref, c0_ref, wh_ref, wci_ref, wcf_ref, wco_ref,
                     nd_ref, hseq_ref, hfin_ref, cfin_ref,
                     *, Hc, Wc, C, b_total, bb, gate_dtype):
    bi = pl.program_id(0)
    t = pl.program_id(1)
    HW = Hc * Wc

    @pl.when(t == 0)
    def _():
        hfin_ref[...] = h0_ref[...]
        cfin_ref[...] = c0_ref[...]

    nd = _smem_col(nd_ref, t * b_total + bi * bb, bb)        # (bb,1) f32 (SMEM)
    nd3 = nd.reshape(bb, 1, 1)
    h = hfin_ref[...] * nd3                                  # (bb, HW, C) f32
    c = cfin_ref[...] * nd3

    # zero-padded bf16 h for the 3x3 'same' convolution
    hb = h.astype(jnp.bfloat16).reshape(bb, Hc, Wc, C)
    zc = jnp.zeros((bb, Hc, 1, C), jnp.bfloat16)
    zr = jnp.zeros((bb, 1, Wc + 2, C), jnp.bfloat16)
    hp = jnp.concatenate([zr, jnp.concatenate([zc, hb, zc], axis=2), zr], axis=1)

    # 9 accumulating (bb*HW, C) @ (C, 4C) MXU matmuls (no 9C-wide concat)
    gates = xg_ref[0].astype(jnp.float32).reshape(bb * HW, 4 * C)
    for k in range(9):
        di, dj = k // 3, k % 3
        hk = hp[:, di:di + Hc, dj:dj + Wc, :].reshape(bb * HW, C)
        gates = gates + jnp.dot(hk, wh_ref[k], preferred_element_type=jnp.float32)
    gates = gates.reshape(bb, HW, 4 * C)

    wci, wcf, wco = wci_ref[...], wcf_ref[...], wco_ref[...]   # (HW, C) f32

    def _act(fn, v):  # transcendentals in bf16 on v6e/v7x EUP, f32 on v5e
        return fn(v.astype(gate_dtype)).astype(jnp.float32)

    ci = _act(jax.nn.sigmoid, gates[..., 0:C] + c * wci)
    cf = _act(jax.nn.sigmoid, gates[..., C:2 * C] + c * wcf)
    cc = cf * c + ci * _act(jnp.tanh, gates[..., 2 * C:3 * C])
    co = _act(jax.nn.sigmoid, gates[..., 3 * C:4 * C] + cc * wco)
    ch = co * _act(jnp.tanh, cc)

    hseq_ref[0] = ch.astype(hseq_ref.dtype)    # bf16 stream to the policy core
    hfin_ref[...] = ch                         # f32 carried state
    cfin_ref[...] = cc


def convlstm_scan(xg, nd_flat, h0, c0, wh, wci, wcf, wco, Hc, Wc, batch_blocks=1):
    """xg:(T,B,HW,4C) bf16  nd_flat:(T*B,) f32  h0/c0:(B,HW,C) f32
       wh:(9,C,4C)  wci/wcf/wco:(HW,C) f32."""
    T, B, HW, C4 = xg.shape
    C = C4 // 4
    nb = batch_blocks if (B % batch_blocks == 0) else 1
    bb = B // nb
    gate_dtype = jnp.bfloat16 if _bf16_eup_supported() else jnp.float32
    kern = functools.partial(_convlstm_kernel, Hc=Hc, Wc=Wc, C=C,
                             b_total=B, bb=bb, gate_dtype=gate_dtype)
    return pl.pallas_call(
        kern,
        out_shape=(jax.ShapeDtypeStruct((T, B, HW, C), jnp.bfloat16),
                   jax.ShapeDtypeStruct((B, HW, C), jnp.float32),
                   jax.ShapeDtypeStruct((B, HW, C), jnp.float32)),
        grid=(nb, T),
        in_specs=[
            pl.BlockSpec((1, bb, HW, C4), lambda b, t: (t, b, 0, 0)),
            pl.BlockSpec((bb, HW, C), lambda b, t: (b, 0, 0)),
            pl.BlockSpec((bb, HW, C), lambda b, t: (b, 0, 0)),
            pl.BlockSpec((9, C, 4 * C), lambda b, t: (0, 0, 0)),
            pl.BlockSpec((HW, C), lambda b, t: (0, 0)),
            pl.BlockSpec((HW, C), lambda b, t: (0, 0)),
            pl.BlockSpec((HW, C), lambda b, t: (0, 0)),
            pl.BlockSpec(memory_space=pltpu.MemorySpace.SMEM),
        ],
        out_specs=(pl.BlockSpec((1, bb, HW, C), lambda b, t: (t, b, 0, 0)),
                   pl.BlockSpec((bb, HW, C), lambda b, t: (b, 0, 0)),
                   pl.BlockSpec((bb, HW, C), lambda b, t: (b, 0, 0))),
        compiler_params=pltpu.CompilerParams(
            dimension_semantics=("parallel", "arbitrary"),
            vmem_limit_bytes=32 * 1024 * 1024),
    )(xg.astype(jnp.bfloat16), h0, c0, wh.astype(jnp.bfloat16),
      wci, wcf, wco, nd_flat)


# ----------------------- fused policy-core recurrence -----------------------

def _policy_core_kernel(h_ref, sb_ref, sbt_ref, h0_ref, c0_ref,
                        q1w, q1b, q2w, q2b, q3w, q3b,
                        ap1w, ap1b, ap2w, ap2b, lstm_w, lstm_b,
                        nd_ref, ext_ref,
                        hseq_ref, hfin_ref, cfin_ref,
                        *, hidden, nq, c_k, b_total, bb):
    bi = pl.program_id(0)
    t = pl.program_id(1)

    @pl.when(t == 0)
    def _():
        hfin_ref[...] = h0_ref[...]
        cfin_ref[...] = c0_ref[...]

    nd = _smem_col(nd_ref, t * b_total + bi * bb, bb)        # (bb,1) f32 (SMEM)
    h = hfin_ref[...] * nd                                   # (bb,hidden)
    c = cfin_ref[...] * nd

    def mm(a, w_ref):
        return jnp.dot(a.astype(jnp.bfloat16), w_ref[...],
                       preferred_element_type=jnp.float32)

    # --- query network (hidden -> 128 -> nq*c_qk -> nq*c_qk) ---
    q = jnp.maximum(mm(h, q1w) + q1b[...], 0.0)
    q = jnp.maximum(mm(q, q2w) + q2b[...], 0.0)
    q = mm(q, q3w) + q3b[...]                                # (bb, nq*c_qk) f32

    vis = h_ref[0]                                           # (bb, HW, C) bf16
    sb = sb_ref[...]                                         # (HW, c_s)  bf16
    sbt = sbt_ref[...]                                       # (c_s, HW)  bf16
    HW = vis.shape[1]
    c_s = sb.shape[-1]
    c_qk = c_k + c_s

    qb = q.astype(jnp.bfloat16).reshape(bb, nq, c_qk)
    q_k = qb[..., :c_k]                                      # (bb, nq, c_k)
    q_s = qb[..., c_k:].reshape(bb * nq, c_s)                # (bb*nq, c_s)

    # keys/values are never materialized: scores = q_k.vis_k^T + q_s.S^T
    scores = jax.lax.dot_general(q_k, vis[..., :c_k],
                                 (((2,), (2,)), ((0,), (0,))),
                                 preferred_element_type=jnp.float32)
    scores = scores + jnp.dot(q_s, sbt,
                              preferred_element_type=jnp.float32).reshape(bb, nq, HW)

    m = jnp.max(scores, axis=-1, keepdims=True)
    e = jnp.exp(scores - m)
    denom = jnp.sum(e, axis=-1, keepdims=True)
    alpha = (e * pl.reciprocal(denom, approx=True)).astype(jnp.bfloat16)

    ans_v = jax.lax.dot_general(alpha, vis[..., c_k:],
                                (((2,), (1,)), ((0,), (0,))),
                                preferred_element_type=jnp.float32)  # (bb,nq,c_v)
    ans_s = jnp.dot(alpha.reshape(bb * nq, HW), sb,
                    preferred_element_type=jnp.float32).reshape(bb, nq, c_s)
    ans = jnp.concatenate([ans_v, ans_s], axis=-1).reshape(bb, -1)   # (bb, nq*(cv+cs))

    rew = _smem_col(ext_ref, (2 * t) * b_total + bi * bb, bb)        # (bb,1)
    act = _smem_col(ext_ref, (2 * t + 1) * b_total + bi * bb, bb)    # (bb,1)
    feat = jnp.concatenate([ans, q, rew, act], axis=1)               # (bb,1026)

    # --- answer processor ---
    a1 = jnp.maximum(mm(feat, ap1w) + ap1b[...], 0.0)
    a2 = mm(a1, ap2w) + ap2b[...]                                    # (bb,hidden)

    # --- LSTM cell, single fused matmul on [x ; h] (gate order i,f,g,o) ---
    gates = mm(jnp.concatenate([a2, h], axis=1), lstm_w) + lstm_b[...]
    i_g = jax.nn.sigmoid(gates[:, 0:hidden])
    f_g = jax.nn.sigmoid(gates[:, hidden:2 * hidden])
    g_g = jnp.tanh(gates[:, 2 * hidden:3 * hidden])
    o_g = jax.nn.sigmoid(gates[:, 3 * hidden:4 * hidden])
    c_new = f_g * c + i_g * g_g
    h_new = o_g * jnp.tanh(c_new)

    hseq_ref[0] = h_new.astype(hseq_ref.dtype)
    hfin_ref[...] = h_new
    cfin_ref[...] = c_new


def policy_core_scan(h_seq, sbasis, sbasis_t, nd_flat, ext_flat, h0, c0, p,
                     batch_blocks=1):
    T, B, HW, C = h_seq.shape
    H = h0.shape[-1]
    cs = sbasis.shape[-1]
    nb = batch_blocks if (B % batch_blocks == 0) else 1
    bb = B // nb

    bf = lambda a: a.astype(jnp.bfloat16)
    row = lambda a: a.reshape(1, -1).astype(jnp.float32)

    lstm_w = jnp.concatenate([p['lstm_wih'], p['lstm_whh']], axis=0)  # (2H,4H)

    w_args, w_specs = [], []
    for name in ('q1', 'q2', 'q3', 'ap1', 'ap2'):
        w, b_ = p[name + '_w'], p[name + '_b']
        w_args += [bf(w), row(b_)]
        w_specs += [pl.BlockSpec(w.shape, lambda b, t: (0, 0)),
                    pl.BlockSpec((1, b_.shape[0]), lambda b, t: (0, 0))]
    w_args += [bf(lstm_w), row(p['lstm_b'])]
    w_specs += [pl.BlockSpec(lstm_w.shape, lambda b, t: (0, 0)),
                pl.BlockSpec((1, p['lstm_b'].shape[0]), lambda b, t: (0, 0))]

    kern = functools.partial(_policy_core_kernel, hidden=H, nq=NUM_QUERIES,
                             c_k=C_K, b_total=B, bb=bb)
    return pl.pallas_call(
        kern,
        out_shape=(jax.ShapeDtypeStruct((T, B, H), jnp.bfloat16),
                   jax.ShapeDtypeStruct((B, H), jnp.float32),
                   jax.ShapeDtypeStruct((B, H), jnp.float32)),
        grid=(nb, T),
        in_specs=[
            pl.BlockSpec((1, bb, HW, C), lambda b, t: (t, b, 0, 0)),
            pl.BlockSpec((HW, cs), lambda b, t: (0, 0)),
            pl.BlockSpec((cs, HW), lambda b, t: (0, 0)),
            pl.BlockSpec((bb, H), lambda b, t: (b, 0)),
            pl.BlockSpec((bb, H), lambda b, t: (b, 0)),
        ] + w_specs + [
            pl.BlockSpec(memory_space=pltpu.MemorySpace.SMEM),
            pl.BlockSpec(memory_space=pltpu.MemorySpace.SMEM),
        ],
        out_specs=(pl.BlockSpec((1, bb, H), lambda b, t: (t, b, 0)),
                   pl.BlockSpec((bb, H), lambda b, t: (b, 0)),
                   pl.BlockSpec((bb, H), lambda b, t: (b, 0))),
        compiler_params=pltpu.CompilerParams(
            dimension_semantics=("parallel", "arbitrary"),
            vmem_limit_bytes=32 * 1024 * 1024),
    )(h_seq.astype(jnp.bfloat16), bf(sbasis), bf(sbasis_t), h0, c0,
      *w_args, nd_flat, ext_flat)


# ------------------------------ Glue (JAX) ---------------------------------

def spatial_basis(h, w):
    p_h = (jnp.arange(1, h + 1, dtype=jnp.float32)[:, None]
           * jnp.ones((1, w), jnp.float32)) * (np.pi / h)
    p_w = (jnp.ones((h, 1), jnp.float32)
           * jnp.arange(1, w + 1, dtype=jnp.float32)[None, :]) * (np.pi / w)
    U = 8
    u = jnp.arange(1, U + 1, dtype=jnp.float32)[None, :]
    a = p_h[:, :, None] * u
    bb = p_w[:, :, None] * u
    return jnp.einsum('hwu,hwv->hwuv', jnp.cos(a), jnp.cos(bb)).reshape(h, w, U * U)


def init_params(key, obs_shape, num_actions, conv_hw):
    Cin = obs_shape[0]
    Hc, Wc = conv_hw
    HW = Hc * Wc
    ks = iter(jax.random.split(key, 32))

    def dense(k, fi, fo):
        return jax.random.normal(k, (fi, fo), jnp.float32) / np.sqrt(fi)

    def conv(k, kh, kw, ci, co):
        return jax.random.normal(k, (kh, kw, ci, co), jnp.float32) / np.sqrt(kh * kw * ci)

    p = {}
    p['conv1_w'] = conv(next(ks), 8, 8, Cin, 32); p['conv1_b'] = jnp.zeros((32,), jnp.float32)
    p['conv2_w'] = conv(next(ks), 4, 4, 32, 64);  p['conv2_b'] = jnp.zeros((64,), jnp.float32)
    # fused ConvLSTM input->gate conv, output columns ordered [i | f | c | o]
    p['wx_w'] = conv(next(ks), 3, 3, 64, 4 * VISION_HIDDEN)
    p['wx_b'] = jnp.zeros((4 * VISION_HIDDEN,), jnp.float32)
    # fused hidden->gate conv; wh[k] is the (C, 4C) block for kernel tap (k//3, k%3)
    p['wh_w'] = (jax.random.normal(next(ks), (9, VISION_HIDDEN, 4 * VISION_HIDDEN),
                                   jnp.float32) / np.sqrt(9 * VISION_HIDDEN))
    # Wci/Wcf/Wco are created as zeros in the reference
    p['wci'] = jnp.zeros((HW, VISION_HIDDEN), jnp.float32)
    p['wcf'] = jnp.zeros((HW, VISION_HIDDEN), jnp.float32)
    p['wco'] = jnp.zeros((HW, VISION_HIDDEN), jnp.float32)
    c_o = C_K + C_S
    p['q1_w'] = dense(next(ks), HIDDEN, 128);             p['q1_b'] = jnp.zeros((128,), jnp.float32)
    p['q2_w'] = dense(next(ks), 128, NUM_QUERIES * c_o);  p['q2_b'] = jnp.zeros((NUM_QUERIES * c_o,), jnp.float32)
    p['q3_w'] = dense(next(ks), NUM_QUERIES * c_o, NUM_QUERIES * c_o)
    p['q3_b'] = jnp.zeros((NUM_QUERIES * c_o,), jnp.float32)
    ans_in = (C_V + C_S) * NUM_QUERIES + (C_K + C_S) * NUM_QUERIES + 2
    p['ap1_w'] = dense(next(ks), ans_in, 512);   p['ap1_b'] = jnp.zeros((512,), jnp.float32)
    p['ap2_w'] = dense(next(ks), 512, HIDDEN);   p['ap2_b'] = jnp.zeros((HIDDEN,), jnp.float32)
    # nn.LSTM gate order (i, f, g, o); b = b_ih + b_hh folded together.
    p['lstm_wih'] = dense(next(ks), HIDDEN, 4 * HIDDEN)
    p['lstm_whh'] = dense(next(ks), HIDDEN, 4 * HIDDEN)
    p['lstm_b'] = jax.random.normal(next(ks), (4 * HIDDEN,), jnp.float32) * 0.02
    # fused heads: columns [0:A] policy logits, column A normalized baseline
    p['head_w'] = jnp.concatenate([dense(next(ks), HIDDEN, num_actions),
                                   dense(next(ks), HIDDEN, 1)], axis=1)
    p['head_b'] = jnp.zeros((num_actions + 1,), jnp.float32)
    # TODO(synk): PopArtLayer source not provided; modeled as linear head with mu=0, sigma=1.
    p['popart_mu'] = jnp.zeros((1,), jnp.float32)
    p['popart_sigma'] = jnp.ones((1,), jnp.float32)
    return p


def forward(params, frame, reward, last_action, done, state, conv_hw,
            batch_blocks=1):
    T, B = frame.shape[:2]
    Hc, Wc = conv_hw
    HW = Hc * Wc
    C = VISION_HIDDEN

    x = frame.astype(jnp.float32) / 255.0                  # (T,B,Cin,H,W)
    x = jnp.transpose(x, (0, 1, 3, 4, 2))                  # (T,B,H,W,Cin)
    x = x.reshape((T * B,) + x.shape[2:])

    # scalar side inputs live in SMEM inside the recurrent kernels
    nd_flat = (1.0 - done.astype(jnp.float32)).reshape(T * B)
    ext_flat = jnp.stack([reward.astype(jnp.float32),        # (T,2,B): [rew, act]
                          last_action.astype(jnp.float32)], axis=1).reshape(T * 2 * B)

    h_vis, c_vis, h_pol, c_pol = state                     # NHWC vision state

    # ---- time-independent CNN + fused x-gate conv, batched over T*B (bf16) ----
    z = conv2d_nhwc(x, params['conv1_w'], params['conv1_b'], 4, 1)
    z = conv2d_nhwc(z, params['conv2_w'], params['conv2_b'], 2, 2)
    xg = conv2d_nhwc(z, params['wx_w'], params['wx_b'], 1, 1)   # (T*B,Hc,Wc,4C) bf16
    xg = xg.reshape(T, B, HW, 4 * C)

    # ---- ConvLSTM recurrence: one fused pallas_call, grid=(batch_blocks, T) ----
    h_seq, h_vis_f, c_vis_f = convlstm_scan(
        xg, nd_flat, h_vis.reshape(B, HW, C), c_vis.reshape(B, HW, C),
        params['wh_w'], params['wci'], params['wcf'], params['wco'],
        Hc, Wc, batch_blocks)

    # ---- policy core recurrence: keys/values built in-kernel from h_seq + S ----
    # TODO(synk): attention maps are not materialized (reference default path
    # discards them; return_attention_maps=True is not supported here).
    s = spatial_basis(Hc, Wc).reshape(HW, C_S)
    h_seq_p, h_pol_f, c_pol_f = policy_core_scan(
        h_seq, s, s.T, nd_flat, ext_flat, h_pol, c_pol, params, batch_blocks)

    out = h_seq_p.reshape(T * B, HIDDEN)

    # ---- fused policy-logits + baseline head, lane-padded to 128 columns ----
    A = params['head_w'].shape[1] - 1
    n_pad = max(128, ((A + 1 + 127) // 128) * 128)
    head_w = jnp.zeros((HIDDEN, n_pad), jnp.float32).at[:, :A + 1].set(params['head_w'])
    head_b = jnp.zeros((n_pad,), jnp.float32).at[:A + 1].set(params['head_b'])
    head = pallas_linear(out, head_w, head_b, out_dtype=jnp.float32)
    logits = head[:, :A]
    norm_baseline = head[:, A:A + 1]
    baseline = norm_baseline * params['popart_sigma'] + params['popart_mu']
    # TODO(synk): training-mode torch.multinomial sampling not implemented; eval-mode argmax used.
    action = jnp.argmax(logits, axis=1)

    result = dict(
        policy_logits=logits.reshape(T, B, A),
        baseline=baseline.reshape(T, B, 1),
        normalized_baseline=norm_baseline.reshape(T, B, 1),
        action=action.reshape(T, B, 1),
    )
    new_state = (h_vis_f.reshape(B, Hc, Wc, C), c_vis_f.reshape(B, Hc, Wc, C),
                 h_pol_f, c_pol_f)
    return result, new_state


# --------------------------------- main -------------------------------------

if __name__ == "__main__":
    T, B = 2, 2
    obs_shape = (3, 32, 32)          # (C, H, W)
    num_actions = 6
    H1 = (32 + 2 * 1 - 8) // 4 + 1   # conv1: 8x8 s4 p1 -> 7
    H2 = (H1 + 2 * 2 - 4) // 2 + 1   # conv2: 4x4 s2 p2 -> 4
    conv_hw = (H2, H2)

    key = jax.random.PRNGKey(0)
    k_frame, k_rew, k_act, k_param = jax.random.split(key, 4)
    frame = jax.random.randint(k_frame, (T, B) + obs_shape, 0, 256,
                               dtype=jnp.int32).astype(jnp.uint8)
    reward = jax.random.normal(k_rew, (T, B), jnp.float32)
    last_action = jax.random.randint(k_act, (T, B), 0, num_actions, dtype=jnp.int32)
    done = jnp.zeros((T, B), jnp.bool_)

    params = init_params(k_param, obs_shape, num_actions, conv_hw)

    state = (jnp.zeros((B, conv_hw[0], conv_hw[1], VISION_HIDDEN), jnp.float32),
             jnp.zeros((B, conv_hw[0], conv_hw[1], VISION_HIDDEN), jnp.float32),
             jnp.zeros((B, HIDDEN), jnp.float32),
             jnp.zeros((B, HIDDEN), jnp.float32))

    # batch_blocks=2 splits the batch across the 2 TensorCores on v7x;
    # keep 1 on single-TC chips (v5e/v6e).
    fwd = jax.jit(functools.partial(forward, conv_hw=conv_hw, batch_blocks=1))
    result, new_state = fwd(params, frame, reward, last_action, done, state)
    jax.tree_util.tree_map(jax.block_until_ready, (result, new_state))
    print("KERNEL_OK")
</pallas_src>

<mosaic_0001>
module attributes {stable_mosaic.version = 11 : i64} {
  func.func @_linear_kernel(%arg0: i32, %arg1: memref<196x192xbf16, #tpu.memory_space<vmem>>, %arg2: memref<192x32xbf16, #tpu.memory_space<vmem>>, %arg3: memref<1x32xf32, #tpu.memory_space<vmem>>, %arg4: memref<196x32xbf16, #tpu.memory_space<vmem>>) attributes {dimension_semantics = [#tpu.dimension_semantics<parallel>], iteration_bounds = array<i64: 1>, scalar_prefetch = 0 : i64, scratch_operands = 0 : i64, tpu.core_type = #tpu.core_type<tc>, window_params = [{transform_indices = @transform_0, window_bounds = array<i64: 196, 192>}, {pipeline_mode = #tpu.pipeline_mode<synchronous>, transform_indices = @transform_1, window_bounds = array<i64: 192, 32>}, {pipeline_mode = #tpu.pipeline_mode<synchronous>, transform_indices = @transform_2, window_bounds = array<i64: 1, 32>}, {transform_indices = @transform_3, window_bounds = array<i64: 196, 32>}]} {
    %c0 = arith.constant 0 : index
    %c0_0 = arith.constant 0 : index
    %0 = vector.load %arg1[%c0, %c0_0] : memref<196x192xbf16, #tpu.memory_space<vmem>>, vector<196x192xbf16>
    %c0_1 = arith.constant 0 : index
    %c0_2 = arith.constant 0 : index
    %1 = vector.load %arg2[%c0_1, %c0_2] : memref<192x32xbf16, #tpu.memory_space<vmem>>, vector<192x32xbf16>
    %cst = arith.constant dense<0.000000e+00> : vector<196x32xf32>
    %2 = tpu.matmul %0, %1, %cst {dimension_numbers = #tpu.dot_dimension_numbers<[1], [0], [0], [1], [0, 0, 1, 1], [], []>} : vector<196x192xbf16>, vector<192x32xbf16>, vector<196x32xf32> -> vector<196x32xf32>
    %c0_3 = arith.constant 0 : index
    %c0_4 = arith.constant 0 : index
    %3 = vector.load %arg3[%c0_3, %c0_4] : memref<1x32xf32, #tpu.memory_space<vmem>>, vector<1x32xf32>
    %4 = vector.broadcast %3 : vector<1x32xf32> to vector<196x32xf32>
    %5 = arith.addf %2, %4 : vector<196x32xf32>
    %6 = arith.truncf %5 : vector<196x32xf32> to vector<196x32xbf16>
    %c0_5 = arith.constant 0 : index
    %c0_6 = arith.constant 0 : index
    %7 = vector.load %arg4[%c0_5, %c0_6] : memref<196x32xbf16, #tpu.memory_space<vmem>>, vector<196x32xbf16>
    tpu.vector_store %arg4[%c0_5, %c0_6], %6 {strides = array<i32>} : memref<196x32xbf16, #tpu.memory_space<vmem>>, vector<196x32xbf16>,
    return
  }
  func.func @transform_0(%arg0: i32) -> (i32, i32) {
    %c0_i32 = arith.constant 0 : i32
    %c0_i32_0 = arith.constant 0 : i32
    return %arg0, %c0_i32 : i32, i32
  }
  func.func @transform_1(%arg0: i32) -> (i32, i32) {
    %c0_i32 = arith.constant 0 : i32
    %c0_i32_0 = arith.constant 0 : i32
    %c0_i32_1 = arith.constant 0 : i32
    return %c0_i32, %c0_i32_0 : i32, i32
  }
  func.func @transform_2(%arg0: i32) -> (i32, i32) {
    %c0_i32 = arith.constant 0 : i32
    %c0_i32_0 = arith.constant 0 : i32
    %c0_i32_1 = arith.constant 0 : i32
    return %c0_i32, %c0_i32_0 : i32, i32
  }
  func.func @transform_3(%arg0: i32) -> (i32, i32) {
    %c0_i32 = arith.constant 0 : i32
    %c0_i32_0 = arith.constant 0 : i32
    return %arg0, %c0_i32 : i32, i32
  }
}

module attributes {stable_mosaic.version = 11 : i64} {
  func.func @_linear_kernel(%arg0: i32, %arg1: memref<64x512xbf16, #tpu.memory_space<vmem>>, %arg2: memref<512x64xbf16, #tpu.memory_space<vmem>>, %arg3: memref<1x64xf32, #tpu.memory_space<vmem>>, %arg4: memref<64x64xbf16, #tpu.memory_space<vmem>>) attributes {dimension_semantics = [#tpu.dimension_semantics<parallel>], iteration_bounds = array<i64: 1>, scalar_prefetch = 0 : i64, scratch_operands = 0 : i64, tpu.core_type = #tpu.core_type<tc>, window_params = [{transform_indices = @transform_0, window_bounds = array<i64: 64, 512>}, {pipeline_mode = #tpu.pipeline_mode<synchronous>, transform_indices = @transform_1, window_bounds = array<i64: 512, 64>}, {pipeline_mode = #tpu.pipeline_mode<synchronous>, transform_indices = @transform_2, window_bounds = array<i64: 1, 64>}, {transform_indices = @transform_3, window_bounds = array<i64: 64, 64>}]} {
    %c0 = arith.constant 0 : index
    %c0_0 = arith.constant 0 : index
    %0 = vector.load %arg1[%c0, %c0_0] : memref<64x512xbf16, #tpu.memory_space<vmem>>, vector<64x512xbf16>
    %c0_1 = arith.constant 0 : index
    %c0_2 = arith.constant 0 : index
    %1 = vector.load %arg2[%c0_1, %c0_2] : memref<512x64xbf16, #tpu.memory_space<vmem>>, vector<512x64xbf16>
    %cst = arith.constant dense<0.000000e+00> : vector<64x64xf32>
    %2 = tpu.matmul %0, %1, %cst {dimension_numbers = #tpu.dot_dimension_numbers<[1], [0], [0], [1], [0, 0, 1, 1], [], []>} : vector<64x512xbf16>, vector<512x64xbf16>, vector<64x64xf32> -> vector<64x64xf32>
    %c0_3 = arith.constant 0 : index
    %c0_4 = arith.constant 0 : index
    %3 = vector.load %arg3[%c0_3, %c0_4] : memref<1x64xf32, #tpu.memory_space<vmem>>, vector<1x64xf32>
    %4 = vector.broadcast %3 : vector<1x64xf32> to vector<64x64xf32>
    %5 = arith.addf %2, %4 : vector<64x64xf32>
    %6 = arith.truncf %5 : vector<64x64xf32> to vector<64x64xbf16>
    %c0_5 = arith.constant 0 : index
    %c0_6 = arith.constant 0 : index
    %7 = vector.load %arg4[%c0_5, %c0_6] : memref<64x64xbf16, #tpu.memory_space<vmem>>, vector<64x64xbf16>
    tpu.vector_store %arg4[%c0_5, %c0_6], %6 {strides = array<i32>} : memref<64x64xbf16, #tpu.memory_space<vmem>>, vector<64x64xbf16>,
    return
  }
  func.func @transform_0(%arg0: i32) -> (i32, i32) {
    %c0_i32 = arith.constant 0 : i32
    %c0_i32_0 = arith.constant 0 : i32
    return %arg0, %c0_i32 : i32, i32
  }
  func.func @transform_1(%arg0: i32) -> (i32, i32) {
    %c0_i32 = arith.constant 0 : i32
    %c0_i32_0 = arith.constant 0 : i32
    %c0_i32_1 = arith.constant 0 : i32
    return %c0_i32, %c0_i32_0 : i32, i32
  }
  func.func @transform_2(%arg0: i32) -> (i32, i32) {
    %c0_i32 = arith.constant 0 : i32
    %c0_i32_0 = arith.constant 0 : i32
    %c0_i32_1 = arith.constant 0 : i32
    return %c0_i32, %c0_i32_0 : i32, i32
  }
  func.func @transform_3(%arg0: i32) -> (i32, i32) {
    %c0_i32 = arith.constant 0 : i32
    %c0_i32_0 = arith.constant 0 : i32
    return %arg0, %c0_i32 : i32, i32
  }
}

module attributes {stable_mosaic.version = 11 : i64} {
  func.func @_linear_kernel(%arg0: i32, %arg1: memref<64x576xbf16, #tpu.memory_space<vmem>>, %arg2: memref<576x512xbf16, #tpu.memory_space<vmem>>, %arg3: memref<1x512xf32, #tpu.memory_space<vmem>>, %arg4: memref<64x512xbf16, #tpu.memory_space<vmem>>) attributes {dimension_semantics = [#tpu.dimension_semantics<parallel>], iteration_bounds = array<i64: 1>, scalar_prefetch = 0 : i64, scratch_operands = 0 : i64, tpu.core_type = #tpu.core_type<tc>, window_params = [{transform_indices = @transform_0, window_bounds = array<i64: 64, 576>}, {pipeline_mode = #tpu.pipeline_mode<synchronous>, transform_indices = @transform_1, window_bounds = array<i64: 576, 512>}, {pipeline_mode = #tpu.pipeline_mode<synchronous>, transform_indices = @transform_2, window_bounds = array<i64: 1, 512>}, {transform_indices = @transform_3, window_bounds = array<i64: 64, 512>}]} {
    %c0 = arith.constant 0 : index
    %c0_0 = arith.constant 0 : index
    %0 = vector.load %arg1[%c0, %c0_0] : memref<64x576xbf16, #tpu.memory_space<vmem>>, vector<64x576xbf16>
    %c0_1 = arith.constant 0 : index
    %c0_2 = arith.constant 0 : index
    %1 = vector.load %arg2[%c0_1, %c0_2] : memref<576x512xbf16, #tpu.memory_space<vmem>>, vector<576x512xbf16>
    %cst = arith.constant dense<0.000000e+00> : vector<64x512xf32>
    %2 = tpu.matmul %0, %1, %cst {dimension_numbers = #tpu.dot_dimension_numbers<[1], [0], [0], [1], [0, 0, 1, 1], [], []>} : vector<64x576xbf16>, vector<576x512xbf16>, vector<64x512xf32> -> vector<64x512xf32>
    %c0_3 = arith.constant 0 : index
    %c0_4 = arith.constant 0 : index
    %3 = vector.load %arg3[%c0_3, %c0_4] : memref<1x512xf32, #tpu.memory_space<vmem>>, vector<1x512xf32>
    %4 = vector.broadcast %3 : vector<1x512xf32> to vector<64x512xf32>
    %5 = arith.addf %2, %4 : vector<64x512xf32>
    %6 = arith.truncf %5 : vector<64x512xf32> to vector<64x512xbf16>
    %c0_5 = arith.constant 0 : index
    %c0_6 = arith.constant 0 : index
    %7 = vector.load %arg4[%c0_5, %c0_6] : memref<64x512xbf16, #tpu.memory_space<vmem>>, vector<64x512xbf16>
    tpu.vector_store %arg4[%c0_5, %c0_6], %6 {strides = array<i32>} : memref<64x512xbf16, #tpu.memory_space<vmem>>, vector<64x512xbf16>,
    return
  }
  func.func @transform_0(%arg0: i32) -> (i32, i32) {
    %c0_i32 = arith.constant 0 : i32
    %c0_i32_0 = arith.constant 0 : i32
    return %arg0, %c0_i32 : i32, i32
  }
  func.func @transform_1(%arg0: i32) -> (i32, i32) {
    %c0_i32 = arith.constant 0 : i32
    %c0_i32_0 = arith.constant 0 : i32
    %c0_i32_1 = arith.constant 0 : i32
    return %c0_i32, %c0_i32_0 : i32, i32
  }
  func.func @transform_2(%arg0: i32) -> (i32, i32) {
    %c0_i32 = arith.constant 0 : i32
    %c0_i32_0 = arith.constant 0 : i32
    %c0_i32_1 = arith.constant 0 : i32
    return %c0_i32, %c0_i32_0 : i32, i32
  }
  func.func @transform_3(%arg0: i32) -> (i32, i32) {
    %c0_i32 = arith.constant 0 : i32
    %c0_i32_0 = arith.constant 0 : i32
    return %arg0, %c0_i32 : i32, i32
  }
}

module attributes {stable_mosaic.version = 11 : i64} {
  func.func @_convlstm_kernel(%arg0: i32, %arg1: i32, %arg2: memref<1x2x16x512xbf16, #tpu.memory_space<vmem>>, %arg3: memref<2x16x128xf32, #tpu.memory_space<vmem>>, %arg4: memref<2x16x128xf32, #tpu.memory_space<vmem>>, %arg5: memref<9x128x512xbf16, #tpu.memory_space<vmem>>, %arg6: memref<16x128xf32, #tpu.memory_space<vmem>>, %arg7: memref<16x128xf32, #tpu.memory_space<vmem>>, %arg8: memref<16x128xf32, #tpu.memory_space<vmem>>, %arg9: memref<4xf32, #tpu.memory_space<smem>>, %arg10: memref<1x2x16x128xbf16, #tpu.memory_space<vmem>>, %arg11: memref<2x16x128xf32, #tpu.memory_space<vmem>>, %arg12: memref<2x16x128xf32, #tpu.memory_space<vmem>>) attributes {dimension_semantics = [#tpu.dimension_semantics<parallel>, #tpu.dimension_semantics<arbitrary>], iteration_bounds = array<i64: 1, 2>, scalar_prefetch = 0 : i64, scratch_operands = 0 : i64, tpu.core_type = #tpu.core_type<tc>, window_params = [{transform_indices = @transform_0, window_bounds = array<i64: 1, 2, 16, 512>}, {transform_indices = @transform_1, window_bounds = array<i64: 2, 16, 128>}, {transform_indices = @transform_2, window_bounds = array<i64: 2, 16, 128>}, {pipeline_mode = #tpu.pipeline_mode<synchronous>, transform_indices = @transform_3, window_bounds = array<i64: 9, 128, 512>}, {pipeline_mode = #tpu.pipeline_mode<synchronous>, transform_indices = @transform_4, window_bounds = array<i64: 16, 128>}, {pipeline_mode = #tpu.pipeline_mode<synchronous>, transform_indices = @transform_5, window_bounds = array<i64: 16, 128>}, {pipeline_mode = #tpu.pipeline_mode<synchronous>, transform_indices = @transform_6, window_bounds = array<i64: 16, 128>}, {transform_indices = @transform_7, window_bounds = array<i64: 4>}, {transform_indices = @transform_8, window_bounds = array<i64: 1, 2, 16, 128>}, {transform_indices = @transform_9, window_bounds = array<i64: 2, 16, 128>}, {transform_indices = @transform_10, window_bounds = array<i64: 2, 16, 128>}]} {
    %c0_i32 = arith.constant 0 : i32
    %0 = arith.cmpi eq, %arg1, %c0_i32 : i32
    %1 = arith.extui %0 : i1 to i32
    %c0_i32_0 = arith.constant 0 : i32
    %2 = arith.cmpi ne, %1, %c0_i32_0 : i32
    scf.if %2 {
      %c0_65 = arith.constant 0 : index
      %c0_66 = arith.constant 0 : index
      %c0_67 = arith.constant 0 : index
      %144 = vector.load %arg3[%c0_65, %c0_66, %c0_67] : memref<2x16x128xf32, #tpu.memory_space<vmem>>, vector<2x16x128xf32>
      %c0_68 = arith.constant 0 : index
      %c0_69 = arith.constant 0 : index
      %c0_70 = arith.constant 0 : index
      %145 = vector.load %arg11[%c0_68, %c0_69, %c0_70] : memref<2x16x128xf32, #tpu.memory_space<vmem>>, vector<2x16x128xf32>
      tpu.vector_store %arg11[%c0_68, %c0_69, %c0_70], %144 {strides = array<i32>} : memref<2x16x128xf32, #tpu.memory_space<vmem>>, vector<2x16x128xf32>,
      %c0_71 = arith.constant 0 : index
      %c0_72 = arith.constant 0 : index
      %c0_73 = arith.constant 0 : index
      %146 = vector.load %arg4[%c0_71, %c0_72, %c0_73] : memref<2x16x128xf32, #tpu.memory_space<vmem>>, vector<2x16x128xf32>
      %c0_74 = arith.constant 0 : index
      %c0_75 = arith.constant 0 : index
      %c0_76 = arith.constant 0 : index
      %147 = vector.load %arg12[%c0_74, %c0_75, %c0_76] : memref<2x16x128xf32, #tpu.memory_space<vmem>>, vector<2x16x128xf32>
      tpu.vector_store %arg12[%c0_74, %c0_75, %c0_76], %146 {strides = array<i32>} : memref<2x16x128xf32, #tpu.memory_space<vmem>>, vector<2x16x128xf32>,
    } else {
    }
    %c2_i32 = arith.constant 2 : i32
    %3 = arith.muli %arg1, %c2_i32 : i32
    %c2_i32_1 = arith.constant 2 : i32
    %4 = arith.muli %arg0, %c2_i32_1 : i32
    %5 = arith.addi %3, %4 : i32
    %6 = tpu.iota {dimensions = array<i32: 0>} : vector<2x1xi32>
    %cst = arith.constant 0.000000e+00 : f32
    %7 = vector.broadcast %cst : f32 to vector<2x1xf32>
    %c0_i32_2 = arith.constant 0 : i32
    %8 = vector.broadcast %c0_i32_2 : i32 to vector<2x1xi32>
    %9 = arith.cmpi eq, %6, %8 : vector<2x1xi32>
    %c0_i32_3 = arith.constant 0 : i32
    %10 = arith.addi %5, %c0_i32_3 : i32
    %11 = arith.index_cast %10 : i32 to index
    %12 = memref.load %arg9[%11] : memref<4xf32, #tpu.memory_space<smem>>
    %cst_4 = arith.constant 0.000000e+00 : f32
    %13 = vector.broadcast %12 : f32 to vector<2x1xf32>
    %14 = vector.broadcast %cst_4 : f32 to vector<2x1xf32>
    %15 = arith.select %9, %13, %14 : vector<2x1xi1>, vector<2x1xf32>
    %16 = arith.addf %7, %15 : vector<2x1xf32>
    %c1_i32 = arith.constant 1 : i32
    %17 = vector.broadcast %c1_i32 : i32 to vector<2x1xi32>
    %18 = arith.cmpi eq, %6, %17 : vector<2x1xi32>
    %c1_i32_5 = arith.constant 1 : i32
    %19 = arith.addi %5, %c1_i32_5 : i32
    %20 = arith.index_cast %19 : i32 to index
    %21 = memref.load %arg9[%20] : memref<4xf32, #tpu.memory_space<smem>>
    %cst_6 = arith.constant 0.000000e+00 : f32
    %22 = vector.broadcast %21 : f32 to vector<2x1xf32>
    %23 = vector.broadcast %cst_6 : f32 to vector<2x1xf32>
    %24 = arith.select %18, %22, %23 : vector<2x1xi1>, vector<2x1xf32>
    %25 = arith.addf %16, %24 : vector<2x1xf32>
    %26 = vector.shape_cast %25 : vector<2x1xf32> to vector<2x1x1xf32>
    %c0 = arith.constant 0 : index
    %c0_7 = arith.constant 0 : index
    %c0_8 = arith.constant 0 : index
    %27 = vector.load %arg11[%c0, %c0_7, %c0_8] : memref<2x16x128xf32, #tpu.memory_space<vmem>>, vector<2x16x128xf32>
    %28 = vector.broadcast %26 : vector<2x1x1xf32> to vector<2x16x128xf32>
    %29 = arith.mulf %27, %28 : vector<2x16x128xf32>
    %c0_9 = arith.constant 0 : index
    %c0_10 = arith.constant 0 : index
    %c0_11 = arith.constant 0 : index
    %30 = vector.load %arg12[%c0_9, %c0_10, %c0_11] : memref<2x16x128xf32, #tpu.memory_space<vmem>>, vector<2x16x128xf32>
    %31 = vector.broadcast %26 : vector<2x1x1xf32> to vector<2x16x128xf32>
    %32 = arith.mulf %30, %31 : vector<2x16x128xf32>
    %33 = arith.truncf %29 : vector<2x16x128xf32> to vector<2x16x128xbf16>
    %34 = vector.shape_cast %33 : vector<2x16x128xbf16> to vector<2x4x4x128xbf16>
    %cst_12 = arith.constant 0.000000e+00 : bf16
    %35 = vector.broadcast %cst_12 : bf16 to vector<2x4x1x128xbf16>
    %cst_13 = arith.constant 0.000000e+00 : bf16
    %36 = vector.broadcast %cst_13 : bf16 to vector<2x1x6x128xbf16>
    %37 = tpu.concatenate %35, %34, %35 in 2 : vector<2x4x1x128xbf16>, vector<2x4x4x128xbf16>, vector<2x4x1x128xbf16> -> vector<2x4x6x128xbf16>
    %38 = tpu.concatenate %36, %37, %36 in 1 : vector<2x1x6x128xbf16>, vector<2x4x6x128xbf16>, vector<2x1x6x128xbf16> -> vector<2x6x6x128xbf16>
    %c0_14 = arith.constant 0 : index
    %c0_15 = arith.constant 0 : index
    %c0_16 = arith.constant 0 : index
    %c0_17 = arith.constant 0 : index
    %39 = vector.load %arg2[%c0_14, %c0_15, %c0_16, %c0_17] : memref<1x2x16x512xbf16, #tpu.memory_space<vmem>>, vector<1x2x16x512xbf16>
    %40 = vector.shape_cast %39 : vector<1x2x16x512xbf16> to vector<2x16x512xbf16>
    %41 = arith.extf %40 : vector<2x16x512xbf16> to vector<2x16x512xf32>
    %42 = vector.shape_cast %41 : vector<2x16x512xf32> to vector<32x512xf32>
    %43 = vector.extract_strided_slice %38 {offsets = [0, 0, 0, 0], sizes = [2, 4, 4, 128], strides = [1, 1, 1, 1]} : vector<2x6x6x128xbf16> to vector<2x4x4x128xbf16>
    %44 = vector.shape_cast %43 : vector<2x4x4x128xbf16> to vector<32x128xbf16>
    %c0_18 = arith.constant 0 : index
    %c0_19 = arith.constant 0 : index
    %c0_20 = arith.constant 0 : index
    %45 = vector.load %arg5[%c0_18, %c0_19, %c0_20] : memref<9x128x512xbf16, #tpu.memory_space<vmem>>, vector<1x128x512xbf16>
    %46 = vector.shape_cast %45 : vector<1x128x512xbf16> to vector<128x512xbf16>
    %cst_21 = arith.constant dense<0.000000e+00> : vector<32x512xf32>
    %47 = tpu.matmul %44, %46, %cst_21 {dimension_numbers = #tpu.dot_dimension_numbers<[1], [0], [0], [1], [0, 0, 1, 1], [], []>} : vector<32x128xbf16>, vector<128x512xbf16>, vector<32x512xf32> -> vector<32x512xf32>
    %48 = arith.addf %42, %47 : vector<32x512xf32>
    %49 = vector.extract_strided_slice %38 {offsets = [0, 0, 1, 0], sizes = [2, 4, 4, 128], strides = [1, 1, 1, 1]} : vector<2x6x6x128xbf16> to vector<2x4x4x128xbf16>
    %50 = vector.shape_cast %49 : vector<2x4x4x128xbf16> to vector<32x128xbf16>
    %c1 = arith.constant 1 : index
    %c0_22 = arith.constant 0 : index
    %c0_23 = arith.constant 0 : index
    %51 = vector.load %arg5[%c1, %c0_22, %c0_23] : memref<9x128x512xbf16, #tpu.memory_space<vmem>>, vector<1x128x512xbf16>
    %52 = vector.shape_cast %51 : vector<1x128x512xbf16> to vector<128x512xbf16>
    %cst_24 = arith.constant dense<0.000000e+00> : vector<32x512xf32>
    %53 = tpu.matmul %50, %52, %cst_24 {dimension_numbers = #tpu.dot_dimension_numbers<[1], [0], [0], [1], [0, 0, 1, 1], [], []>} : vector<32x128xbf16>, vector<128x512xbf16>, vector<32x512xf32> -> vector<32x512xf32>
    %54 = arith.addf %48, %53 : vector<32x512xf32>
    %55 = vector.extract_strided_slice %38 {offsets = [0, 0, 2, 0], sizes = [2, 4, 4, 128], strides = [1, 1, 1, 1]} : vector<2x6x6x128xbf16> to vector<2x4x4x128xbf16>
    %56 = vector.shape_cast %55 : vector<2x4x4x128xbf16> to vector<32x128xbf16>
    %c2 = arith.constant 2 : index
    %c0_25 = arith.constant 0 : index
    %c0_26 = arith.constant 0 : index
    %57 = vector.load %arg5[%c2, %c0_25, %c0_26] : memref<9x128x512xbf16, #tpu.memory_space<vmem>>, vector<1x128x512xbf16>
    %58 = vector.shape_cast %57 : vector<1x128x512xbf16> to vector<128x512xbf16>
    %cst_27 = arith.constant dense<0.000000e+00> : vector<32x512xf32>
    %59 = tpu.matmul %56, %58, %cst_27 {dimension_numbers = #tpu.dot_dimension_numbers<[1], [0], [0], [1], [0, 0, 1, 1], [], []>} : vector<32x128xbf16>, vector<128x512xbf16>, vector<32x512xf32> -> vector<32x512xf32>
    %60 = arith.addf %54, %59 : vector<32x512xf32>
    %61 = vector.extract_strided_slice %38 {offsets = [0, 1, 0, 0], sizes = [2, 4, 4, 128], strides = [1, 1, 1, 1]} : vector<2x6x6x128xbf16> to vector<2x4x4x128xbf16>
    %62 = vector.shape_cast %61 : vector<2x4x4x128xbf16> to vector<32x128xbf16>
    %c3 = arith.constant 3 : index
    %c0_28 = arith.constant 0 : index
    %c0_29 = arith.constant 0 : index
    %63 = vector.load %arg5[%c3, %c0_28, %c0_29] : memref<9x128x512xbf16, #tpu.memory_space<vmem>>, vector<1x128x512xbf16>
    %64 = vector.shape_cast %63 : vector<1x128x512xbf16> to vector<128x512xbf16>
    %cst_30 = arith.constant dense<0.000000e+00> : vector<32x512xf32>
    %65 = tpu.matmul %62, %64, %cst_30 {dimension_numbers = #tpu.dot_dimension_numbers<[1], [0], [0], [1], [0, 0, 1, 1], [], []>} : vector<32x128xbf16>, vector<128x512xbf16>, vector<32x512xf32> -> vector<32x512xf32>
    %66 = arith.addf %60, %65 : vector<32x512xf32>
    %67 = vector.extract_strided_slice %38 {offsets = [0, 1, 1, 0], sizes = [2, 4, 4, 128], strides = [1, 1, 1, 1]} : vector<2x6x6x128xbf16> to vector<2x4x4x128xbf16>
    %68 = vector.shape_cast %67 : vector<2x4x4x128xbf16> to vector<32x128xbf16>
    %c4 = arith.constant 4 : index
    %c0_31 = arith.constant 0 : index
    %c0_32 = arith.constant 0 : index
    %69 = vector.load %arg5[%c4, %c0_31, %c0_32] : memref<9x128x512xbf16, #tpu.memory_space<vmem>>, vector<1x128x512xbf16>
    %70 = vector.shape_cast %69 : vector<1x128x512xbf16> to vector<128x512xbf16>
    %cst_33 = arith.constant dense<0.000000e+00> : vector<32x512xf32>
    %71 = tpu.matmul %68, %70, %cst_33 {dimension_numbers = #tpu.dot_dimension_numbers<[1], [0], [0], [1], [0, 0, 1, 1], [], []>} : vector<32x128xbf16>, vector<128x512xbf16>, vector<32x512xf32> -> vector<32x512xf32>
    %72 = arith.addf %66, %71 : vector<32x512xf32>
    %73 = vector.extract_strided_slice %38 {offsets = [0, 1, 2, 0], sizes = [2, 4, 4, 128], strides = [1, 1, 1, 1]} : vector<2x6x6x128xbf16> to vector<2x4x4x128xbf16>
    %74 = vector.shape_cast %73 : vector<2x4x4x128xbf16> to vector<32x128xbf16>
    %c5 = arith.constant 5 : index
    %c0_34 = arith.constant 0 : index
    %c0_35 = arith.constant 0 : index
    %75 = vector.load %arg5[%c5, %c0_34, %c0_35] : memref<9x128x512xbf16, #tpu.memory_space<vmem>>, vector<1x128x512xbf16>
    %76 = vector.shape_cast %75 : vector<1x128x512xbf16> to vector<128x512xbf16>
    %cst_36 = arith.constant dense<0.000000e+00> : vector<32x512xf32>
    %77 = tpu.matmul %74, %76, %cst_36 {dimension_numbers = #tpu.dot_dimension_numbers<[1], [0], [0], [1], [0, 0, 1, 1], [], []>} : vector<32x128xbf16>, vector<128x512xbf16>, vector<32x512xf32> -> vector<32x512xf32>
    %78 = arith.addf %72, %77 : vector<32x512xf32>
    %79 = vector.extract_strided_slice %38 {offsets = [0, 2, 0, 0], sizes = [2, 4, 4, 128], strides = [1, 1, 1, 1]} : vector<2x6x6x128xbf16> to vector<2x4x4x128xbf16>
    %80 = vector.shape_cast %79 : vector<2x4x4x128xbf16> to vector<32x128xbf16>
    %c6 = arith.constant 6 : index
    %c0_37 = arith.constant 0 : index
    %c0_38 = arith.constant 0 : index
    %81 = vector.load %arg5[%c6, %c0_37, %c0_38] : memref<9x128x512xbf16, #tpu.memory_space<vmem>>, vector<1x128x512xbf16>
    %82 = vector.shape_cast %81 : vector<1x128x512xbf16> to vector<128x512xbf16>
    %cst_39 = arith.constant dense<0.000000e+00> : vector<32x512xf32>
    %83 = tpu.matmul %80, %82, %cst_39 {dimension_numbers = #tpu.dot_dimension_numbers<[1], [0], [0], [1], [0, 0, 1, 1], [], []>} : vector<32x128xbf16>, vector<128x512xbf16>, vector<32x512xf32> -> vector<32x512xf32>
    %84 = arith.addf %78, %83 : vector<32x512xf32>
    %85 = vector.extract_strided_slice %38 {offsets = [0, 2, 1, 0], sizes = [2, 4, 4, 128], strides = [1, 1, 1, 1]} : vector<2x6x6x128xbf16> to vector<2x4x4x128xbf16>
    %86 = vector.shape_cast %85 : vector<2x4x4x128xbf16> to vector<32x128xbf16>
    %c7 = arith.constant 7 : index
    %c0_40 = arith.constant 0 : index
    %c0_41 = arith.constant 0 : index
    %87 = vector.load %arg5[%c7, %c0_40, %c0_41] : memref<9x128x512xbf16, #tpu.memory_space<vmem>>, vector<1x128x512xbf16>
    %88 = vector.shape_cast %87 : vector<1x128x512xbf16> to vector<128x512xbf16>
    %cst_42 = arith.constant dense<0.000000e+00> : vector<32x512xf32>
    %89 = tpu.matmul %86, %88, %cst_42 {dimension_numbers = #tpu.dot_dimension_numbers<[1], [0], [0], [1], [0, 0, 1, 1], [], []>} : vector<32x128xbf16>, vector<128x512xbf16>, vector<32x512xf32> -> vector<32x512xf32>
    %90 = arith.addf %84, %89 : vector<32x512xf32>
    %91 = vector.extract_strided_slice %38 {offsets = [0, 2, 2, 0], sizes = [2, 4, 4, 128], strides = [1, 1, 1, 1]} : vector<2x6x6x128xbf16> to vector<2x4x4x128xbf16>
    %92 = vector.shape_cast %91 : vector<2x4x4x128xbf16> to vector<32x128xbf16>
    %c8 = arith.constant 8 : index
    %c0_43 = arith.constant 0 : index
    %c0_44 = arith.constant 0 : index
    %93 = vector.load %arg5[%c8, %c0_43, %c0_44] : memref<9x128x512xbf16, #tpu.memory_space<vmem>>, vector<1x128x512xbf16>
    %94 = vector.shape_cast %93 : vector<1x128x512xbf16> to vector<128x512xbf16>
    %cst_45 = arith.constant dense<0.000000e+00> : vector<32x512xf32>
    %95 = tpu.matmul %92, %94, %cst_45 {dimension_numbers = #tpu.dot_dimension_numbers<[1], [0], [0], [1], [0, 0, 1, 1], [], []>} : vector<32x128xbf16>, vector<128x512xbf16>, vector<32x512xf32> -> vector<32x512xf32>
    %96 = arith.addf %90, %95 : vector<32x512xf32>
    %97 = vector.shape_cast %96 : vector<32x512xf32> to vector<2x16x512xf32>
    %c0_46 = arith.constant 0 : index
    %c0_47 = arith.constant 0 : index
    %98 = vector.load %arg6[%c0_46, %c0_47] : memref<16x128xf32, #tpu.memory_space<vmem>>, vector<16x128xf32>
    %c0_48 = arith.constant 0 : index
    %c0_49 = arith.constant 0 : index
    %99 = vector.load %arg7[%c0_48, %c0_49] : memref<16x128xf32, #tpu.memory_space<vmem>>, vector<16x128xf32>
    %c0_50 = arith.constant 0 : index
    %c0_51 = arith.constant 0 : index
    %100 = vector.load %arg8[%c0_50, %c0_51] : memref<16x128xf32, #tpu.memory_space<vmem>>, vector<16x128xf32>
    %101 = vector.extract_strided_slice %97 {offsets = [0, 0, 0], sizes = [2, 16, 128], strides = [1, 1, 1]} : vector<2x16x512xf32> to vector<2x16x128xf32>
    %102 = vector.shape_cast %98 : vector<16x128xf32> to vector<1x16x128xf32>
    %103 = vector.broadcast %102 : vector<1x16x128xf32> to vector<2x16x128xf32>
    %104 = arith.mulf %32, %103 : vector<2x16x128xf32>
    %105 = arith.addf %101, %104 : vector<2x16x128xf32>
    %106 = arith.negf %105 : vector<2x16x128xf32>
    %107 = math.exp %106 : vector<2x16x128xf32>
    %cst_52 = arith.constant 1.000000e+00 : f32
    %108 = vector.broadcast %cst_52 : f32 to vector<2x16x128xf32>
    %109 = arith.addf %108, %107 : vector<2x16x128xf32>
    %110 = arith.divf %108, %109 : vector<2x16x128xf32>
    %111 = vector.extract_strided_slice %97 {offsets = [0, 0, 128], sizes = [2, 16, 128], strides = [1, 1, 1]} : vector<2x16x512xf32> to vector<2x16x128xf32>
    %112 = vector.shape_cast %99 : vector<16x128xf32> to vector<1x16x128xf32>
    %113 = vector.broadcast %112 : vector<1x16x128xf32> to vector<2x16x128xf32>
    %114 = arith.mulf %32, %113 : vector<2x16x128xf32>
    %115 = arith.addf %111, %114 : vector<2x16x128xf32>
    %116 = arith.negf %115 : vector<2x16x128xf32>
    %117 = math.exp %116 : vector<2x16x128xf32>
    %cst_53 = arith.constant 1.000000e+00 : f32
    %118 = vector.broadcast %cst_53 : f32 to vector<2x16x128xf32>
    %119 = arith.addf %118, %117 : vector<2x16x128xf32>
    %120 = arith.divf %118, %119 : vector<2x16x128xf32>
    %121 = arith.mulf %120, %32 : vector<2x16x128xf32>
    %122 = vector.extract_strided_slice %97 {offsets = [0, 0, 256], sizes = [2, 16, 128], strides = [1, 1, 1]} : vector<2x16x512xf32> to vector<2x16x128xf32>
    %123 = math.tanh %122 : vector<2x16x128xf32>
    %124 = arith.mulf %110, %123 : vector<2x16x128xf32>
    %125 = arith.addf %121, %124 : vector<2x16x128xf32>
    %126 = vector.extract_strided_slice %97 {offsets = [0, 0, 384], sizes = [2, 16, 128], strides = [1, 1, 1]} : vector<2x16x512xf32> to vector<2x16x128xf32>
    %127 = vector.shape_cast %100 : vector<16x128xf32> to vector<1x16x128xf32>
    %128 = vector.broadcast %127 : vector<1x16x128xf32> to vector<2x16x128xf32>
    %129 = arith.mulf %125, %128 : vector<2x16x128xf32>
    %130 = arith.addf %126, %129 : vector<2x16x128xf32>
    %131 = arith.negf %130 : vector<2x16x128xf32>
    %132 = math.exp %131 : vector<2x16x128xf32>
    %cst_54 = arith.constant 1.000000e+00 : f32
    %133 = vector.broadcast %cst_54 : f32 to vector<2x16x128xf32>
    %134 = arith.addf %133, %132 : vector<2x16x128xf32>
    %135 = arith.divf %133, %134 : vector<2x16x128xf32>
    %136 = math.tanh %125 : vector<2x16x128xf32>
    %137 = arith.mulf %135, %136 : vector<2x16x128xf32>
    %138 = arith.truncf %137 : vector<2x16x128xf32> to vector<2x16x128xbf16>
    %c0_55 = arith.constant 0 : index
    %c0_56 = arith.constant 0 : index
    %c0_57 = arith.constant 0 : index
    %c0_58 = arith.constant 0 : index
    %139 = vector.load %arg10[%c0_55, %c0_56, %c0_57, %c0_58] : memref<1x2x16x128xbf16, #tpu.memory_space<vmem>>, vector<1x2x16x128xbf16>
    %140 = vector.shape_cast %139 : vector<1x2x16x128xbf16> to vector<2x16x128xbf16>
    %141 = vector.shape_cast %138 : vector<2x16x128xbf16> to vector<1x2x16x128xbf16>
    tpu.vector_store %arg10[%c0_55, %c0_56, %c0_57, %c0_58], %141 {strides = array<i32>} : memref<1x2x16x128xbf16, #tpu.memory_space<vmem>>, vector<1x2x16x128xbf16>,
    %c0_59 = arith.constant 0 : index
    %c0_60 = arith.constant 0 : index
    %c0_61 = arith.constant 0 : index
    %142 = vector.load %arg11[%c0_59, %c0_60, %c0_61] : memref<2x16x128xf32, #tpu.memory_space<vmem>>, vector<2x16x128xf32>
    tpu.vector_store %arg11[%c0_59, %c0_60, %c0_61], %137 {strides = array<i32>} : memref<2x16x128xf32, #tpu.memory_space<vmem>>, vector<2x16x128xf32>,
    %c0_62 = arith.constant 0 : index
    %c0_63 = arith.constant 0 : index
    %c0_64 = arith.constant 0 : index
    %143 = vector.load %arg12[%c0_62, %c0_63, %c0_64] : memref<2x16x128xf32, #tpu.memory_space<vmem>>, vector<2x16x128xf32>
    tpu.vector_store %arg12[%c0_62, %c0_63, %c0_64], %125 {strides = array<i32>} : memref<2x16x128xf32, #tpu.memory_space<vmem>>, vector<2x16x128xf32>,
    return
  }
  func.func @transform_0(%arg0: i32, %arg1: i32) -> (i32, i32, i32, i32) {
    %c0_i32 = arith.constant 0 : i32
    %c0_i32_0 = arith.constant 0 : i32
    %c0_i32_1 = arith.constant 0 : i32
    return %arg1, %arg0, %c0_i32, %c0_i32_0 : i32, i32, i32, i32
  }
  func.func @transform_1(%arg0: i32, %arg1: i32) -> (i32, i32, i32) {
    %c0_i32 = arith.constant 0 : i32
    %c0_i32_0 = arith.constant 0 : i32
    %c0_i32_1 = arith.constant 0 : i32
    return %arg0, %c0_i32, %c0_i32_0 : i32, i32, i32
  }
  func.func @transform_2(%arg0: i32, %arg1: i32) -> (i32, i32, i32) {
    %c0_i32 = arith.constant 0 : i32
    %c0_i32_0 = arith.constant 0 : i32
    %c0_i32_1 = arith.constant 0 : i32
    return %arg0, %c0_i32, %c0_i32_0 : i32, i32, i32
  }
  func.func @transform_3(%arg0: i32, %arg1: i32) -> (i32, i32, i32) {
    %c0_i32 = arith.constant 0 : i32
    %c0_i32_0 = arith.constant 0 : i32
    %c0_i32_1 = arith.constant 0 : i32
    %c0_i32_2 = arith.constant 0 : i32
    return %c0_i32, %c0_i32_0, %c0_i32_1 : i32, i32, i32
  }
  func.func @transform_4(%arg0: i32, %arg1: i32) -> (i32, i32) {
    %c0_i32 = arith.constant 0 : i32
    %c0_i32_0 = arith.constant 0 : i32
    %c0_i32_1 = arith.constant 0 : i32
    return %c0_i32, %c0_i32_0 : i32, i32
  }
  func.func @transform_5(%arg0: i32, %arg1: i32) -> (i32, i32) {
    %c0_i32 = arith.constant 0 : i32
    %c0_i32_0 = arith.constant 0 : i32
    %c0_i32_1 = arith.constant 0 : i32
    return %c0_i32, %c0_i32_0 : i32, i32
  }
  func.func @transform_6(%arg0: i32, %arg1: i32) -> (i32, i32) {
    %c0_i32 = arith.constant 0 : i32
    %c0_i32_0 = arith.constant 0 : i32
    %c0_i32_1 = arith.constant 0 : i32
    return %c0_i32, %c0_i32_0 : i32, i32
  }
  func.func @transform_7(%arg0: i32, %arg1: i32) -> i32 {
    %c0_i32 = arith.constant 0 : i32
    %c0_i32_0 = arith.constant 0 : i32
    return %c0_i32 : i32
  }
  func.func @transform_8(%arg0: i32, %arg1: i32) -> (i32, i32, i32, i32) {
    %c0_i32 = arith.constant 0 : i32
    %c0_i32_0 = arith.constant 0 : i32
    %c0_i32_1 = arith.constant 0 : i32
    return %arg1, %arg0, %c0_i32, %c0_i32_0 : i32, i32, i32, i32
  }
  func.func @transform_9(%arg0: i32, %arg1: i32) -> (i32, i32, i32) {
    %c0_i32 = arith.constant 0 : i32
    %c0_i32_0 = arith.constant 0 : i32
    %c0_i32_1 = arith.constant 0 : i32
    return %arg0, %c0_i32, %c0_i32_0 : i32, i32, i32
  }
  func.func @transform_10(%arg0: i32, %arg1: i32) -> (i32, i32, i32) {
    %c0_i32 = arith.constant 0 : i32
    %c0_i32_0 = arith.constant 0 : i32
    %c0_i32_1 = arith.constant 0 : i32
    return %arg0, %c0_i32, %c0_i32_0 : i32, i32, i32
  }
}

module attributes {stable_mosaic.version = 11 : i64} {
  func.func @_policy_core_kernel(%arg0: i32, %arg1: i32, %arg2: memref<1x2x16x128xbf16, #tpu.memory_space<vmem>>, %arg3: memref<16x64xbf16, #tpu.memory_space<vmem>>, %arg4: memref<64x16xbf16, #tpu.memory_space<vmem>>, %arg5: memref<2x256xf32, #tpu.memory_space<vmem>>, %arg6: memref<2x256xf32, #tpu.memory_space<vmem>>, %arg7: memref<256x128xbf16, #tpu.memory_space<vmem>>, %arg8: memref<1x128xf32, #tpu.memory_space<vmem>>, %arg9: memref<128x288xbf16, #tpu.memory_space<vmem>>, %arg10: memref<1x288xf32, #tpu.memory_space<vmem>>, %arg11: memref<288x288xbf16, #tpu.memory_space<vmem>>, %arg12: memref<1x288xf32, #tpu.memory_space<vmem>>, %arg13: memref<1026x512xbf16, #tpu.memory_space<vmem>>, %arg14: memref<1x512xf32, #tpu.memory_space<vmem>>, %arg15: memref<512x256xbf16, #tpu.memory_space<vmem>>, %arg16: memref<1x256xf32, #tpu.memory_space<vmem>>, %arg17: memref<512x1024xbf16, #tpu.memory_space<vmem>>, %arg18: memref<1x1024xf32, #tpu.memory_space<vmem>>, %arg19: memref<4xf32, #tpu.memory_space<smem>>, %arg20: memref<8xf32, #tpu.memory_space<smem>>, %arg21: memref<1x2x256xbf16, #tpu.memory_space<vmem>>, %arg22: memref<2x256xf32, #tpu.memory_space<vmem>>, %arg23: memref<2x256xf32, #tpu.memory_space<vmem>>) attributes {dimension_semantics = [#tpu.dimension_semantics<parallel>, #tpu.dimension_semantics<arbitrary>], iteration_bounds = array<i64: 1, 2>, scalar_prefetch = 0 : i64, scratch_operands = 0 : i64, tpu.core_type = #tpu.core_type<tc>, window_params = [{transform_indices = @transform_0, window_bounds = array<i64: 1, 2, 16, 128>}, {pipeline_mode = #tpu.pipeline_mode<synchronous>, transform_indices = @transform_1, window_bounds = array<i64: 16, 64>}, {pipeline_mode = #tpu.pipeline_mode<synchronous>, transform_indices = @transform_2, window_bounds = array<i64: 64, 16>}, {transform_indices = @transform_3, window_bounds = array<i64: 2, 256>}, {transform_indices = @transform_4, window_bounds = array<i64: 2, 256>}, {pipeline_mode = #tpu.pipeline_mode<synchronous>, transform_indices = @transform_5, window_bounds = array<i64: 256, 128>}, {pipeline_mode = #tpu.pipeline_mode<synchronous>, transform_indices = @transform_6, window_bounds = array<i64: 1, 128>}, {pipeline_mode = #tpu.pipeline_mode<synchronous>, transform_indices = @transform_7, window_bounds = array<i64: 128, 288>}, {pipeline_mode = #tpu.pipeline_mode<synchronous>, transform_indices = @transform_8, window_bounds = array<i64: 1, 288>}, {pipeline_mode = #tpu.pipeline_mode<synchronous>, transform_indices = @transform_9, window_bounds = array<i64: 288, 288>}, {pipeline_mode = #tpu.pipeline_mode<synchronous>, transform_indices = @transform_10, window_bounds = array<i64: 1, 288>}, {pipeline_mode = #tpu.pipeline_mode<synchronous>, transform_indices = @transform_11, window_bounds = array<i64: 1026, 512>}, {pipeline_mode = #tpu.pipeline_mode<synchronous>, transform_indices = @transform_12, window_bounds = array<i64: 1, 512>}, {pipeline_mode = #tpu.pipeline_mode<synchronous>, transform_indices = @transform_13, window_bounds = array<i64: 512, 256>}, {pipeline_mode = #tpu.pipeline_mode<synchronous>, transform_indices = @transform_14, window_bounds = array<i64: 1, 256>}, {pipeline_mode = #tpu.pipeline_mode<synchronous>, transform_indices = @transform_15, window_bounds = array<i64: 512, 1024>}, {pipeline_mode = #tpu.pipeline_mode<synchronous>, transform_indices = @transform_16, window_bounds = array<i64: 1, 1024>}, {transform_indices = @transform_17, window_bounds = array<i64: 4>}, {transform_indices = @transform_18, window_bounds = array<i64: 8>}, {transform_indices = @transform_19, window_bounds = array<i64: 1, 2, 256>}, {transform_indices = @transform_20, window_bounds = array<i64: 2, 256>}, {transform_indices = @transform_21, window_bounds = array<i64: 2, 256>}]} {
    %c0_i32 = arith.constant 0 : i32
    %0 = arith.cmpi eq, %arg1, %c0_i32 : i32
    %1 = arith.extui %0 : i1 to i32
    %c0_i32_0 = arith.constant 0 : i32
    %2 = arith.cmpi ne, %1, %c0_i32_0 : i32
    scf.if %2 {
      %c0_88 = arith.constant 0 : index
      %c0_89 = arith.constant 0 : index
      %188 = vector.load %arg5[%c0_88, %c0_89] : memref<2x256xf32, #tpu.memory_space<vmem>>, vector<2x256xf32>
      %c0_90 = arith.constant 0 : index
      %c0_91 = arith.constant 0 : index
      %189 = vector.load %arg22[%c0_90, %c0_91] : memref<2x256xf32, #tpu.memory_space<vmem>>, vector<2x256xf32>
      tpu.vector_store %arg22[%c0_90, %c0_91], %188 {strides = array<i32>} : memref<2x256xf32, #tpu.memory_space<vmem>>, vector<2x256xf32>,
      %c0_92 = arith.constant 0 : index
      %c0_93 = arith.constant 0 : index
      %190 = vector.load %arg6[%c0_92, %c0_93] : memref<2x256xf32, #tpu.memory_space<vmem>>, vector<2x256xf32>
      %c0_94 = arith.constant 0 : index
      %c0_95 = arith.constant 0 : index
      %191 = vector.load %arg23[%c0_94, %c0_95] : memref<2x256xf32, #tpu.memory_space<vmem>>, vector<2x256xf32>
      tpu.vector_store %arg23[%c0_94, %c0_95], %190 {strides = array<i32>} : memref<2x256xf32, #tpu.memory_space<vmem>>, vector<2x256xf32>,
    } else {
    }
    %c2_i32 = arith.constant 2 : i32
    %3 = arith.muli %arg1, %c2_i32 : i32
    %c2_i32_1 = arith.constant 2 : i32
    %4 = arith.muli %arg0, %c2_i32_1 : i32
    %5 = arith.addi %3, %4 : i32
    %6 = tpu.iota {dimensions = array<i32: 0>} : vector<2x1xi32>
    %cst = arith.constant 0.000000e+00 : f32
    %7 = vector.broadcast %cst : f32 to vector<2x1xf32>
    %c0_i32_2 = arith.constant 0 : i32
    %8 = vector.broadcast %c0_i32_2 : i32 to vector<2x1xi32>
    %9 = arith.cmpi eq, %6, %8 : vector<2x1xi32>
    %c0_i32_3 = arith.constant 0 : i32
    %10 = arith.addi %5, %c0_i32_3 : i32
    %11 = arith.index_cast %10 : i32 to index
    %12 = memref.load %arg19[%11] : memref<4xf32, #tpu.memory_space<smem>>
    %cst_4 = arith.constant 0.000000e+00 : f32
    %13 = vector.broadcast %12 : f32 to vector<2x1xf32>
    %14 = vector.broadcast %cst_4 : f32 to vector<2x1xf32>
    %15 = arith.select %9, %13, %14 : vector<2x1xi1>, vector<2x1xf32>
    %16 = arith.addf %7, %15 : vector<2x1xf32>
    %c1_i32 = arith.constant 1 : i32
    %17 = vector.broadcast %c1_i32 : i32 to vector<2x1xi32>
    %18 = arith.cmpi eq, %6, %17 : vector<2x1xi32>
    %c1_i32_5 = arith.constant 1 : i32
    %19 = arith.addi %5, %c1_i32_5 : i32
    %20 = arith.index_cast %19 : i32 to index
    %21 = memref.load %arg19[%20] : memref<4xf32, #tpu.memory_space<smem>>
    %cst_6 = arith.constant 0.000000e+00 : f32
    %22 = vector.broadcast %21 : f32 to vector<2x1xf32>
    %23 = vector.broadcast %cst_6 : f32 to vector<2x1xf32>
    %24 = arith.select %18, %22, %23 : vector<2x1xi1>, vector<2x1xf32>
    %25 = arith.addf %16, %24 : vector<2x1xf32>
    %c0 = arith.constant 0 : index
    %c0_7 = arith.constant 0 : index
    %26 = vector.load %arg22[%c0, %c0_7] : memref<2x256xf32, #tpu.memory_space<vmem>>, vector<2x256xf32>
    %27 = vector.broadcast %25 : vector<2x1xf32> to vector<2x256xf32>
    %28 = arith.mulf %26, %27 : vector<2x256xf32>
    %c0_8 = arith.constant 0 : index
    %c0_9 = arith.constant 0 : index
    %29 = vector.load %arg23[%c0_8, %c0_9] : memref<2x256xf32, #tpu.memory_space<vmem>>, vector<2x256xf32>
    %30 = vector.broadcast %25 : vector<2x1xf32> to vector<2x256xf32>
    %31 = arith.mulf %29, %30 : vector<2x256xf32>
    %32 = arith.truncf %28 : vector<2x256xf32> to vector<2x256xbf16>
    %c0_10 = arith.constant 0 : index
    %c0_11 = arith.constant 0 : index
    %33 = vector.load %arg7[%c0_10, %c0_11] : memref<256x128xbf16, #tpu.memory_space<vmem>>, vector<256x128xbf16>
    %cst_12 = arith.constant dense<0.000000e+00> : vector<2x128xf32>
    %34 = tpu.matmul %32, %33, %cst_12 {dimension_numbers = #tpu.dot_dimension_numbers<[1], [0], [0], [1], [0, 0, 1, 1], [], []>} : vector<2x256xbf16>, vector<256x128xbf16>, vector<2x128xf32> -> vector<2x128xf32>
    %c0_13 = arith.constant 0 : index
    %c0_14 = arith.constant 0 : index
    %35 = vector.load %arg8[%c0_13, %c0_14] : memref<1x128xf32, #tpu.memory_space<vmem>>, vector<1x128xf32>
    %36 = vector.broadcast %35 : vector<1x128xf32> to vector<2x128xf32>
    %37 = arith.addf %34, %36 : vector<2x128xf32>
    %cst_15 = arith.constant 0.000000e+00 : f32
    %38 = vector.broadcast %cst_15 : f32 to vector<2x128xf32>
    %39 = arith.maximumf %37, %38 : vector<2x128xf32>
    %40 = arith.truncf %39 : vector<2x128xf32> to vector<2x128xbf16>
    %c0_16 = arith.constant 0 : index
    %c0_17 = arith.constant 0 : index
    %41 = vector.load %arg9[%c0_16, %c0_17] : memref<128x288xbf16, #tpu.memory_space<vmem>>, vector<128x288xbf16>
    %cst_18 = arith.constant dense<0.000000e+00> : vector<2x288xf32>
    %42 = tpu.matmul %40, %41, %cst_18 {dimension_numbers = #tpu.dot_dimension_numbers<[1], [0], [0], [1], [0, 0, 1, 1], [], []>} : vector<2x128xbf16>, vector<128x288xbf16>, vector<2x288xf32> -> vector<2x288xf32>
    %c0_19 = arith.constant 0 : index
    %c0_20 = arith.constant 0 : index
    %43 = vector.load %arg10[%c0_19, %c0_20] : memref<1x288xf32, #tpu.memory_space<vmem>>, vector<1x288xf32>
    %44 = vector.broadcast %43 : vector<1x288xf32> to vector<2x288xf32>
    %45 = arith.addf %42, %44 : vector<2x288xf32>
    %cst_21 = arith.constant 0.000000e+00 : f32
    %46 = vector.broadcast %cst_21 : f32 to vector<2x288xf32>
    %47 = arith.maximumf %45, %46 : vector<2x288xf32>
    %48 = arith.truncf %47 : vector<2x288xf32> to vector<2x288xbf16>
    %c0_22 = arith.constant 0 : index
    %c0_23 = arith.constant 0 : index
    %49 = vector.load %arg11[%c0_22, %c0_23] : memref<288x288xbf16, #tpu.memory_space<vmem>>, vector<288x288xbf16>
    %cst_24 = arith.constant dense<0.000000e+00> : vector<2x288xf32>
    %50 = tpu.matmul %48, %49, %cst_24 {dimension_numbers = #tpu.dot_dimension_numbers<[1], [0], [0], [1], [0, 0, 1, 1], [], []>} : vector<2x288xbf16>, vector<288x288xbf16>, vector<2x288xf32> -> vector<2x288xf32>
    %c0_25 = arith.constant 0 : index
    %c0_26 = arith.constant 0 : index
    %51 = vector.load %arg12[%c0_25, %c0_26] : memref<1x288xf32, #tpu.memory_space<vmem>>, vector<1x288xf32>
    %52 = vector.broadcast %51 : vector<1x288xf32> to vector<2x288xf32>
    %53 = arith.addf %50, %52 : vector<2x288xf32>
    %c0_27 = arith.constant 0 : index
    %c0_28 = arith.constant 0 : index
    %c0_29 = arith.constant 0 : index
    %c0_30 = arith.constant 0 : index
    %54 = vector.load %arg2[%c0_27, %c0_28, %c0_29, %c0_30] : memref<1x2x16x128xbf16, #tpu.memory_space<vmem>>, vector<1x2x16x128xbf16>
    %55 = vector.shape_cast %54 : vector<1x2x16x128xbf16> to vector<2x16x128xbf16>
    %c0_31 = arith.constant 0 : index
    %c0_32 = arith.constant 0 : index
    %56 = vector.load %arg3[%c0_31, %c0_32] : memref<16x64xbf16, #tpu.memory_space<vmem>>, vector<16x64xbf16>
    %c0_33 = arith.constant 0 : index
    %c0_34 = arith.constant 0 : index
    %57 = vector.load %arg4[%c0_33, %c0_34] : memref<64x16xbf16, #tpu.memory_space<vmem>>, vector<64x16xbf16>
    %58 = arith.truncf %53 : vector<2x288xf32> to vector<2x288xbf16>
    %59 = vector.shape_cast %58 : vector<2x288xbf16> to vector<2x4x72xbf16>
    %60 = vector.extract_strided_slice %59 {offsets = [0, 0, 0], sizes = [2, 4, 8], strides = [1, 1, 1]} : vector<2x4x72xbf16> to vector<2x4x8xbf16>
    %61 = vector.extract_strided_slice %59 {offsets = [0, 0, 8], sizes = [2, 4, 64], strides = [1, 1, 1]} : vector<2x4x72xbf16> to vector<2x4x64xbf16>
    %62 = vector.shape_cast %61 : vector<2x4x64xbf16> to vector<8x64xbf16>
    %63 = vector.extract_strided_slice %55 {offsets = [0, 0, 0], sizes = [2, 16, 8], strides = [1, 1, 1]} : vector<2x16x128xbf16> to vector<2x16x8xbf16>
    %cst_35 = arith.constant dense<0.000000e+00> : vector<2x4x16xf32>
    %64 = tpu.matmul %60, %63, %cst_35 {dimension_numbers = #tpu.dot_dimension_numbers<[2], [2], [1], [1], [0, 0, 0, 1, 1, 1], [0], [0]>} : vector<2x4x8xbf16>, vector<2x16x8xbf16>, vector<2x4x16xf32> -> vector<2x4x16xf32>
    %cst_36 = arith.constant dense<0.000000e+00> : vector<8x16xf32>
    %65 = tpu.matmul %62, %57, %cst_36 {dimension_numbers = #tpu.dot_dimension_numbers<[1], [0], [0], [1], [0, 0, 1, 1], [], []>} : vector<8x64xbf16>, vector<64x16xbf16>, vector<8x16xf32> -> vector<8x16xf32>
    %66 = vector.shape_cast %65 : vector<8x16xf32> to vector<2x4x16xf32>
    %67 = arith.addf %64, %66 : vector<2x4x16xf32>
    %cst_37 = arith.constant dense<0xFF800000> : vector<2x4xf32>
    %68 = vector.multi_reduction <maximumf>, %67, %cst_37 [2] : vector<2x4x16xf32> to vector<2x4xf32>
    %69 = vector.shape_cast %68 : vector<2x4xf32> to vector<2x4x1xf32>
    %70 = vector.broadcast %69 : vector<2x4x1xf32> to vector<2x4x16xf32>
    %71 = arith.subf %67, %70 : vector<2x4x16xf32>
    %72 = math.exp %71 : vector<2x4x16xf32>
    %cst_38 = arith.constant dense<0.000000e+00> : vector<2x4xf32>
    %73 = vector.multi_reduction <add>, %72, %cst_38 [2] : vector<2x4x16xf32> to vector<2x4xf32>
    %74 = vector.shape_cast %73 : vector<2x4xf32> to vector<2x4x1xf32>
    %75 = tpu.reciprocal %74 {approx = true} : vector<2x4x1xf32> -> vector<2x4x1xf32>
    %76 = vector.broadcast %75 : vector<2x4x1xf32> to vector<2x4x16xf32>
    %77 = arith.mulf %72, %76 : vector<2x4x16xf32>
    %78 = arith.truncf %77 : vector<2x4x16xf32> to vector<2x4x16xbf16>
    %79 = vector.extract_strided_slice %55 {offsets = [0, 0, 8], sizes = [2, 16, 120], strides = [1, 1, 1]} : vector<2x16x128xbf16> to vector<2x16x120xbf16>
    %cst_39 = arith.constant dense<0.000000e+00> : vector<2x4x120xf32>
    %80 = tpu.matmul %78, %79, %cst_39 {dimension_numbers = #tpu.dot_dimension_numbers<[2], [1], [1], [2], [0, 0, 0, 1, 1, 2], [0], [0]>} : vector<2x4x16xbf16>, vector<2x16x120xbf16>, vector<2x4x120xf32> -> vector<2x4x120xf32>
    %81 = vector.shape_cast %78 : vector<2x4x16xbf16> to vector<8x16xbf16>
    %cst_40 = arith.constant dense<0.000000e+00> : vector<8x64xf32>
    %82 = tpu.matmul %81, %56, %cst_40 {dimension_numbers = #tpu.dot_dimension_numbers<[1], [0], [0], [1], [0, 0, 1, 1], [], []>} : vector<8x16xbf16>, vector<16x64xbf16>, vector<8x64xf32> -> vector<8x64xf32>
    %83 = vector.shape_cast %82 : vector<8x64xf32> to vector<2x4x64xf32>
    %84 = tpu.concatenate %80, %83 in 2 : vector<2x4x120xf32>, vector<2x4x64xf32> -> vector<2x4x184xf32>
    %85 = vector.shape_cast %84 : vector<2x4x184xf32> to vector<2x736xf32>
    %c2_i32_41 = arith.constant 2 : i32
    %86 = arith.muli %c2_i32_41, %arg1 : i32
    %c2_i32_42 = arith.constant 2 : i32
    %87 = arith.muli %86, %c2_i32_42 : i32
    %c2_i32_43 = arith.constant 2 : i32
    %88 = arith.muli %arg0, %c2_i32_43 : i32
    %89 = arith.addi %87, %88 : i32
    %90 = tpu.iota {dimensions = array<i32: 0>} : vector<2x1xi32>
    %cst_44 = arith.constant 0.000000e+00 : f32
    %91 = vector.broadcast %cst_44 : f32 to vector<2x1xf32>
    %c0_i32_45 = arith.constant 0 : i32
    %92 = vector.broadcast %c0_i32_45 : i32 to vector<2x1xi32>
    %93 = arith.cmpi eq, %90, %92 : vector<2x1xi32>
    %c0_i32_46 = arith.constant 0 : i32
    %94 = arith.addi %89, %c0_i32_46 : i32
    %95 = arith.index_cast %94 : i32 to index
    %96 = memref.load %arg20[%95] : memref<8xf32, #tpu.memory_space<smem>>
    %cst_47 = arith.constant 0.000000e+00 : f32
    %97 = vector.broadcast %96 : f32 to vector<2x1xf32>
    %98 = vector.broadcast %cst_47 : f32 to vector<2x1xf32>
    %99 = arith.select %93, %97, %98 : vector<2x1xi1>, vector<2x1xf32>
    %100 = arith.addf %91, %99 : vector<2x1xf32>
    %c1_i32_48 = arith.constant 1 : i32
    %101 = vector.broadcast %c1_i32_48 : i32 to vector<2x1xi32>
    %102 = arith.cmpi eq, %90, %101 : vector<2x1xi32>
    %c1_i32_49 = arith.constant 1 : i32
    %103 = arith.addi %89, %c1_i32_49 : i32
    %104 = arith.index_cast %103 : i32 to index
    %105 = memref.load %arg20[%104] : memref<8xf32, #tpu.memory_space<smem>>
    %cst_50 = arith.constant 0.000000e+00 : f32
    %106 = vector.broadcast %105 : f32 to vector<2x1xf32>
    %107 = vector.broadcast %cst_50 : f32 to vector<2x1xf32>
    %108 = arith.select %102, %106, %107 : vector<2x1xi1>, vector<2x1xf32>
    %109 = arith.addf %100, %108 : vector<2x1xf32>
    %c2_i32_51 = arith.constant 2 : i32
    %110 = arith.muli %c2_i32_51, %arg1 : i32
    %c1_i32_52 = arith.constant 1 : i32
    %111 = arith.addi %110, %c1_i32_52 : i32
    %c2_i32_53 = arith.constant 2 : i32
    %112 = arith.muli %111, %c2_i32_53 : i32
    %c2_i32_54 = arith.constant 2 : i32
    %113 = arith.muli %arg0, %c2_i32_54 : i32
    %114 = arith.addi %112, %113 : i32
    %115 = tpu.iota {dimensions = array<i32: 0>} : vector<2x1xi32>
    %cst_55 = arith.constant 0.000000e+00 : f32
    %116 = vector.broadcast %cst_55 : f32 to vector<2x1xf32>
    %c0_i32_56 = arith.constant 0 : i32
    %117 = vector.broadcast %c0_i32_56 : i32 to vector<2x1xi32>
    %118 = arith.cmpi eq, %115, %117 : vector<2x1xi32>
    %c0_i32_57 = arith.constant 0 : i32
    %119 = arith.addi %114, %c0_i32_57 : i32
    %120 = arith.index_cast %119 : i32 to index
    %121 = memref.load %arg20[%120] : memref<8xf32, #tpu.memory_space<smem>>
    %cst_58 = arith.constant 0.000000e+00 : f32
    %122 = vector.broadcast %121 : f32 to vector<2x1xf32>
    %123 = vector.broadcast %cst_58 : f32 to vector<2x1xf32>
    %124 = arith.select %118, %122, %123 : vector<2x1xi1>, vector<2x1xf32>
    %125 = arith.addf %116, %124 : vector<2x1xf32>
    %c1_i32_59 = arith.constant 1 : i32
    %126 = vector.broadcast %c1_i32_59 : i32 to vector<2x1xi32>
    %127 = arith.cmpi eq, %115, %126 : vector<2x1xi32>
    %c1_i32_60 = arith.constant 1 : i32
    %128 = arith.addi %114, %c1_i32_60 : i32
    %129 = arith.index_cast %128 : i32 to index
    %130 = memref.load %arg20[%129] : memref<8xf32, #tpu.memory_space<smem>>
    %cst_61 = arith.constant 0.000000e+00 : f32
    %131 = vector.broadcast %130 : f32 to vector<2x1xf32>
    %132 = vector.broadcast %cst_61 : f32 to vector<2x1xf32>
    %133 = arith.select %127, %131, %132 : vector<2x1xi1>, vector<2x1xf32>
    %134 = arith.addf %125, %133 : vector<2x1xf32>
    %135 = tpu.concatenate %85, %53, %109, %134 in 1 : vector<2x736xf32>, vector<2x288xf32>, vector<2x1xf32>, vector<2x1xf32> -> vector<2x1026xf32>
    %136 = arith.truncf %135 : vector<2x1026xf32> to vector<2x1026xbf16>
    %c0_62 = arith.constant 0 : index
    %c0_63 = arith.constant 0 : index
    %137 = vector.load %arg13[%c0_62, %c0_63] : memref<1026x512xbf16, #tpu.memory_space<vmem>>, vector<1026x512xbf16>
    %cst_64 = arith.constant dense<0.000000e+00> : vector<2x512xf32>
    %138 = tpu.matmul %136, %137, %cst_64 {dimension_numbers = #tpu.dot_dimension_numbers<[1], [0], [0], [1], [0, 0, 1, 1], [], []>} : vector<2x1026xbf16>, vector<1026x512xbf16>, vector<2x512xf32> -> vector<2x512xf32>
    %c0_65 = arith.constant 0 : index
    %c0_66 = arith.constant 0 : index
    %139 = vector.load %arg14[%c0_65, %c0_66] : memref<1x512xf32, #tpu.memory_space<vmem>>, vector<1x512xf32>
    %140 = vector.broadcast %139 : vector<1x512xf32> to vector<2x512xf32>
    %141 = arith.addf %138, %140 : vector<2x512xf32>
    %cst_67 = arith.constant 0.000000e+00 : f32
    %142 = vector.broadcast %cst_67 : f32 to vector<2x512xf32>
    %143 = arith.maximumf %141, %142 : vector<2x512xf32>
    %144 = arith.truncf %143 : vector<2x512xf32> to vector<2x512xbf16>
    %c0_68 = arith.constant 0 : index
    %c0_69 = arith.constant 0 : index
    %145 = vector.load %arg15[%c0_68, %c0_69] : memref<512x256xbf16, #tpu.memory_space<vmem>>, vector<512x256xbf16>
    %cst_70 = arith.constant dense<0.000000e+00> : vector<2x256xf32>
    %146 = tpu.matmul %144, %145, %cst_70 {dimension_numbers = #tpu.dot_dimension_numbers<[1], [0], [0], [1], [0, 0, 1, 1], [], []>} : vector<2x512xbf16>, vector<512x256xbf16>, vector<2x256xf32> -> vector<2x256xf32>
    %c0_71 = arith.constant 0 : index
    %c0_72 = arith.constant 0 : index
    %147 = vector.load %arg16[%c0_71, %c0_72] : memref<1x256xf32, #tpu.memory_space<vmem>>, vector<1x256xf32>
    %148 = vector.broadcast %147 : vector<1x256xf32> to vector<2x256xf32>
    %149 = arith.addf %146, %148 : vector<2x256xf32>
    %150 = tpu.concatenate %149, %28 in 1 : vector<2x256xf32>, vector<2x256xf32> -> vector<2x512xf32>
    %151 = arith.truncf %150 : vector<2x512xf32> to vector<2x512xbf16>
    %c0_73 = arith.constant 0 : index
    %c0_74 = arith.constant 0 : index
    %152 = vector.load %arg17[%c0_73, %c0_74] : memref<512x1024xbf16, #tpu.memory_space<vmem>>, vector<512x1024xbf16>
    %cst_75 = arith.constant dense<0.000000e+00> : vector<2x1024xf32>
    %153 = tpu.matmul %151, %152, %cst_75 {dimension_numbers = #tpu.dot_dimension_numbers<[1], [0], [0], [1], [0, 0, 1, 1], [], []>} : vector<2x512xbf16>, vector<512x1024xbf16>, vector<2x1024xf32> -> vector<2x1024xf32>
    %c0_76 = arith.constant 0 : index
    %c0_77 = arith.constant 0 : index
    %154 = vector.load %arg18[%c0_76, %c0_77] : memref<1x1024xf32, #tpu.memory_space<vmem>>, vector<1x1024xf32>
    %155 = vector.broadcast %154 : vector<1x1024xf32> to vector<2x1024xf32>
    %156 = arith.addf %153, %155 : vector<2x1024xf32>
    %157 = vector.extract_strided_slice %156 {offsets = [0, 0], sizes = [2, 256], strides = [1, 1]} : vector<2x1024xf32> to vector<2x256xf32>
    %158 = arith.negf %157 : vector<2x256xf32>
    %159 = math.exp %158 : vector<2x256xf32>
    %cst_78 = arith.constant 1.000000e+00 : f32
    %160 = vector.broadcast %cst_78 : f32 to vector<2x256xf32>
    %161 = arith.addf %160, %159 : vector<2x256xf32>
    %162 = arith.divf %160, %161 : vector<2x256xf32>
    %163 = vector.extract_strided_slice %156 {offsets = [0, 256], sizes = [2, 256], strides = [1, 1]} : vector<2x1024xf32> to vector<2x256xf32>
    %164 = arith.negf %163 : vector<2x256xf32>
    %165 = math.exp %164 : vector<2x256xf32>
    %cst_79 = arith.constant 1.000000e+00 : f32
    %166 = vector.broadcast %cst_79 : f32 to vector<2x256xf32>
    %167 = arith.addf %166, %165 : vector<2x256xf32>
    %168 = arith.divf %166, %167 : vector<2x256xf32>
    %169 = vector.extract_strided_slice %156 {offsets = [0, 512], sizes = [2, 256], strides = [1, 1]} : vector<2x1024xf32> to vector<2x256xf32>
    %170 = math.tanh %169 : vector<2x256xf32>
    %171 = vector.extract_strided_slice %156 {offsets = [0, 768], sizes = [2, 256], strides = [1, 1]} : vector<2x1024xf32> to vector<2x256xf32>
    %172 = arith.negf %171 : vector<2x256xf32>
    %173 = math.exp %172 : vector<2x256xf32>
    %cst_80 = arith.constant 1.000000e+00 : f32
    %174 = vector.broadcast %cst_80 : f32 to vector<2x256xf32>
    %175 = arith.addf %174, %173 : vector<2x256xf32>
    %176 = arith.divf %174, %175 : vector<2x256xf32>
    %177 = arith.mulf %168, %31 : vector<2x256xf32>
    %178 = arith.mulf %162, %170 : vector<2x256xf32>
    %179 = arith.addf %177, %178 : vector<2x256xf32>
    %180 = math.tanh %179 : vector<2x256xf32>
    %181 = arith.mulf %176, %180 : vector<2x256xf32>
    %182 = arith.truncf %181 : vector<2x256xf32> to vector<2x256xbf16>
    %c0_81 = arith.constant 0 : index
    %c0_82 = arith.constant 0 : index
    %c0_83 = arith.constant 0 : index
    %183 = vector.load %arg21[%c0_81, %c0_82, %c0_83] : memref<1x2x256xbf16, #tpu.memory_space<vmem>>, vector<1x2x256xbf16>
    %184 = vector.shape_cast %183 : vector<1x2x256xbf16> to vector<2x256xbf16>
    %185 = vector.shape_cast %182 : vector<2x256xbf16> to vector<1x2x256xbf16>
    tpu.vector_store %arg21[%c0_81, %c0_82, %c0_83], %185 {strides = array<i32>} : memref<1x2x256xbf16, #tpu.memory_space<vmem>>, vector<1x2x256xbf16>,
    %c0_84 = arith.constant 0 : index
    %c0_85 = arith.constant 0 : index
    %186 = vector.load %arg22[%c0_84, %c0_85] : memref<2x256xf32, #tpu.memory_space<vmem>>, vector<2x256xf32>
    tpu.vector_store %arg22[%c0_84, %c0_85], %181 {strides = array<i32>} : memref<2x256xf32, #tpu.memory_space<vmem>>, vector<2x256xf32>,
    %c0_86 = arith.constant 0 : index
    %c0_87 = arith.constant 0 : index
    %187 = vector.load %arg23[%c0_86, %c0_87] : memref<2x256xf32, #tpu.memory_space<vmem>>, vector<2x256xf32>
    tpu.vector_store %arg23[%c0_86, %c0_87], %179 {strides = array<i32>} : memref<2x256xf32, #tpu.memory_space<vmem>>, vector<2x256xf32>,
    return
  }
  func.func @transform_0(%arg0: i32, %arg1: i32) -> (i32, i32, i32, i32) {
    %c0_i32 = arith.constant 0 : i32
    %c0_i32_0 = arith.constant 0 : i32
    %c0_i32_1 = arith.constant 0 : i32
    return %arg1, %arg0, %c0_i32, %c0_i32_0 : i32, i32, i32, i32
  }
  func.func @transform_1(%arg0: i32, %arg1: i32) -> (i32, i32) {
    %c0_i32 = arith.constant 0 : i32
    %c0_i32_0 = arith.constant 0 : i32
    %c0_i32_1 = arith.constant 0 : i32
    return %c0_i32, %c0_i32_0 : i32, i32
  }
  func.func @transform_2(%arg0: i32, %arg1: i32) -> (i32, i32) {
    %c0_i32 = arith.constant 0 : i32
    %c0_i32_0 = arith.constant 0 : i32
    %c0_i32_1 = arith.constant 0 : i32
    return %c0_i32, %c0_i32_0 : i32, i32
  }
  func.func @transform_3(%arg0: i32, %arg1: i32) -> (i32, i32) {
    %c0_i32 = arith.constant 0 : i32
    %c0_i32_0 = arith.constant 0 : i32
    return %arg0, %c0_i32 : i32, i32
  }
  func.func @transform_4(%arg0: i32, %arg1: i32) -> (i32, i32) {
    %c0_i32 = arith.constant 0 : i32
    %c0_i32_0 = arith.constant 0 : i32
    return %arg0, %c0_i32 : i32, i32
  }
  func.func @transform_5(%arg0: i32, %arg1: i32) -> (i32, i32) {
    %c0_i32 = arith.constant 0 : i32
    %c0_i32_0 = arith.constant 0 : i32
    %c0_i32_1 = arith.constant 0 : i32
    return %c0_i32, %c0_i32_0 : i32, i32
  }
  func.func @transform_6(%arg0: i32, %arg1: i32) -> (i32, i32) {
    %c0_i32 = arith.constant 0 : i32
    %c0_i32_0 = arith.constant 0 : i32
    %c0_i32_1 = arith.constant 0 : i32
    return %c0_i32, %c0_i32_0 : i32, i32
  }
  func.func @transform_7(%arg0: i32, %arg1: i32) -> (i32, i32) {
    %c0_i32 = arith.constant 0 : i32
    %c0_i32_0 = arith.constant 0 : i32
    %c0_i32_1 = arith.constant 0 : i32
    return %c0_i32, %c0_i32_0 : i32, i32
  }
  func.func @transform_8(%arg0: i32, %arg1: i32) -> (i32, i32) {
    %c0_i32 = arith.constant 0 : i32
    %c0_i32_0 = arith.constant 0 : i32
    %c0_i32_1 = arith.constant 0 : i32
    return %c0_i32, %c0_i32_0 : i32, i32
  }
  func.func @transform_9(%arg0: i32, %arg1: i32) -> (i32, i32) {
    %c0_i32 = arith.constant 0 : i32
    %c0_i32_0 = arith.constant 0 : i32
    %c0_i32_1 = arith.constant 0 : i32
    return %c0_i32, %c0_i32_0 : i32, i32
  }
  func.func @transform_10(%arg0: i32, %arg1: i32) -> (i32, i32) {
    %c0_i32 = arith.constant 0 : i32
    %c0_i32_0 = arith.constant 0 : i32
    %c0_i32_1 = arith.constant 0 : i32
    return %c0_i32, %c0_i32_0 : i32, i32
  }
  func.func @transform_11(%arg0: i32, %arg1: i32) -> (i32, i32) {
    %c0_i32 = arith.constant 0 : i32
    %c0_i32_0 = arith.constant 0 : i32
    %c0_i32_1 = arith.constant 0 : i32
    return %c0_i32, %c0_i32_0 : i32, i32
  }
  func.func @transform_12(%arg0: i32, %arg1: i32) -> (i32, i32) {
    %c0_i32 = arith.constant 0 : i32
    %c0_i32_0 = arith.constant 0 : i32
    %c0_i32_1 = arith.constant 0 : i32
    return %c0_i32, %c0_i32_0 : i32, i32
  }
  func.func @transform_13(%arg0: i32, %arg1: i32) -> (i32, i32) {
    %c0_i32 = arith.constant 0 : i32
    %c0_i32_0 = arith.constant 0 : i32
    %c0_i32_1 = arith.constant 0 : i32
    return %c0_i32, %c0_i32_0 : i32, i32
  }
  func.func @transform_14(%arg0: i32, %arg1: i32) -> (i32, i32) {
    %c0_i32 = arith.constant 0 : i32
    %c0_i32_0 = arith.constant 0 : i32
    %c0_i32_1 = arith.constant 0 : i32
    return %c0_i32, %c0_i32_0 : i32, i32
  }
  func.func @transform_15(%arg0: i32, %arg1: i32) -> (i32, i32) {
    %c0_i32 = arith.constant 0 : i32
    %c0_i32_0 = arith.constant 0 : i32
    %c0_i32_1 = arith.constant 0 : i32
    return %c0_i32, %c0_i32_0 : i32, i32
  }
  func.func @transform_16(%arg0: i32, %arg1: i32) -> (i32, i32) {
    %c0_i32 = arith.constant 0 : i32
    %c0_i32_0 = arith.constant 0 : i32
    %c0_i32_1 = arith.constant 0 : i32
    return %c0_i32, %c0_i32_0 : i32, i32
  }
  func.func @transform_17(%arg0: i32, %arg1: i32) -> i32 {
    %c0_i32 = arith.constant 0 : i32
    %c0_i32_0 = arith.constant 0 : i32
    return %c0_i32 : i32
  }
  func.func @transform_18(%arg0: i32, %arg1: i32) -> i32 {
    %c0_i32 = arith.constant 0 : i32
    %c0_i32_0 = arith.constant 0 : i32
    return %c0_i32 : i32
  }
  func.func @transform_19(%arg0: i32, %arg1: i32) -> (i32, i32, i32) {
    %c0_i32 = arith.constant 0 : i32
    %c0_i32_0 = arith.constant 0 : i32
    return %arg1, %arg0, %c0_i32 : i32, i32, i32
  }
  func.func @transform_20(%arg0: i32, %arg1: i32) -> (i32, i32) {
    %c0_i32 = arith.constant 0 : i32
    %c0_i32_0 = arith.constant 0 : i32
    return %arg0, %c0_i32 : i32, i32
  }
  func.func @transform_21(%arg0: i32, %arg1: i32) -> (i32, i32) {
    %c0_i32 = arith.constant 0 : i32
    %c0_i32_0 = arith.constant 0 : i32
    return %arg0, %c0_i32 : i32, i32
  }
}

module attributes {stable_mosaic.version = 11 : i64} {
  func.func @_linear_kernel(%arg0: i32, %arg1: memref<4x256xbf16, #tpu.memory_space<vmem>>, %arg2: memref<256x128xbf16, #tpu.memory_space<vmem>>, %arg3: memref<1x128xf32, #tpu.memory_space<vmem>>, %arg4: memref<4x128xf32, #tpu.memory_space<vmem>>) attributes {dimension_semantics = [#tpu.dimension_semantics<parallel>], iteration_bounds = array<i64: 1>, scalar_prefetch = 0 : i64, scratch_operands = 0 : i64, tpu.core_type = #tpu.core_type<tc>, window_params = [{transform_indices = @transform_0, window_bounds = array<i64: 4, 256>}, {pipeline_mode = #tpu.pipeline_mode<synchronous>, transform_indices = @transform_1, window_bounds = array<i64: 256, 128>}, {pipeline_mode = #tpu.pipeline_mode<synchronous>, transform_indices = @transform_2, window_bounds = array<i64: 1, 128>}, {transform_indices = @transform_3, window_bounds = array<i64: 4, 128>}]} {
    %c0 = arith.constant 0 : index
    %c0_0 = arith.constant 0 : index
    %0 = vector.load %arg1[%c0, %c0_0] : memref<4x256xbf16, #tpu.memory_space<vmem>>, vector<4x256xbf16>
    %c0_1 = arith.constant 0 : index
    %c0_2 = arith.constant 0 : index
    %1 = vector.load %arg2[%c0_1, %c0_2] : memref<256x128xbf16, #tpu.memory_space<vmem>>, vector<256x128xbf16>
    %cst = arith.constant dense<0.000000e+00> : vector<4x128xf32>
    %2 = tpu.matmul %0, %1, %cst {dimension_numbers = #tpu.dot_dimension_numbers<[1], [0], [0], [1], [0, 0, 1, 1], [], []>} : vector<4x256xbf16>, vector<256x128xbf16>, vector<4x128xf32> -> vector<4x128xf32>
    %c0_3 = arith.constant 0 : index
    %c0_4 = arith.constant 0 : index
    %3 = vector.load %arg3[%c0_3, %c0_4] : memref<1x128xf32, #tpu.memory_space<vmem>>, vector<1x128xf32>
    %4 = vector.broadcast %3 : vector<1x128xf32> to vector<4x128xf32>
    %5 = arith.addf %2, %4 : vector<4x128xf32>
    %c0_5 = arith.constant 0 : index
    %c0_6 = arith.constant 0 : index
    %6 = vector.load %arg4[%c0_5, %c0_6] : memref<4x128xf32, #tpu.memory_space<vmem>>, vector<4x128xf32>
    tpu.vector_store %arg4[%c0_5, %c0_6], %5 {strides = array<i32>} : memref<4x128xf32, #tpu.memory_space<vmem>>, vector<4x128xf32>,
    return
  }
  func.func @transform_0(%arg0: i32) -> (i32, i32) {
    %c0_i32 = arith.constant 0 : i32
    %c0_i32_0 = arith.constant 0 : i32
    return %arg0, %c0_i32 : i32, i32
  }
  func.func @transform_1(%arg0: i32) -> (i32, i32) {
    %c0_i32 = arith.constant 0 : i32
    %c0_i32_0 = arith.constant 0 : i32
    %c0_i32_1 = arith.constant 0 : i32
    return %c0_i32, %c0_i32_0 : i32, i32
  }
  func.func @transform_2(%arg0: i32) -> (i32, i32) {
    %c0_i32 = arith.constant 0 : i32
    %c0_i32_0 = arith.constant 0 : i32
    %c0_i32_1 = arith.constant 0 : i32
    return %c0_i32, %c0_i32_0 : i32, i32
  }
  func.func @transform_3(%arg0: i32) -> (i32, i32) {
    %c0_i32 = arith.constant 0 : i32
    %c0_i32_0 = arith.constant 0 : i32
    return %arg0, %c0_i32 : i32, i32
  }
}

</mosaic_0001>

<bundles_post_ra>
// kernel: forward.6
= control target key start
LH: loop header
LB: loop body
LE: loop exit
PB: predicated region body
PF: predicated region fallthrough
CT: control target
= control target key end

     0   :  { %v742_v0 = vmov 0   ;;  %vm257_vm0 = vcmask 523264   ;;  %vm534_vm1 = vcmask 257024   ;;  %vm559_vm2 = vcmask 254976   ;;  %s1040_s1 = inlined_call_operand.vmem [shape: bf16[192,32], index: 1, kind: input, shape index: {}]   ;;  %s1041_s0 = inlined_call_operand.vmem [shape: bf16[196,192], index: 0, kind: input, shape index: {}]   ;;  %s1042_s2 = inlined_call_operand.vmem [shape: f32[1,32], index: 2, kind: input, shape index: {}]   ;;  %s1043_s3 = inlined_call_operand.vmem [shape: bf16[196,32], index: 3, kind: output, shape index: {}]  }
   0x1   :  { %297 = vmatprep.subr.bf16.mxu0 %v742_v0  ;;  %v692_v1 = vld [vmem:[%s1040_s1] sm:$0xff]   ;;  %667 = vmatprep.subr.bf16.mxu1 %v742_v0  ;;  %v693_v2 = vld [vmem:[%s1040_s1 + $0x8] sm:$0xff]   ;;  %v694_v3 = vld [vmem:[%s1040_s1 + $0x10] sm:$0xff]  }
   0x2   :  { %298 = vmatpush1.bf16.msra.mxu0 %v692_v1  ;;  %679 = vmatpush1.bf16.msra.mxu1 %v692_v1  ;;  %v695_v4 = vld [vmem:[%s1040_s1 + $0x18] sm:$0xff]   ;;  %v706_v5 = vld [vmem:[%s1041_s0 + $0x4] ss:$8 sps:$4 sm:$0xff]   ;;  %v698_v9 = vld [vmem:[%s1040_s1 + $0x30] sm:$0xff]  }
   0x3   :  { %299 = vmatprep.subr.bf16.mxu0 %v742_v0  ;;  %668 = vmatprep.subr.bf16.mxu1 %v742_v0  ;;  %v696_v6 = vld [vmem:[%s1040_s1 + $0x20] sm:$0xff]   ;;  %v709_v7 = vld [vmem:[%s1041_s0 + $0x74] ss:$8 sps:$4 sm:$0xff]   ;;  %v697_v8 = vld [vmem:[%s1040_s1 + $0x28] sm:$0xff]  }
   0x4   :  { %604 = vmatprep.mubr.msk.bf16.mxu0 %vm257_vm0, %v706_v5  ;;  %611 = vmatprep.mubr.msk.bf16.mxu1 %vm257_vm0, %v709_v7  ;;  %v699_v10 = vld [vmem:[%s1040_s1 + $0x38] sm:$0xff]   ;;  %v700_v11 = vld [vmem:[%s1040_s1 + $0x40] sm:$0xff]   ;;  %v701_v12 = vld [vmem:[%s1040_s1 + $0x48] sm:$0xff]  }
   0x5   :  { %v702_v13 = vld [vmem:[%s1040_s1 + $0x50] sm:$0xff]   ;;  %v703_v14 = vld [vmem:[%s1040_s1 + $0x58] sm:$0xff]   ;;  %v704_v15 = vld [vmem:[%s1041_s0] ss:$8 sps:$4 sm:$0xff]  }
   0x6   :  { %300 = vmatpush1.bf16.msra.mxu0 %v693_v2  ;;  %680 = vmatpush1.bf16.msra.mxu1 %v693_v2  ;;  %v707_v16 = vld [vmem:[%s1041_s0 + $0x70] ss:$8 sps:$4 sm:$0xff]   ;;  %v710_v17 = vld [vmem:[%s1041_s0 + $0x14] ss:$8 sps:$4 sm:$0xff]   ;;  %v713_v18 = vld [vmem:[%s1041_s0 + $0x84] ss:$8 sps:$4 sm:$0xff]  }
   0x7   :  { %301 = vmatprep.subr.bf16.mxu0 %v742_v0  ;;  %669 = vmatprep.subr.bf16.mxu1 %v742_v0  ;;  %v712_v19 = vld [vmem:[%s1041_s0 + $0x10] ss:$8 sps:$4 sm:$0xff]   ;;  %v717_v20 = vld [vmem:[%s1041_s0 + $0x80] ss:$8 sps:$4 sm:$0xff]   ;;  %v715_v21 = vld [vmem:[%s1041_s0 + $0x24] ss:$8 sps:$4 sm:$0xff]  }
   0x8   :  { %v719_v22 = vld [vmem:[%s1041_s0 + $0x94] ss:$8 sps:$4 sm:$0xff]   ;;  %v718_v23 = vld [vmem:[%s1041_s0 + $0x20] ss:$8 sps:$4 sm:$0xff]   ;;  %v723_v24 = vld [vmem:[%s1041_s0 + $0x90] ss:$8 sps:$4 sm:$0xff]  }
   0x9   :  { %v721_v25 = vld [vmem:[%s1041_s0 + $0x34] ss:$8 sps:$4 sm:$0xff]   ;;  %v725_v26 = vld [vmem:[%s1041_s0 + $0xa4] ss:$8 sps:$4 sm:$0xff]   ;;  %v724_v27 = vld [vmem:[%s1041_s0 + $0x30] ss:$8 sps:$4 sm:$0xff]  }
   0xa   :  { %302 = vmatpush1.bf16.msra.mxu0 %v694_v3  ;;  %681 = vmatpush1.bf16.msra.mxu1 %v694_v3  ;;  %v729_v28 = vld [vmem:[%s1041_s0 + $0xa0] ss:$8 sps:$4 sm:$0xff]   ;;  %v727_v29 = vld [vmem:[%s1041_s0 + $0x44] ss:$8 sps:$4 sm:$0xff]   ;;  %v731_v30 = vld [vmem:[%s1041_s0 + $0xb4] ss:$8 sps:$4 sm:$0xff]  }
   0xb   :  { %303 = vmatprep.subr.bf16.mxu0 %v742_v0  ;;  %670 = vmatprep.subr.bf16.mxu1 %v742_v0  ;;  %v39_v31 = vld [vmem:[%s1041_s0 + $0xc0] sm:$0x33]  ;;  %v735_v33 = vld [vmem:[%s1041_s0 + $0xb0] ss:$8 sps:$4 sm:$0xff]   ;;  %v733_v34 = vld [vmem:[%s1041_s0 + $0x54] ss:$8 sps:$4 sm:$0xff]  }
   0xc   :  { %v730_v32 = vld [vmem:[%s1041_s0 + $0x40] ss:$8 sps:$4 sm:$0xff]   ;;  %v591_v35 = vcombine.high %v39_v31, %v39_v31  ;;  %v736_v36 = vld [vmem:[%s1041_s0 + $0x50] ss:$8 sps:$4 sm:$0xff]   ;;  %v590_v37 = vcombine.low %v39_v31, %v39_v31  ;;  %v738_v38 = vld [vmem:[%s1041_s0 + $0x64] ss:$8 sps:$4 sm:$0xff]  }
   0xd   :  { %v741_v39 = vld [vmem:[%s1041_s0 + $0x60] ss:$8 sps:$4 sm:$0xff]  }
   0xe   :  { %304 = vmatpush1.bf16.msra.mxu0 %v695_v4  ;;  %682 = vmatpush1.bf16.msra.mxu1 %v695_v4  ;;  %v914_v40 = vld [vmem:[%s1042_s2] ss:$0 sm:$0xff] }
   0xf   :  { %305 = vmatprep.subr.bf16.mxu0 %v742_v0  ;;  %671 = vmatprep.subr.bf16.mxu1 %v742_v0 }
  0x12   :  { %306 = vmatpush1.bf16.msra.mxu0 %v696_v6  ;;  %683 = vmatpush1.bf16.msra.mxu1 %v696_v6 }
  0x13   :  { %307 = vmatprep.subr.bf16.mxu0 %v742_v0  ;;  %672 = vmatprep.subr.bf16.mxu1 %v742_v0 }
  0x16   :  { %308 = vmatpush1.bf16.msra.mxu0 %v697_v8  ;;  %684 = vmatpush1.bf16.msra.mxu1 %v697_v8 }
  0x17   :  { %309 = vmatprep.subr.bf16.mxu0 %v742_v0  ;;  %673 = vmatprep.subr.bf16.mxu1 %v742_v0 }
  0x1a   :  { %310 = vmatpush1.bf16.msra.mxu0 %v698_v9  ;;  %685 = vmatpush1.bf16.msra.mxu1 %v698_v9 }
  0x1b   :  { %311 = vmatprep.subr.bf16.mxu0 %v742_v0  ;;  %674 = vmatprep.subr.bf16.mxu1 %v742_v0 }
  0x1e   :  { %312 = vmatpush1.bf16.msra.mxu0 %v699_v10  ;;  %686 = vmatpush1.bf16.msra.mxu1 %v699_v10 }
  0x1f   :  { %313 = vmatprep.subr.bf16.mxu0 %v742_v0  ;;  %675 = vmatprep.subr.bf16.mxu1 %v742_v0 }
  0x22   :  { %314 = vmatpush1.bf16.msra.mxu0 %v700_v11  ;;  %687 = vmatpush1.bf16.msra.mxu1 %v700_v11 }
  0x23   :  { %315 = vmatprep.subr.bf16.mxu0 %v742_v0  ;;  %676 = vmatprep.subr.bf16.mxu1 %v742_v0 }
  0x26   :  { %316 = vmatpush1.bf16.msra.mxu0 %v701_v12  ;;  %688 = vmatpush1.bf16.msra.mxu1 %v701_v12 }
  0x27   :  { %317 = vmatprep.subr.bf16.mxu0 %v742_v0  ;;  %677 = vmatprep.subr.bf16.mxu1 %v742_v0 }
  0x2a   :  { %318 = vmatpush1.bf16.msra.mxu0 %v702_v13  ;;  %689 = vmatpush1.bf16.msra.mxu1 %v702_v13 }
  0x2b   :  { %319 = vmatprep.subr.bf16.mxu0 %v742_v0  ;;  %678 = vmatprep.subr.bf16.mxu1 %v742_v0 }
  0x2e   :  { %320 = vmatpush1.bf16.msra.mxu0 %v703_v14  ;;  %690 = vmatpush1.bf16.msra.mxu1 %v703_v14 }
  0x31   :  { %330 = vmatmul.mubr.bf16.vlgmr.msra.gmra.mrb[0].mxu0 %v704_v15  ;;  %386 = vmatmul.mubr.bf16.vlgmr.msra.gmra.mrb[0].mxu1 %v707_v16 }
  0x32   :  { %605 = vmatprep.mubr.msk.bf16.mxu0 %vm257_vm0, %v710_v17  ;;  %612 = vmatprep.mubr.msk.bf16.mxu1 %vm257_vm0, %v713_v18 }
  0x39   :  { %338 = vmatmul.mubr.bf16.gmra.mrb[4].mxu0 %v712_v19  ;;  %394 = vmatmul.mubr.bf16.gmra.mrb[4].mxu1 %v717_v20 }
  0x3a   :  { %606 = vmatprep.mubr.msk.bf16.mxu0 %vm257_vm0, %v715_v21  ;;  %613 = vmatprep.mubr.msk.bf16.mxu1 %vm257_vm0, %v719_v22 }
  0x41   :  { %346 = vmatmul.mubr.bf16.gmra.mrb[8].mxu0 %v718_v23  ;;  %402 = vmatmul.mubr.bf16.gmra.mrb[8].mxu1 %v723_v24 }
  0x42   :  { %607 = vmatprep.mubr.msk.bf16.mxu0 %vm257_vm0, %v721_v25  ;;  %614 = vmatprep.mubr.msk.bf16.mxu1 %vm257_vm0, %v725_v26 }
  0x49   :  { %354 = vmatmul.mubr.bf16.gmra.mrb[12].mxu0 %v724_v27  ;;  %410 = vmatmul.mubr.bf16.gmra.mrb[12].mxu1 %v729_v28 }
  0x4a   :  { %608 = vmatprep.mubr.msk.bf16.mxu0 %vm257_vm0, %v727_v29  ;;  %615 = vmatprep.mubr.msk.bf16.mxu1 %vm257_vm0, %v731_v30 }
  0x51   :  { %362 = vmatmul.mubr.bf16.gmra.mrb[16].mxu0 %v730_v32  ;;  %418 = vmatmul.mubr.bf16.gmra.mrb[16].mxu1 %v735_v33 }
  0x52   :  { %609 = vmatprep.mubr.msk.bf16.mxu0 %vm257_vm0, %v733_v34  ;;  %616 = vmatprep.mubr.msk.bf16.mxu1 %vm257_vm0, %v591_v35 }
  0x59   :  { %370 = vmatmul.mubr.bf16.gmra.mrb[20].mxu0 %v736_v36  ;;  %426 = vmatmul.mubr.bf16.gmra.mrb[20].mxu1 %v590_v37 }
  0x5a   :  { %610 = vmatprep.mubr.msk.bf16.mxu0 %vm257_vm0, %v738_v38 }
  0x61   :  { %378 = vmatmul.mubr.bf16.gmra.mrb[24].mxu0 %v741_v39 }
 0x104   :  { %v331_v41 = vpop.f32.mrb[0].mxu0  ;;  %v387_v42 = vpop.f32.mrb[0].mxu1 }
 0x105   :  { %v332_v43 = vadd.f32 %v914_v40, %v331_v41  ;;  %v333_v44 = vpop.f32.mrb[1].mxu0  ;;  %v388_v45 = vadd.f32 %v914_v40, %v387_v42  ;;  %v389_v46 = vpop.f32.mrb[1].mxu1 }
 0x106   :  { %v334_v47 = vpop.f32.mrb[2].mxu0  ;;  %v390_v48 = vpop.f32.mrb[2].mxu1 }
 0x107   :  { %v642_v49 = vpack.c.bf16 %v332_v43, %v332_v43  ;;  %v335_v50 = vadd.f32 %v914_v40, %v334_v47  ;;  %v336_v51 = vpop.f32.mrb[3].mxu0  ;;  %v656_v52 = vpack.c.bf16 %v388_v45, %v388_v45  ;;  %v391_v53 = vadd.f32 %v914_v40, %v390_v48  ;;  %v392_v54 = vpop.f32.mrb[3].mxu1 }
 0x109   :  { %535 = vst.msk [vmem:[%s1043_s3] sm:$0xf] %vm534_vm1, %v642_v49  ;;  %v643_v55 = vpack.c.bf16 %v335_v50, %v335_v50  ;;  %549 = vst.msk [vmem:[%s1043_s3 + $0x38] sm:$0xf] %vm534_vm1, %v656_v52  ;;  %v657_v56 = vpack.c.bf16 %v391_v53, %v391_v53 }
 0x10b   :  { %536 = vst.msk [vmem:[%s1043_s3 + $0x4] sm:$0xf] %vm534_vm1, %v643_v55  ;;  %550 = vst.msk [vmem:[%s1043_s3 + $0x3c] sm:$0xf] %vm534_vm1, %v657_v56 }
 0x10c   :  { %v339_v57 = vpop.f32.mrb[4].mxu0  ;;  %v395_v58 = vpop.f32.mrb[4].mxu1 }
 0x10d   :  { %v340_v59 = vadd.f32 %v914_v40, %v339_v57  ;;  %v341_v60 = vpop.f32.mrb[5].mxu0  ;;  %v396_v61 = vadd.f32 %v914_v40, %v395_v58  ;;  %v397_v62 = vpop.f32.mrb[5].mxu1 }
 0x10e   :  { %v342_v63 = vpop.f32.mrb[6].mxu0  ;;  %v398_v0 = vpop.f32.mrb[6].mxu1 }
 0x10f   :  { %v644_v1 = vpack.c.bf16 %v340_v59, %v340_v59  ;;  %v343_v2 = vadd.f32 %v914_v40, %v342_v63  ;;  %v344_v3 = vpop.f32.mrb[7].mxu0  ;;  %v658_v4 = vpack.c.bf16 %v396_v61, %v396_v61  ;;  %v399_v5 = vadd.f32 %v914_v40, %v398_v0  ;;  %v400_v6 = vpop.f32.mrb[7].mxu1 }
 0x111   :  { %537 = vst.msk [vmem:[%s1043_s3 + $0x8] sm:$0xf] %vm534_vm1, %v644_v1  ;;  %v645_v7 = vpack.c.bf16 %v343_v2, %v343_v2  ;;  %551 = vst.msk [vmem:[%s1043_s3 + $0x40] sm:$0xf] %vm534_vm1, %v658_v4  ;;  %v659_v8 = vpack.c.bf16 %v399_v5, %v399_v5 }
 0x113   :  { %538 = vst.msk [vmem:[%s1043_s3 + $0xc] sm:$0xf] %vm534_vm1, %v645_v7  ;;  %552 = vst.msk [vmem:[%s1043_s3 + $0x44] sm:$0xf] %vm534_vm1, %v659_v8 }
 0x114   :  { %v347_v9 = vpop.f32.mrb[8].mxu0  ;;  %v403_v10 = vpop.f32.mrb[8].mxu1 }
 0x115   :  { %v348_v11 = vadd.f32 %v914_v40, %v347_v9  ;;  %v349_v12 = vpop.f32.mrb[9].mxu0  ;;  %v404_v13 = vadd.f32 %v914_v40, %v403_v10  ;;  %v405_v14 = vpop.f32.mrb[9].mxu1 }
 0x116   :  { %v350_v15 = vpop.f32.mrb[10].mxu0  ;;  %v406_v16 = vpop.f32.mrb[10].mxu1 }
 0x117   :  { %v646_v17 = vpack.c.bf16 %v348_v11, %v348_v11  ;;  %v351_v18 = vadd.f32 %v914_v40, %v350_v15  ;;  %v352_v19 = vpop.f32.mrb[11].mxu0  ;;  %v660_v20 = vpack.c.bf16 %v404_v13, %v404_v13  ;;  %v407_v21 = vadd.f32 %v914_v40, %v406_v16  ;;  %v408_v22 = vpop.f32.mrb[11].mxu1 }
 0x119   :  { %539 = vst.msk [vmem:[%s1043_s3 + $0x10] sm:$0xf] %vm534_vm1, %v646_v17  ;;  %v647_v23 = vpack.c.bf16 %v351_v18, %v351_v18  ;;  %553 = vst.msk [vmem:[%s1043_s3 + $0x48] sm:$0xf] %vm534_vm1, %v660_v20  ;;  %v661_v24 = vpack.c.bf16 %v407_v21, %v407_v21 }
 0x11b   :  { %540 = vst.msk [vmem:[%s1043_s3 + $0x14] sm:$0xf] %vm534_vm1, %v647_v23  ;;  %554 = vst.msk [vmem:[%s1043_s3 + $0x4c] sm:$0xf] %vm534_vm1, %v661_v24 }
 0x11c   :  { %v355_v25 = vpop.f32.mrb[12].mxu0  ;;  %v411_v26 = vpop.f32.mrb[12].mxu1 }
 0x11d   :  { %v356_v27 = vadd.f32 %v914_v40, %v355_v25  ;;  %v357_v28 = vpop.f32.mrb[13].mxu0  ;;  %v412_v29 = vadd.f32 %v914_v40, %v411_v26  ;;  %v413_v30 = vpop.f32.mrb[13].mxu1 }
 0x11e   :  { %v358_v31 = vpop.f32.mrb[14].mxu0  ;;  %v414_v32 = vpop.f32.mrb[14].mxu1 }
 0x11f   :  { %v648_v33 = vpack.c.bf16 %v356_v27, %v356_v27  ;;  %v359_v34 = vadd.f32 %v914_v40, %v358_v31  ;;  %v360_v35 = vpop.f32.mrb[15].mxu0  ;;  %v662_v36 = vpack.c.bf16 %v412_v29, %v412_v29  ;;  %v415_v37 = vadd.f32 %v914_v40, %v414_v32  ;;  %v416_v38 = vpop.f32.mrb[15].mxu1 }
 0x121   :  { %541 = vst.msk [vmem:[%s1043_s3 + $0x18] sm:$0xf] %vm534_vm1, %v648_v33  ;;  %v649_v39 = vpack.c.bf16 %v359_v34, %v359_v34  ;;  %555 = vst.msk [vmem:[%s1043_s3 + $0x50] sm:$0xf] %vm534_vm1, %v662_v36  ;;  %v663_v41 = vpack.c.bf16 %v415_v37, %v415_v37 }
 0x123   :  { %542 = vst.msk [vmem:[%s1043_s3 + $0x1c] sm:$0xf] %vm534_vm1, %v649_v39  ;;  %556 = vst.msk [vmem:[%s1043_s3 + $0x54] sm:$0xf] %vm534_vm1, %v663_v41 }
 0x124   :  { %v363_v42 = vpop.f32.mrb[16].mxu0  ;;  %v419_v43 = vpop.f32.mrb[16].mxu1 }
 0x125   :  { %v364_v44 = vadd.f32 %v914_v40, %v363_v42  ;;  %v365_v45 = vpop.f32.mrb[17].mxu0  ;;  %v420_v46 = vadd.f32 %v914_v40, %v419_v43  ;;  %v421_v47 = vpop.f32.mrb[17].mxu1 }
 0x126   :  { %v366_v48 = vpop.f32.mrb[18].mxu0  ;;  %v422_v49 = vpop.f32.mrb[18].mxu1 }
 0x127   :  { %v650_v50 = vpack.c.bf16 %v364_v44, %v364_v44  ;;  %v367_v51 = vadd.f32 %v914_v40, %v366_v48  ;;  %v368_v52 = vpop.f32.mrb[19].mxu0  ;;  %v664_v53 = vpack.c.bf16 %v420_v46, %v420_v46  ;;  %v423_v54 = vadd.f32 %v914_v40, %v422_v49  ;;  %v424_v55 = vpop.f32.mrb[19].mxu1 }
 0x129   :  { %543 = vst.msk [vmem:[%s1043_s3 + $0x20] sm:$0xf] %vm534_vm1, %v650_v50  ;;  %v651_v56 = vpack.c.bf16 %v367_v51, %v367_v51  ;;  %557 = vst.msk [vmem:[%s1043_s3 + $0x58] sm:$0xf] %vm534_vm1, %v664_v53  ;;  %v665_v57 = vpack.c.bf16 %v423_v54, %v423_v54 }
 0x12b   :  { %544 = vst.msk [vmem:[%s1043_s3 + $0x24] sm:$0xf] %vm534_vm1, %v651_v56  ;;  %558 = vst.msk [vmem:[%s1043_s3 + $0x5c] sm:$0xf] %vm534_vm1, %v665_v57 }
 0x12c   :  { %v371_v58 = vpop.f32.mrb[20].mxu0  ;;  %v427_v59 = vpop.f32.mrb[20].mxu1 }
 0x12d   :  { %v372_v60 = vadd.f32 %v914_v40, %v371_v58  ;;  %v373_v61 = vpop.f32.mrb[21].mxu0  ;;  %v428_v62 = vadd.f32 %v914_v40, %v427_v59  ;;  %v429_v63 = vpop.f32.mrb[21].mxu1 }
 0x12e   :  { %v374_v0 = vpop.f32.mrb[22].mxu0  ;;  %v430_v1 = vpop.f32.mrb[22].mxu1 }
 0x12f   :  { %v652_v2 = vpack.c.bf16 %v372_v60, %v372_v60  ;;  %v375_v3 = vadd.f32 %v914_v40, %v374_v0  ;;  %v376_v4 = vpop.f32.mrb[23].mxu0  ;;  %v666_v5 = vpack.c.bf16 %v428_v62, %v428_v62  ;;  %v431_v6 = vpop.f32.mrb[23].mxu1 }
 0x131   :  { %545 = vst.msk [vmem:[%s1043_s3 + $0x28] sm:$0xf] %vm534_vm1, %v652_v2  ;;  %v653_v7 = vpack.c.bf16 %v375_v3, %v375_v3 }
 0x132   :  { %560 = vst.msk [vmem:[%s1043_s3 + $0x60] sm:$0x3] %vm559_vm2, %v666_v5 }
 0x133   :  { %546 = vst.msk [vmem:[%s1043_s3 + $0x2c] sm:$0xf] %vm534_vm1, %v653_v7 }
 0x134   :  { %v379_v8 = vpop.f32.mrb[24].mxu0 }
 0x135   :  { %v380_v9 = vadd.f32 %v914_v40, %v379_v8  ;;  %v381_v10 = vpop.f32.mrb[25].mxu0 }
 0x136   :  { %v382_v11 = vpop.f32.mrb[26].mxu0 }
 0x137   :  { %v654_v12 = vpack.c.bf16 %v380_v9, %v380_v9  ;;  %v383_v13 = vadd.f32 %v914_v40, %v382_v11  ;;  %v384_v14 = vpop.f32.mrb[27].mxu0 }
 0x139   :  { %547 = vst.msk [vmem:[%s1043_s3 + $0x30] sm:$0xf] %vm534_vm1, %v654_v12  ;;  %v655_v15 = vpack.c.bf16 %v383_v13, %v383_v13 }
 0x13b   :  { %548 = vst.msk [vmem:[%s1043_s3 + $0x34] sm:$0xf] %vm534_vm1, %v655_v15 }

// kernel: forward.7
= control target key start
LH: loop header
LB: loop body
LE: loop exit
PB: predicated region body
PF: predicated region fallthrough
CT: control target
= control target key end

     0   :  { %vm536_vm0 = vcmask 519168   ;;  %s959_s1 = inlined_call_operand.vmem [shape: bf16[512,64], index: 1, kind: input, shape index: {}]   ;;  %s960_s0 = inlined_call_operand.vmem [shape: bf16[64,512], index: 0, kind: input, shape index: {}]   ;;  %s961_s2 = inlined_call_operand.vmem [shape: f32[1,64], index: 2, kind: input, shape index: {}]   ;;  %s962_s3 = inlined_call_operand.vmem [shape: bf16[64,64], index: 3, kind: output, shape index: {}]  }
   0x1   :  { %v694_v0 = vld [vmem:[%s959_s1 + $0x40] sm:$0xff]   ;;  %v698_v4 = vld [vmem:[%s959_s1 + $0x48] sm:$0xff]   ;;  %v702_v8 = vld [vmem:[%s959_s1 + $0x50] sm:$0xff]  }
   0x2   :  { %v695_v1 = vld [vmem:[%s959_s1 + $0xc0] sm:$0xff]   ;;  %614 = vmatprep.subr.bf16.mxu0 %v694_v0  ;;  %v699_v5 = vld [vmem:[%s959_s1 + $0xc8] sm:$0xff]   ;;  %v703_v9 = vld [vmem:[%s959_s1 + $0xd0] sm:$0xff]  }
   0x3   :  { %v696_v2 = vld [vmem:[%s959_s1] sm:$0xff]   ;;  %654 = vmatprep.subr.bf16.mxu1 %v695_v1  ;;  %v700_v6 = vld [vmem:[%s959_s1 + $0x8] sm:$0xff]   ;;  %v704_v10 = vld [vmem:[%s959_s1 + $0x10] sm:$0xff]  }
   0x4   :  { %v697_v3 = vld [vmem:[%s959_s1 + $0x80] sm:$0xff]   ;;  %615 = vmatpush3.bf16.msra.mxu0 %v696_v2  ;;  %v701_v7 = vld [vmem:[%s959_s1 + $0x88] sm:$0xff]   ;;  %v705_v11 = vld [vmem:[%s959_s1 + $0x90] sm:$0xff]  }
   0x5   :  { %655 = vmatpush3.bf16.msra.mxu1 %v697_v3  ;;  %616 = vmatprep.subr.bf16.mxu0 %v698_v4  ;;  %v706_v12 = vld [vmem:[%s959_s1 + $0x58] sm:$0xff]   ;;  %v710_v16 = vld [vmem:[%s959_s1 + $0x60] sm:$0xff]   ;;  %v714_v20 = vld [vmem:[%s959_s1 + $0x68] sm:$0xff]  }
   0x6   :  { %656 = vmatprep.subr.bf16.mxu1 %v699_v5  ;;  %v707_v13 = vld [vmem:[%s959_s1 + $0xd8] sm:$0xff]   ;;  %v711_v17 = vld [vmem:[%s959_s1 + $0xe0] sm:$0xff]   ;;  %v715_v21 = vld [vmem:[%s959_s1 + $0xe8] sm:$0xff]  }
   0x7   :  { %v708_v14 = vld [vmem:[%s959_s1 + $0x18] sm:$0xff]   ;;  %v712_v18 = vld [vmem:[%s959_s1 + $0x20] sm:$0xff]   ;;  %v716_v22 = vld [vmem:[%s959_s1 + $0x28] sm:$0xff]  }
   0x8   :  { %617 = vmatpush3.bf16.msra.mxu0 %v700_v6  ;;  %v709_v15 = vld [vmem:[%s959_s1 + $0x98] sm:$0xff]   ;;  %v713_v19 = vld [vmem:[%s959_s1 + $0xa0] sm:$0xff]   ;;  %v717_v23 = vld [vmem:[%s959_s1 + $0xa8] sm:$0xff]  }
   0x9   :  { %657 = vmatpush3.bf16.msra.mxu1 %v701_v7  ;;  %618 = vmatprep.subr.bf16.mxu0 %v702_v8  ;;  %v718_v24 = vld [vmem:[%s959_s1 + $0x70] sm:$0xff]   ;;  %v722_v28 = vld [vmem:[%s959_s1 + $0x78] sm:$0xff]   ;;  %v917_v50 = vld [vmem:[%s961_s2] ss:$0 sm:$0xff] }
   0xa   :  { %658 = vmatprep.subr.bf16.mxu1 %v703_v9  ;;  %v719_v25 = vld [vmem:[%s959_s1 + $0xf0] sm:$0xff]   ;;  %v723_v29 = vld [vmem:[%s959_s1 + $0xf8] sm:$0xff]  }
   0xb   :  { %v720_v26 = vld [vmem:[%s959_s1 + $0x30] sm:$0xff]   ;;  %v724_v30 = vld [vmem:[%s959_s1 + $0x38] sm:$0xff]  }
   0xc   :  { %619 = vmatpush3.bf16.msra.mxu0 %v704_v10  ;;  %v721_v27 = vld [vmem:[%s959_s1 + $0xb0] sm:$0xff]   ;;  %v725_v31 = vld [vmem:[%s959_s1 + $0xb8] sm:$0xff]  }
   0xd   :  { %659 = vmatpush3.bf16.msra.mxu1 %v705_v11  ;;  %620 = vmatprep.subr.bf16.mxu0 %v706_v12  ;;  %v726_v32 = vld [vmem:[%s960_s0] ss:$16 sps:$4 sm:$0xff]   ;;  %v728_v33 = vld [vmem:[%s960_s0 + $0x4] ss:$16 sps:$4 sm:$0xff]   ;;  %v729_v34 = vld [vmem:[%s960_s0 + $0x8] ss:$16 sps:$4 sm:$0xff]  }
   0xe   :  { %660 = vmatprep.subr.bf16.mxu1 %v707_v13  ;;  %v731_v35 = vld [vmem:[%s960_s0 + $0xc] ss:$16 sps:$4 sm:$0xff]   ;;  %406 = vmatprep.mubr.bf16.mxu0 %v728_v33  ;;  %v732_v36 = vld [vmem:[%s960_s0 + $0x24] ss:$16 sps:$4 sm:$0xff]   ;;  %v736_v38 = vld [vmem:[%s960_s0 + $0x20] ss:$16 sps:$4 sm:$0xff]  }
   0xf   :  { %471 = vmatprep.mubr.bf16.mxu1 %v731_v35  ;;  %v734_v37 = vld [vmem:[%s960_s0 + $0x2c] ss:$16 sps:$4 sm:$0xff]   ;;  %v737_v39 = vld [vmem:[%s960_s0 + $0x28] ss:$16 sps:$4 sm:$0xff]   ;;  %v738_v40 = vld [vmem:[%s960_s0 + $0x44] ss:$16 sps:$4 sm:$0xff]  }
  0x10   :  { %621 = vmatpush3.bf16.msra.mxu0 %v708_v14  ;;  %v740_v41 = vld [vmem:[%s960_s0 + $0x4c] ss:$16 sps:$4 sm:$0xff]   ;;  %v742_v42 = vld [vmem:[%s960_s0 + $0x40] ss:$16 sps:$4 sm:$0xff]   ;;  %v743_v43 = vld [vmem:[%s960_s0 + $0x48] ss:$16 sps:$4 sm:$0xff]  }
  0x11   :  { %661 = vmatpush3.bf16.msra.mxu1 %v709_v15  ;;  %622 = vmatprep.subr.bf16.mxu0 %v710_v16  ;;  %v744_v44 = vld [vmem:[%s960_s0 + $0x64] ss:$16 sps:$4 sm:$0xff]   ;;  %v746_v45 = vld [vmem:[%s960_s0 + $0x6c] ss:$16 sps:$4 sm:$0xff]   ;;  %v748_v46 = vld [vmem:[%s960_s0 + $0x60] ss:$16 sps:$4 sm:$0xff]  }
  0x12   :  { %662 = vmatprep.subr.bf16.mxu1 %v711_v17  ;;  %v749_v47 = vld [vmem:[%s960_s0 + $0x68] ss:$16 sps:$4 sm:$0xff]  }
  0x14   :  { %623 = vmatpush3.bf16.msra.mxu0 %v712_v18 }
  0x15   :  { %663 = vmatpush3.bf16.msra.mxu1 %v713_v19  ;;  %624 = vmatprep.subr.bf16.mxu0 %v714_v20 }
  0x16   :  { %664 = vmatprep.subr.bf16.mxu1 %v715_v21 }
  0x18   :  { %625 = vmatpush3.bf16.msra.mxu0 %v716_v22 }
  0x19   :  { %665 = vmatpush3.bf16.msra.mxu1 %v717_v23  ;;  %626 = vmatprep.subr.bf16.mxu0 %v718_v24 }
  0x1a   :  { %666 = vmatprep.subr.bf16.mxu1 %v719_v25 }
  0x1c   :  { %627 = vmatpush3.bf16.msra.mxu0 %v720_v26 }
  0x1d   :  { %667 = vmatpush3.bf16.msra.mxu1 %v721_v27  ;;  %628 = vmatprep.subr.bf16.mxu0 %v722_v28 }
  0x1e   :  { %668 = vmatprep.subr.bf16.mxu1 %v723_v29 }
  0x20   :  { %629 = vmatpush3.bf16.msra.mxu0 %v724_v30 }
  0x21   :  { %669 = vmatpush3.bf16.msra.mxu1 %v725_v31 }
  0x23   :  { %407 = vmatmul.mubr.bf16.vlgmr.msra.gmra.mrb[0].mxu0 %v726_v32 }
  0x24   :  { %472 = vmatmul.mubr.bf16.vlgmr.msra.gmra.mrb[0].mxu1 %v729_v34  ;;  %414 = vmatprep.mubr.bf16.mxu0 %v732_v36 }
  0x25   :  { %479 = vmatprep.mubr.bf16.mxu1 %v734_v37 }
  0x2b   :  { %415 = vmatmul.mubr.bf16.gmra.mrb[4].mxu0 %v736_v38 }
  0x2c   :  { %480 = vmatmul.mubr.bf16.gmra.mrb[4].mxu1 %v737_v39  ;;  %422 = vmatprep.mubr.bf16.mxu0 %v738_v40 }
  0x2d   :  { %487 = vmatprep.mubr.bf16.mxu1 %v740_v41 }
  0x33   :  { %423 = vmatmul.mubr.bf16.gmra.mrb[8].mxu0 %v742_v42 }
  0x34   :  { %488 = vmatmul.mubr.bf16.gmra.mrb[8].mxu1 %v743_v43  ;;  %430 = vmatprep.mubr.bf16.mxu0 %v744_v44 }
  0x35   :  { %495 = vmatprep.mubr.bf16.mxu1 %v746_v45 }
  0x3b   :  { %431 = vmatmul.mubr.bf16.gmra.mrb[12].mxu0 %v748_v46 }
  0x3c   :  { %496 = vmatmul.mubr.bf16.gmra.mrb[12].mxu1 %v749_v47 }
  0xf6   :  { %v630_v48 = vpop.f32.mrb[0].mxu0 }
  0xf7   :  { %v670_v49 = vpop.f32.mrb[0].mxu1  ;;  %v631_v51 = vpop.f32.mrb[1].mxu0 }
  0xf8   :  { %v632_v52 = vadd.f32 %v631_v51, %v630_v48  ;;  %v671_v53 = vpop.f32.mrb[1].mxu1  ;;  %v633_v54 = vpop.f32.mrb[2].mxu0 }
  0xf9   :  { %v672_v55 = vadd.f32 %v671_v53, %v670_v49  ;;  %v673_v56 = vpop.f32.mrb[2].mxu1  ;;  %v634_v57 = vpop.f32.mrb[3].mxu0 }
  0xfa   :  { %v409_v58 = vadd.f32 %v632_v52, %v917_v50  ;;  %v635_v59 = vadd.f32 %v634_v57, %v633_v54  ;;  %v674_v60 = vpop.f32.mrb[3].mxu1 }
  0xfb   :  { %v675_v61 = vadd.f32 %v674_v60, %v673_v56 }
  0xfc   :  { %v474_v62 = vadd.f32 %v672_v55, %v409_v58  ;;  %v412_v63 = vadd.f32 %v635_v59, %v917_v50 }
  0xfe   :  { %v606_v0 = vpack.c.bf16 %v474_v62, %v474_v62  ;;  %v477_v1 = vadd.f32 %v675_v61, %v412_v63  ;;  %v636_v2 = vpop.f32.mrb[4].mxu0 }
  0xff   :  { %v676_v3 = vpop.f32.mrb[4].mxu1  ;;  %v637_v4 = vpop.f32.mrb[5].mxu0 }
 0x100   :  { %537 = vst.msk [vmem:[%s962_s3] sm:$0xf] %vm536_vm0, %v606_v0  ;;  %v607_v5 = vpack.c.bf16 %v477_v1, %v477_v1  ;;  %v638_v6 = vadd.f32 %v637_v4, %v636_v2  ;;  %v677_v7 = vpop.f32.mrb[5].mxu1  ;;  %v639_v8 = vpop.f32.mrb[6].mxu0 }
 0x101   :  { %v678_v9 = vadd.f32 %v677_v7, %v676_v3  ;;  %v679_v10 = vpop.f32.mrb[6].mxu1  ;;  %v640_v11 = vpop.f32.mrb[7].mxu0 }
 0x102   :  { %538 = vst.msk [vmem:[%s962_s3 + $0x4] sm:$0xf] %vm536_vm0, %v607_v5  ;;  %v417_v12 = vadd.f32 %v638_v6, %v917_v50  ;;  %v641_v13 = vadd.f32 %v640_v11, %v639_v8  ;;  %v680_v14 = vpop.f32.mrb[7].mxu1 }
 0x103   :  { %v681_v15 = vadd.f32 %v680_v14, %v679_v10 }
 0x104   :  { %v482_v16 = vadd.f32 %v678_v9, %v417_v12  ;;  %v420_v17 = vadd.f32 %v641_v13, %v917_v50 }
 0x106   :  { %v608_v18 = vpack.c.bf16 %v482_v16, %v482_v16  ;;  %v485_v19 = vadd.f32 %v681_v15, %v420_v17  ;;  %v642_v20 = vpop.f32.mrb[8].mxu0 }
 0x107   :  { %v682_v21 = vpop.f32.mrb[8].mxu1  ;;  %v643_v22 = vpop.f32.mrb[9].mxu0 }
 0x108   :  { %539 = vst.msk [vmem:[%s962_s3 + $0x8] sm:$0xf] %vm536_vm0, %v608_v18  ;;  %v609_v23 = vpack.c.bf16 %v485_v19, %v485_v19  ;;  %v644_v24 = vadd.f32 %v643_v22, %v642_v20  ;;  %v683_v25 = vpop.f32.mrb[9].mxu1  ;;  %v645_v26 = vpop.f32.mrb[10].mxu0 }
 0x109   :  { %v684_v27 = vadd.f32 %v683_v25, %v682_v21  ;;  %v685_v28 = vpop.f32.mrb[10].mxu1  ;;  %v646_v29 = vpop.f32.mrb[11].mxu0 }
 0x10a   :  { %540 = vst.msk [vmem:[%s962_s3 + $0xc] sm:$0xf] %vm536_vm0, %v609_v23  ;;  %v425_v30 = vadd.f32 %v644_v24, %v917_v50  ;;  %v647_v31 = vadd.f32 %v646_v29, %v645_v26  ;;  %v686_v32 = vpop.f32.mrb[11].mxu1 }
 0x10b   :  { %v687_v33 = vadd.f32 %v686_v32, %v685_v28 }
 0x10c   :  { %v490_v34 = vadd.f32 %v684_v27, %v425_v30  ;;  %v428_v35 = vadd.f32 %v647_v31, %v917_v50 }
 0x10e   :  { %v610_v36 = vpack.c.bf16 %v490_v34, %v490_v34  ;;  %v493_v37 = vadd.f32 %v687_v33, %v428_v35  ;;  %v648_v38 = vpop.f32.mrb[12].mxu0 }
 0x10f   :  { %v688_v39 = vpop.f32.mrb[12].mxu1  ;;  %v649_v40 = vpop.f32.mrb[13].mxu0 }
 0x110   :  { %541 = vst.msk [vmem:[%s962_s3 + $0x10] sm:$0xf] %vm536_vm0, %v610_v36  ;;  %v611_v41 = vpack.c.bf16 %v493_v37, %v493_v37  ;;  %v650_v42 = vadd.f32 %v649_v40, %v648_v38  ;;  %v689_v43 = vpop.f32.mrb[13].mxu1  ;;  %v651_v44 = vpop.f32.mrb[14].mxu0 }
 0x111   :  { %v690_v45 = vadd.f32 %v689_v43, %v688_v39  ;;  %v691_v46 = vpop.f32.mrb[14].mxu1  ;;  %v652_v47 = vpop.f32.mrb[15].mxu0 }
 0x112   :  { %542 = vst.msk [vmem:[%s962_s3 + $0x14] sm:$0xf] %vm536_vm0, %v611_v41  ;;  %v433_v48 = vadd.f32 %v650_v42, %v917_v50  ;;  %v653_v49 = vadd.f32 %v652_v47, %v651_v44  ;;  %v692_v51 = vpop.f32.mrb[15].mxu1 }
 0x113   :  { %v693_v52 = vadd.f32 %v692_v51, %v691_v46 }
 0x114   :  { %v498_v53 = vadd.f32 %v690_v45, %v433_v48  ;;  %v436_v54 = vadd.f32 %v653_v49, %v917_v50 }
 0x116   :  { %v612_v55 = vpack.c.bf16 %v498_v53, %v498_v53  ;;  %v501_v56 = vadd.f32 %v693_v52, %v436_v54 }
 0x118   :  { %543 = vst.msk [vmem:[%s962_s3 + $0x18] sm:$0xf] %vm536_vm0, %v612_v55  ;;  %v613_v57 = vpack.c.bf16 %v501_v56, %v501_v56 }
 0x11a   :  { %544 = vst.msk [vmem:[%s962_s3 + $0x1c] sm:$0xf] %vm536_vm0, %v613_v57 }

// kernel: forward.8
= control target key start
LH: loop header
LB: loop body
LE: loop exit
PB: predicated region body
PF: predicated region fallthrough
CT: control target
= control target key end

     0   :  { %vm1025_vm0 = vcmask 523264   ;;  %s2749_s1 = inlined_call_operand.vmem [shape: bf16[576,512], index: 1, kind: input, shape index: {}]   ;;  %s2750_s0 = inlined_call_operand.vmem [shape: bf16[64,576], index: 0, kind: input, shape index: {}]   ;;  %s2751_s2 = inlined_call_operand.vmem [shape: f32[1,512], index: 2, kind: input, shape index: {}]   ;;  %s2752_s3 = inlined_call_operand.vmem [shape: bf16[64,512], index: 3, kind: output, shape index: {}]  }
   0x1   :  { %v1893_v0 = vld [vmem:[%s2749_s1 + $0x4] ss:$16 sps:$4 sm:$0xff]   ;;  %v1895_v1 = vld [vmem:[%s2749_s1 + $0xc] ss:$16 sps:$4 sm:$0xff]   ;;  %v1897_v2 = vld [vmem:[%s2749_s1] ss:$16 sps:$4 sm:$0xff]  }
   0x2   :  { %1038 = vmatprep.subr.bf16.mxu0 %v1893_v0  ;;  %v1898_v3 = vld [vmem:[%s2749_s1 + $0x8] ss:$16 sps:$4 sm:$0xff]   ;;  %1257 = vmatprep.subr.bf16.mxu1 %v1895_v1  ;;  %v1899_v4 = vld [vmem:[%s2749_s1 + $0x24] ss:$16 sps:$4 sm:$0xff]   ;;  %v1901_v5 = vld [vmem:[%s2749_s1 + $0x2c] ss:$16 sps:$4 sm:$0xff]  }
   0x3   :  { %1039 = vmatpush1.bf16.msra.mxu0 %v1897_v2  ;;  %1258 = vmatpush1.bf16.msra.mxu1 %v1898_v3  ;;  %v1903_v6 = vld [vmem:[%s2749_s1 + $0x20] ss:$16 sps:$4 sm:$0xff]   ;;  %v1904_v7 = vld [vmem:[%s2749_s1 + $0x28] ss:$16 sps:$4 sm:$0xff]   ;;  %v1905_v8 = vld [vmem:[%s2749_s1 + $0x44] ss:$16 sps:$4 sm:$0xff]  }
   0x4   :  { %1040 = vmatprep.subr.bf16.mxu0 %v1899_v4  ;;  %1259 = vmatprep.subr.bf16.mxu1 %v1901_v5  ;;  %v1907_v9 = vld [vmem:[%s2749_s1 + $0x4c] ss:$16 sps:$4 sm:$0xff]   ;;  %v1909_v10 = vld [vmem:[%s2749_s1 + $0x40] ss:$16 sps:$4 sm:$0xff]   ;;  %v1910_v11 = vld [vmem:[%s2749_s1 + $0x48] ss:$16 sps:$4 sm:$0xff]  }
   0x5   :  { %v1911_v12 = vld [vmem:[%s2749_s1 + $0x64] ss:$16 sps:$4 sm:$0xff]   ;;  %v1913_v13 = vld [vmem:[%s2749_s1 + $0x6c] ss:$16 sps:$4 sm:$0xff]   ;;  %v1915_v14 = vld [vmem:[%s2749_s1 + $0x60] ss:$16 sps:$4 sm:$0xff]  }
   0x6   :  { %v1916_v15 = vld [vmem:[%s2749_s1 + $0x68] ss:$16 sps:$4 sm:$0xff]   ;;  %v1917_v16 = vld [vmem:[%s2749_s1 + $0x84] ss:$16 sps:$4 sm:$0xff]   ;;  %v1919_v17 = vld [vmem:[%s2749_s1 + $0x8c] ss:$16 sps:$4 sm:$0xff]  }
   0x7   :  { %1041 = vmatpush1.bf16.msra.mxu0 %v1903_v6  ;;  %1260 = vmatpush1.bf16.msra.mxu1 %v1904_v7  ;;  %v1921_v18 = vld [vmem:[%s2749_s1 + $0x80] ss:$16 sps:$4 sm:$0xff]   ;;  %v1922_v19 = vld [vmem:[%s2749_s1 + $0x88] ss:$16 sps:$4 sm:$0xff]   ;;  %v1923_v20 = vld [vmem:[%s2749_s1 + $0xa4] ss:$16 sps:$4 sm:$0xff]  }
   0x8   :  { %1042 = vmatprep.subr.bf16.mxu0 %v1905_v8  ;;  %1261 = vmatprep.subr.bf16.mxu1 %v1907_v9  ;;  %v1925_v21 = vld [vmem:[%s2749_s1 + $0xac] ss:$16 sps:$4 sm:$0xff]   ;;  %v1927_v22 = vld [vmem:[%s2749_s1 + $0xa0] ss:$16 sps:$4 sm:$0xff]   ;;  %v1928_v23 = vld [vmem:[%s2749_s1 + $0xa8] ss:$16 sps:$4 sm:$0xff]  }
   0x9   :  { %v1929_v24 = vld [vmem:[%s2749_s1 + $0xc4] ss:$16 sps:$4 sm:$0xff]   ;;  %v1931_v25 = vld [vmem:[%s2749_s1 + $0xcc] ss:$16 sps:$4 sm:$0xff]   ;;  %v1933_v26 = vld [vmem:[%s2749_s1 + $0xc0] ss:$16 sps:$4 sm:$0xff]  }
   0xa   :  { %v1934_v27 = vld [vmem:[%s2749_s1 + $0xc8] ss:$16 sps:$4 sm:$0xff]   ;;  %v1935_v28 = vld [vmem:[%s2749_s1 + $0xe4] ss:$16 sps:$4 sm:$0xff]   ;;  %v1937_v29 = vld [vmem:[%s2749_s1 + $0xec] ss:$16 sps:$4 sm:$0xff]  }
   0xb   :  { %1043 = vmatpush1.bf16.msra.mxu0 %v1909_v10  ;;  %1262 = vmatpush1.bf16.msra.mxu1 %v1910_v11  ;;  %v1939_v30 = vld [vmem:[%s2749_s1 + $0xe0] ss:$16 sps:$4 sm:$0xff]   ;;  %v1940_v31 = vld [vmem:[%s2749_s1 + $0xe8] ss:$16 sps:$4 sm:$0xff]   ;;  %v1941_v32 = vld [vmem:[%s2749_s1 + $0x104] ss:$16 sps:$4 sm:$0xff]  }
   0xc   :  { %1044 = vmatprep.subr.bf16.mxu0 %v1911_v12  ;;  %1263 = vmatprep.subr.bf16.mxu1 %v1913_v13  ;;  %v1943_v33 = vld [vmem:[%s2749_s1 + $0x10c] ss:$16 sps:$4 sm:$0xff]   ;;  %v1945_v34 = vld [vmem:[%s2749_s1 + $0x100] ss:$16 sps:$4 sm:$0xff]   ;;  %v1946_v35 = vld [vmem:[%s2749_s1 + $0x108] ss:$16 sps:$4 sm:$0xff]  }
   0xd   :  { %v1947_v36 = vld [vmem:[%s2749_s1 + $0x124] ss:$16 sps:$4 sm:$0xff]   ;;  %v1949_v37 = vld [vmem:[%s2749_s1 + $0x12c] ss:$16 sps:$4 sm:$0xff]   ;;  %v1951_v38 = vld [vmem:[%s2749_s1 + $0x120] ss:$16 sps:$4 sm:$0xff]  }
   0xe   :  { %v1952_v39 = vld [vmem:[%s2749_s1 + $0x128] ss:$16 sps:$4 sm:$0xff]   ;;  %v1953_v40 = vld [vmem:[%s2749_s1 + $0x144] ss:$16 sps:$4 sm:$0xff]   ;;  %v1955_v41 = vld [vmem:[%s2749_s1 + $0x14c] ss:$16 sps:$4 sm:$0xff]  }
   0xf   :  { %1045 = vmatpush1.bf16.msra.mxu0 %v1915_v14  ;;  %1264 = vmatpush1.bf16.msra.mxu1 %v1916_v15  ;;  %v1957_v42 = vld [vmem:[%s2749_s1 + $0x140] ss:$16 sps:$4 sm:$0xff]   ;;  %v1958_v43 = vld [vmem:[%s2749_s1 + $0x148] ss:$16 sps:$4 sm:$0xff]   ;;  %v1959_v44 = vld [vmem:[%s2749_s1 + $0x164] ss:$16 sps:$4 sm:$0xff]  }
  0x10   :  { %1046 = vmatprep.subr.bf16.mxu0 %v1917_v16  ;;  %1265 = vmatprep.subr.bf16.mxu1 %v1919_v17  ;;  %v1961_v45 = vld [vmem:[%s2749_s1 + $0x16c] ss:$16 sps:$4 sm:$0xff]   ;;  %v1963_v46 = vld [vmem:[%s2749_s1 + $0x160] ss:$16 sps:$4 sm:$0xff]   ;;  %v1964_v47 = vld [vmem:[%s2749_s1 + $0x168] ss:$16 sps:$4 sm:$0xff]  }
  0x11   :  { %v1991_v48 = vld [vmem:[%s2750_s0 + $0x4] ss:$20 sps:$4 sm:$0xff]   ;;  %v1967_v50 = vld [vmem:[%s2749_s1 + $0x18c] ss:$16 sps:$4 sm:$0xff]   ;;  %v1969_v51 = vld [vmem:[%s2749_s1 + $0x180] ss:$16 sps:$4 sm:$0xff]  }
  0x12   :  { %v1965_v49 = vld [vmem:[%s2749_s1 + $0x184] ss:$16 sps:$4 sm:$0xff]   ;;  %1070 = vmatprep.mubr.bf16.mxu0 %v1991_v48  ;;  %1289 = vmatprep.mubr.bf16.mxu1 %v1991_v48  ;;  %v1970_v52 = vld [vmem:[%s2749_s1 + $0x188] ss:$16 sps:$4 sm:$0xff]   ;;  %v1973_v54 = vld [vmem:[%s2749_s1 + $0x1ac] ss:$16 sps:$4 sm:$0xff]  }
  0x13   :  { %1047 = vmatpush1.bf16.msra.mxu0 %v1921_v18  ;;  %1266 = vmatpush1.bf16.msra.mxu1 %v1922_v19  ;;  %v1971_v53 = vld [vmem:[%s2749_s1 + $0x1a4] ss:$16 sps:$4 sm:$0xff]   ;;  %v1975_v55 = vld [vmem:[%s2749_s1 + $0x1a0] ss:$16 sps:$4 sm:$0xff]   ;;  %v1976_v56 = vld [vmem:[%s2749_s1 + $0x1a8] ss:$16 sps:$4 sm:$0xff]  }
  0x14   :  { %1048 = vmatprep.subr.bf16.mxu0 %v1923_v20  ;;  %1267 = vmatprep.subr.bf16.mxu1 %v1925_v21  ;;  %v1977_v57 = vld [vmem:[%s2749_s1 + $0x1c4] ss:$16 sps:$4 sm:$0xff]   ;;  %v1979_v58 = vld [vmem:[%s2749_s1 + $0x1cc] ss:$16 sps:$4 sm:$0xff]   ;;  %v1981_v59 = vld [vmem:[%s2749_s1 + $0x1c0] ss:$16 sps:$4 sm:$0xff]  }
  0x15   :  { %v1982_v60 = vld [vmem:[%s2749_s1 + $0x1c8] ss:$16 sps:$4 sm:$0xff]   ;;  %v1983_v61 = vld [vmem:[%s2749_s1 + $0x1e4] ss:$16 sps:$4 sm:$0xff]   ;;  %v1985_v62 = vld [vmem:[%s2749_s1 + $0x1ec] ss:$16 sps:$4 sm:$0xff]  }
  0x16   :  { %v1987_v63 = vld [vmem:[%s2749_s1 + $0x1e0] ss:$16 sps:$4 sm:$0xff]   ;;  %v1988_v0 = vld [vmem:[%s2749_s1 + $0x1e8] ss:$16 sps:$4 sm:$0xff]   ;;  %v1994_v1 = vld [vmem:[%s2749_s1 + $0x204] ss:$16 sps:$4 sm:$0xff]  }
  0x17   :  { %1049 = vmatpush1.bf16.msra.mxu0 %v1927_v22  ;;  %1268 = vmatpush1.bf16.msra.mxu1 %v1928_v23  ;;  %v1997_v2 = vld [vmem:[%s2749_s1 + $0x20c] ss:$16 sps:$4 sm:$0xff]   ;;  %v1989_v3 = vld [vmem:[%s2750_s0] ss:$20 sps:$4 sm:$0xff]   ;;  %v1995_v5 = vld [vmem:[%s2749_s1 + $0x208] ss:$16 sps:$4 sm:$0xff]  }
  0x18   :  { %1050 = vmatprep.subr.bf16.mxu0 %v1929_v24  ;;  %1269 = vmatprep.subr.bf16.mxu1 %v1931_v25  ;;  %v1992_v4 = vld [vmem:[%s2749_s1 + $0x200] ss:$16 sps:$4 sm:$0xff]   ;;  %v2000_v6 = vld [vmem:[%s2749_s1 + $0x224] ss:$16 sps:$4 sm:$0xff]   ;;  %v2003_v7 = vld [vmem:[%s2749_s1 + $0x22c] ss:$16 sps:$4 sm:$0xff]  }
  0x19   :  { %v1998_v8 = vld [vmem:[%s2749_s1 + $0x220] ss:$16 sps:$4 sm:$0xff]   ;;  %v2001_v9 = vld [vmem:[%s2749_s1 + $0x228] ss:$16 sps:$4 sm:$0xff]   ;;  %v2006_v10 = vld [vmem:[%s2749_s1 + $0x244] ss:$16 sps:$4 sm:$0xff]  }
  0x1a   :  { %v2009_v11 = vld [vmem:[%s2749_s1 + $0x24c] ss:$16 sps:$4 sm:$0xff]   ;;  %v2004_v12 = vld [vmem:[%s2749_s1 + $0x240] ss:$16 sps:$4 sm:$0xff]   ;;  %v2007_v13 = vld [vmem:[%s2749_s1 + $0x248] ss:$16 sps:$4 sm:$0xff]  }
  0x1b   :  { %1051 = vmatpush1.bf16.msra.mxu0 %v1933_v26  ;;  %1270 = vmatpush1.bf16.msra.mxu1 %v1934_v27  ;;  %v2052_v14 = vld [vmem:[%s2750_s0 + $0x2c] ss:$20 sps:$4 sm:$0xff]   ;;  %v2054_v15 = vld [vmem:[%s2750_s0 + $0x28] ss:$20 sps:$4 sm:$0xff]   ;;  %v2012_v16 = vld [vmem:[%s2749_s1 + $0x264] ss:$16 sps:$4 sm:$0xff]  }
  0x1c   :  { %1052 = vmatprep.subr.bf16.mxu0 %v1935_v28  ;;  %1271 = vmatprep.subr.bf16.mxu1 %v1937_v29  ;;  %v2015_v17 = vld [vmem:[%s2749_s1 + $0x26c] ss:$16 sps:$4 sm:$0xff]   ;;  %v2010_v18 = vld [vmem:[%s2749_s1 + $0x260] ss:$16 sps:$4 sm:$0xff]   ;;  %v2013_v19 = vld [vmem:[%s2749_s1 + $0x268] ss:$16 sps:$4 sm:$0xff]  }
  0x1d   :  { %v2018_v20 = vld [vmem:[%s2749_s1 + $0x284] ss:$16 sps:$4 sm:$0xff]   ;;  %v2021_v21 = vld [vmem:[%s2749_s1 + $0x28c] ss:$16 sps:$4 sm:$0xff]   ;;  %v2016_v22 = vld [vmem:[%s2749_s1 + $0x280] ss:$16 sps:$4 sm:$0xff]  }
  0x1e   :  { %v2067_v23 = vld [vmem:[%s2750_s0 + $0x54] ss:$20 sps:$4 sm:$0xff]   ;;  %v2069_v25 = vld [vmem:[%s2750_s0 + $0x50] ss:$20 sps:$4 sm:$0xff]   ;;  %v2027_v27 = vld [vmem:[%s2749_s1 + $0x2ac] ss:$16 sps:$4 sm:$0xff]  }
  0x1f   :  { %1053 = vmatpush1.bf16.msra.mxu0 %v1939_v30  ;;  %1272 = vmatpush1.bf16.msra.mxu1 %v1940_v31  ;;  %v2019_v24 = vld [vmem:[%s2749_s1 + $0x288] ss:$16 sps:$4 sm:$0xff]   ;;  %v2024_v26 = vld [vmem:[%s2749_s1 + $0x2a4] ss:$16 sps:$4 sm:$0xff]   ;;  %v2022_v28 = vld [vmem:[%s2749_s1 + $0x2a0] ss:$16 sps:$4 sm:$0xff]  }
  0x20   :  { %1054 = vmatprep.subr.bf16.mxu0 %v1941_v32  ;;  %1273 = vmatprep.subr.bf16.mxu1 %v1943_v33  ;;  %v2025_v29 = vld [vmem:[%s2749_s1 + $0x2a8] ss:$16 sps:$4 sm:$0xff]   ;;  %v2030_v30 = vld [vmem:[%s2749_s1 + $0x2c4] ss:$16 sps:$4 sm:$0xff]   ;;  %v2082_v31 = vld [vmem:[%s2750_s0 + $0x7c] ss:$20 sps:$4 sm:$0xff]  }
  0x21   :  { %v2033_v32 = vld [vmem:[%s2749_s1 + $0x2cc] ss:$16 sps:$4 sm:$0xff]   ;;  %v2028_v33 = vld [vmem:[%s2749_s1 + $0x2c0] ss:$16 sps:$4 sm:$0xff]   ;;  %v2049_v48 = vld [vmem:[%s2749_s1 + $0x328] ss:$16 sps:$4 sm:$0xff]  }
  0x23   :  { %1055 = vmatpush1.bf16.msra.mxu0 %v1945_v34  ;;  %1274 = vmatpush1.bf16.msra.mxu1 %v1946_v35  ;;  %v2031_v34 = vld [vmem:[%s2749_s1 + $0x2c8] ss:$16 sps:$4 sm:$0xff]  }
  0x24   :  { %1056 = vmatprep.subr.bf16.mxu0 %v1947_v36  ;;  %1275 = vmatprep.subr.bf16.mxu1 %v1949_v37  ;;  %v2084_v35 = vld [vmem:[%s2750_s0 + $0x78] ss:$20 sps:$4 sm:$0xff]   ;;  %v2036_v36 = vld [vmem:[%s2749_s1 + $0x2e4] ss:$16 sps:$4 sm:$0xff]  }
  0x25   :  { %v2039_v37 = vld [vmem:[%s2749_s1 + $0x2ec] ss:$16 sps:$4 sm:$0xff]  }
  0x27   :  { %1057 = vmatpush1.bf16.msra.mxu0 %v1951_v38  ;;  %1276 = vmatpush1.bf16.msra.mxu1 %v1952_v39  ;;  %v2034_v38 = vld [vmem:[%s2749_s1 + $0x2e0] ss:$16 sps:$4 sm:$0xff]   ;;  %v2037_v39 = vld [vmem:[%s2749_s1 + $0x2e8] ss:$16 sps:$4 sm:$0xff]  }
  0x28   :  { %1058 = vmatprep.subr.bf16.mxu0 %v1953_v40  ;;  %1277 = vmatprep.subr.bf16.mxu1 %v1955_v41  ;;  %v2099_v40 = vld [vmem:[%s2750_s0 + $0xc] ss:$20 sps:$4 sm:$0xff]   ;;  %v2042_v41 = vld [vmem:[%s2749_s1 + $0x304] ss:$16 sps:$4 sm:$0xff]  }
  0x2b   :  { %1059 = vmatpush1.bf16.msra.mxu0 %v1957_v42  ;;  %1278 = vmatpush1.bf16.msra.mxu1 %v1958_v43  ;;  %v2045_v42 = vld [vmem:[%s2749_s1 + $0x30c] ss:$16 sps:$4 sm:$0xff]   ;;  %v2040_v43 = vld [vmem:[%s2749_s1 + $0x300] ss:$16 sps:$4 sm:$0xff]  }
  0x2c   :  { %1060 = vmatprep.subr.bf16.mxu0 %v1959_v44  ;;  %1279 = vmatprep.subr.bf16.mxu1 %v1961_v45  ;;  %v2043_v44 = vld [vmem:[%s2749_s1 + $0x308] ss:$16 sps:$4 sm:$0xff]   ;;  %v2048_v45 = vld [vmem:[%s2749_s1 + $0x324] ss:$16 sps:$4 sm:$0xff]  }
  0x2f   :  { %1061 = vmatpush1.bf16.msra.mxu0 %v1963_v46  ;;  %1280 = vmatpush1.bf16.msra.mxu1 %v1964_v47  ;;  %v2051_v46 = vld [vmem:[%s2749_s1 + $0x32c] ss:$16 sps:$4 sm:$0xff]   ;;  %v2046_v47 = vld [vmem:[%s2749_s1 + $0x320] ss:$16 sps:$4 sm:$0xff]  }
  0x30   :  { %1062 = vmatprep.subr.bf16.mxu0 %v1965_v49  ;;  %1281 = vmatprep.subr.bf16.mxu1 %v1967_v50  ;;  %v2057_v49 = vld [vmem:[%s2749_s1 + $0x344] ss:$16 sps:$4 sm:$0xff]   ;;  %v2060_v50 = vld [vmem:[%s2749_s1 + $0x34c] ss:$16 sps:$4 sm:$0xff]  }
  0x33   :  { %1063 = vmatpush1.bf16.msra.mxu0 %v1969_v51  ;;  %1282 = vmatpush1.bf16.msra.mxu1 %v1970_v52  ;;  %v2055_v51 = vld [vmem:[%s2749_s1 + $0x340] ss:$16 sps:$4 sm:$0xff]   ;;  %v2058_v52 = vld [vmem:[%s2749_s1 + $0x348] ss:$16 sps:$4 sm:$0xff]  }
  0x34   :  { %1064 = vmatprep.subr.bf16.mxu0 %v1971_v53  ;;  %1283 = vmatprep.subr.bf16.mxu1 %v1973_v54  ;;  %v2063_v53 = vld [vmem:[%s2749_s1 + $0x364] ss:$16 sps:$4 sm:$0xff]   ;;  %v2066_v54 = vld [vmem:[%s2749_s1 + $0x36c] ss:$16 sps:$4 sm:$0xff]  }
  0x37   :  { %1065 = vmatpush1.bf16.msra.mxu0 %v1975_v55  ;;  %1284 = vmatpush1.bf16.msra.mxu1 %v1976_v56  ;;  %v2061_v55 = vld [vmem:[%s2749_s1 + $0x360] ss:$16 sps:$4 sm:$0xff]   ;;  %v2064_v56 = vld [vmem:[%s2749_s1 + $0x368] ss:$16 sps:$4 sm:$0xff]  }
  0x38   :  { %1066 = vmatprep.subr.bf16.mxu0 %v1977_v57  ;;  %1285 = vmatprep.subr.bf16.mxu1 %v1979_v58  ;;  %v2072_v57 = vld [vmem:[%s2749_s1 + $0x384] ss:$16 sps:$4 sm:$0xff]   ;;  %v2075_v58 = vld [vmem:[%s2749_s1 + $0x38c] ss:$16 sps:$4 sm:$0xff]  }
  0x3b   :  { %1067 = vmatpush1.bf16.msra.mxu0 %v1981_v59  ;;  %1286 = vmatpush1.bf16.msra.mxu1 %v1982_v60  ;;  %v2070_v59 = vld [vmem:[%s2749_s1 + $0x380] ss:$16 sps:$4 sm:$0xff]   ;;  %v2073_v60 = vld [vmem:[%s2749_s1 + $0x388] ss:$16 sps:$4 sm:$0xff]  }
  0x3c   :  { %1068 = vmatprep.subr.bf16.mxu0 %v1983_v61  ;;  %1287 = vmatprep.subr.bf16.mxu1 %v1985_v62  ;;  %v2078_v61 = vld [vmem:[%s2749_s1 + $0x3a4] ss:$16 sps:$4 sm:$0xff]   ;;  %v2081_v62 = vld [vmem:[%s2749_s1 + $0x3ac] ss:$16 sps:$4 sm:$0xff]  }
  0x3f   :  { %1069 = vmatpush1.bf16.msra.mxu0 %v1987_v63  ;;  %1288 = vmatpush1.bf16.msra.mxu1 %v1988_v0  ;;  %v2076_v63 = vld [vmem:[%s2749_s1 + $0x3a0] ss:$16 sps:$4 sm:$0xff]   ;;  %v2079_v0 = vld [vmem:[%s2749_s1 + $0x3a8] ss:$16 sps:$4 sm:$0xff]  }
  0x40   :  { %1111 = vmatprep.subr.bf16.mxu0 %v1994_v1  ;;  %1330 = vmatprep.subr.bf16.mxu1 %v1997_v2  ;;  %v2087_v1 = vld [vmem:[%s2749_s1 + $0x3c4] ss:$16 sps:$4 sm:$0xff]   ;;  %v2090_v2 = vld [vmem:[%s2749_s1 + $0x3cc] ss:$16 sps:$4 sm:$0xff]  }
  0x42   :  { %1071 = vmatmul.mubr.bf16.vlgmr.msra.gmra.mrb[0].mxu0 %v1989_v3  ;;  %1290 = vmatmul.mubr.bf16.vlgmr.msra.gmra.mrb[0].mxu1 %v1989_v3  ;;  %v2085_v3 = vld [vmem:[%s2749_s1 + $0x3c0] ss:$16 sps:$4 sm:$0xff]  }
  0x43   :  { %1112 = vmatpush1.bf16.msra.mxu0 %v1992_v4  ;;  %1331 = vmatpush1.bf16.msra.mxu1 %v1995_v5  ;;  %v2088_v4 = vld [vmem:[%s2749_s1 + $0x3c8] ss:$16 sps:$4 sm:$0xff]   ;;  %v2093_v5 = vld [vmem:[%s2749_s1 + $0x3e4] ss:$16 sps:$4 sm:$0xff]  }
  0x44   :  { %1113 = vmatprep.subr.bf16.mxu0 %v2000_v6  ;;  %1332 = vmatprep.subr.bf16.mxu1 %v2003_v7  ;;  %v2096_v6 = vld [vmem:[%s2749_s1 + $0x3ec] ss:$16 sps:$4 sm:$0xff]   ;;  %v2091_v7 = vld [vmem:[%s2749_s1 + $0x3e0] ss:$16 sps:$4 sm:$0xff]  }
  0x45   :  { %1080 = vmatprep.mubr.bf16.mxu0 %v2052_v14  ;;  %1299 = vmatprep.mubr.bf16.mxu1 %v2052_v14  ;;  %v2106_v14 = vld [vmem:[%s2750_s0 + $0x34] ss:$20 sps:$4 sm:$0xff]  }
  0x47   :  { %1114 = vmatpush1.bf16.msra.mxu0 %v1998_v8  ;;  %1333 = vmatpush1.bf16.msra.mxu1 %v2001_v9  ;;  %v2094_v8 = vld [vmem:[%s2749_s1 + $0x3e8] ss:$16 sps:$4 sm:$0xff]   ;;  %v2102_v9 = vld [vmem:[%s2749_s1 + $0x404] ss:$16 sps:$4 sm:$0xff]  }
  0x48   :  { %1115 = vmatprep.subr.bf16.mxu0 %v2006_v10  ;;  %1334 = vmatprep.subr.bf16.mxu1 %v2009_v11  ;;  %v2105_v10 = vld [vmem:[%s2749_s1 + $0x40c] ss:$16 sps:$4 sm:$0xff]  }
  0x49   :  { %v2097_v11 = vld [vmem:[%s2750_s0 + $0x8] ss:$20 sps:$4 sm:$0xff]  }
  0x4a   :  { %1081 = vmatmul.mubr.bf16.gmra.mrb[4].mxu0 %v2054_v15  ;;  %1300 = vmatmul.mubr.bf16.gmra.mrb[4].mxu1 %v2054_v15  ;;  %v2111_v15 = vld [vmem:[%s2749_s1 + $0x424] ss:$16 sps:$4 sm:$0xff]  }
  0x4b   :  { %1116 = vmatpush1.bf16.msra.mxu0 %v2004_v12  ;;  %1335 = vmatpush1.bf16.msra.mxu1 %v2007_v13  ;;  %v2100_v12 = vld [vmem:[%s2749_s1 + $0x400] ss:$16 sps:$4 sm:$0xff]   ;;  %v2103_v13 = vld [vmem:[%s2749_s1 + $0x408] ss:$16 sps:$4 sm:$0xff]  }
  0x4c   :  { %1117 = vmatprep.subr.bf16.mxu0 %v2012_v16  ;;  %1336 = vmatprep.subr.bf16.mxu1 %v2015_v17  ;;  %v2114_v16 = vld [vmem:[%s2749_s1 + $0x42c] ss:$16 sps:$4 sm:$0xff]   ;;  %v2109_v17 = vld [vmem:[%s2749_s1 + $0x420] ss:$16 sps:$4 sm:$0xff]  }
  0x4d   :  { %1090 = vmatprep.mubr.bf16.mxu0 %v2067_v23  ;;  %1309 = vmatprep.mubr.bf16.mxu1 %v2067_v23  ;;  %v2118_v23 = vld [vmem:[%s2749_s1 + $0x440] ss:$16 sps:$4 sm:$0xff]  }
  0x4f   :  { %1118 = vmatpush1.bf16.msra.mxu0 %v2010_v18  ;;  %1337 = vmatpush1.bf16.msra.mxu1 %v2013_v19  ;;  %v2112_v18 = vld [vmem:[%s2749_s1 + $0x428] ss:$16 sps:$4 sm:$0xff]   ;;  %v2120_v19 = vld [vmem:[%s2749_s1 + $0x444] ss:$16 sps:$4 sm:$0xff]  }
  0x50   :  { %1119 = vmatprep.subr.bf16.mxu0 %v2018_v20  ;;  %1338 = vmatprep.subr.bf16.mxu1 %v2021_v21  ;;  %v2123_v20 = vld [vmem:[%s2749_s1 + $0x44c] ss:$16 sps:$4 sm:$0xff]   ;;  %v2108_v21 = vld [vmem:[%s2750_s0 + $0x30] ss:$20 sps:$4 sm:$0xff]  }
  0x52   :  { %1091 = vmatmul.mubr.bf16.gmra.mrb[8].mxu0 %v2069_v25  ;;  %1310 = vmatmul.mubr.bf16.gmra.mrb[8].mxu1 %v2069_v25  ;;  %v2129_v25 = vld [vmem:[%s2749_s1 + $0x464] ss:$16 sps:$4 sm:$0xff]  }
  0x53   :  { %1120 = vmatpush1.bf16.msra.mxu0 %v2016_v22  ;;  %1339 = vmatpush1.bf16.msra.mxu1 %v2019_v24  ;;  %v2115_v22 = vld [vmem:[%s2750_s0 + $0x5c] ss:$20 sps:$4 sm:$0xff]   ;;  %v2121_v24 = vld [vmem:[%s2749_s1 + $0x448] ss:$16 sps:$4 sm:$0xff]  }
  0x54   :  { %1121 = vmatprep.subr.bf16.mxu0 %v2024_v26  ;;  %1340 = vmatprep.subr.bf16.mxu1 %v2027_v27  ;;  %v2132_v26 = vld [vmem:[%s2749_s1 + $0x46c] ss:$16 sps:$4 sm:$0xff]   ;;  %v2127_v27 = vld [vmem:[%s2749_s1 + $0x460] ss:$16 sps:$4 sm:$0xff]  }
  0x55   :  { %1100 = vmatprep.mubr.bf16.mxu0 %v2082_v31  ;;  %1319 = vmatprep.mubr.bf16.mxu1 %v2082_v31  ;;  %v2126_v31 = vld [vmem:[%s2750_s0 + $0x80] ss:$20 sps:$4 sm:$0xff]  }
  0x57   :  { %1122 = vmatpush1.bf16.msra.mxu0 %v2022_v28  ;;  %1341 = vmatpush1.bf16.msra.mxu1 %v2025_v29  ;;  %v2130_v28 = vld [vmem:[%s2749_s1 + $0x468] ss:$16 sps:$4 sm:$0xff]  }
  0x58   :  { %1123 = vmatprep.subr.bf16.mxu0 %v2030_v30  ;;  %1342 = vmatprep.subr.bf16.mxu1 %v2033_v32  ;;  %v2117_v29 = vld [vmem:[%s2750_s0 + $0x58] ss:$20 sps:$4 sm:$0xff]   ;;  %v2137_v32 = vmov 0  }
  0x59   :  { %v2124_v30 = vld [vmem:[%s2750_s0 + $0x84] ss:$20 sps:$4 sm:$0xff]  }
  0x5a   :  { %1101 = vmatmul.mubr.bf16.gmra.mrb[12].mxu0 %v2084_v35  ;;  %1320 = vmatmul.mubr.bf16.gmra.mrb[12].mxu1 %v2084_v35  ;;  %v2135_v35 = vld [vmem:[%s2750_s0 + $0x60] ss:$20 sps:$4 sm:$0xff]  }
  0x5b   :  { %1124 = vmatpush1.bf16.msra.mxu0 %v2028_v33  ;;  %1343 = vmatpush1.bf16.msra.mxu1 %v2031_v34  ;;  %v2133_v33 = vld [vmem:[%s2750_s0 + $0x10] ss:$20 sps:$4 sm:$0xff]   ;;  %v2134_v34 = vld [vmem:[%s2750_s0 + $0x38] ss:$20 sps:$4 sm:$0xff]  }
  0x5c   :  { %1125 = vmatprep.subr.bf16.mxu0 %v2036_v36  ;;  %1344 = vmatprep.subr.bf16.mxu1 %v2039_v37  ;;  %v2136_v36 = vld [vmem:[%s2750_s0 + $0x88] ss:$20 sps:$4 sm:$0xff]   ;;  %v185_v37 = vlaneseq }
  0x5d   :  { %1143 = vmatprep.mubr.bf16.mxu0 %v2099_v40  ;;  %1362 = vmatprep.mubr.bf16.mxu1 %v2099_v40 }
  0x5f   :  { %1126 = vmatpush1.bf16.msra.mxu0 %v2034_v38  ;;  %1345 = vmatpush1.bf16.msra.mxu1 %v2037_v39  ;;  %v186_v38 = vshrl.u32 %v185_v37, 7 }
  0x60   :  { %1127 = vmatprep.subr.bf16.mxu0 %v2042_v41  ;;  %1346 = vmatprep.subr.bf16.mxu1 %v2045_v42  ;;  %v183_v41 = vld [vmem:[%s2751_s2] sm:$0xf] }
  0x61   :  { %v187_v39 = vsub.s32 0, %v186_v38  ;;  %v195_v40 = vsub.s32 2, %v186_v38  ;;  %v191_v42 = vsub.s32 1, %v186_v38 }
  0x63   :  { %1128 = vmatpush1.bf16.msra.mxu0 %v2040_v43  ;;  %1347 = vmatpush1.bf16.msra.mxu1 %v2043_v44  ;;  %v199_v43 = vsub.s32 3, %v186_v38  ;;  %v2661_v44 = vrot.slane %v183_v41, %v187_v39 }
  0x64   :  { %1129 = vmatprep.subr.bf16.mxu0 %v2048_v45  ;;  %1348 = vmatprep.subr.bf16.mxu1 %v2051_v46  ;;  %v2663_v45 = vrot.slane %v183_v41, %v195_v40  ;;  %v2665_v46 = vrot.slane %v183_v41, %v191_v42 }
  0x67   :  { %1130 = vmatpush1.bf16.msra.mxu0 %v2046_v47  ;;  %1349 = vmatpush1.bf16.msra.mxu1 %v2049_v48  ;;  %v2667_v47 = vrot.slane %v183_v41, %v199_v43 }
  0x68   :  { %1131 = vmatprep.subr.bf16.mxu0 %v2057_v49  ;;  %1350 = vmatprep.subr.bf16.mxu1 %v2060_v50 }
  0x6b   :  { %1132 = vmatpush1.bf16.msra.mxu0 %v2055_v51  ;;  %1351 = vmatpush1.bf16.msra.mxu1 %v2058_v52 }
  0x6c   :  { %1133 = vmatprep.subr.bf16.mxu0 %v2063_v53  ;;  %1352 = vmatprep.subr.bf16.mxu1 %v2066_v54 }
  0x6f   :  { %1134 = vmatpush1.bf16.msra.mxu0 %v2061_v55  ;;  %1353 = vmatpush1.bf16.msra.mxu1 %v2064_v56 }
  0x70   :  { %1135 = vmatprep.subr.bf16.mxu0 %v2072_v57  ;;  %1354 = vmatprep.subr.bf16.mxu1 %v2075_v58 }
  0x73   :  { %1136 = vmatpush1.bf16.msra.mxu0 %v2070_v59  ;;  %1355 = vmatpush1.bf16.msra.mxu1 %v2073_v60 }
  0x74   :  { %1137 = vmatprep.subr.bf16.mxu0 %v2078_v61  ;;  %1356 = vmatprep.subr.bf16.mxu1 %v2081_v62 }
  0x77   :  { %1138 = vmatpush1.bf16.msra.mxu0 %v2076_v63  ;;  %1357 = vmatpush1.bf16.msra.mxu1 %v2079_v0 }
  0x78   :  { %1139 = vmatprep.subr.bf16.mxu0 %v2087_v1  ;;  %1358 = vmatprep.subr.bf16.mxu1 %v2090_v2 }
  0x7b   :  { %1140 = vmatpush1.bf16.msra.mxu0 %v2085_v3  ;;  %1359 = vmatpush1.bf16.msra.mxu1 %v2088_v4 }
  0x7c   :  { %1141 = vmatprep.subr.bf16.mxu0 %v2093_v5  ;;  %1360 = vmatprep.subr.bf16.mxu1 %v2096_v6 }
  0x7f   :  { %1142 = vmatpush1.bf16.msra.mxu0 %v2091_v7  ;;  %1361 = vmatpush1.bf16.msra.mxu1 %v2094_v8 }
  0x80   :  { %1184 = vmatprep.subr.bf16.mxu0 %v2102_v9  ;;  %1403 = vmatprep.subr.bf16.mxu1 %v2105_v10 }
  0x82   :  { %1144 = vmatmul.mubr.bf16.vlgmr.msra.gmra.mrb[0].mxu0 %v2097_v11  ;;  %1363 = vmatmul.mubr.bf16.vlgmr.msra.gmra.mrb[0].mxu1 %v2097_v11 }
  0x83   :  { %1185 = vmatpush1.bf16.msra.mxu0 %v2100_v12  ;;  %1404 = vmatpush1.bf16.msra.mxu1 %v2103_v13 }
  0x84   :  { %1153 = vmatprep.mubr.bf16.mxu0 %v2106_v14  ;;  %1372 = vmatprep.mubr.bf16.mxu1 %v2106_v14 }
  0x85   :  { %1186 = vmatprep.subr.bf16.mxu0 %v2111_v15  ;;  %1405 = vmatprep.subr.bf16.mxu1 %v2114_v16 }
  0x87   :  { %1187 = vmatpush1.bf16.msra.mxu0 %v2109_v17  ;;  %1406 = vmatpush1.bf16.msra.mxu1 %v2112_v18 }
  0x88   :  { %1188 = vmatprep.subr.bf16.mxu0 %v2120_v19  ;;  %1407 = vmatprep.subr.bf16.mxu1 %v2123_v20 }
  0x8a   :  { %1154 = vmatmul.mubr.bf16.gmra.mrb[4].mxu0 %v2108_v21  ;;  %1373 = vmatmul.mubr.bf16.gmra.mrb[4].mxu1 %v2108_v21 }
  0x8b   :  { %1163 = vmatprep.mubr.bf16.mxu0 %v2115_v22  ;;  %1382 = vmatprep.mubr.bf16.mxu1 %v2115_v22 }
  0x8c   :  { %1189 = vmatpush1.bf16.msra.mxu0 %v2118_v23  ;;  %1408 = vmatpush1.bf16.msra.mxu1 %v2121_v24 }
  0x8d   :  { %1190 = vmatprep.subr.bf16.mxu0 %v2129_v25  ;;  %1409 = vmatprep.subr.bf16.mxu1 %v2132_v26 }
  0x90   :  { %1191 = vmatpush1.bf16.msra.mxu0 %v2127_v27  ;;  %1410 = vmatpush1.bf16.msra.mxu1 %v2130_v28 }
  0x92   :  { %1164 = vmatmul.mubr.bf16.gmra.mrb[8].mxu0 %v2117_v29  ;;  %1383 = vmatmul.mubr.bf16.gmra.mrb[8].mxu1 %v2117_v29 }
  0x93   :  { %1173 = vmatprep.mubr.bf16.mxu0 %v2124_v30  ;;  %1392 = vmatprep.mubr.bf16.mxu1 %v2124_v30 }
  0x9a   :  { %1174 = vmatmul.mubr.bf16.gmra.mrb[12].mxu0 %v2126_v31  ;;  %1393 = vmatmul.mubr.bf16.gmra.mrb[12].mxu1 %v2126_v31 }
  0x9b   :  { %1216 = vmatprep.mubr.bf16.mxu0 %v2137_v32  ;;  %1435 = vmatprep.mubr.bf16.mxu1 %v2137_v32 }
  0xa2   :  { %1756 = vmatmul.mubr.msk.bf16.vlgmr.msra.gmra.mrb[0].mxu0 %vm1025_vm0, %v2133_v33  ;;  %1760 = vmatmul.mubr.msk.bf16.vlgmr.msra.gmra.mrb[0].mxu1 %vm1025_vm0, %v2133_v33 }
  0xa3   :  { %1226 = vmatprep.mubr.bf16.mxu0 %v2137_v32  ;;  %1445 = vmatprep.mubr.bf16.mxu1 %v2137_v32 }
  0xaa   :  { %1757 = vmatmul.mubr.msk.bf16.gmra.mrb[4].mxu0 %vm1025_vm0, %v2134_v34  ;;  %1761 = vmatmul.mubr.msk.bf16.gmra.mrb[4].mxu1 %vm1025_vm0, %v2134_v34 }
  0xab   :  { %1236 = vmatprep.mubr.bf16.mxu0 %v2137_v32  ;;  %1455 = vmatprep.mubr.bf16.mxu1 %v2137_v32 }
  0xb2   :  { %1758 = vmatmul.mubr.msk.bf16.gmra.mrb[8].mxu0 %vm1025_vm0, %v2135_v35  ;;  %1762 = vmatmul.mubr.msk.bf16.gmra.mrb[8].mxu1 %vm1025_vm0, %v2135_v35 }
  0xb3   :  { %1246 = vmatprep.mubr.bf16.mxu0 %v2137_v32  ;;  %1465 = vmatprep.mubr.bf16.mxu1 %v2137_v32 }
  0xba   :  { %1759 = vmatmul.mubr.msk.bf16.gmra.mrb[12].mxu0 %vm1025_vm0, %v2136_v36  ;;  %1763 = vmatmul.mubr.msk.bf16.gmra.mrb[12].mxu1 %vm1025_vm0, %v2136_v36 }
 0x175   :  { %v1218_v48 = vpop.f32.mrb[0].mxu0  ;;  %v1437_v49 = vpop.f32.mrb[0].mxu1 }
 0x176   :  { %v1796_v50 = vadd.f32 %v1218_v48, %v2661_v44  ;;  %v1812_v51 = vadd.f32 %v1437_v49, %v2663_v45  ;;  %v1220_v52 = vpop.f32.mrb[1].mxu0  ;;  %v1439_v53 = vpop.f32.mrb[1].mxu1 }
 0x177   :  { %v1797_v54 = vadd.f32 %v1220_v52, %v2665_v46  ;;  %v1813_v55 = vadd.f32 %v1439_v53, %v2667_v47  ;;  %v1222_v56 = vpop.f32.mrb[2].mxu0  ;;  %v1441_v57 = vpop.f32.mrb[2].mxu1 }
 0x178   :  { %v1798_v58 = vadd.f32 %v1222_v56, %v2661_v44  ;;  %v1814_v59 = vadd.f32 %v1441_v57, %v2663_v45  ;;  %v1224_v60 = vpop.f32.mrb[3].mxu0  ;;  %v1443_v61 = vpop.f32.mrb[3].mxu1 }
 0x179   :  { %v1780_v62 = vpack.c.bf16 %v1797_v54, %v1796_v50  ;;  %v1781_v63 = vpack.c.bf16 %v1813_v55, %v1812_v51  ;;  %v1799_v0 = vadd.f32 %v1224_v60, %v2665_v46  ;;  %v1815_v1 = vadd.f32 %v1443_v61, %v2667_v47 }
 0x17b   :  { %1572 = vst [vmem:[%s2752_s3] sm:$0xff] %v1780_v62  ;;  %1573 = vst [vmem:[%s2752_s3 + $0x8] sm:$0xff] %v1781_v63  ;;  %v1782_v2 = vpack.c.bf16 %v1799_v0, %v1798_v58  ;;  %v1783_v3 = vpack.c.bf16 %v1815_v1, %v1814_v59 }
 0x17d   :  { %1574 = vst [vmem:[%s2752_s3 + $0x10] sm:$0xff] %v1782_v2  ;;  %1575 = vst [vmem:[%s2752_s3 + $0x18] sm:$0xff] %v1783_v3  ;;  %v1228_v4 = vpop.f32.mrb[4].mxu0  ;;  %v1447_v5 = vpop.f32.mrb[4].mxu1 }
 0x17e   :  { %v1800_v6 = vadd.f32 %v1228_v4, %v2661_v44  ;;  %v1816_v7 = vadd.f32 %v1447_v5, %v2663_v45  ;;  %v1230_v8 = vpop.f32.mrb[5].mxu0  ;;  %v1449_v9 = vpop.f32.mrb[5].mxu1 }
 0x17f   :  { %v1801_v10 = vadd.f32 %v1230_v8, %v2665_v46  ;;  %v1817_v11 = vadd.f32 %v1449_v9, %v2667_v47  ;;  %v1232_v12 = vpop.f32.mrb[6].mxu0  ;;  %v1451_v13 = vpop.f32.mrb[6].mxu1 }
 0x180   :  { %v1802_v14 = vadd.f32 %v1232_v12, %v2661_v44  ;;  %v1818_v15 = vadd.f32 %v1451_v13, %v2663_v45  ;;  %v1234_v16 = vpop.f32.mrb[7].mxu0  ;;  %v1453_v17 = vpop.f32.mrb[7].mxu1 }
 0x181   :  { %v1784_v18 = vpack.c.bf16 %v1801_v10, %v1800_v6  ;;  %v1785_v19 = vpack.c.bf16 %v1817_v11, %v1816_v7  ;;  %v1803_v20 = vadd.f32 %v1234_v16, %v2665_v46  ;;  %v1819_v21 = vadd.f32 %v1453_v17, %v2667_v47 }
 0x183   :  { %1576 = vst [vmem:[%s2752_s3 + $0x20] sm:$0xff] %v1784_v18  ;;  %1577 = vst [vmem:[%s2752_s3 + $0x28] sm:$0xff] %v1785_v19  ;;  %v1786_v22 = vpack.c.bf16 %v1803_v20, %v1802_v14  ;;  %v1787_v23 = vpack.c.bf16 %v1819_v21, %v1818_v15 }
 0x185   :  { %1578 = vst [vmem:[%s2752_s3 + $0x30] sm:$0xff] %v1786_v22  ;;  %1579 = vst [vmem:[%s2752_s3 + $0x38] sm:$0xff] %v1787_v23  ;;  %v1238_v24 = vpop.f32.mrb[8].mxu0  ;;  %v1457_v25 = vpop.f32.mrb[8].mxu1 }
 0x186   :  { %v1804_v26 = vadd.f32 %v1238_v24, %v2661_v44  ;;  %v1820_v27 = vadd.f32 %v1457_v25, %v2663_v45  ;;  %v1240_v28 = vpop.f32.mrb[9].mxu0  ;;  %v1459_v29 = vpop.f32.mrb[9].mxu1 }
 0x187   :  { %v1805_v30 = vadd.f32 %v1240_v28, %v2665_v46  ;;  %v1821_v31 = vadd.f32 %v1459_v29, %v2667_v47  ;;  %v1242_v32 = vpop.f32.mrb[10].mxu0  ;;  %v1461_v33 = vpop.f32.mrb[10].mxu1 }
 0x188   :  { %v1806_v34 = vadd.f32 %v1242_v32, %v2661_v44  ;;  %v1822_v35 = vadd.f32 %v1461_v33, %v2663_v45  ;;  %v1244_v36 = vpop.f32.mrb[11].mxu0  ;;  %v1463_v37 = vpop.f32.mrb[11].mxu1 }
 0x189   :  { %v1788_v38 = vpack.c.bf16 %v1805_v30, %v1804_v26  ;;  %v1789_v39 = vpack.c.bf16 %v1821_v31, %v1820_v27  ;;  %v1807_v40 = vadd.f32 %v1244_v36, %v2665_v46  ;;  %v1823_v41 = vadd.f32 %v1463_v37, %v2667_v47 }
 0x18b   :  { %1580 = vst [vmem:[%s2752_s3 + $0x40] sm:$0xff] %v1788_v38  ;;  %1581 = vst [vmem:[%s2752_s3 + $0x48] sm:$0xff] %v1789_v39  ;;  %v1790_v42 = vpack.c.bf16 %v1807_v40, %v1806_v34  ;;  %v1791_v43 = vpack.c.bf16 %v1823_v41, %v1822_v35 }
 0x18d   :  { %1582 = vst [vmem:[%s2752_s3 + $0x50] sm:$0xff] %v1790_v42  ;;  %1583 = vst [vmem:[%s2752_s3 + $0x58] sm:$0xff] %v1791_v43  ;;  %v1248_v48 = vpop.f32.mrb[12].mxu0  ;;  %v1467_v49 = vpop.f32.mrb[12].mxu1 }
 0x18e   :  { %v1808_v50 = vadd.f32 %v1248_v48, %v2661_v44  ;;  %v1824_v51 = vadd.f32 %v1467_v49, %v2663_v45  ;;  %v1250_v52 = vpop.f32.mrb[13].mxu0  ;;  %v1469_v53 = vpop.f32.mrb[13].mxu1 }
 0x18f   :  { %v1809_v54 = vadd.f32 %v1250_v52, %v2665_v46  ;;  %v1825_v55 = vadd.f32 %v1469_v53, %v2667_v47  ;;  %v1252_v56 = vpop.f32.mrb[14].mxu0  ;;  %v1471_v57 = vpop.f32.mrb[14].mxu1 }
 0x190   :  { %v1810_v58 = vadd.f32 %v1252_v56, %v2661_v44  ;;  %v1826_v59 = vadd.f32 %v1471_v57, %v2663_v45  ;;  %v1254_v60 = vpop.f32.mrb[15].mxu0  ;;  %v1473_v61 = vpop.f32.mrb[15].mxu1 }
 0x191   :  { %v1792_v62 = vpack.c.bf16 %v1809_v54, %v1808_v50  ;;  %v1793_v63 = vpack.c.bf16 %v1825_v55, %v1824_v51  ;;  %v1811_v0 = vadd.f32 %v1254_v60, %v2665_v46  ;;  %v1827_v1 = vadd.f32 %v1473_v61, %v2667_v47 }
 0x193   :  { %1584 = vst [vmem:[%s2752_s3 + $0x60] sm:$0xff] %v1792_v62  ;;  %1585 = vst [vmem:[%s2752_s3 + $0x68] sm:$0xff] %v1793_v63  ;;  %v1794_v2 = vpack.c.bf16 %v1811_v0, %v1810_v58  ;;  %v1795_v44 = vpack.c.bf16 %v1827_v1, %v1826_v59 }
 0x195   :  { %1586 = vst [vmem:[%s2752_s3 + $0x70] sm:$0xff] %v1794_v2  ;;  %1587 = vst [vmem:[%s2752_s3 + $0x78] sm:$0xff] %v1795_v44 }

// kernel: forward.9
= control target key start
LH: loop header
LB: loop body
LE: loop exit
PB: predicated region body
PF: predicated region fallthrough
CT: control target
= control target key end

     0   :  { %16 = vsyncpa [#allocation4], 0  ;;  %s7556_s0 = inlined_call_operand.vmem [shape: bf16[2,2,16,512], index: 0, kind: input, shape index: {}]   ;;  %s7557_s1 = inlined_call_operand.vmem [shape: f32[2,16,128], index: 1, kind: input, shape index: {}]   ;;  %s7558_s2 = inlined_call_operand.vmem [shape: f32[2,16,128], index: 2, kind: input, shape index: {}]   ;;  %s7559_s3 = inlined_call_operand.vmem [shape: bf16[9,128,512], index: 3, kind: input, shape index: {}]   ;;  %s7560_s4 = inlined_call_operand.vmem [shape: f32[16,128], index: 4, kind: input, shape index: {}]   ;;  %s7561_s5 = inlined_call_operand.vmem [shape: f32[16,128], index: 5, kind: input, shape index: {}]   ;;  %s7562_s6 = inlined_call_operand.vmem [shape: f32[16,128], index: 6, kind: input, shape index: {}]   ;;  %s7563_s7 = inlined_call_operand.vmem [shape: f32[4], index: 7, kind: input, shape index: {}]   ;;  %s7564_s8 = inlined_call_operand.vmem [shape: bf16[2,2,16,128], index: 8, kind: output, shape index: {0}]   ;;  %s7565_s9 = inlined_call_operand.hbm [shape: f32[2,16,128], index: 9, kind: output, shape index: {1}]   ;;  %s7566_s10 = inlined_call_operand.hbm [shape: f32[2,16,128], index: 10, kind: output, shape index: {2}]  }
   0x1   :  { %17 = vsyncpa [#allocation3], 0 }
   0x2   :  { %18 = vsyncpa [#allocation7], 0  ;;  %s5932_s13 = smov 0   ;;  %s5934_s14 = smov 0  }
   0x3   :  { %s5936_s15 = smov 0  }
   0x4 LB: > { %s4465_s16 = sadd.s32 4294967295, %s5868_s15   ;;  %s33_s17 = sadd.s32 1, %s5864_s14  ;;  %s5868_s15 = sphi %s5936_s15, %s24_s15   ;;  %s5864_s14 = sphi %s5934_s14, %s7587_s14   ;;  %s5860_s13 = sphi %s5932_s13, %s7586_s13  }
   0x5   : > { %p34_p0 = scmp.ge.s32.totalorder %s33_s17, 2  ;;  %p4467_p1 = scmp.ge.s32.totalorder %s5868_s15, 1 }
   0x6   : > { %p306_p2 = scmp.lt.s32.totalorder %s5868_s15, 3  ;;  %p5959_p4 = scmp.eq.s32.totalorder %s4465_s16, 0 }
   0x7   : > { %s7589_s17 = smov (%p34_p0, %s33_s17), 0  ;;  %s351_s22 = sshll.u32 %s7563_s7, 4  ;;  %s352_s22 = int_to_ptr.vmem [resolvable:$true] %s351_s22 }
   0x8   : > { %p5953_p3 = pnand %p4467_p1, %p306_p2  ;;  %s5767_s23 = scalar_lea.vmem %s352_s22, 16 }
   0x9   : > { %p5768_p7 = scmp.ne.s32.totalorder %s352_s22, %s5767_s23  ;;  %p5775_p11 = scmp.lt.s32.totalorder %s352_s22, %s352_s22 }
   0xa   : > { %p5230_p5 = pneg %p5953_p3  ;;  %p5776_p12 = scmp.lt.s32.totalorder %s5767_s23, %s5767_s23 }
   0xc   : > { %p5231_p6 = pnand %p5959_p4, %p5230_p5  ;;  %p5777_p13 = por %p5776_p12, %p5775_p11 }
   0xe   : > { %p5769_p8 = pneg %p5231_p6 }
  0x10   : > { %p5770_p9 = pnand %p5769_p8, %p5768_p7 }
  0x12   : > { %p5771_p10 = pneg %p5770_p9 }
  0x14   : > { %p5778_p0 = pnand %p5777_p13, %p5771_p10 }
  0x16   : > { %5781 = shalt.err (!%p5778_p0)
}
  0x17   : > { %s5870_s24 = smov [#allocation2]   ;;  %378 = sbr.rel (%p5953_p3) target bundleno = 654 (0x28e), region = 52 }
  0x18   : > { %5233 = dma.vmem_to_smem (!%p5231_p6), %s352_s22, 16, %s5870_s24, [#allocation4]  }
  0x1e   : > { %5847 = dma.done.wait (%p5959_p4), [#allocation4], 16  }
  0x1f   : > { %5849 = vsyncadd (%p5959_p4), [#allocation4], 4294967280 }
  0x20   : > { %384 = sfence }
  0x21   : > { %p440_p1 = scmp.lt.s32.totalorder %s5860_s13, 1  ;;  %p4478_p2 = scmp.ne.s32.totalorder %s5860_s13, 0 }
  0x22   : > { %v482_v0 = vld [vmem:[%s7557_s1] sm:$0xff] (!%p4478_p2)  ;;  %v483_v1 = vld [vmem:[%s7557_s1 + $0x8] sm:$0xff] (!%p4478_p2)  ;;  %v484_v2 = vld [vmem:[%s7557_s1 + $0x10] sm:$0xff] (!%p4478_p2) }
  0x23   : > { %s441_s25 = scalar_select %p440_p1, %s5860_s13, 1 }
  0x24   : > { %481 = sbr.rel (%p4478_p2) target bundleno = 43 (0x2b), region = 60  ;;  %486 = vst [vmem:[#allocation5] sm:$0xff] (!%p4478_p2), %v482_v0  ;;  %487 = vst [vmem:[#allocation5 + $0x8] sm:$0xff] (!%p4478_p2), %v483_v1  ;;  %v485_v3 = vld [vmem:[%s7557_s1 + $0x18] sm:$0xff] (!%p4478_p2)  ;;  %v490_v4 = vld [vmem:[%s7558_s2] sm:$0xff] (!%p4478_p2) }
  0x25   : > { %s5057_s26 = sshll.u32 %s441_s25, 6  ;;  %s5058_s27 = sshll.u32 %s441_s25, 4  ;;  %488 = vst [vmem:[#allocation5 + $0x10] sm:$0xff] (!%p4478_p2), %v484_v2  ;;  %v491_v5 = vld [vmem:[%s7558_s2 + $0x8] sm:$0xff] (!%p4478_p2)  ;;  %489 = vst [vmem:[#allocation5 + $0x18] sm:$0xff] (!%p4478_p2), %v485_v3  ;;  %v492_v6 = vld [vmem:[%s7558_s2 + $0x10] sm:$0xff] (!%p4478_p2) }
  0x26   : > { %s5981_s30 = scalar_lea.vmem %s7556_s0, %s5057_s26  ;;  %s5986_s18 = scalar_lea.vmem %s7564_s8, %s5058_s27  ;;  %494 = vst [vmem:[#allocation6] sm:$0xff] (!%p4478_p2), %v490_v4  ;;  %495 = vst [vmem:[#allocation6 + $0x8] sm:$0xff] (!%p4478_p2), %v491_v5  ;;  %v493_v7 = vld [vmem:[%s7558_s2 + $0x18] sm:$0xff] (!%p4478_p2) }
  0x27   : > { %496 = vst [vmem:[#allocation6 + $0x10] sm:$0xff] (!%p4478_p2), %v492_v6  ;;  %497 = vst [vmem:[#allocation6 + $0x18] sm:$0xff] (!%p4478_p2), %v493_v7 }
  0x2b PF: > { %v5271_v8 = vld [vmem:[%s7559_s3 + $0x4] ss:$16 sps:$4 sm:$0xff]   ;;  %s4479_s24 = sshll.u32 %s5860_s13, 1  ;;  %v5273_v9 = vld [vmem:[%s7559_s3 + $0xc] ss:$16 sps:$4 sm:$0xff]   ;;  %v5871_v10 = vmov 0   ;;  %v501_v13 = vlaneseq }
  0x2c   : > { %1012 = vmatprep.mubr.bf16.mxu0 %v5871_v10  ;;  %1065 = vmatprep.mubr.bf16.mxu1 %v5871_v10  ;;  %s509_s27 = sadd.s32 1, %s4479_s24  ;;  %v5275_v11 = vld [vmem:[%s7559_s3] ss:$16 sps:$4 sm:$0xff]   ;;  %v5276_v12 = vld [vmem:[%s7559_s3 + $0x8] ss:$16 sps:$4 sm:$0xff]   ;;  %s6028_s13 = sld [smem:[#allocation2 + %s4479_s24]] }
  0x2d   : > { %980 = vmatprep.subr.bf16.mxu0 %v5271_v8  ;;  %1033 = vmatprep.subr.bf16.mxu1 %v5273_v9  ;;  %v5277_v14 = vld [vmem:[%s7559_s3 + $0x24] ss:$16 sps:$4 sm:$0xff]   ;;  %s6033_s21 = sld [smem:[#allocation2 + %s509_s27]]  ;;  %v5279_v15 = vld [vmem:[%s7559_s3 + $0x2c] ss:$16 sps:$4 sm:$0xff]   ;;  %v6047_v19 = vshrl.u32 %v501_v13, 7 }
  0x2e   : > { %981 = vmatpush1.bf16.msra.mxu0 %v5275_v11  ;;  %1034 = vmatpush1.bf16.msra.mxu1 %v5276_v12  ;;  %v5281_v16 = vld [vmem:[%s7559_s3 + $0x20] ss:$16 sps:$4 sm:$0xff]   ;;  %v5282_v17 = vld [vmem:[%s7559_s3 + $0x28] ss:$16 sps:$4 sm:$0xff]   ;;  %v5283_v18 = vld [vmem:[%s7559_s3 + $0x44] ss:$16 sps:$4 sm:$0xff]  }
  0x2f   : > { %982 = vmatprep.subr.bf16.mxu0 %v5277_v14  ;;  %1035 = vmatprep.subr.bf16.mxu1 %v5279_v15  ;;  %v5285_v20 = vld [vmem:[%s7559_s3 + $0x4c] ss:$16 sps:$4 sm:$0xff]   ;;  %v5287_v21 = vld [vmem:[%s7559_s3 + $0x40] ss:$16 sps:$4 sm:$0xff]   ;;  %v5288_v22 = vld [vmem:[%s7559_s3 + $0x48] ss:$16 sps:$4 sm:$0xff]  }
  0x30   : > { %v5289_v23 = vld [vmem:[%s7559_s3 + $0x64] ss:$16 sps:$4 sm:$0xff]   ;;  %v5291_v24 = vld [vmem:[%s7559_s3 + $0x6c] ss:$16 sps:$4 sm:$0xff]   ;;  %v5293_v26 = vld [vmem:[%s7559_s3 + $0x60] ss:$16 sps:$4 sm:$0xff]  }
  0x31   : > { %vm503_vm0 = vcmp.eq.s32.totalorder %v6047_v19, 0  ;;  %vm508_vm1 = vcmp.eq.s32.totalorder %v6047_v19, 1  ;;  %v5294_v28 = vld [vmem:[%s7559_s3 + $0x68] ss:$16 sps:$4 sm:$0xff]   ;;  %v5295_v29 = vld [vmem:[%s7559_s3 + $0x84] ss:$16 sps:$4 sm:$0xff]  }
  0x32   : > { %983 = vmatpush1.bf16.msra.mxu0 %v5281_v16  ;;  %1036 = vmatpush1.bf16.msra.mxu1 %v5282_v17  ;;  %v505_v25 = vstv %s6028_s13  ;;  %v5297_v30 = vld [vmem:[%s7559_s3 + $0x8c] ss:$16 sps:$4 sm:$0xff]   ;;  %v5299_v33 = vld [vmem:[%s7559_s3 + $0x80] ss:$16 sps:$4 sm:$0xff]   ;;  %v5300_v34 = vld [vmem:[%s7559_s3 + $0x88] ss:$16 sps:$4 sm:$0xff]  }
  0x33   : > { %984 = vmatprep.subr.bf16.mxu0 %v5283_v18  ;;  %1037 = vmatprep.subr.bf16.mxu1 %v5285_v20  ;;  %v511_v27 = vstv %s6033_s21  ;;  %v506_v31 = vsel %vm503_vm0, %v505_v25, 0.0  ;;  %v5301_v35 = vld [vmem:[%s7559_s3 + $0xa4] ss:$16 sps:$4 sm:$0xff]   ;;  %v5303_v36 = vld [vmem:[%s7559_s3 + $0xac] ss:$16 sps:$4 sm:$0xff]   ;;  %v517_v38 = vsub.s32 0, %v6047_v19 }
  0x34   : > { %v512_v32 = vsel %vm508_vm1, %v511_v27, 0.0  ;;  %v5872_v39 = vmov 1983009808   ;;  %v5305_v41 = vld [vmem:[%s7559_s3 + $0xa0] ss:$16 sps:$4 sm:$0xff]   ;;  %v526_v51 = vld [vmem:[#allocation5 + $0x8] sm:$0xff] }
  0x35   : > { %v6092_v37 = vadd.f32 %v512_v32, %v506_v31  ;;  %v547_v40 = vunpack.c.l.s4 %v5872_v39  ;;  %v5306_v42 = vld [vmem:[%s7559_s3 + $0xa8] ss:$16 sps:$4 sm:$0xff]   ;;  %v5307_v43 = vld [vmem:[%s7559_s3 + $0xc4] ss:$16 sps:$4 sm:$0xff]   ;;  %v5309_v44 = vld [vmem:[%s7559_s3 + $0xcc] ss:$16 sps:$4 sm:$0xff]  }
  0x36   : > { %985 = vmatpush1.bf16.msra.mxu0 %v5287_v21  ;;  %1038 = vmatpush1.bf16.msra.mxu1 %v5288_v22  ;;  %v5311_v47 = vld [vmem:[%s7559_s3 + $0xc0] ss:$16 sps:$4 sm:$0xff]   ;;  %v5312_v48 = vld [vmem:[%s7559_s3 + $0xc8] ss:$16 sps:$4 sm:$0xff]   ;;  %v5313_v49 = vld [vmem:[%s7559_s3 + $0xe4] ss:$16 sps:$4 sm:$0xff]  }
  0x37   : > { %986 = vmatprep.subr.bf16.mxu0 %v5289_v23  ;;  %1039 = vmatprep.subr.bf16.mxu1 %v5291_v24  ;;  %v6108_v45 = vrot.slane %v6092_v37, %v517_v38  ;;  %v548_v46 = vunpack.c.0.s8 %v547_v40  ;;  %v525_v50 = vld [vmem:[#allocation5] sm:$0xff]  ;;  %v5315_v52 = vld [vmem:[%s7559_s3 + $0xec] ss:$16 sps:$4 sm:$0xff]   ;;  %v5318_v59 = vld [vmem:[%s7559_s3 + $0xe8] ss:$16 sps:$4 sm:$0xff]   ;;  %vm699_vm2 = vcmask 1040384  }
  0x38   : > { %v5317_v58 = vld [vmem:[%s7559_s3 + $0xe0] ss:$16 sps:$4 sm:$0xff]   ;;  %v5321_v60 = vld [vmem:[%s7559_s3 + $0x104] ss:$16 sps:$4 sm:$0xff]   ;;  %v5324_v61 = vld [vmem:[%s7559_s3 + $0x10c] ss:$16 sps:$4 sm:$0xff]  }
  0x39   : > { %v529_v53 = vmul.f32 %v525_v50, %v6108_v45  ;;  %v530_v54 = vmul.f32 %v526_v51, %v6108_v45  ;;  %v6125_v55 = vsub.s32 %v548_v46, %v6047_v19  ;;  %vm700_vm3 = vsmask.f32 256  ;;  %v5382_v18 = vld [vmem:[%s7559_s3 + $0x248] ss:$16 sps:$4 sm:$0xff]   ;;  %s5873_s28 = smov [#allocation6]   ;;  %p7487_p3 = scmp.eq.s32.totalorder %s4465_s16, 1 }
  0x3a   : > { %987 = vmatpush1.bf16.msra.mxu0 %v5293_v26  ;;  %1040 = vmatpush1.bf16.msra.mxu1 %v5294_v28  ;;  %vm710_vm4 = vcmask 1042432   ;;  %vm711_vm5 = vsmask.f32 2304  ;;  %vm6151_vm6 = vmand %vm699_vm2, %vm700_vm3  ;;  %v521_v26 = vsub.s32 1, %v6047_v19  ;;  %vm1158_vm8 = vsmask.f32 1280 }
  0x3b   : > { %988 = vmatprep.subr.bf16.mxu0 %v5295_v29  ;;  %1041 = vmatprep.subr.bf16.mxu1 %v5297_v30  ;;  %v541_v56 = vpack.c.bf16 %v530_v54, %v529_v53  ;;  %v4480_v57 = vpack.c.bf16 %v530_v54, %v530_v54  ;;  %v6145_v4 = vrot.slane %v5871_v10, %v6125_v55  ;;  %vm6157_vm7 = vmand %vm710_vm4, %vm711_vm5  ;;  %vm1159_vm9 = vsmask.f32 3336  ;;  %s4306_s29 = sshll.u32 %s5873_s28, 4  ;;  %s4307_s29 = int_to_ptr.vmem [resolvable:$true] %s4306_s29 }
  0x3c   : > { %vm1161_vm10 = vsmask.f32 5392  ;;  %vm6247_vm11 = vmor %vm1158_vm8, %vm1159_vm9  ;;  %vm1163_vm12 = vsmask.f32 7448  ;;  %vm1614_vm15 = vcmask 1042434   ;;  %vm1616_vm0 = vcmask 1044484   ;;  %p5789_p7 = scmp.lt.s32.totalorder %s4307_s29, %s4307_s29 }
  0x3d   : > { %v552_v62 = vrot.slane %v541_v56, %v6125_v55  ;;  %v559_v63 = vrot.slane %v4480_v57, %v6125_v55  ;;  %v1166_v20 = vshrl.u32 %v6145_v4, 16  ;;  %v6215_v50 = vcombine.high %v6145_v4, %v6145_v4  ;;  %vm6277_vm13 = vmor %vm6247_vm11, %vm1161_vm10  ;;  %s5782_s11 = scalar_lea.vmem %s4307_s29, 512 }
  0x3e   : > { %989 = vmatpush1.bf16.msra.mxu0 %v5299_v33  ;;  %1042 = vmatpush1.bf16.msra.mxu1 %v5300_v34  ;;  %v1169_v33 = vshll.u32 %v6145_v4, 16  ;;  %vm6302_vm14 = vmor %vm6277_vm13, %vm1163_vm12  ;;  %vm1618_vm1 = vcmask 1046534   ;;  %p5783_p4 = scmp.ne.s32.totalorder %s4307_s29, %s5782_s11  ;;  %p5790_p8 = scmp.lt.s32.totalorder %s5782_s11, %s5782_s11 }
  0x3f   : > { %990 = vmatprep.subr.bf16.mxu0 %v5301_v35  ;;  %1043 = vmatprep.subr.bf16.mxu1 %v5303_v36  ;;  %v560_v0 = vcombine.high %v552_v62, %v552_v62  ;;  %v561_v1 = vcombine.high %v559_v63, %v559_v63  ;;  %v585_v2 = vrot.slane %v552_v62, %v6125_v55  ;;  %v6170_v32 = vrot.slane %v1166_v20, 6  ;;  %vm6376_vm3 = vmor %vm699_vm2, %vm1614_vm15 }
  0x40   : > { %v599_v3 = vrot.slane %v559_v63, %v6125_v55  ;;  %v1171_v51 = vrot.slane %v1169_v33, 7  ;;  %vm6436_vm2 = vmor %vm6376_vm3, %vm1616_vm0  ;;  %p5784_p5 = pnand %p5783_p4, %p7487_p3  ;;  %p5791_p9 = por %p5790_p8, %p5789_p7 }
  0x41   : > { %v592_v5 = vrot.slane %v560_v0, %v6125_v55  ;;  %v606_v6 = vrot.slane %v561_v1, %v6125_v55  ;;  %v636_v7 = vshrl.u32 %v585_v2, 16  ;;  %v639_v8 = vshll.u32 %v585_v2, 16  ;;  %v527_v2 = vld [vmem:[#allocation5 + $0x10] sm:$0xff]  ;;  %vm6474_vm4 = vmor %vm6436_vm2, %vm1618_vm1 }
  0x42   : > { %991 = vmatpush1.bf16.msra.mxu0 %v5305_v41  ;;  %1044 = vmatpush1.bf16.msra.mxu1 %v5306_v42  ;;  %v650_v9 = vshrl.u32 %v599_v3, 16  ;;  %v653_v11 = vshll.u32 %v599_v3, 16  ;;  %v528_v3 = vld [vmem:[#allocation5 + $0x18] sm:$0xff]  ;;  %p5785_p6 = pneg %p5784_p5 }
  0x43   : > { %992 = vmatprep.subr.bf16.mxu0 %v5307_v43  ;;  %1045 = vmatprep.subr.bf16.mxu1 %v5309_v44  ;;  %v638_v12 = vrot.slane %v636_v7, 7  ;;  %v643_v13 = vshrl.u32 %v592_v5, 16  ;;  %v646_v14 = vshll.u32 %v592_v5, 16  ;;  %v657_v15 = vshrl.u32 %v606_v6, 16 }
  0x44   : > { %v652_v16 = vrot.slane %v650_v9, 7  ;;  %v660_v17 = vshll.u32 %v606_v6, 16  ;;  %v5325_v6 = vld [vmem:[%s7559_s3 + $0x120] ss:$16 sps:$4 sm:$0xff]   ;;  %v1172_v7 = vor.u32 %v1171_v51, %v6170_v32  ;;  %p5792_p10 = pnand %p5791_p9, %p5785_p6 }
  0x45   : > { %v641_v21 = vor.u32 %v639_v8, %v638_v12  ;;  %v645_v22 = vrot.slane %v643_v13, 7  ;;  %v659_v23 = vrot.slane %v657_v15, 7  ;;  %v1175_v8 = vshll.u32 %v6215_v50, 16 }
  0x46   : > { %993 = vmatpush1.bf16.msra.mxu0 %v5311_v47  ;;  %1046 = vmatpush1.bf16.msra.mxu1 %v5312_v48  ;;  %v655_v25 = vor.u32 %v653_v11, %v652_v16  ;;  %v5319_v47 = vld [vmem:[%s7559_s3 + $0x100] ss:$16 sps:$4 sm:$0xff]   ;;  %v5333_v16 = vld [vmem:[%s7559_s3 + $0x144] ss:$16 sps:$4 sm:$0xff]  }
  0x47   : > { %994 = vmatprep.subr.bf16.mxu0 %v5313_v49  ;;  %1047 = vmatprep.subr.bf16.mxu1 %v5315_v52  ;;  %v648_v27 = vor.u32 %v646_v14, %v645_v22  ;;  %v662_v28 = vor.u32 %v660_v17, %v659_v23  ;;  %v702_v29 = vsel %vm6151_vm6, 0, %v641_v21  ;;  %v5322_v52 = vld [vmem:[%s7559_s3 + $0x108] ss:$16 sps:$4 sm:$0xff]  }
  0x48   : > { %v704_v30 = vsel %vm6151_vm6, 0, %v655_v25  ;;  %v6168_v31 = vsel %vm6157_vm7, %v702_v29, 0  ;;  %v5328_v14 = vld [vmem:[%s7559_s3 + $0x128] ss:$16 sps:$4 sm:$0xff]   ;;  %v5331_v29 = vld [vmem:[%s7559_s3 + $0x140] ss:$16 sps:$4 sm:$0xff]  }
  0x49   : > { %v703_v19 = vsel %vm6151_vm6, 0, %v648_v27  ;;  %v705_v34 = vsel %vm6151_vm6, 0, %v662_v28  ;;  %v6179_v35 = vsel %vm6157_vm7, %v704_v30, 0  ;;  %v784_v36 = vcombine.low %v5871_v10, %v6168_v31  ;;  %v5334_v30 = vld [vmem:[%s7559_s3 + $0x148] ss:$16 sps:$4 sm:$0xff]  }
  0x4a   : > { %995 = vmatpush1.bf16.msra.mxu0 %v5317_v58  ;;  %1048 = vmatpush1.bf16.msra.mxu1 %v5318_v59  ;;  %v6185_v38 = vsel %vm6157_vm7, %v703_v19, 0  ;;  %v6189_v39 = vsel %vm6157_vm7, %v705_v34, 0  ;;  %v6193_v40 = vrot.slane %v6168_v31, %v6125_v55  ;;  %v6197_v41 = vrot.slane %v6179_v35, %v6125_v55  ;;  %v5327_v59 = vld [vmem:[%s7559_s3 + $0x124] ss:$16 sps:$4 sm:$0xff]  }
  0x4b   : > { %1492 = vmatprep.subr.bf16.mxu0 %v5321_v60  ;;  %1545 = vmatprep.subr.bf16.mxu1 %v5324_v61  ;;  %v785_v42 = vcombine.low %v6185_v38, %v6179_v35  ;;  %v792_v43 = vrot.slane %v784_v36, %v6125_v55  ;;  %v6204_v44 = vrot.slane %v6185_v38, %v6125_v55  ;;  %v5330_v60 = vld [vmem:[%s7559_s3 + $0x12c] ss:$16 sps:$4 sm:$0xff]   ;;  %v1177_v19 = vrot.slane %v1175_v8, 7 }
  0x4c   : > { %v2034_v46 = vcombine.low %v6168_v31, %v6185_v38  ;;  %v1180_v48 = vshrl.u32 %v6193_v40, 16  ;;  %v1183_v49 = vshll.u32 %v6193_v40, 16  ;;  %v6225_v57 = vcombine.high %v6193_v40, %v6193_v40 }
  0x4d   : > { %v799_v53 = vrot.slane %v785_v42, %v6125_v55  ;;  %v1194_v54 = vshrl.u32 %v6204_v44, 16  ;;  %v1197_v56 = vshll.u32 %v6204_v44, 16  ;;  %v6234_v61 = vrot.slane %v6092_v37, %v521_v26  ;;  %v5336_v26 = vld [vmem:[%s7559_s3 + $0x14c] ss:$16 sps:$4 sm:$0xff]  }
  0x4e   : > { %v1182_v58 = vrot.slane %v1180_v48, 6  ;;  %v1185_v63 = vrot.slane %v1183_v49, 7  ;;  %v1208_v0 = vshrl.u32 %v6197_v41, 16  ;;  %v1211_v1 = vshll.u32 %v6197_v41, 16 }
  0x4f   : > { %v800_v62 = vcombine.low %v792_v43, %v799_v53  ;;  %v6240_v5 = vcombine.high %v6204_v44, %v6204_v44  ;;  %v1196_v9 = vrot.slane %v1194_v54, 6  ;;  %v1199_v11 = vrot.slane %v1197_v56, 7  ;;  %v5339_v43 = vld [vmem:[%s7559_s3 + $0x164] ss:$16 sps:$4 sm:$0xff]  }
  0x50   : > { %v2035_v12 = vcombine.low %v6179_v35, %v6189_v39  ;;  %v3139_v13 = vcombine.low %v6189_v39, %v5871_v10  ;;  %v6262_v15 = vcombine.high %v6197_v41, %v6197_v41  ;;  %v531_v17 = vmul.f32 %v527_v2, %v6234_v61 }
  0x51   : > { %1013 = vmatmul.mubr.bf16.vlgmr.msra.gmra.mrb[0].mxu0 %v800_v62  ;;  %1066 = vmatmul.mubr.bf16.vlgmr.msra.gmra.mrb[0].mxu1 %v800_v62  ;;  %v532_v20 = vmul.f32 %v528_v3, %v6234_v61  ;;  %v1189_v21 = vshll.u32 %v6225_v57, 16  ;;  %v1210_v22 = vrot.slane %v1208_v0, 6  ;;  %v1213_v23 = vrot.slane %v1211_v1, 7  ;;  %v5345_v3 = vld [vmem:[%s7559_s3 + $0x184] ss:$16 sps:$4 sm:$0xff]  }
  0x52   : > { %1493 = vmatpush1.bf16.msra.mxu0 %v5319_v47  ;;  %1546 = vmatpush1.bf16.msra.mxu1 %v5322_v52  ;;  %v3146_v25 = vrot.slane %v3139_v13, %v6125_v55  ;;  %v1186_v28 = vor.u32 %v1185_v63, %v1182_v58  ;;  %v1173_v35 = vrot.slane %v1172_v7, 2  ;;  %v1200_v36 = vor.u32 %v1199_v11, %v1196_v9  ;;  %v5348_v9 = vld [vmem:[%s7559_s3 + $0x18c] ss:$16 sps:$4 sm:$0xff]  }
  0x53   : > { %1494 = vmatprep.subr.bf16.mxu0 %v5327_v59  ;;  %1547 = vmatprep.subr.bf16.mxu1 %v5330_v60  ;;  %v542_v32 = vpack.c.bf16 %v532_v20, %v531_v17  ;;  %v4481_v33 = vpack.c.bf16 %v532_v20, %v532_v20  ;;  %v1203_v42 = vshll.u32 %v6240_v5, 16  ;;  %v1191_v51 = vrot.slane %v1189_v21, 7  ;;  %v5337_v60 = vld [vmem:[%s7559_s3 + $0x160] ss:$16 sps:$4 sm:$0xff]  }
  0x54   : > { %1022 = vmatprep.mubr.bf16.mxu0 %v5871_v10  ;;  %1075 = vmatprep.mubr.bf16.mxu1 %v5871_v10  ;;  %v6289_v34 = vcombine.low %v799_v53, %v3146_v25  ;;  %v2042_v52 = vrot.slane %v2034_v46, %v6125_v55  ;;  %v5342_v53 = vld [vmem:[%s7559_s3 + $0x16c] ss:$16 sps:$4 sm:$0xff]   ;;  %v1187_v54 = vrot.slane %v1186_v28, 2  ;;  %v1214_v56 = vor.u32 %v1213_v23, %v1210_v22  ;;  %v5340_v46 = vld [vmem:[%s7559_s3 + $0x168] ss:$16 sps:$4 sm:$0xff]  }
  0x55   : > { %v569_v47 = vrot.slane %v542_v32, %v6125_v55  ;;  %v6297_v48 = vrot.slane %v4481_v33, %v6125_v55  ;;  %v1217_v58 = vshll.u32 %v6262_v15, 16  ;;  %v2049_v59 = vrot.slane %v2035_v12, %v6125_v55  ;;  %v5343_v22 = vld [vmem:[%s7559_s3 + $0x180] ss:$16 sps:$4 sm:$0xff]   ;;  %v5346_v23 = vld [vmem:[%s7559_s3 + $0x188] ss:$16 sps:$4 sm:$0xff]  }
  0x56   : > { %1495 = vmatpush1.bf16.msra.mxu0 %v5325_v6  ;;  %1548 = vmatpush1.bf16.msra.mxu1 %v5328_v14  ;;  %v6326_v63 = vsel %vm6302_vm14, %v1173_v35, %v1177_v19  ;;  %v1201_v0 = vrot.slane %v1200_v36, 2  ;;  %v1205_v1 = vrot.slane %v1203_v42, 7  ;;  %v6339_v12 = vsel %vm6302_vm14, %v1187_v54, %v1191_v51  ;;  %v5354_v32 = vld [vmem:[%s7559_s3 + $0x1ac] ss:$16 sps:$4 sm:$0xff]   ;;  %v5349_v36 = vld [vmem:[%s7559_s3 + $0x1a0] ss:$16 sps:$4 sm:$0xff]  }
  0x57   : > { %1496 = vmatprep.subr.bf16.mxu0 %v5333_v16  ;;  %1549 = vmatprep.subr.bf16.mxu1 %v5336_v26  ;;  %v577_v62 = vcombine.high %v569_v47, %v569_v47  ;;  %v613_v31 = vrot.slane %v569_v47, %v6125_v55  ;;  %v627_v38 = vrot.slane %v6297_v48, %v6125_v55  ;;  %v1215_v13 = vrot.slane %v1214_v56, 2  ;;  %v5351_v26 = vld [vmem:[%s7559_s3 + $0x1a4] ss:$16 sps:$4 sm:$0xff]  }
  0x58   : > { %v6328_v2 = vcombine.low %v2042_v52, %v2049_v59  ;;  %v1219_v14 = vrot.slane %v1217_v58, 7  ;;  %v4579_v25 = vrot.slane %v6193_v40, 9  ;;  %v6357_v33 = vsel %vm6302_vm14, %v1201_v0, %v1205_v1  ;;  %v5357_v59 = vld [vmem:[%s7559_s3 + $0x1c4] ss:$16 sps:$4 sm:$0xff]  }
  0x59   : > { %v620_v6 = vrot.slane %v577_v62, %v6125_v55  ;;  %v664_v37 = vshrl.u32 %v613_v31, 16  ;;  %v667_v7 = vshll.u32 %v613_v31, 16  ;;  %v678_v8 = vshrl.u32 %v627_v38, 16 }
  0x5a   : > { %1497 = vmatpush1.bf16.msra.mxu0 %v5331_v29  ;;  %1550 = vmatpush1.bf16.msra.mxu1 %v5334_v30  ;;  %v681_v11 = vshll.u32 %v627_v38, 16  ;;  %v4580_v30 = vrot.slane %v6204_v44, 9  ;;  %v1296_v19 = vcombine.low %v6326_v63, %v6339_v12  ;;  %v578_v35 = vcombine.high %v6297_v48, %v6297_v48  ;;  %v5352_v48 = vld [vmem:[%s7559_s3 + $0x1a8] ss:$16 sps:$4 sm:$0xff]   ;;  %v5367_v44 = vld [vmem:[%s7559_s3 + $0x200] ss:$16 sps:$4 sm:$0xff]  }
  0x5b   : > { %1498 = vmatprep.subr.bf16.mxu0 %v5339_v43  ;;  %1551 = vmatprep.subr.bf16.mxu1 %v5342_v53  ;;  %v666_v16 = vrot.slane %v664_v37, 7  ;;  %v671_v17 = vshrl.u32 %v620_v6, 16  ;;  %v674_v20 = vshll.u32 %v620_v6, 16  ;;  %v680_v21 = vrot.slane %v678_v8, 7 }
  0x5c   : > { %v6372_v51 = vsel %vm6302_vm14, %v1215_v13, %v1219_v14  ;;  %v1626_v56 = vrot.slane %v6225_v57, 7  ;;  %v1630_v58 = vrot.slane %v6240_v5, 7  ;;  %v2429_v6 = vcombine.low %v6339_v12, %v6357_v33  ;;  %v5355_v13 = vld [vmem:[%s7559_s3 + $0x1c0] ss:$16 sps:$4 sm:$0xff]   ;;  %v5402_v12 = vld [vmem:[%s7559_s3 + $0x2ac] ss:$16 sps:$4 sm:$0xff]  }
  0x5d   : > { %v669_v27 = vor.u32 %v667_v7, %v666_v16  ;;  %v673_v28 = vrot.slane %v671_v17, 7  ;;  %v683_v29 = vor.u32 %v681_v11, %v680_v21  ;;  %v1297_v1 = vcombine.low %v6357_v33, %v6372_v51  ;;  %v5358_v21 = vld [vmem:[%s7559_s3 + $0x1c8] ss:$16 sps:$4 sm:$0xff]  }
  0x5e   : > { %1499 = vmatpush1.bf16.msra.mxu0 %v5337_v60  ;;  %1552 = vmatpush1.bf16.msra.mxu1 %v5340_v46  ;;  %v5360_v46 = vld [vmem:[%s7559_s3 + $0x1cc] ss:$16 sps:$4 sm:$0xff]   ;;  %v1304_v11 = vrot.slane %v1296_v19, %v6125_v55  ;;  %v5369_v19 = vld [vmem:[%s7559_s3 + $0x204] ss:$16 sps:$4 sm:$0xff]  }
  0x5f   : > { %1500 = vmatprep.subr.bf16.mxu0 %v5345_v3  ;;  %1553 = vmatprep.subr.bf16.mxu1 %v5348_v9  ;;  %v676_v42 = vor.u32 %v674_v20, %v673_v28  ;;  %v706_v43 = vsel %vm6151_vm6, 0, %v669_v27  ;;  %v708_v47 = vsel %vm6151_vm6, 0, %v683_v29  ;;  %v6418_v3 = vrot.slane %v578_v35, %v6125_v55  ;;  %v5363_v28 = vld [vmem:[%s7559_s3 + $0x1e4] ss:$16 sps:$4 sm:$0xff]  }
  0x60   : > { %v6385_v53 = vsel %vm6157_vm7, %v706_v43, 0  ;;  %v6389_v54 = vsel %vm6157_vm7, %v708_v47, 0  ;;  %v5366_v43 = vld [vmem:[%s7559_s3 + $0x1ec] ss:$16 sps:$4 sm:$0xff]  }
  0x61   : > { %v707_v60 = vsel %vm6151_vm6, 0, %v676_v42  ;;  %v801_v62 = vcombine.low %v5871_v10, %v6385_v53  ;;  %v6402_v31 = vrot.slane %v6385_v53, %v6125_v55  ;;  %v6406_v38 = vrot.slane %v6389_v54, %v6125_v55 }
  0x62   : > { %1501 = vmatpush1.bf16.msra.mxu0 %v5343_v22  ;;  %1554 = vmatpush1.bf16.msra.mxu1 %v5346_v23  ;;  %v6413_v0 = vsel %vm6157_vm7, %v707_v60, 0 }
  0x63   : > { %1502 = vmatprep.subr.bf16.mxu0 %v5351_v26  ;;  %1555 = vmatprep.subr.bf16.mxu1 %v5354_v32  ;;  %v802_v37 = vcombine.low %v6413_v0, %v6389_v54  ;;  %v809_v7 = vrot.slane %v801_v62, %v6125_v55  ;;  %v6427_v8 = vrot.slane %v6413_v0, %v6125_v55  ;;  %v1222_v16 = vshrl.u32 %v6402_v31, 16 }
  0x64   : > { %v6431_v9 = vcombine.high %v6402_v31, %v6402_v31  ;;  %v6445_v14 = vcombine.high %v6406_v38, %v6406_v38  ;;  %v1225_v17 = vshll.u32 %v6402_v31, 16  ;;  %v1250_v20 = vshrl.u32 %v6406_v38, 16 }
  0x65   : > { %v6454_v22 = vrot.slane %v802_v37, %v6125_v55  ;;  %v6458_v23 = vcombine.high %v6427_v8, %v6427_v8  ;;  %v1236_v27 = vshrl.u32 %v6427_v8, 16  ;;  %v1224_v29 = vrot.slane %v1222_v16, 6 }
  0x66   : > { %1503 = vmatpush1.bf16.msra.mxu0 %v5349_v36  ;;  %1556 = vmatpush1.bf16.msra.mxu1 %v5352_v48  ;;  %v1231_v26 = vshll.u32 %v6431_v9, 16  ;;  %v1227_v32 = vrot.slane %v1225_v17, 7  ;;  %v1239_v35 = vshll.u32 %v6427_v8, 16  ;;  %v1252_v36 = vrot.slane %v1250_v20, 6  ;;  %v5364_v20 = vld [vmem:[%s7559_s3 + $0x1e8] ss:$16 sps:$4 sm:$0xff]  }
  0x67   : > { %1504 = vmatprep.subr.bf16.mxu0 %v5357_v59  ;;  %1557 = vmatprep.subr.bf16.mxu1 %v5360_v46  ;;  %v817_v42 = vcombine.low %v809_v7, %v6454_v22  ;;  %v1238_v52 = vrot.slane %v1236_v27, 6  ;;  %v1245_v48 = vshll.u32 %v6458_v23, 16  ;;  %v1253_v46 = vshll.u32 %v6406_v38, 16  ;;  %v5361_v7 = vld [vmem:[%s7559_s3 + $0x1e0] ss:$16 sps:$4 sm:$0xff]  }
  0x68   : > { %v1233_v47 = vrot.slane %v1231_v26, 7  ;;  %v1228_v60 = vor.u32 %v1227_v32, %v1224_v29  ;;  %v1241_v62 = vrot.slane %v1239_v35, 7  ;;  %v1259_v37 = vshll.u32 %v6445_v14, 16  ;;  %v5406_v59 = vld [vmem:[%s7559_s3 + $0x2c8] ss:$16 sps:$4 sm:$0xff]  }
  0x69   : > { %1023 = vmatmul.mubr.bf16.gmra.mrb[4].mxu0 %v817_v42  ;;  %1076 = vmatmul.mubr.bf16.gmra.mrb[4].mxu1 %v817_v42  ;;  %v6488_v16 = vrot.slane %v1297_v1, %v6125_v55  ;;  %v2051_v17 = vcombine.low %v6385_v53, %v6413_v0  ;;  %v1247_v29 = vrot.slane %v1245_v48, 7  ;;  %v1255_v32 = vrot.slane %v1253_v46, 7  ;;  %v5372_v1 = vld [vmem:[%s7559_s3 + $0x20c] ss:$16 sps:$4 sm:$0xff]  }
  0x6a   : > { %1505 = vmatpush1.bf16.msra.mxu0 %v5355_v13  ;;  %1558 = vmatpush1.bf16.msra.mxu1 %v5358_v21  ;;  %v1229_v26 = vrot.slane %v1228_v60, 2  ;;  %v1242_v27 = vor.u32 %v1241_v62, %v1238_v52  ;;  %v6497_v35 = vrot.slane %v6189_v39, %v6125_v55  ;;  %v6511_v13 = vsel %vm6474_vm4, %v4579_v25, %v1626_v56 }
  0x6b   : > { %1506 = vmatprep.subr.bf16.mxu0 %v5363_v28  ;;  %1559 = vmatprep.subr.bf16.mxu1 %v5366_v43  ;;  %v6519_v39 = vsel %vm6474_vm4, %v4580_v30, %v1630_v58  ;;  %v685_v21 = vshrl.u32 %v6418_v3, 16  ;;  %v1256_v25 = vor.u32 %v1255_v32, %v1252_v36  ;;  %v1261_v56 = vrot.slane %v1259_v37, 7  ;;  %v5370_v28 = vld [vmem:[%s7559_s3 + $0x208] ss:$16 sps:$4 sm:$0xff]   ;;  %v5375_v36 = vld [vmem:[%s7559_s3 + $0x224] ss:$16 sps:$4 sm:$0xff]  }
  0x6c   : > { %1524 = vmatprep.mubr.bf16.mxu0 %v5871_v10  ;;  %1577 = vmatprep.mubr.bf16.mxu1 %v5871_v10  ;;  %v6526_v40 = vsel %vm6302_vm14, %v1229_v26, %v1233_v47  ;;  %v1243_v57 = vrot.slane %v1242_v27, 2  ;;  %v1312_v5 = vcombine.low %v1304_v11, %v6488_v16  ;;  %v2788_v58 = vcombine.low %v6511_v13, %v6519_v39  ;;  %v5378_v47 = vld [vmem:[%s7559_s3 + $0x22c] ss:$16 sps:$4 sm:$0xff]   ;;  %v5373_v37 = vld [vmem:[%s7559_s3 + $0x220] ss:$16 sps:$4 sm:$0xff]  }
  0x6d   : > { %v1313_v30 = vcombine.low %v6326_v63, %v6526_v40  ;;  %v1257_v43 = vrot.slane %v1256_v25, 2  ;;  %v2359_v52 = vcombine.high %v6497_v35, %v6497_v35  ;;  %v2369_v48 = vshrl.u32 %v6497_v35, 16  ;;  %v5381_v26 = vld [vmem:[%s7559_s3 + $0x244] ss:$16 sps:$4 sm:$0xff]   ;;  %v5384_v32 = vld [vmem:[%s7559_s3 + $0x24c] ss:$16 sps:$4 sm:$0xff]  }
  0x6e   : > { %1507 = vmatpush1.bf16.msra.mxu0 %v5361_v7  ;;  %1560 = vmatpush1.bf16.msra.mxu1 %v5364_v20  ;;  %v6544_v42 = vsel %vm6302_vm14, %v1243_v57, %v1247_v29  ;;  %v687_v62 = vrot.slane %v685_v21, 7  ;;  %v688_v46 = vshll.u32 %v6418_v3, 16  ;;  %v5376_v3 = vld [vmem:[%s7559_s3 + $0x228] ss:$16 sps:$4 sm:$0xff]   ;;  %v2372_v29 = vshll.u32 %v6497_v35, 16 }
  0x6f   : > { %1877 = vmatprep.subr.bf16.mxu0 %v5369_v19  ;;  %1930 = vmatprep.subr.bf16.mxu1 %v5372_v1  ;;  %v6554_v60 = vsel %vm6302_vm14, %v1257_v43, %v1261_v56  ;;  %v1321_v11 = vrot.slane %v1313_v30, %v6125_v55  ;;  %v2446_v20 = vcombine.low %v6526_v40, %v6544_v42  ;;  %v2371_v1 = vrot.slane %v2369_v48, 6 }
  0x70   : > { %v1314_v7 = vcombine.low %v6544_v42, %v6554_v60  ;;  %v690_v27 = vor.u32 %v688_v46, %v687_v62  ;;  %v2378_v21 = vshll.u32 %v2359_v52, 16  ;;  %v4581_v57 = vrot.slane %v6197_v41, 9 }
  0x71   : > { %1525 = vmatmul.mubr.bf16.vlgmr.msra.gmra.mrb[0].mxu0 %v1312_v5  ;;  %1578 = vmatmul.mubr.bf16.vlgmr.msra.gmra.mrb[0].mxu1 %v1312_v5  ;;  %v2374_v56 = vrot.slane %v2372_v29, 7  ;;  %v1634_v30 = vrot.slane %v6262_v15, 7  ;;  %v4777_v41 = vrot.slane %v6497_v35, 9  ;;  %v2059_v24 = vrot.slane %v2051_v17, %v6125_v55  ;;  %v5390_v35 = vld [vmem:[%s7559_s3 + $0x26c] ss:$16 sps:$4 sm:$0xff]  }
  0x72   : > { %1878 = vmatpush1.bf16.msra.mxu0 %v5367_v44  ;;  %1931 = vmatpush1.bf16.msra.mxu1 %v5370_v28  ;;  %v6576_v19 = vrot.slane %v1314_v7, %v6125_v55  ;;  %v709_v25 = vsel %vm6151_vm6, 0, %v690_v27  ;;  %v5379_v44 = vld [vmem:[%s7559_s3 + $0x240] ss:$16 sps:$4 sm:$0xff]   ;;  %v2380_v48 = vrot.slane %v2378_v21, 7  ;;  %v2749_v62 = vrot.slane %v2359_v52, 7 }
  0x73   : > { %1879 = vmatprep.subr.bf16.mxu0 %v5375_v36  ;;  %1932 = vmatprep.subr.bf16.mxu1 %v5378_v47  ;;  %v6590_v28 = vsel %vm6157_vm7, %v709_v25, 0  ;;  %v5387_v36 = vld [vmem:[%s7559_s3 + $0x264] ss:$16 sps:$4 sm:$0xff]   ;;  %v2375_v47 = vor.u32 %v2374_v56, %v2371_v1  ;;  %v5385_v17 = vld [vmem:[%s7559_s3 + $0x260] ss:$16 sps:$4 sm:$0xff]   ;;  %v6625_v52 = vsel %vm6474_vm4, %v4581_v57, %v1634_v30  ;;  %v1622_v56 = vrot.slane %v6215_v50, 7 }
  0x74   : > { %1534 = vmatprep.mubr.bf16.mxu0 %v5871_v10  ;;  %1587 = vmatprep.mubr.bf16.mxu1 %v5871_v10  ;;  %v1329_v5 = vcombine.low %v1321_v11, %v6576_v19  ;;  %v2052_v43 = vcombine.low %v6389_v54, %v6590_v28  ;;  %v6607_v15 = vrot.slane %v6590_v28, %v6125_v55  ;;  %v5396_v1 = vld [vmem:[%s7559_s3 + $0x28c] ss:$16 sps:$4 sm:$0xff]   ;;  %v5391_v30 = vld [vmem:[%s7559_s3 + $0x280] ss:$16 sps:$4 sm:$0xff]   ;;  %v4582_v33 = vrot.slane %v6402_v31, 9 }
  0x75   : > { %v2376_v7 = vrot.slane %v2375_v47, 2  ;;  %v6629_v11 = vsel %vm6474_vm4, %v4777_v41, %v2749_v62  ;;  %v5394_v41 = vld [vmem:[%s7559_s3 + $0x288] ss:$16 sps:$4 sm:$0xff]   ;;  %v1646_v62 = vrot.slane %v6445_v14, 7  ;;  %v5397_v31 = vld [vmem:[%s7559_s3 + $0x2a0] ss:$16 sps:$4 sm:$0xff]  }
  0x76   : > { %1880 = vmatpush1.bf16.msra.mxu0 %v5373_v37  ;;  %1933 = vmatpush1.bf16.msra.mxu1 %v5376_v3  ;;  %v2066_v54 = vrot.slane %v2052_v43, %v6125_v55  ;;  %v6615_v46 = vcombine.high %v6607_v15, %v6607_v15  ;;  %v2383_v53 = vshrl.u32 %v6607_v15, 16  ;;  %v2386_v0 = vshll.u32 %v6607_v15, 16  ;;  %v5388_v3 = vld [vmem:[%s7559_s3 + $0x268] ss:$16 sps:$4 sm:$0xff]  }
  0x77   : > { %1881 = vmatprep.subr.bf16.mxu0 %v5381_v26  ;;  %1934 = vmatprep.subr.bf16.mxu1 %v5384_v32  ;;  %v4578_v37 = vrot.slane %v6145_v4, 9  ;;  %v5393_v26 = vld [vmem:[%s7559_s3 + $0x284] ss:$16 sps:$4 sm:$0xff]   ;;  %v2789_v29 = vcombine.low %v6625_v52, %v6629_v11  ;;  %v2796_v32 = vrot.slane %v2788_v58, %v6125_v55  ;;  %v6650_v21 = vsel %vm6302_vm14, %v2376_v7, %v2380_v48 }
  0x78   : > { %v6637_v4 = vcombine.low %v2059_v24, %v2066_v54  ;;  %v2385_v27 = vrot.slane %v2383_v53, 6  ;;  %v2388_v57 = vrot.slane %v2386_v0, 7  ;;  %v2392_v25 = vshll.u32 %v6615_v46, 16  ;;  %v5408_v0 = vld [vmem:[%s7559_s3 + $0x2cc] ss:$16 sps:$4 sm:$0xff]  }
  0x79   : > { %1535 = vmatmul.mubr.bf16.gmra.mrb[4].mxu0 %v1329_v5  ;;  %1588 = vmatmul.mubr.bf16.gmra.mrb[4].mxu1 %v1329_v5  ;;  %v2430_v58 = vcombine.low %v6372_v51, %v6650_v21  ;;  %v2803_v5 = vrot.slane %v2789_v29, %v6125_v55  ;;  %v5399_v51 = vld [vmem:[%s7559_s3 + $0x2a4] ss:$16 sps:$4 sm:$0xff]   ;;  %v1638_v43 = vrot.slane %v6431_v9, 7  ;;  %v4583_v24 = vrot.slane %v6427_v8, 9 }
  0x7a   : > { %1882 = vmatpush1.bf16.msra.mxu0 %v5379_v44  ;;  %1935 = vmatpush1.bf16.msra.mxu1 %v5382_v18  ;;  %v2437_v44 = vrot.slane %v2429_v6, %v6125_v55  ;;  %v2389_v18 = vor.u32 %v2388_v57, %v2385_v27  ;;  %v2394_v50 = vrot.slane %v2392_v25, 7  ;;  %v4584_v48 = vrot.slane %v6406_v38, 9  ;;  %v5400_v38 = vld [vmem:[%s7559_s3 + $0x2a8] ss:$16 sps:$4 sm:$0xff]   ;;  %v5405_v8 = vld [vmem:[%s7559_s3 + $0x2c4] ss:$16 sps:$4 sm:$0xff]  }
  0x7b   : > { %1883 = vmatprep.subr.bf16.mxu0 %v5387_v36  ;;  %1936 = vmatprep.subr.bf16.mxu1 %v5390_v35  ;;  %v2444_v6 = vrot.slane %v2430_v58, %v6125_v55  ;;  %v6677_v36 = vcombine.low %v2796_v32, %v2803_v5  ;;  %v1642_v35 = vrot.slane %v6458_v23, 7  ;;  %v4778_v9 = vrot.slane %v6607_v15, 9  ;;  %v5411_v27 = vld [vmem:[%s7559_s3 + $0x2e4] ss:$16 sps:$4 sm:$0xff]   ;;  %v5415_v5 = vld [vmem:[%s7559_s3 + $0x300] ss:$16 sps:$4 sm:$0xff]  }
  0x7c   : > { %1909 = vmatprep.mubr.bf16.mxu0 %v5871_v10  ;;  %1962 = vmatprep.mubr.bf16.mxu1 %v5871_v10  ;;  %v2390_v47 = vrot.slane %v2389_v18, 2  ;;  %v6702_v14 = vsel %vm6474_vm4, %v4578_v37, %v1622_v56  ;;  %v2454_v23 = vrot.slane %v2446_v20, %v6125_v55  ;;  %v2753_v15 = vrot.slane %v6615_v46, 7  ;;  %v5403_v46 = vld [vmem:[%s7559_s3 + $0x2c0] ss:$16 sps:$4 sm:$0xff]   ;;  %v5412_v56 = vld [vmem:[%s7559_s3 + $0x2e8] ss:$16 sps:$4 sm:$0xff]  }
  0x7d   : > { %v6684_v54 = vcombine.low %v2437_v44, %v2444_v6  ;;  %v1643_v37 = vsel %vm6474_vm4, %v4583_v24, %v1642_v35  ;;  %v1681_v7 = vcombine.low %v6702_v14, %v6511_v13  ;;  %v5414_v13 = vld [vmem:[%s7559_s3 + $0x2ec] ss:$16 sps:$4 sm:$0xff]   ;;  %v5417_v58 = vld [vmem:[%s7559_s3 + $0x304] ss:$16 sps:$4 sm:$0xff]   ;;  %v5424_v24 = vld [vmem:[%s7559_s3 + $0x328] ss:$16 sps:$4 sm:$0xff]  }
  0x7e   : > { %1884 = vmatpush1.bf16.msra.mxu0 %v5385_v17  ;;  %1937 = vmatpush1.bf16.msra.mxu1 %v5388_v3  ;;  %v6691_v53 = vsel %vm6302_vm14, %v2390_v47, %v2394_v50  ;;  %v1639_v17 = vsel %vm6474_vm4, %v4582_v33, %v1638_v43  ;;  %v6723_v42 = vsel %vm6474_vm4, %v4778_v9, %v2753_v15  ;;  %v5420_v44 = vld [vmem:[%s7559_s3 + $0x30c] ss:$16 sps:$4 sm:$0xff]   ;;  %v5418_v50 = vld [vmem:[%s7559_s3 + $0x308] ss:$16 sps:$4 sm:$0xff]   ;;  %v5421_v33 = vld [vmem:[%s7559_s3 + $0x320] ss:$16 sps:$4 sm:$0xff]  }
  0x7f   : > { %1885 = vmatprep.subr.bf16.mxu0 %v5393_v26  ;;  %1938 = vmatprep.subr.bf16.mxu1 %v5396_v1  ;;  %v2447_v49 = vcombine.low %v6554_v60, %v6691_v53  ;;  %v1647_v60 = vsel %vm6474_vm4, %v4584_v48, %v1646_v62  ;;  %v2805_v20 = vcombine.low %v1639_v17, %v1643_v37  ;;  %v5429_v35 = vld [vmem:[%s7559_s3 + $0x344] ss:$16 sps:$4 sm:$0xff]   ;;  %v5432_v47 = vld [vmem:[%s7559_s3 + $0x34c] ss:$16 sps:$4 sm:$0xff]   ;;  %v5427_v48 = vld [vmem:[%s7559_s3 + $0x340] ss:$16 sps:$4 sm:$0xff]  }
  0x80   : > { %v1682_v3 = vcombine.low %v6519_v39, %v6625_v52  ;;  %v2806_v26 = vcombine.low %v1647_v60, %v6723_v42  ;;  %v5409_v52 = vld [vmem:[%s7559_s3 + $0x2e0] ss:$16 sps:$4 sm:$0xff]   ;;  %v1689_v1 = vrot.slane %v1681_v7, %v6125_v55  ;;  %v1699_v18 = vcombine.low %v1643_v37, %v1647_v60  ;;  %v5435_v9 = vld [vmem:[%s7559_s3 + $0x364] ss:$16 sps:$4 sm:$0xff]   ;;  %v5444_v15 = vld [vmem:[%s7559_s3 + $0x38c] ss:$16 sps:$4 sm:$0xff]  }
  0x81   : > { %v2461_v40 = vrot.slane %v2447_v49, %v6125_v55  ;;  %v2813_v32 = vrot.slane %v2805_v20, %v6125_v55  ;;  %v5436_v49 = vld [vmem:[%s7559_s3 + $0x368] ss:$16 sps:$4 sm:$0xff]   ;;  %v5447_v37 = vld [vmem:[%s7559_s3 + $0x3a4] ss:$16 sps:$4 sm:$0xff]   ;;  %v5450_v60 = vld [vmem:[%s7559_s3 + $0x3ac] ss:$16 sps:$4 sm:$0xff]  }
  0x82   : > { %1886 = vmatpush1.bf16.msra.mxu0 %v5391_v30  ;;  %1939 = vmatpush1.bf16.msra.mxu1 %v5394_v41  ;;  %v2820_v39 = vrot.slane %v2806_v26, %v6125_v55  ;;  %v6751_v57 = vrot.slane %v1682_v3, %v6125_v55  ;;  %v1698_v41 = vcombine.low %v6702_v14, %v1639_v17  ;;  %v5442_v17 = vld [vmem:[%s7559_s3 + $0x388] ss:$16 sps:$4 sm:$0xff]   ;;  %v5456_v7 = vld [vmem:[%s7559_s3 + $0x3cc] ss:$16 sps:$4 sm:$0xff]   ;;  %v5451_v3 = vld [vmem:[%s7559_s3 + $0x3c0] ss:$16 sps:$4 sm:$0xff]  }
  0x83   : > { %1887 = vmatprep.subr.bf16.mxu0 %v5399_v51  ;;  %1940 = vmatprep.subr.bf16.mxu1 %v5402_v12  ;;  %v6739_v29 = vcombine.low %v2454_v23, %v2461_v40  ;;  %v5423_v51 = vld [vmem:[%s7559_s3 + $0x324] ss:$16 sps:$4 sm:$0xff]   ;;  %v5426_v12 = vld [vmem:[%s7559_s3 + $0x32c] ss:$16 sps:$4 sm:$0xff]   ;;  %v6783_v43 = vrot.slane %v1699_v18, %v6125_v55  ;;  %v5445_v40 = vld [vmem:[%s7559_s3 + $0x3a0] ss:$16 sps:$4 sm:$0xff]  }
  0x84   : > { %v6753_v25 = vcombine.low %v2813_v32, %v2820_v39  ;;  %v1697_v30 = vcombine.low %v1689_v1, %v6751_v57  ;;  %v1706_v6 = vrot.slane %v1698_v41, %v6125_v55  ;;  %v5441_v23 = vld [vmem:[%s7559_s3 + $0x384] ss:$16 sps:$4 sm:$0xff]   ;;  %v5448_v20 = vld [vmem:[%s7559_s3 + $0x3a8] ss:$16 sps:$4 sm:$0xff]   ;;  %v5457_v32 = vld [vmem:[%s7559_s3 + $0x3e0] ss:$16 sps:$4 sm:$0xff]  }
  0x85   : > { %v5454_v26 = vld [vmem:[%s7559_s3 + $0x3c8] ss:$16 sps:$4 sm:$0xff]   ;;  %v5465_v39 = vld [vmem:[%s7559_s3 + $0x404] ss:$16 sps:$4 sm:$0xff]   ;;  %v5463_v1 = vld [vmem:[%s7559_s3 + $0x400] ss:$16 sps:$4 sm:$0xff]  }
  0x86   : > { %1888 = vmatpush1.bf16.msra.mxu0 %v5397_v31  ;;  %1941 = vmatpush1.bf16.msra.mxu1 %v5400_v38  ;;  %v1714_v62 = vcombine.low %v1706_v6, %v6783_v43  ;;  %v5430_v31 = vld [vmem:[%s7559_s3 + $0x348] ss:$16 sps:$4 sm:$0xff]   ;;  %v5438_v38 = vld [vmem:[%s7559_s3 + $0x36c] ss:$16 sps:$4 sm:$0xff]   ;;  %v5477_v41 = vld [vmem:[%s7559_s3 + $0x444] ss:$16 sps:$4 sm:$0xff]  }
  0x87   : > { %1889 = vmatprep.subr.bf16.mxu0 %v5405_v8  ;;  %1942 = vmatprep.subr.bf16.mxu1 %v5408_v0  ;;  %v5433_v8 = vld [vmem:[%s7559_s3 + $0x360] ss:$16 sps:$4 sm:$0xff]   ;;  %v5484_v6 = vld [vmem:[%s7559_s3 + $0x468] ss:$16 sps:$4 sm:$0xff]  }
  0x88   : > { %v5439_v0 = vld [vmem:[%s7559_s3 + $0x380] ss:$16 sps:$4 sm:$0xff]  }
  0x89   : > { %v5475_v18 = vld [vmem:[%s7559_s3 + $0x440] ss:$16 sps:$4 sm:$0xff]  }
  0x8a   : > { %1890 = vmatpush1.bf16.msra.mxu0 %v5403_v46  ;;  %1943 = vmatpush1.bf16.msra.mxu1 %v5406_v59  ;;  %v5453_v46 = vld [vmem:[%s7559_s3 + $0x3c4] ss:$16 sps:$4 sm:$0xff]  }
  0x8b   : > { %1891 = vmatprep.subr.bf16.mxu0 %v5411_v27  ;;  %1944 = vmatprep.subr.bf16.mxu1 %v5414_v13  ;;  %v5459_v59 = vld [vmem:[%s7559_s3 + $0x3e4] ss:$16 sps:$4 sm:$0xff]   ;;  %v5462_v27 = vld [vmem:[%s7559_s3 + $0x3ec] ss:$16 sps:$4 sm:$0xff]   ;;  %v5460_v13 = vld [vmem:[%s7559_s3 + $0x3e8] ss:$16 sps:$4 sm:$0xff]  }
  0x8e   : > { %1892 = vmatpush1.bf16.msra.mxu0 %v5409_v52  ;;  %1945 = vmatpush1.bf16.msra.mxu1 %v5412_v56  ;;  %v5468_v52 = vld [vmem:[%s7559_s3 + $0x40c] ss:$16 sps:$4 sm:$0xff]   ;;  %v5466_v56 = vld [vmem:[%s7559_s3 + $0x408] ss:$16 sps:$4 sm:$0xff]  }
  0x8f   : > { %2230 = vmatprep.subr.bf16.mxu0 %v5417_v58  ;;  %2283 = vmatprep.subr.bf16.mxu1 %v5420_v44  ;;  %v5471_v58 = vld [vmem:[%s7559_s3 + $0x424] ss:$16 sps:$4 sm:$0xff]   ;;  %v5474_v44 = vld [vmem:[%s7559_s3 + $0x42c] ss:$16 sps:$4 sm:$0xff]  }
  0x91   : > { %1910 = vmatmul.mubr.bf16.vlgmr.msra.gmra.mrb[0].mxu0 %v1697_v30  ;;  %1963 = vmatmul.mubr.bf16.vlgmr.msra.gmra.mrb[0].mxu1 %v1697_v30  ;;  %v5472_v30 = vld [vmem:[%s7559_s3 + $0x428] ss:$16 sps:$4 sm:$0xff]  }
  0x92   : > { %2231 = vmatpush1.bf16.msra.mxu0 %v5415_v5  ;;  %2284 = vmatpush1.bf16.msra.mxu1 %v5418_v50  ;;  %v5469_v5 = vld [vmem:[%s7559_s3 + $0x420] ss:$16 sps:$4 sm:$0xff]   ;;  %v5478_v50 = vld [vmem:[%s7559_s3 + $0x448] ss:$16 sps:$4 sm:$0xff]  }
  0x93   : > { %2232 = vmatprep.subr.bf16.mxu0 %v5423_v51  ;;  %2285 = vmatprep.subr.bf16.mxu1 %v5426_v12  ;;  %v5483_v51 = vld [vmem:[%s7559_s3 + $0x464] ss:$16 sps:$4 sm:$0xff]   ;;  %v5486_v12 = vld [vmem:[%s7559_s3 + $0x46c] ss:$16 sps:$4 sm:$0xff]  }
  0x94   : > { %1919 = vmatprep.mubr.bf16.mxu0 %v5871_v10  ;;  %1972 = vmatprep.mubr.bf16.mxu1 %v5871_v10 }
  0x96   : > { %2233 = vmatpush1.bf16.msra.mxu0 %v5421_v33  ;;  %2286 = vmatpush1.bf16.msra.mxu1 %v5424_v24  ;;  %v5481_v33 = vld [vmem:[%s7559_s3 + $0x460] ss:$16 sps:$4 sm:$0xff]   ;;  %v5489_v24 = vld [vmem:[%s7559_s3 + $0x484] ss:$16 sps:$4 sm:$0xff]  }
  0x97   : > { %2234 = vmatprep.subr.bf16.mxu0 %v5429_v35  ;;  %2287 = vmatprep.subr.bf16.mxu1 %v5432_v47  ;;  %v5492_v35 = vld [vmem:[%s7559_s3 + $0x48c] ss:$16 sps:$4 sm:$0xff]   ;;  %v5490_v47 = vld [vmem:[%s7559_s3 + $0x488] ss:$16 sps:$4 sm:$0xff]  }
  0x99   : > { %1920 = vmatmul.mubr.bf16.gmra.mrb[4].mxu0 %v1714_v62  ;;  %1973 = vmatmul.mubr.bf16.gmra.mrb[4].mxu1 %v1714_v62  ;;  %v5498_v62 = vld [vmem:[%s7559_s3 + $0x4ac] ss:$16 sps:$4 sm:$0xff]  }
  0x9a   : > { %2235 = vmatpush1.bf16.msra.mxu0 %v5427_v48  ;;  %2288 = vmatpush1.bf16.msra.mxu1 %v5430_v31  ;;  %v5495_v48 = vld [vmem:[%s7559_s3 + $0x4a4] ss:$16 sps:$4 sm:$0xff]   ;;  %v5493_v31 = vld [vmem:[%s7559_s3 + $0x4a0] ss:$16 sps:$4 sm:$0xff]  }
  0x9b   : > { %2236 = vmatprep.subr.bf16.mxu0 %v5435_v9  ;;  %2289 = vmatprep.subr.bf16.mxu1 %v5438_v38  ;;  %v5496_v9 = vld [vmem:[%s7559_s3 + $0x4a8] ss:$16 sps:$4 sm:$0xff]   ;;  %v5501_v38 = vld [vmem:[%s7559_s3 + $0x4c4] ss:$16 sps:$4 sm:$0xff]  }
  0x9c   : > { %2262 = vmatprep.mubr.bf16.mxu0 %v5871_v10  ;;  %2315 = vmatprep.mubr.bf16.mxu1 %v5871_v10 }
  0x9e   : > { %2237 = vmatpush1.bf16.msra.mxu0 %v5433_v8  ;;  %2290 = vmatpush1.bf16.msra.mxu1 %v5436_v49  ;;  %v5504_v8 = vld [vmem:[%s7559_s3 + $0x4cc] ss:$16 sps:$4 sm:$0xff]   ;;  %v5499_v49 = vld [vmem:[%s7559_s3 + $0x4c0] ss:$16 sps:$4 sm:$0xff]  }
  0x9f   : > { %2238 = vmatprep.subr.bf16.mxu0 %v5441_v23  ;;  %2291 = vmatprep.subr.bf16.mxu1 %v5444_v15  ;;  %v5502_v23 = vld [vmem:[%s7559_s3 + $0x4c8] ss:$16 sps:$4 sm:$0xff]   ;;  %v5507_v15 = vld [vmem:[%s7559_s3 + $0x4e4] ss:$16 sps:$4 sm:$0xff]  }
  0xa2   : > { %2239 = vmatpush1.bf16.msra.mxu0 %v5439_v0  ;;  %2292 = vmatpush1.bf16.msra.mxu1 %v5442_v17  ;;  %v5510_v0 = vld [vmem:[%s7559_s3 + $0x4ec] ss:$16 sps:$4 sm:$0xff]   ;;  %v5505_v17 = vld [vmem:[%s7559_s3 + $0x4e0] ss:$16 sps:$4 sm:$0xff]  }
  0xa3   : > { %2240 = vmatprep.subr.bf16.mxu0 %v5447_v37  ;;  %2293 = vmatprep.subr.bf16.mxu1 %v5450_v60  ;;  %v5508_v37 = vld [vmem:[%s7559_s3 + $0x4e8] ss:$16 sps:$4 sm:$0xff]   ;;  %v5513_v60 = vld [vmem:[%s7559_s3 + $0x504] ss:$16 sps:$4 sm:$0xff]  }
  0xa6   : > { %2241 = vmatpush1.bf16.msra.mxu0 %v5445_v40  ;;  %2294 = vmatpush1.bf16.msra.mxu1 %v5448_v20  ;;  %v5516_v40 = vld [vmem:[%s7559_s3 + $0x50c] ss:$16 sps:$4 sm:$0xff]   ;;  %v5511_v20 = vld [vmem:[%s7559_s3 + $0x500] ss:$16 sps:$4 sm:$0xff]  }
  0xa7   : > { %2242 = vmatprep.subr.bf16.mxu0 %v5453_v46  ;;  %2295 = vmatprep.subr.bf16.mxu1 %v5456_v7  ;;  %v5514_v46 = vld [vmem:[%s7559_s3 + $0x508] ss:$16 sps:$4 sm:$0xff]   ;;  %v5519_v7 = vld [vmem:[%s7559_s3 + $0x524] ss:$16 sps:$4 sm:$0xff]  }
  0xaa   : > { %2243 = vmatpush1.bf16.msra.mxu0 %v5451_v3  ;;  %2296 = vmatpush1.bf16.msra.mxu1 %v5454_v26  ;;  %v5522_v3 = vld [vmem:[%s7559_s3 + $0x52c] ss:$16 sps:$4 sm:$0xff]   ;;  %v5517_v26 = vld [vmem:[%s7559_s3 + $0x520] ss:$16 sps:$4 sm:$0xff]  }
  0xab   : > { %2244 = vmatprep.subr.bf16.mxu0 %v5459_v59  ;;  %2297 = vmatprep.subr.bf16.mxu1 %v5462_v27  ;;  %v5520_v59 = vld [vmem:[%s7559_s3 + $0x528] ss:$16 sps:$4 sm:$0xff]   ;;  %v5525_v27 = vld [vmem:[%s7559_s3 + $0x544] ss:$16 sps:$4 sm:$0xff]  }
  0xae   : > { %2245 = vmatpush1.bf16.msra.mxu0 %v5457_v32  ;;  %2298 = vmatpush1.bf16.msra.mxu1 %v5460_v13  ;;  %v5523_v32 = vld [vmem:[%s7559_s3 + $0x540] ss:$16 sps:$4 sm:$0xff]   ;;  %v5526_v13 = vld [vmem:[%s7559_s3 + $0x548] ss:$16 sps:$4 sm:$0xff]  }
  0xaf   : > { %2625 = vmatprep.subr.bf16.mxu0 %v5465_v39  ;;  %2678 = vmatprep.subr.bf16.mxu1 %v5468_v52  ;;  %v5531_v39 = vld [vmem:[%s7559_s3 + $0x564] ss:$16 sps:$4 sm:$0xff]   ;;  %v5534_v52 = vld [vmem:[%s7559_s3 + $0x56c] ss:$16 sps:$4 sm:$0xff]  }
  0xb1   : > { %2263 = vmatmul.mubr.bf16.vlgmr.msra.gmra.mrb[0].mxu0 %v6328_v2  ;;  %2316 = vmatmul.mubr.bf16.vlgmr.msra.gmra.mrb[0].mxu1 %v6328_v2  ;;  %v5480_v2 = vld [vmem:[%s7559_s3 + $0x44c] ss:$16 sps:$4 sm:$0xff]  }
  0xb2   : > { %2626 = vmatpush1.bf16.msra.mxu0 %v5463_v1  ;;  %2679 = vmatpush1.bf16.msra.mxu1 %v5466_v56  ;;  %v5529_v1 = vld [vmem:[%s7559_s3 + $0x560] ss:$16 sps:$4 sm:$0xff]   ;;  %v5532_v56 = vld [vmem:[%s7559_s3 + $0x568] ss:$16 sps:$4 sm:$0xff]  }
  0xb3   : > { %2627 = vmatprep.subr.bf16.mxu0 %v5471_v58  ;;  %2680 = vmatprep.subr.bf16.mxu1 %v5474_v44  ;;  %v5537_v58 = vld [vmem:[%s7559_s3 + $0x584] ss:$16 sps:$4 sm:$0xff]   ;;  %v5540_v44 = vld [vmem:[%s7559_s3 + $0x58c] ss:$16 sps:$4 sm:$0xff]  }
  0xb4   : > { %2272 = vmatprep.mubr.bf16.mxu0 %v5871_v10  ;;  %2325 = vmatprep.mubr.bf16.mxu1 %v5871_v10 }
  0xb6   : > { %2628 = vmatpush1.bf16.msra.mxu0 %v5469_v5  ;;  %2681 = vmatpush1.bf16.msra.mxu1 %v5472_v30  ;;  %v5538_v5 = vld [vmem:[%s7559_s3 + $0x588] ss:$16 sps:$4 sm:$0xff]   ;;  %v5543_v30 = vld [vmem:[%s7559_s3 + $0x5a4] ss:$16 sps:$4 sm:$0xff]  }
  0xb7   : > { %2629 = vmatprep.subr.bf16.mxu0 %v5477_v41  ;;  %2682 = vmatprep.subr.bf16.mxu1 %v5480_v2  ;;  %v5546_v41 = vld [vmem:[%s7559_s3 + $0x5ac] ss:$16 sps:$4 sm:$0xff]   ;;  %v5541_v2 = vld [vmem:[%s7559_s3 + $0x5a0] ss:$16 sps:$4 sm:$0xff]  }
  0xb9   : > { %2273 = vmatmul.mubr.bf16.gmra.mrb[4].mxu0 %v6637_v4  ;;  %2326 = vmatmul.mubr.bf16.gmra.mrb[4].mxu1 %v6637_v4  ;;  %v5487_v4 = vld [vmem:[%s7559_s3 + $0x480] ss:$16 sps:$4 sm:$0xff]  }
  0xba   : > { %2630 = vmatpush1.bf16.msra.mxu0 %v5475_v18  ;;  %2683 = vmatpush1.bf16.msra.mxu1 %v5478_v50  ;;  %v5544_v18 = vld [vmem:[%s7559_s3 + $0x5a8] ss:$16 sps:$4 sm:$0xff]   ;;  %v5549_v50 = vld [vmem:[%s7559_s3 + $0x5c4] ss:$16 sps:$4 sm:$0xff]  }
  0xbb   : > { %2631 = vmatprep.subr.bf16.mxu0 %v5483_v51  ;;  %2684 = vmatprep.subr.bf16.mxu1 %v5486_v12  ;;  %v5552_v51 = vld [vmem:[%s7559_s3 + $0x5cc] ss:$16 sps:$4 sm:$0xff]   ;;  %v5547_v12 = vld [vmem:[%s7559_s3 + $0x5c0] ss:$16 sps:$4 sm:$0xff]  }
  0xbc   : > { %2657 = vmatprep.mubr.bf16.mxu0 %v5871_v10  ;;  %2710 = vmatprep.mubr.bf16.mxu1 %v5871_v10 }
  0xbe   : > { %2632 = vmatpush1.bf16.msra.mxu0 %v5481_v33  ;;  %2685 = vmatpush1.bf16.msra.mxu1 %v5484_v6  ;;  %v5550_v33 = vld [vmem:[%s7559_s3 + $0x5c8] ss:$16 sps:$4 sm:$0xff]   ;;  %v5555_v6 = vld [vmem:[%s7559_s3 + $0x5e4] ss:$16 sps:$4 sm:$0xff]  }
  0xbf   : > { %2633 = vmatprep.subr.bf16.mxu0 %v5489_v24  ;;  %2686 = vmatprep.subr.bf16.mxu1 %v5492_v35  ;;  %v5558_v24 = vld [vmem:[%s7559_s3 + $0x5ec] ss:$16 sps:$4 sm:$0xff]   ;;  %v5553_v35 = vld [vmem:[%s7559_s3 + $0x5e0] ss:$16 sps:$4 sm:$0xff]  }
  0xc2   : > { %2634 = vmatpush1.bf16.msra.mxu0 %v5487_v4  ;;  %2687 = vmatpush1.bf16.msra.mxu1 %v5490_v47  ;;  %v5556_v4 = vld [vmem:[%s7559_s3 + $0x5e8] ss:$16 sps:$4 sm:$0xff]   ;;  %v5561_v47 = vld [vmem:[%s7559_s3 + $0x604] ss:$16 sps:$4 sm:$0xff]  }
  0xc3   : > { %2635 = vmatprep.subr.bf16.mxu0 %v5495_v48  ;;  %2688 = vmatprep.subr.bf16.mxu1 %v5498_v62  ;;  %v5564_v48 = vld [vmem:[%s7559_s3 + $0x60c] ss:$16 sps:$4 sm:$0xff]   ;;  %v5559_v62 = vld [vmem:[%s7559_s3 + $0x600] ss:$16 sps:$4 sm:$0xff]  }
  0xc6   : > { %2636 = vmatpush1.bf16.msra.mxu0 %v5493_v31  ;;  %2689 = vmatpush1.bf16.msra.mxu1 %v5496_v9  ;;  %v5562_v31 = vld [vmem:[%s7559_s3 + $0x608] ss:$16 sps:$4 sm:$0xff]   ;;  %v5567_v9 = vld [vmem:[%s7559_s3 + $0x624] ss:$16 sps:$4 sm:$0xff]  }
  0xc7   : > { %2637 = vmatprep.subr.bf16.mxu0 %v5501_v38  ;;  %2690 = vmatprep.subr.bf16.mxu1 %v5504_v8  ;;  %v5570_v38 = vld [vmem:[%s7559_s3 + $0x62c] ss:$16 sps:$4 sm:$0xff]   ;;  %v5565_v8 = vld [vmem:[%s7559_s3 + $0x620] ss:$16 sps:$4 sm:$0xff]  }
  0xca   : > { %2638 = vmatpush1.bf16.msra.mxu0 %v5499_v49  ;;  %2691 = vmatpush1.bf16.msra.mxu1 %v5502_v23  ;;  %v5568_v49 = vld [vmem:[%s7559_s3 + $0x628] ss:$16 sps:$4 sm:$0xff]   ;;  %v5573_v23 = vld [vmem:[%s7559_s3 + $0x644] ss:$16 sps:$4 sm:$0xff]  }
  0xcb   : > { %2639 = vmatprep.subr.bf16.mxu0 %v5507_v15  ;;  %2692 = vmatprep.subr.bf16.mxu1 %v5510_v0  ;;  %v5571_v15 = vld [vmem:[%s7559_s3 + $0x640] ss:$16 sps:$4 sm:$0xff]   ;;  %v5574_v0 = vld [vmem:[%s7559_s3 + $0x648] ss:$16 sps:$4 sm:$0xff]  }
  0xce   : > { %2640 = vmatpush1.bf16.msra.mxu0 %v5505_v17  ;;  %2693 = vmatpush1.bf16.msra.mxu1 %v5508_v37  ;;  %v5579_v17 = vld [vmem:[%s7559_s3 + $0x664] ss:$16 sps:$4 sm:$0xff]   ;;  %v5582_v37 = vld [vmem:[%s7559_s3 + $0x66c] ss:$16 sps:$4 sm:$0xff]  }
  0xcf   : > { %2984 = vmatprep.subr.bf16.mxu0 %v5513_v60  ;;  %3037 = vmatprep.subr.bf16.mxu1 %v5516_v40  ;;  %v5577_v60 = vld [vmem:[%s7559_s3 + $0x660] ss:$16 sps:$4 sm:$0xff]   ;;  %v5580_v40 = vld [vmem:[%s7559_s3 + $0x668] ss:$16 sps:$4 sm:$0xff]  }
  0xd1   : > { %2658 = vmatmul.mubr.bf16.vlgmr.msra.gmra.mrb[0].mxu0 %v6684_v54  ;;  %2711 = vmatmul.mubr.bf16.vlgmr.msra.gmra.mrb[0].mxu1 %v6684_v54  ;;  %v5528_v54 = vld [vmem:[%s7559_s3 + $0x54c] ss:$16 sps:$4 sm:$0xff]  }
  0xd2   : > { %2985 = vmatpush1.bf16.msra.mxu0 %v5511_v20  ;;  %3038 = vmatpush1.bf16.msra.mxu1 %v5514_v46  ;;  %v5585_v20 = vld [vmem:[%s7559_s3 + $0x684] ss:$16 sps:$4 sm:$0xff]   ;;  %v5583_v46 = vld [vmem:[%s7559_s3 + $0x680] ss:$16 sps:$4 sm:$0xff]  }
  0xd3   : > { %2986 = vmatprep.subr.bf16.mxu0 %v5519_v7  ;;  %3039 = vmatprep.subr.bf16.mxu1 %v5522_v3  ;;  %v5586_v7 = vld [vmem:[%s7559_s3 + $0x688] ss:$16 sps:$4 sm:$0xff]   ;;  %v5591_v3 = vld [vmem:[%s7559_s3 + $0x6a4] ss:$16 sps:$4 sm:$0xff]  }
  0xd4   : > { %2667 = vmatprep.mubr.bf16.mxu0 %v5871_v10  ;;  %2720 = vmatprep.mubr.bf16.mxu1 %v5871_v10 }
  0xd6   : > { %2987 = vmatpush1.bf16.msra.mxu0 %v5517_v26  ;;  %3040 = vmatpush1.bf16.msra.mxu1 %v5520_v59  ;;  %v5594_v26 = vld [vmem:[%s7559_s3 + $0x6ac] ss:$16 sps:$4 sm:$0xff]   ;;  %v5589_v59 = vld [vmem:[%s7559_s3 + $0x6a0] ss:$16 sps:$4 sm:$0xff]  }
  0xd7   : > { %2988 = vmatprep.subr.bf16.mxu0 %v5525_v27  ;;  %3041 = vmatprep.subr.bf16.mxu1 %v5528_v54  ;;  %v5592_v27 = vld [vmem:[%s7559_s3 + $0x6a8] ss:$16 sps:$4 sm:$0xff]   ;;  %v5597_v54 = vld [vmem:[%s7559_s3 + $0x6c4] ss:$16 sps:$4 sm:$0xff]  }
  0xd9   : > { %2668 = vmatmul.mubr.bf16.gmra.mrb[4].mxu0 %v6739_v29  ;;  %2721 = vmatmul.mubr.bf16.gmra.mrb[4].mxu1 %v6739_v29  ;;  %v5535_v29 = vld [vmem:[%s7559_s3 + $0x580] ss:$16 sps:$4 sm:$0xff]  }
  0xda   : > { %2989 = vmatpush1.bf16.msra.mxu0 %v5523_v32  ;;  %3042 = vmatpush1.bf16.msra.mxu1 %v5526_v13  ;;  %v5600_v32 = vld [vmem:[%s7559_s3 + $0x6cc] ss:$16 sps:$4 sm:$0xff]   ;;  %v5595_v13 = vld [vmem:[%s7559_s3 + $0x6c0] ss:$16 sps:$4 sm:$0xff]  }
  0xdb   : > { %2990 = vmatprep.subr.bf16.mxu0 %v5531_v39  ;;  %3043 = vmatprep.subr.bf16.mxu1 %v5534_v52  ;;  %v5598_v39 = vld [vmem:[%s7559_s3 + $0x6c8] ss:$16 sps:$4 sm:$0xff]   ;;  %v5603_v52 = vld [vmem:[%s7559_s3 + $0x6e4] ss:$16 sps:$4 sm:$0xff]  }
  0xdc   : > { %3016 = vmatprep.mubr.bf16.mxu0 %v5871_v10  ;;  %3069 = vmatprep.mubr.bf16.mxu1 %v5871_v10 }
  0xde   : > { %2991 = vmatpush1.bf16.msra.mxu0 %v5529_v1  ;;  %3044 = vmatpush1.bf16.msra.mxu1 %v5532_v56  ;;  %v5606_v1 = vld [vmem:[%s7559_s3 + $0x6ec] ss:$16 sps:$4 sm:$0xff]   ;;  %v5601_v56 = vld [vmem:[%s7559_s3 + $0x6e0] ss:$16 sps:$4 sm:$0xff]  }
  0xdf   : > { %2992 = vmatprep.subr.bf16.mxu0 %v5537_v58  ;;  %3045 = vmatprep.subr.bf16.mxu1 %v5540_v44  ;;  %v5604_v58 = vld [vmem:[%s7559_s3 + $0x6e8] ss:$16 sps:$4 sm:$0xff]   ;;  %v5609_v44 = vld [vmem:[%s7559_s3 + $0x704] ss:$16 sps:$4 sm:$0xff]  }
  0xe2   : > { %2993 = vmatpush1.bf16.msra.mxu0 %v5535_v29  ;;  %3046 = vmatpush1.bf16.msra.mxu1 %v5538_v5  ;;  %v5612_v29 = vld [vmem:[%s7559_s3 + $0x70c] ss:$16 sps:$4 sm:$0xff]   ;;  %v3148_v5 = vcombine.low %v6590_v28, %v5871_v10 }
  0xe3   : > { %2994 = vmatprep.subr.bf16.mxu0 %v5543_v30  ;;  %3047 = vmatprep.subr.bf16.mxu1 %v5546_v41  ;;  %v5607_v30 = vld [vmem:[%s7559_s3 + $0x700] ss:$16 sps:$4 sm:$0xff]   ;;  %v5610_v41 = vld [vmem:[%s7559_s3 + $0x708] ss:$16 sps:$4 sm:$0xff]   ;;  %v5618_v28 = vld [vmem:[%s7559_s3 + $0x72c] ss:$16 sps:$4 sm:$0xff]  }
  0xe6   : > { %2995 = vmatpush1.bf16.msra.mxu0 %v5541_v2  ;;  %3048 = vmatpush1.bf16.msra.mxu1 %v5544_v18  ;;  %v5615_v2 = vld [vmem:[%s7559_s3 + $0x724] ss:$16 sps:$4 sm:$0xff]   ;;  %v3155_v18 = vrot.slane %v3148_v5, %v6125_v55 }
  0xe7   : > { %2996 = vmatprep.subr.bf16.mxu0 %v5549_v50  ;;  %3049 = vmatprep.subr.bf16.mxu1 %v5552_v51  ;;  %v5613_v50 = vld [vmem:[%s7559_s3 + $0x720] ss:$16 sps:$4 sm:$0xff]   ;;  %v5616_v51 = vld [vmem:[%s7559_s3 + $0x728] ss:$16 sps:$4 sm:$0xff]   ;;  %v5681_v5 = vld [vmem:[%s7559_s3 + $0x884] ss:$16 sps:$4 sm:$0xff]  }
  0xea   : > { %2997 = vmatpush1.bf16.msra.mxu0 %v5547_v12  ;;  %3050 = vmatpush1.bf16.msra.mxu1 %v5550_v33  ;;  %v5621_v12 = vld [vmem:[%s7559_s3 + $0x744] ss:$16 sps:$4 sm:$0xff]   ;;  %v3156_v33 = vcombine.low %v6454_v22, %v3155_v18  ;;  %v5630_v22 = vld [vmem:[%s7559_s3 + $0x76c] ss:$16 sps:$4 sm:$0xff]  }
  0xeb   : > { %2998 = vmatprep.subr.bf16.mxu0 %v5555_v6  ;;  %3051 = vmatprep.subr.bf16.mxu1 %v5558_v24  ;;  %v5619_v6 = vld [vmem:[%s7559_s3 + $0x740] ss:$16 sps:$4 sm:$0xff]   ;;  %v5622_v24 = vld [vmem:[%s7559_s3 + $0x748] ss:$16 sps:$4 sm:$0xff]   ;;  %v5690_v18 = vld [vmem:[%s7559_s3 + $0x8ac] ss:$16 sps:$4 sm:$0xff]  }
  0xee   : > { %2999 = vmatpush1.bf16.msra.mxu0 %v5553_v35  ;;  %3052 = vmatpush1.bf16.msra.mxu1 %v5556_v4  ;;  %v5627_v35 = vld [vmem:[%s7559_s3 + $0x764] ss:$16 sps:$4 sm:$0xff]   ;;  %v5625_v4 = vld [vmem:[%s7559_s3 + $0x760] ss:$16 sps:$4 sm:$0xff]  }
  0xef   : > { %3319 = vmatprep.subr.bf16.mxu0 %v5561_v47  ;;  %3372 = vmatprep.subr.bf16.mxu1 %v5564_v48  ;;  %v5628_v47 = vld [vmem:[%s7559_s3 + $0x768] ss:$16 sps:$4 sm:$0xff]   ;;  %v5633_v48 = vld [vmem:[%s7559_s3 + $0x784] ss:$16 sps:$4 sm:$0xff]  }
  0xf1   : > { %3017 = vmatmul.mubr.bf16.vlgmr.msra.gmra.mrb[0].mxu0 %v6677_v36  ;;  %3070 = vmatmul.mubr.bf16.vlgmr.msra.gmra.mrb[0].mxu1 %v6677_v36  ;;  %v5576_v36 = vld [vmem:[%s7559_s3 + $0x64c] ss:$16 sps:$4 sm:$0xff]  }
  0xf2   : > { %3320 = vmatpush1.bf16.msra.mxu0 %v5559_v62  ;;  %3373 = vmatpush1.bf16.msra.mxu1 %v5562_v31  ;;  %v5636_v62 = vld [vmem:[%s7559_s3 + $0x78c] ss:$16 sps:$4 sm:$0xff]   ;;  %v5631_v31 = vld [vmem:[%s7559_s3 + $0x780] ss:$16 sps:$4 sm:$0xff]  }
  0xf3   : > { %3321 = vmatprep.subr.bf16.mxu0 %v5567_v9  ;;  %3374 = vmatprep.subr.bf16.mxu1 %v5570_v38  ;;  %v5634_v9 = vld [vmem:[%s7559_s3 + $0x788] ss:$16 sps:$4 sm:$0xff]   ;;  %v5639_v38 = vld [vmem:[%s7559_s3 + $0x7a4] ss:$16 sps:$4 sm:$0xff]  }
  0xf4   : > { %3026 = vmatprep.mubr.bf16.mxu0 %v5871_v10  ;;  %3079 = vmatprep.mubr.bf16.mxu1 %v5871_v10 }
  0xf6   : > { %3322 = vmatpush1.bf16.msra.mxu0 %v5565_v8  ;;  %3375 = vmatpush1.bf16.msra.mxu1 %v5568_v49  ;;  %v5642_v8 = vld [vmem:[%s7559_s3 + $0x7ac] ss:$16 sps:$4 sm:$0xff]   ;;  %v5637_v49 = vld [vmem:[%s7559_s3 + $0x7a0] ss:$16 sps:$4 sm:$0xff]  }
  0xf7   : > { %3323 = vmatprep.subr.bf16.mxu0 %v5573_v23  ;;  %3376 = vmatprep.subr.bf16.mxu1 %v5576_v36  ;;  %v5640_v23 = vld [vmem:[%s7559_s3 + $0x7a8] ss:$16 sps:$4 sm:$0xff]   ;;  %v5645_v36 = vld [vmem:[%s7559_s3 + $0x7c4] ss:$16 sps:$4 sm:$0xff]  }
  0xf9   : > { %3027 = vmatmul.mubr.bf16.gmra.mrb[4].mxu0 %v6753_v25  ;;  %3080 = vmatmul.mubr.bf16.gmra.mrb[4].mxu1 %v6753_v25  ;;  %v5588_v25 = vld [vmem:[%s7559_s3 + $0x68c] ss:$16 sps:$4 sm:$0xff]  }
  0xfa   : > { %3324 = vmatpush1.bf16.msra.mxu0 %v5571_v15  ;;  %3377 = vmatpush1.bf16.msra.mxu1 %v5574_v0  ;;  %v5648_v15 = vld [vmem:[%s7559_s3 + $0x7cc] ss:$16 sps:$4 sm:$0xff]   ;;  %v3474_v0 = vcombine.low %v6650_v21, %v6326_v63 }
  0xfb   : > { %3325 = vmatprep.subr.bf16.mxu0 %v5579_v17  ;;  %3378 = vmatprep.subr.bf16.mxu1 %v5582_v37  ;;  %v5643_v17 = vld [vmem:[%s7559_s3 + $0x7c0] ss:$16 sps:$4 sm:$0xff]   ;;  %v5646_v37 = vld [vmem:[%s7559_s3 + $0x7c8] ss:$16 sps:$4 sm:$0xff]   ;;  %v5654_v21 = vld [vmem:[%s7559_s3 + $0x7ec] ss:$16 sps:$4 sm:$0xff]  }
  0xfc   : > { %3351 = vmatprep.mubr.bf16.mxu0 %v5871_v10  ;;  %3404 = vmatprep.mubr.bf16.mxu1 %v5871_v10 }
  0xfe   : > { %3326 = vmatpush1.bf16.msra.mxu0 %v5577_v60  ;;  %3379 = vmatpush1.bf16.msra.mxu1 %v5580_v40  ;;  %v5651_v60 = vld [vmem:[%s7559_s3 + $0x7e4] ss:$16 sps:$4 sm:$0xff]   ;;  %v3481_v40 = vrot.slane %v3474_v0, %v6125_v55 }
  0xff   : > { %3327 = vmatprep.subr.bf16.mxu0 %v5585_v20  ;;  %3380 = vmatprep.subr.bf16.mxu1 %v5588_v25  ;;  %v5649_v20 = vld [vmem:[%s7559_s3 + $0x7e0] ss:$16 sps:$4 sm:$0xff]   ;;  %v5652_v25 = vld [vmem:[%s7559_s3 + $0x7e8] ss:$16 sps:$4 sm:$0xff]  }
 0x102   : > { %3328 = vmatpush1.bf16.msra.mxu0 %v5583_v46  ;;  %3381 = vmatpush1.bf16.msra.mxu1 %v5586_v7  ;;  %v5657_v46 = vld [vmem:[%s7559_s3 + $0x804] ss:$16 sps:$4 sm:$0xff]   ;;  %v5660_v7 = vld [vmem:[%s7559_s3 + $0x80c] ss:$16 sps:$4 sm:$0xff]  }
 0x103   : > { %3329 = vmatprep.subr.bf16.mxu0 %v5591_v3  ;;  %3382 = vmatprep.subr.bf16.mxu1 %v5594_v26  ;;  %v3482_v3 = vcombine.low %v6488_v16, %v3481_v40  ;;  %v3483_v26 = vcombine.low %v6691_v53, %v6326_v63  ;;  %v5666_v63 = vld [vmem:[%s7559_s3 + $0x82c] ss:$16 sps:$4 sm:$0xff]   ;;  %v5661_v53 = vld [vmem:[%s7559_s3 + $0x820] ss:$16 sps:$4 sm:$0xff]  }
 0x104   : > { %v535_v40 = vld [vmem:[#allocation6 + $0x10] sm:$0xff] }
 0x105   : > { %v3490_v16 = vrot.slane %v3483_v26, %v6125_v55 }
 0x106   : > { %3330 = vmatpush1.bf16.msra.mxu0 %v5589_v59  ;;  %3383 = vmatpush1.bf16.msra.mxu1 %v5592_v27  ;;  %v5655_v59 = vld [vmem:[%s7559_s3 + $0x800] ss:$16 sps:$4 sm:$0xff]   ;;  %v5658_v27 = vld [vmem:[%s7559_s3 + $0x808] ss:$16 sps:$4 sm:$0xff]  }
 0x107   : > { %3331 = vmatprep.subr.bf16.mxu0 %v5597_v54  ;;  %3384 = vmatprep.subr.bf16.mxu1 %v5600_v32  ;;  %v5663_v54 = vld [vmem:[%s7559_s3 + $0x824] ss:$16 sps:$4 sm:$0xff]   ;;  %v5664_v32 = vld [vmem:[%s7559_s3 + $0x828] ss:$16 sps:$4 sm:$0xff]  }
 0x10a   : > { %3332 = vmatpush1.bf16.msra.mxu0 %v5595_v13  ;;  %3385 = vmatpush1.bf16.msra.mxu1 %v5598_v39  ;;  %v5669_v13 = vld [vmem:[%s7559_s3 + $0x844] ss:$16 sps:$4 sm:$0xff]   ;;  %v5672_v39 = vld [vmem:[%s7559_s3 + $0x84c] ss:$16 sps:$4 sm:$0xff]  }
 0x10b   : > { %3333 = vmatprep.subr.bf16.mxu0 %v5603_v52  ;;  %3386 = vmatprep.subr.bf16.mxu1 %v5606_v1  ;;  %v3491_v52 = vcombine.low %v6576_v19, %v3490_v16  ;;  %v5667_v1 = vld [vmem:[%s7559_s3 + $0x840] ss:$16 sps:$4 sm:$0xff]   ;;  %v5678_v19 = vld [vmem:[%s7559_s3 + $0x86c] ss:$16 sps:$4 sm:$0xff]  }
 0x10e   : > { %3334 = vmatpush1.bf16.msra.mxu0 %v5601_v56  ;;  %3387 = vmatpush1.bf16.msra.mxu1 %v5604_v58  ;;  %v5670_v56 = vld [vmem:[%s7559_s3 + $0x848] ss:$16 sps:$4 sm:$0xff]   ;;  %v5675_v58 = vld [vmem:[%s7559_s3 + $0x864] ss:$16 sps:$4 sm:$0xff]  }
 0x10f   : > { %3654 = vmatprep.subr.bf16.mxu0 %v5609_v44  ;;  %3707 = vmatprep.subr.bf16.mxu1 %v5612_v29  ;;  %v5673_v44 = vld [vmem:[%s7559_s3 + $0x860] ss:$16 sps:$4 sm:$0xff]   ;;  %v5676_v29 = vld [vmem:[%s7559_s3 + $0x868] ss:$16 sps:$4 sm:$0xff]  }
 0x111   : > { %3352 = vmatmul.mubr.bf16.vlgmr.msra.gmra.mrb[0].mxu0 %v6289_v34  ;;  %3405 = vmatmul.mubr.bf16.vlgmr.msra.gmra.mrb[0].mxu1 %v6289_v34  ;;  %v5624_v34 = vld [vmem:[%s7559_s3 + $0x74c] ss:$16 sps:$4 sm:$0xff]  }
 0x112   : > { %3655 = vmatpush1.bf16.msra.mxu0 %v5607_v30  ;;  %3708 = vmatpush1.bf16.msra.mxu1 %v5610_v41  ;;  %v5684_v30 = vld [vmem:[%s7559_s3 + $0x88c] ss:$16 sps:$4 sm:$0xff]   ;;  %v5679_v41 = vld [vmem:[%s7559_s3 + $0x880] ss:$16 sps:$4 sm:$0xff]  }
 0x113   : > { %3656 = vmatprep.subr.bf16.mxu0 %v5615_v2  ;;  %3709 = vmatprep.subr.bf16.mxu1 %v5618_v28  ;;  %v5682_v2 = vld [vmem:[%s7559_s3 + $0x888] ss:$16 sps:$4 sm:$0xff]   ;;  %v5687_v28 = vld [vmem:[%s7559_s3 + $0x8a4] ss:$16 sps:$4 sm:$0xff]  }
 0x114   : > { %3361 = vmatprep.mubr.bf16.mxu0 %v5871_v10  ;;  %3414 = vmatprep.mubr.bf16.mxu1 %v5871_v10 }
 0x116   : > { %3657 = vmatpush1.bf16.msra.mxu0 %v5613_v50  ;;  %3710 = vmatpush1.bf16.msra.mxu1 %v5616_v51  ;;  %v5685_v50 = vld [vmem:[%s7559_s3 + $0x8a0] ss:$16 sps:$4 sm:$0xff]   ;;  %v5688_v51 = vld [vmem:[%s7559_s3 + $0x8a8] ss:$16 sps:$4 sm:$0xff]  }
 0x117   : > { %3658 = vmatprep.subr.bf16.mxu0 %v5621_v12  ;;  %3711 = vmatprep.subr.bf16.mxu1 %v5624_v34  ;;  %v5693_v12 = vld [vmem:[%s7559_s3 + $0x8c4] ss:$16 sps:$4 sm:$0xff]   ;;  %v5696_v34 = vld [vmem:[%s7559_s3 + $0x8cc] ss:$16 sps:$4 sm:$0xff]  }
 0x119   : > { %3362 = vmatmul.mubr.bf16.gmra.mrb[4].mxu0 %v3156_v33  ;;  %3415 = vmatmul.mubr.bf16.gmra.mrb[4].mxu1 %v3156_v33  ;;  %v3809_v33 = vcombine.low %v6629_v11, %v6702_v14  ;;  %v5702_v11 = vld [vmem:[%s7559_s3 + $0x8ec] ss:$16 sps:$4 sm:$0xff]  }
 0x11a   : > { %3659 = vmatpush1.bf16.msra.mxu0 %v5619_v6  ;;  %3712 = vmatpush1.bf16.msra.mxu1 %v5622_v24  ;;  %v5691_v6 = vld [vmem:[%s7559_s3 + $0x8c0] ss:$16 sps:$4 sm:$0xff]   ;;  %v5694_v24 = vld [vmem:[%s7559_s3 + $0x8c8] ss:$16 sps:$4 sm:$0xff]  }
 0x11b   : > { %3660 = vmatprep.subr.bf16.mxu0 %v5627_v35  ;;  %3713 = vmatprep.subr.bf16.mxu1 %v5630_v22  ;;  %v5699_v35 = vld [vmem:[%s7559_s3 + $0x8e4] ss:$16 sps:$4 sm:$0xff]   ;;  %v3816_v22 = vrot.slane %v3809_v33, %v6125_v55 }
 0x11c   : > { %3686 = vmatprep.mubr.bf16.mxu0 %v5871_v10  ;;  %3739 = vmatprep.mubr.bf16.mxu1 %v5871_v10 }
 0x11e   : > { %3661 = vmatpush1.bf16.msra.mxu0 %v5625_v4  ;;  %3714 = vmatpush1.bf16.msra.mxu1 %v5628_v47  ;;  %v5697_v4 = vld [vmem:[%s7559_s3 + $0x8e0] ss:$16 sps:$4 sm:$0xff]   ;;  %v5700_v47 = vld [vmem:[%s7559_s3 + $0x8e8] ss:$16 sps:$4 sm:$0xff]  }
 0x11f   : > { %3662 = vmatprep.subr.bf16.mxu0 %v5633_v48  ;;  %3715 = vmatprep.subr.bf16.mxu1 %v5636_v62  ;;  %v3817_v48 = vcombine.low %v6751_v57, %v3816_v22  ;;  %v3818_v62 = vcombine.low %v6723_v42, %v6702_v14  ;;  %v721_v57 = vld [vmem:[%s5981_s30] sm:$0xff] }
 0x120   : > { %v4111_v42 = vld [vmem:[%s7560_s4] sm:$0xff] }
 0x122   : > { %3663 = vmatpush1.bf16.msra.mxu0 %v5631_v31  ;;  %3716 = vmatpush1.bf16.msra.mxu1 %v5634_v9  ;;  %v3825_v31 = vrot.slane %v3818_v62, %v6125_v55  ;;  %v729_v55 = vunpack.c.l.bf16 %v721_v57 }
 0x123   : > { %3664 = vmatprep.subr.bf16.mxu0 %v5639_v38  ;;  %3717 = vmatprep.subr.bf16.mxu1 %v5642_v8  ;;  %v533_v38 = vld [vmem:[#allocation6] sm:$0xff]  ;;  %v534_v8 = vld [vmem:[#allocation6 + $0x8] sm:$0xff] }
 0x124   : > { %v3826_v9 = vcombine.low %v6783_v43, %v3825_v31  ;;  %v7403_v14 = vmul.f32 %v533_v38, %v6108_v45  ;;  %v7413_v43 = vmul.f32 %v534_v8, %v6108_v45 }
 0x126   : > { %3665 = vmatpush1.bf16.msra.mxu0 %v5637_v49  ;;  %3718 = vmatpush1.bf16.msra.mxu1 %v5640_v23  ;;  %v723_v49 = vld [vmem:[%s5981_s30 + $0x10] sm:$0xff]  ;;  %v730_v23 = vunpack.c.h.bf16 %v721_v57 }
 0x127   : > { %3666 = vmatprep.subr.bf16.mxu0 %v5645_v36  ;;  %3719 = vmatprep.subr.bf16.mxu1 %v5648_v15  ;;  %v4112_v36 = vld [vmem:[%s7560_s4 + $0x8] sm:$0xff]  ;;  %v4117_v15 = vmul.f32 %v4111_v42, %v7403_v14  ;;  %v733_v0 = vunpack.c.l.bf16 %v723_v49  ;;  %v734_v45 = vunpack.c.h.bf16 %v723_v49 }
 0x12a   : > { %3667 = vmatpush1.bf16.msra.mxu0 %v5643_v17  ;;  %3720 = vmatpush1.bf16.msra.mxu1 %v5646_v37  ;;  %v4114_v17 = vld [vmem:[%s7561_s5 + $0x8] sm:$0xff] }
 0x12b   : > { %3668 = vmatprep.subr.bf16.mxu0 %v5651_v60  ;;  %3721 = vmatprep.subr.bf16.mxu1 %v5654_v21 }
 0x12e   : > { %3669 = vmatpush1.bf16.msra.mxu0 %v5649_v20  ;;  %3722 = vmatpush1.bf16.msra.mxu1 %v5652_v25 }
 0x12f   : > { %3989 = vmatprep.subr.bf16.mxu0 %v5657_v46  ;;  %4042 = vmatprep.subr.bf16.mxu1 %v5660_v7  ;;  %v4118_v7 = vmul.f32 %v4112_v36, %v7413_v43 }
 0x131   : > { %3687 = vmatmul.mubr.bf16.vlgmr.msra.gmra.mrb[0].mxu0 %v3482_v3  ;;  %3740 = vmatmul.mubr.bf16.vlgmr.msra.gmra.mrb[0].mxu1 %v3482_v3 }
 0x132   : > { %3990 = vmatpush1.bf16.msra.mxu0 %v5655_v59  ;;  %4043 = vmatpush1.bf16.msra.mxu1 %v5658_v27  ;;  %v4150_v27 = vmul.f32 %v4114_v17, %v7413_v43 }
 0x133   : > { %3991 = vmatprep.subr.bf16.mxu0 %v5663_v54  ;;  %4044 = vmatprep.subr.bf16.mxu1 %v5666_v63  ;;  %v725_v54 = vld [vmem:[%s5981_s30 + $0x20] sm:$0xff]  ;;  %v536_v63 = vld [vmem:[#allocation6 + $0x18] sm:$0xff] }
 0x134   : > { %3696 = vmatprep.mubr.bf16.mxu0 %v5871_v10  ;;  %3749 = vmatprep.mubr.bf16.mxu1 %v5871_v10 }
 0x136   : > { %3992 = vmatpush1.bf16.msra.mxu0 %v5661_v53  ;;  %4045 = vmatpush1.bf16.msra.mxu1 %v5664_v32  ;;  %v7429_v53 = vld [vmem:[%s5981_s30 + $0x8] sm:$0xff] }
 0x137   : > { %3993 = vmatprep.subr.bf16.mxu0 %v5669_v13  ;;  %4046 = vmatprep.subr.bf16.mxu1 %v5672_v39 }
 0x139   : > { %3697 = vmatmul.mubr.bf16.gmra.mrb[4].mxu0 %v3491_v52  ;;  %3750 = vmatmul.mubr.bf16.gmra.mrb[4].mxu1 %v3491_v52  ;;  %v7434_v52 = vmul.f32 %v535_v40, %v6234_v61 }
 0x13a   : > { %3994 = vmatpush1.bf16.msra.mxu0 %v5667_v1  ;;  %4047 = vmatpush1.bf16.msra.mxu1 %v5670_v56 }
 0x13b   : > { %3995 = vmatprep.subr.bf16.mxu0 %v5675_v58  ;;  %4048 = vmatprep.subr.bf16.mxu1 %v5678_v19  ;;  %v727_v58 = vld [vmem:[%s5981_s30 + $0x30] sm:$0xff] }
 0x13c   : > { %4021 = vmatprep.mubr.bf16.mxu0 %v5871_v10  ;;  %4074 = vmatprep.mubr.bf16.mxu1 %v5871_v10 }
 0x13e   : > { %3996 = vmatpush1.bf16.msra.mxu0 %v5673_v44  ;;  %4049 = vmatpush1.bf16.msra.mxu1 %v5676_v29  ;;  %v737_v29 = vunpack.c.l.bf16 %v725_v54 }
 0x13f   : > { %3997 = vmatprep.subr.bf16.mxu0 %v5681_v5  ;;  %4050 = vmatprep.subr.bf16.mxu1 %v5684_v30  ;;  %v7438_v5 = vmul.f32 %v536_v63, %v6234_v61  ;;  %v731_v30 = vunpack.c.l.bf16 %v7429_v53  ;;  %v742_v61 = vunpack.c.h.bf16 %v727_v58 }
 0x142   : > { %3998 = vmatpush1.bf16.msra.mxu0 %v5679_v41  ;;  %4051 = vmatpush1.bf16.msra.mxu1 %v5682_v2 }
 0x143   : > { %3999 = vmatprep.subr.bf16.mxu0 %v5687_v28  ;;  %4052 = vmatprep.subr.bf16.mxu1 %v5690_v18  ;;  %v738_v28 = vunpack.c.h.bf16 %v725_v54 }
 0x146   : > { %4000 = vmatpush1.bf16.msra.mxu0 %v5685_v50  ;;  %4053 = vmatpush1.bf16.msra.mxu1 %v5688_v51  ;;  %v4119_v50 = vmul.f32 %v4111_v42, %v7434_v52  ;;  %v741_v51 = vunpack.c.l.bf16 %v727_v58 }
 0x147   : > { %4001 = vmatprep.subr.bf16.mxu0 %v5693_v12  ;;  %4054 = vmatprep.subr.bf16.mxu1 %v5696_v34  ;;  %v7443_v12 = vld [vmem:[%s5981_s30 + $0x18] sm:$0xff] }
 0x148   : > { %v735_v38 = vunpack.c.l.bf16 %v7443_v12 }
 0x14a   : > { %4002 = vmatpush1.bf16.msra.mxu0 %v5691_v6  ;;  %4055 = vmatpush1.bf16.msra.mxu1 %v5694_v24 }
 0x14b   : > { %4003 = vmatprep.subr.bf16.mxu0 %v5699_v35  ;;  %4056 = vmatprep.subr.bf16.mxu1 %v5702_v11 }
 0x14e   : > { %4004 = vmatpush1.bf16.msra.mxu0 %v5697_v4  ;;  %4057 = vmatpush1.bf16.msra.mxu1 %v5700_v47  ;;  %v4120_v4 = vmul.f32 %v4112_v36, %v7438_v5 }
 0x151   : > { %4022 = vmatmul.mubr.bf16.vlgmr.msra.gmra.mrb[0].mxu0 %v3817_v48  ;;  %4075 = vmatmul.mubr.bf16.vlgmr.msra.gmra.mrb[0].mxu1 %v3817_v48 }
 0x152   : > { %4031 = vmatprep.mubr.bf16.mxu0 %v5871_v10  ;;  %4084 = vmatprep.mubr.bf16.mxu1 %v5871_v10  ;;  %v4113_v10 = vld [vmem:[%s7561_s5] sm:$0xff] }
 0x153   : > { %v4149_v21 = vmul.f32 %v4113_v10, %v7403_v14  ;;  %v4151_v24 = vmul.f32 %v4113_v10, %v7434_v52 }
 0x159   : > { %4032 = vmatmul.mubr.bf16.gmra.mrb[4].mxu0 %v3826_v9  ;;  %4085 = vmatmul.mubr.bf16.gmra.mrb[4].mxu1 %v3826_v9  ;;  %v4152_v9 = vmul.f32 %v4114_v17, %v7438_v5 }
 0x224   : > { %v4023_v37 = vpop.f32.mrb[0].mxu0  ;;  %v4076_v60 = vpop.f32.mrb[0].mxu1 }
 0x225   : > { %v5074_v20 = vadd.f32 %v4023_v37, %v729_v55  ;;  %v4025_v25 = vpop.f32.mrb[1].mxu0  ;;  %v7423_v46 = vpop.f32.mrb[1].mxu1  ;;  %v5082_v47 = vadd.f32 %v4076_v60, %v731_v30  ;;  %v7454_v60 = vld [vmem:[%s5981_s30 + $0x28] sm:$0xff] }
 0x226   : > { %v5075_v3 = vadd.f32 %v4025_v25, %v730_v23  ;;  %v4027_v26 = vpop.f32.mrb[2].mxu0  ;;  %v4080_v59 = vpop.f32.mrb[2].mxu1 }
 0x227   : > { %v4121_v16 = vadd.f32 %v5074_v20, %v4117_v15  ;;  %v5076_v32 = vadd.f32 %v4027_v26, %v733_v0  ;;  %v4029_v13 = vpop.f32.mrb[3].mxu0  ;;  %v7431_v39 = vpop.f32.mrb[3].mxu1  ;;  %v5084_v37 = vadd.f32 %v4080_v59, %v735_v38 }
 0x228   : > { %v4153_v1 = vadd.f32 %v5075_v3, %v4149_v21  ;;  %v5077_v56 = vadd.f32 %v4029_v13, %v734_v45  ;;  %v7457_v21 = vld [vmem:[%s5981_s30 + $0x38] sm:$0xff] }
 0x229   : > { %v5035_v19 = vmul.f32 -1.442695, %v4121_v16  ;;  %v4122_v44 = vadd.f32 %v5076_v32, %v4118_v7  ;;  %v739_v7 = vunpack.c.l.bf16 %v7454_v60  ;;  %v743_v59 = vunpack.c.l.bf16 %v7457_v21 }
 0x22a   : > { %v5039_v41 = vmul.f32 -1.442695, %v4153_v1  ;;  %v4154_v2 = vadd.f32 %v5077_v56, %v4150_v27 }
 0x22b   : > { %5703 = vpow2.f32 %v5035_v19  ;;  %v5036_v18 = vmul.f32 -1.442695, %v4122_v44 }
 0x22c   : > { %5705 = vpow2.f32 %v5039_v41  ;;  %v5040_v34 = vmul.f32 -1.442695, %v4154_v2  ;;  %v4033_v33 = vpop.f32.mrb[4].mxu0  ;;  %v4086_v6 = vpop.f32.mrb[4].mxu1 }
 0x22d   : > { %5707 = vpow2.f32 %v5036_v18  ;;  %v5078_v35 = vadd.f32 %v4033_v33, %v737_v29  ;;  %v4035_v11 = vpop.f32.mrb[5].mxu0  ;;  %v7446_v22 = vpop.f32.mrb[5].mxu1  ;;  %v5086_v16 = vadd.f32 %v4086_v6, %v739_v7 }
 0x22e   : > { %5709 = vpow2.f32 %v5040_v34  ;;  %v5079_v48 = vadd.f32 %v4035_v11, %v738_v28  ;;  %v4037_v62 = vpop.f32.mrb[6].mxu0  ;;  %v4090_v31 = vpop.f32.mrb[6].mxu1  ;;  %v732_v34 = vunpack.c.h.bf16 %v7429_v53  ;;  %v736_v11 = vunpack.c.h.bf16 %v7443_v12 }
 0x22f   : > { %v4123_v57 = vadd.f32 %v5078_v35, %v4119_v50  ;;  %v5080_v8 = vadd.f32 %v4037_v62, %v741_v51  ;;  %v4039_v42 = vpop.f32.mrb[7].mxu0  ;;  %v7451_v49 = vpop.f32.mrb[7].mxu1  ;;  %5711 = vtanh.f32 %v5082_v47  ;;  %v5088_v32 = vadd.f32 %v4090_v31, %v743_v59  ;;  %v4116_v47 = vld [vmem:[%s7562_s6 + $0x8] sm:$0xff] }
 0x230   : > { %v4155_v55 = vadd.f32 %v5079_v48, %v4151_v24  ;;  %v5081_v10 = vadd.f32 %v4039_v42, %v742_v61  ;;  %v4115_v24 = vld [vmem:[%s7562_s6] sm:$0xff]  ;;  %v5083_v53 = vadd.f32 %v7423_v46, %v732_v34  ;;  %v5085_v12 = vadd.f32 %v7431_v39, %v736_v11 }
 0x231   : > { %v5037_v23 = vmul.f32 -1.442695, %v4123_v57  ;;  %v4124_v36 = vadd.f32 %v5080_v8, %v4120_v4 }
 0x232   : > { %v5041_v15 = vmul.f32 -1.442695, %v4155_v55  ;;  %v4156_v0 = vadd.f32 %v5081_v10, %v4152_v9  ;;  %v740_v10 = vunpack.c.h.bf16 %v7454_v60 }
 0x233   : > { %5713 = vpow2.f32 %v5037_v23  ;;  %v5038_v17 = vmul.f32 -1.442695, %v4124_v36 }
 0x234   : > { %5715 = vpow2.f32 %v5041_v15  ;;  %v5042_v45 = vmul.f32 -1.442695, %v4156_v0  ;;  %v744_v15 = vunpack.c.h.bf16 %v7457_v21 }
 0x235   : > { %v5704_v40 = vpop.eup %5703  ;;  %5717 = vpow2.f32 %v5038_v17 }
 0x236   : > { %v5706_v20 = vpop.eup %5705  ;;  %v4137_v25 = vadd.f32 1.0, %v5704_v40  ;;  %5719 = vpow2.f32 %v5042_v45  ;;  %v5089_v40 = vadd.f32 %v7451_v49, %v744_v15 }
 0x237   : > { %v5708_v3 = vpop.eup %5707  ;;  %v4169_v26 = vadd.f32 1.0, %v5706_v20  ;;  %5721 = vtanh.f32 %v5084_v37 }
 0x238   : > { %v5710_v27 = vpop.eup %5709  ;;  %5723 = vrcp.f32 %v4137_v25  ;;  %v4138_v54 = vadd.f32 1.0, %v5708_v3 }
 0x239   : > { %5725 = vrcp.f32 %v4169_v26  ;;  %v4170_v63 = vadd.f32 1.0, %v5710_v27  ;;  %v5712_v13 = vpop.eup %5711 }
 0x23a   : > { %5727 = vrcp.f32 %v4138_v54 }
 0x23b   : > { %5729 = vrcp.f32 %v4170_v63 }
 0x23c   : > { %5731 = vtanh.f32 %v5086_v16 }
 0x23d   : > { %v5714_v1 = vpop.eup %5713  ;;  %5733 = vtanh.f32 %v5088_v32 }
 0x23e   : > { %v5716_v56 = vpop.eup %5715  ;;  %v4139_v58 = vadd.f32 1.0, %v5714_v1 }
 0x23f   : > { %v5718_v19 = vpop.eup %5717  ;;  %v4171_v44 = vadd.f32 1.0, %v5716_v56 }
 0x240   : > { %v5720_v29 = vpop.eup %5719  ;;  %5735 = vrcp.f32 %v4139_v58  ;;  %v4140_v30 = vadd.f32 1.0, %v5718_v19 }
 0x241   : > { %v5722_v41 = vpop.eup %5721  ;;  %5737 = vrcp.f32 %v4171_v44  ;;  %v4172_v2 = vadd.f32 1.0, %v5720_v29 }
 0x242   : > { %v5724_v28 = vpop.eup %5723  ;;  %5739 = vrcp.f32 %v4140_v30 }
 0x243   : > { %v5726_v18 = vpop.eup %5725  ;;  %v4189_v50 = vmul.f32 %v5724_v28, %v5712_v13  ;;  %5741 = vrcp.f32 %v4172_v2 }
 0x244   : > { %v5728_v51 = vpop.eup %5727  ;;  %v4181_v33 = vmul.f32 %v5726_v18, %v7403_v14 }
 0x245   : > { %v5730_v6 = vpop.eup %5729  ;;  %v4190_v61 = vmul.f32 %v5728_v51, %v5722_v41 }
 0x246   : > { %v7466_v35 = vadd.f32 %v4189_v50, %v4181_v33  ;;  %v4182_v4 = vmul.f32 %v5730_v6, %v7413_v43  ;;  %v5732_v48 = vpop.eup %5731 }
 0x247   : > { %v5734_v31 = vpop.eup %5733 }
 0x248   : > { %v4197_v14 = vmul.f32 %v7466_v35, %v4115_v24  ;;  %4261 = vst [vmem:[#allocation6] sm:$0xff] %v7466_v35  ;;  %v7476_v62 = vadd.f32 %v4190_v61, %v4182_v4 }
 0x24a   : > { %v5736_v9 = vpop.eup %5735  ;;  %v4201_v38 = vadd.f32 %v5083_v53, %v4197_v14  ;;  %v4198_v43 = vmul.f32 %v7476_v62, %v4116_v47  ;;  %4262 = vst [vmem:[#allocation6 + $0x8] sm:$0xff] %v7476_v62 }
 0x24b   : > { %v5738_v57 = vpop.eup %5737  ;;  %v4191_v8 = vmul.f32 %v5736_v9, %v5732_v48 }
 0x24c   : > { %v5740_v42 = vpop.eup %5739  ;;  %v5043_v46 = vmul.f32 -1.442695, %v4201_v38  ;;  %v4202_v55 = vadd.f32 %v5085_v12, %v4198_v43  ;;  %v4183_v23 = vmul.f32 %v5738_v57, %v7434_v52  ;;  %v5087_v52 = vadd.f32 %v7446_v22, %v740_v10 }
 0x24d   : > { %v5742_v36 = vpop.eup %5741  ;;  %v4192_v0 = vmul.f32 %v5740_v42, %v5734_v31 }
 0x24e   : > { %5743 = vpow2.f32 %v5043_v46  ;;  %v5044_v39 = vmul.f32 -1.442695, %v4202_v55  ;;  %v4195_v37 = vadd.f32 %v4191_v8, %v4183_v23  ;;  %v4184_v17 = vmul.f32 %v5742_v36, %v7438_v5 }
 0x250   : > { %5745 = vpow2.f32 %v5044_v39  ;;  %v4199_v60 = vmul.f32 %v4195_v37, %v4115_v24  ;;  %4263 = vst [vmem:[#allocation6 + $0x10] sm:$0xff] %v4195_v37  ;;  %v4196_v21 = vadd.f32 %v4192_v0, %v4184_v17 }
 0x252   : > { %v4203_v45 = vadd.f32 %v5087_v52, %v4199_v60  ;;  %v4200_v20 = vmul.f32 %v4196_v21, %v4116_v47  ;;  %4264 = vst [vmem:[#allocation6 + $0x18] sm:$0xff] %v4196_v21 }
 0x253   : > { %5795 = shalt.err (!%p5792_p10)
}
 0x254   : > { %s5796_s19 = scalar_lea.hbm %s7566_s10, 512 }
 0x255   : > { %p5797_p11 = scmp.ne.s32.totalorder %s7566_s10, %s5796_s19  ;;  %p5802_p0 = scmp.lt.u32.totalorder %s5796_s19, %s7566_s10 }
 0x257   : > { %p5798_p12 = pnand %p5797_p11, %p7487_p3 }
 0x259   : > { %p5799_p13 = pneg %p5798_p12 }
 0x25b   : > { %p5804_p1 = pnand %p5802_p0, %p5799_p13 }
 0x25d   : > { %5807 = shalt.err (!%p5804_p1)
}
 0x25e   : > { %s5874_s21 = smov 128   ;;  %s5875_s30 = smov 8   ;;  %v5045_v5 = vmul.f32 -1.442695, %v4203_v45  ;;  %v4204_v22 = vadd.f32 %v5089_v40, %v4200_v20  ;;  %v5744_v25 = vpop.eup %5743 }
 0x25f   : > { %5225 = dma.vmem_to_hbm [thread:$0]  (%p7487_p3), %s4307_s29, 512, %s7566_s10, [#allocation7], %s5874_s21, %s5874_s21, %s5875_s30   ;;  %v4217_v7 = vadd.f32 1.0, %v5744_v25  ;;  %v5746_v3 = vpop.eup %5745 }
 0x260   : > { %5747 = vpow2.f32 %v5045_v5  ;;  %v5046_v49 = vmul.f32 -1.442695, %v4204_v22  ;;  %v4218_v26 = vadd.f32 1.0, %v5746_v3  ;;  %s5876_s24 = smov [#allocation5]  }
 0x261   : > { %s4289_s28 = sshll.u32 %s5876_s24, 4  ;;  %s4290_s28 = int_to_ptr.vmem [resolvable:$true] %s4289_s28 }
 0x262   : > { %5749 = vpow2.f32 %v5046_v49  ;;  %s5808_s29 = scalar_lea.vmem %s4290_s28, 512  ;;  %p5815_p6 = scmp.lt.s32.totalorder %s4290_s28, %s4290_s28 }
 0x263   : > { %5751 = vtanh.f32 %v7466_v35  ;;  %p5809_p2 = scmp.ne.s32.totalorder %s4290_s28, %s5808_s29  ;;  %p5816_p7 = scmp.lt.s32.totalorder %s5808_s29, %s5808_s29 }
 0x264   : > { %5753 = vrcp.f32 %v4217_v7 }
 0x265   : > { %5755 = vtanh.f32 %v7476_v62  ;;  %p5810_p4 = pnand %p5809_p2, %p7487_p3  ;;  %p5817_p8 = por %p5816_p7, %p5815_p6 }
 0x266   : > { %5757 = vrcp.f32 %v4218_v26 }
 0x267   : > { %5759 = vtanh.f32 %v4195_v37  ;;  %p5811_p5 = pneg %p5810_p4 }
 0x269   : > { %p5818_p9 = pnand %p5817_p8, %p5811_p5 }
 0x26a   : > { %v5748_v59 = vpop.eup %5747 }
 0x26b   : > { %v4219_v27 = vadd.f32 1.0, %v5748_v59 }
 0x26c   : > { %v5750_v54 = vpop.eup %5749 }
 0x26d   : > { %5761 = vrcp.f32 %v4219_v27  ;;  %v4220_v63 = vadd.f32 1.0, %v5750_v54  ;;  %v5752_v16 = vpop.eup %5751 }
 0x26e   : > { %5763 = vtanh.f32 %v4196_v21  ;;  %v5754_v32 = vpop.eup %5753 }
 0x26f   : > { %5765 = vrcp.f32 %v4220_v63  ;;  %v5756_v13 = vpop.eup %5755  ;;  %v4233_v1 = vmul.f32 %v5754_v32, %v5752_v16 }
 0x270   : > { %v5758_v56 = vpop.eup %5757 }
 0x271   : > { %v4234_v58 = vmul.f32 %v5758_v56, %v5756_v13  ;;  %4257 = vst [vmem:[#allocation5] sm:$0xff] %v4233_v1  ;;  %v5760_v44 = vpop.eup %5759 }
 0x273   : > { %v5066_v19 = vpack.c.bf16 %v4234_v58, %v4233_v1  ;;  %4258 = vst [vmem:[#allocation5 + $0x8] sm:$0xff] %v4234_v58 }
 0x275   : > { %5067 = vst [vmem:[%s5986_s18] sm:$0xff] %v5066_v19  }
 0x277   : > { %v5762_v29 = vpop.eup %5761 }
 0x278   : > { %v5764_v30 = vpop.eup %5763  ;;  %v4235_v41 = vmul.f32 %v5762_v29, %v5760_v44 }
 0x279   : > { %v5766_v2 = vpop.eup %5765 }
 0x27a   : > { %v4236_v28 = vmul.f32 %v5766_v2, %v5764_v30  ;;  %4259 = vst [vmem:[#allocation5 + $0x10] sm:$0xff] %v4235_v41 }
 0x27c   : > { %v5071_v18 = vpack.c.bf16 %v4236_v28, %v4235_v41  ;;  %4260 = vst [vmem:[#allocation5 + $0x18] sm:$0xff] %v4236_v28 }
 0x27d   : > { %5821 = shalt.err (!%p5818_p9)
}
 0x27e   : > { %s5822_s12 = scalar_lea.hbm %s7565_s9, 512 }
 0x27f   : > { %p5823_p10 = scmp.ne.s32.totalorder %s7565_s9, %s5822_s12  ;;  %p5828_p13 = scmp.lt.u32.totalorder %s5822_s12, %s7565_s9 }
 0x281   : > { %p5824_p11 = pnand %p5823_p10, %p7487_p3 }
 0x283   : > { %p5825_p12 = pneg %p5824_p11 }
 0x285   : > { %p5830_p0 = pnand %p5828_p13, %p5825_p12 }
 0x287   : > { %5833 = shalt.err (!%p5830_p0)
}
 0x288   : > { %5223 = dma.vmem_to_hbm [thread:$0]  (%p7487_p3), %s4290_s28, 512, %s7565_s9, [#allocation3], %s5874_s21, %s5874_s21, %s5875_s30  }
 0x289   : > { %5073 = vst [vmem:[%s5986_s18 + $0x8] sm:$0xff] %v5071_v18  }
 0x28a   : > { %5851 = dma.done.wait (%p7487_p3), [#allocation3], 512  }
 0x28b   : > { %5853 = vsyncadd (%p7487_p3), [#allocation3], 4294966784 }
 0x28c   : > { %5855 = dma.done.wait (%p7487_p3), [#allocation7], 512  }
 0x28d   : > { %5857 = vsyncadd (%p7487_p3), [#allocation7], 4294966784 }
 0x28e PF: > { %s24_s15 = sadd.s32 1, %s5868_s15   ;;  %s7586_s13 = smov %s5864_s14 }
 0x28f   : > { %p21_p1 = scmp.ge.s32.totalorder %s24_s15, 4   ;;  %s7587_s14 = smov %s7589_s17 }
 0x291   :  { %23 = sbr.rel (!%p21_p1) target bundleno = 4 (0x4), region = 124 }
 0x298   :  { %4339 = vsyncpa [#allocation3], 1 }
 0x299   :  { %4341 = vsyncpa [#allocation3 + $0x1], 1 }
 0x29a   :  { %4342 = vsyncpa [#allocation7], 1 }
 0x29b   :  { %4343 = vsyncpa [#allocation4], 1 }
 0x29c   :  { %4345 = vsyncpa [#allocation4 + $0x1], 1 }

// kernel: forward.11
= control target key start
LH: loop header
LB: loop body
LE: loop exit
PB: predicated region body
PF: predicated region fallthrough
CT: control target
= control target key end

     0   :  { %s340_s1 = inlined_call_operand.vmem [shape: bf16[256,128], index: 1, kind: input, shape index: {}]   ;;  %s341_s0 = inlined_call_operand.vmem [shape: bf16[4,256], index: 0, kind: input, shape index: {}]   ;;  %s342_s2 = inlined_call_operand.vmem [shape: f32[1,128], index: 2, kind: input, shape index: {}]   ;;  %s343_s3 = inlined_call_operand.vmem [shape: f32[4,128], index: 3, kind: output, shape index: {}]  }
   0x1   :  { %v247_v0 = vld [vmem:[%s340_s1 + $0x40] sm:$0xff]   ;;  %v249_v2 = vld [vmem:[%s340_s1 + $0x48] sm:$0xff]   ;;  %v251_v4 = vld [vmem:[%s340_s1 + $0x50] sm:$0xff]  }
   0x2   :  { %v248_v1 = vld [vmem:[%s340_s1] sm:$0xff]   ;;  %225 = vmatprep.subr.bf16.mxu0 %v247_v0  ;;  %v250_v3 = vld [vmem:[%s340_s1 + $0x8] sm:$0xff]   ;;  %v252_v5 = vld [vmem:[%s340_s1 + $0x10] sm:$0xff]  }
   0x3   :  { %226 = vmatpush3.bf16.msra.mxu0 %v248_v1  ;;  %v253_v6 = vld [vmem:[%s340_s1 + $0x58] sm:$0xff]   ;;  %v255_v8 = vld [vmem:[%s340_s1 + $0x60] sm:$0xff]   ;;  %v257_v10 = vld [vmem:[%s340_s1 + $0x68] sm:$0xff]  }
   0x4   :  { %227 = vmatprep.subr.bf16.mxu0 %v249_v2  ;;  %v254_v7 = vld [vmem:[%s340_s1 + $0x18] sm:$0xff]   ;;  %v256_v9 = vld [vmem:[%s340_s1 + $0x20] sm:$0xff]   ;;  %v258_v13 = vld [vmem:[%s340_s1 + $0x28] sm:$0xff]  }
   0x5   :  { %v208_v11 = vld.sshfl [vmem:[%s341_s0] sm:$0x33 pattern:$0x76325410]  ;;  %v259_v14 = vld [vmem:[%s340_s1 + $0x70] sm:$0xff]   ;;  %v261_v16 = vld [vmem:[%s340_s1 + $0x78] sm:$0xff]  }
   0x6   :  { %v63_v12 = vcombine.high %v208_v11, %v208_v11  ;;  %v260_v15 = vld [vmem:[%s340_s1 + $0x30] sm:$0xff]   ;;  %v262_v17 = vld [vmem:[%s340_s1 + $0x38] sm:$0xff]   ;;  %v207_v19 = vld [vmem:[%s342_s2] ss:$0 sm:$0xff] }
   0x7   :  { %228 = vmatpush3.bf16.msra.mxu0 %v250_v3 }
   0x8   :  { %229 = vmatprep.subr.bf16.mxu0 %v251_v4  ;;  %194 = vmatprep.mubr.bf16.mxu0 %v63_v12 }
   0xb   :  { %230 = vmatpush3.bf16.msra.mxu0 %v252_v5 }
   0xc   :  { %231 = vmatprep.subr.bf16.mxu0 %v253_v6 }
   0xf   :  { %232 = vmatpush3.bf16.msra.mxu0 %v254_v7 }
  0x10   :  { %233 = vmatprep.subr.bf16.mxu0 %v255_v8 }
  0x13   :  { %234 = vmatpush3.bf16.msra.mxu0 %v256_v9 }
  0x14   :  { %235 = vmatprep.subr.bf16.mxu0 %v257_v10 }
  0x17   :  { %236 = vmatpush3.bf16.msra.mxu0 %v258_v13 }
  0x18   :  { %237 = vmatprep.subr.bf16.mxu0 %v259_v14 }
  0x1b   :  { %238 = vmatpush3.bf16.msra.mxu0 %v260_v15 }
  0x1c   :  { %239 = vmatprep.subr.bf16.mxu0 %v261_v16 }
  0x1f   :  { %240 = vmatpush3.bf16.msra.mxu0 %v262_v17 }
  0x22   :  { %195 = vmatmul.mubr.bf16.vlgmr.msra.gmra.mrb[0].mxu0 %v208_v11 }
  0xf5   :  { %v241_v18 = vpop.f32.mrb[0].mxu0 }
  0xf6   :  { %v242_v20 = vpop.f32.mrb[1].mxu0 }
  0xf7   :  { %v243_v21 = vadd.f32 %v242_v20, %v241_v18  ;;  %v244_v22 = vpop.f32.mrb[2].mxu0 }
  0xf8   :  { %v245_v23 = vpop.f32.mrb[3].mxu0 }
  0xf9   :  { %v197_v24 = vadd.f32 %v243_v21, %v207_v19 }
  0xfb   :  { %202 = vst [vmem:[%s343_s3] sm:$0xf] %v197_v24 }

// kernel: forward.10
= control target key start
LH: loop header
LB: loop body
LE: loop exit
PB: predicated region body
PF: predicated region fallthrough
CT: control target
= control target key end

     0   :  { %s11470_s0 = inlined_call_operand.vmem [shape: bf16[2,2,16,128], index: 0, kind: input, shape index: {}]   ;;  %s11471_s1 = inlined_call_operand.vmem [shape: bf16[16,64], index: 1, kind: input, shape index: {}]   ;;  %s11472_s2 = inlined_call_operand.vmem [shape: bf16[64,16], index: 2, kind: input, shape index: {}]   ;;  %s11473_s3 = inlined_call_operand.vmem [shape: f32[2,256], index: 3, kind: input, shape index: {}]   ;;  %s11474_s4 = inlined_call_operand.vmem [shape: f32[2,256], index: 4, kind: input, shape index: {}]   ;;  %s11475_s5 = inlined_call_operand.vmem [shape: bf16[256,128], index: 5, kind: input, shape index: {}]   ;;  %s11476_s6 = inlined_call_operand.vmem [shape: f32[1,128], index: 6, kind: input, shape index: {}]   ;;  %s11477_s7 = inlined_call_operand.vmem [shape: bf16[128,288], index: 7, kind: input, shape index: {}]   ;;  %s11478_s8 = inlined_call_operand.vmem [shape: f32[1,288], index: 8, kind: input, shape index: {}]   ;;  %s11479_s9 = inlined_call_operand.vmem [shape: bf16[288,288], index: 9, kind: input, shape index: {}]   ;;  %s11480_s10 = inlined_call_operand.vmem [shape: f32[1,288], index: 10, kind: input, shape index: {}]   ;;  %s11481_s11 = inlined_call_operand.vmem [shape: bf16[1026,512], index: 11, kind: input, shape index: {}]   ;;  %s11482_s12 = inlined_call_operand.vmem [shape: f32[1,512], index: 12, kind: input, shape index: {}]   ;;  %s11483_s13 = inlined_call_operand.vmem [shape: bf16[512,256], index: 13, kind: input, shape index: {}]   ;;  %s11484_s14 = inlined_call_operand.vmem [shape: f32[1,256], index: 14, kind: input, shape index: {}]   ;;  %s11485_s15 = inlined_call_operand.vmem [shape: bf16[512,1024], index: 15, kind: input, shape index: {}]   ;;  %s11486_s16 = inlined_call_operand.vmem [shape: f32[1,1024], index: 16, kind: input, shape index: {}]   ;;  %s11487_s17 = inlined_call_operand.vmem [shape: f32[4], index: 17, kind: input, shape index: {}]   ;;  %s11488_s18 = inlined_call_operand.vmem [shape: f32[8], index: 18, kind: input, shape index: {}]   ;;  %s11489_s19 = inlined_call_operand.vmem [shape: bf16[2,2,256], index: 19, kind: output, shape index: {0}]   ;;  %s11490_s20 = inlined_call_operand.hbm [shape: f32[2,256], index: 20, kind: output, shape index: {1}]   ;;  %s11491_s21 = inlined_call_operand.hbm [shape: f32[2,256], index: 21, kind: output, shape index: {2}]  }
   0x1   :  { %11502 = sst [smem:[#allocation16_spill]] %s11470_s0 }
   0x2   :  { %11503 = sst [smem:[#allocation17_spill]] %s11471_s1 }
   0x3   :  { %11504 = sst [smem:[#allocation18_spill]] %s11472_s2 }
   0x4   :  { %11505 = sst [smem:[#allocation19_spill]] %s11473_s3 }
   0x5   :  { %11506 = sst [smem:[#allocation20_spill]] %s11474_s4 }
   0x6   :  { %11507 = sst [smem:[#allocation21_spill]] %s11475_s5 }
   0x7   :  { %11508 = sst [smem:[#allocation22_spill]] %s11487_s17 }
   0x8   :  { %11509 = sst [smem:[#allocation23_spill]] %s11488_s18 }
   0x9   :  { %27 = vsyncpa [#allocation4], 0 }
   0xa   :  { %28 = vsyncpa [#allocation6], 0 }
   0xb   :  { %29 = vsyncpa [#allocation3], 0 }
   0xc   :  { %30 = vsyncpa [#allocation9], 0  ;;  %s9003_s2 = smov 0   ;;  %s9005_s25 = smov 0  }
   0xd   :  { %s9007_s26 = smov 0  }
   0xe LB: > { %11510 = sst [smem:[#allocation14_spill]] %s8871_s25  ;;  %s11497_s27 = sadd.s32 4294967295, %s8875_s26   ;;  %s8875_s26 = sphi %s9007_s26, %s36_s26   ;;  %s8871_s25 = sphi %s9005_s25, %s11530_s25   ;;  %s8867_s2 = sphi %s9003_s2, %s11529_s2  }
   0xf   : > { %s45_s3 = sadd.s32 1, %s8871_s25  ;;  %p7076_p1 = scmp.ge.s32.totalorder %s8875_s26, 1 }
  0x10   : > { %p46_p0 = scmp.ge.s32.totalorder %s45_s3, 2  ;;  %p549_p2 = scmp.lt.s32.totalorder %s8875_s26, 3 }
  0x11   : > { %p9030_p4 = scmp.eq.s32.totalorder %s11497_s27, 0  ;;  %s11514_s17 = sld [smem:[#allocation22_spill]] }
  0x12   : > { %s11532_s3 = smov (%p46_p0, %s45_s3), 0  ;;  %p9024_p3 = pnand %p7076_p1, %p549_p2 }
  0x13   : > { %11511 = sst [smem:[#allocation15_spill]] %s11532_s3  ;;  %s11515_s18 = sld [smem:[#allocation23_spill]] }
  0x14   : > { %s11512_s28 = scalar_select %p9024_p3, 1, 0 }
  0x15   : > { %s11513_s29 = scalar_select %p9030_p4, 1, 0 }
  0x16   : > { %p8034_p5 = pneg %p9024_p3 }
  0x17   : > { %s620_s30 = sshll.u32 %s11514_s17, 4  ;;  %s621_s30 = int_to_ptr.vmem [resolvable:$true] %s620_s30 }
  0x18   : > { %p9044_p6 = pnand %p9030_p4, %p8034_p5  ;;  %s8755_s24 = scalar_lea.vmem %s621_s30, 16 }
  0x19   : > { %s631_s23 = sshll.u32 %s11515_s18, 4  ;;  %p8756_p7 = scmp.ne.s32.totalorder %s621_s30, %s8755_s24  ;;  %s632_s23 = int_to_ptr.vmem [resolvable:$true] %s631_s23 }
  0x1a   : > { %p8757_p8 = pneg %p9044_p6  ;;  %p8763_p11 = scmp.lt.s32.totalorder %s621_s30, %s621_s30 }
  0x1b   : > { %p8764_p12 = scmp.lt.s32.totalorder %s8755_s24, %s8755_s24 }
  0x1c   : > { %p8758_p9 = pnand %p8757_p8, %p8756_p7 }
  0x1d   : > { %p8765_p13 = por %p8764_p12, %p8763_p11 }
  0x1e   : > { %p8759_p10 = pneg %p8758_p9 }
  0x20   : > { %p8766_p0 = pnand %p8765_p13, %p8759_p10 }
  0x22   : > { %8769 = shalt.err (!%p8766_p0)
}
  0x23   : > { %s8877_s0 = smov [#allocation2]   ;;  %s8770_s4 = scalar_lea.vmem %s632_s23, 16 }
  0x24   : > { %8037 = dma.vmem_to_smem (!%p9044_p6), %s621_s30, 16, %s8877_s0, [#allocation4]  }
  0x25   : > { %p8771_p1 = scmp.ne.s32.totalorder %s632_s23, %s8770_s4  ;;  %p8778_p4 = scmp.lt.s32.totalorder %s632_s23, %s632_s23 }
  0x26   : > { %p8779_p3 = scmp.lt.s32.totalorder %s8770_s4, %s8770_s4 }
  0x27   : > { %p8773_p2 = pnand %p8771_p1, %p8757_p8 }
  0x28   : > { %p8780_p7 = por %p8779_p3, %p8778_p4 }
  0x29   : > { %p8774_p5 = pneg %p8773_p2 }
  0x2b   : > { %p8781_p9 = pnand %p8780_p7, %p8774_p5 }
  0x2d   : > { %8784 = shalt.err (!%p8781_p9)
}
  0x2e   : > { %s8878_s5 = smov [#allocation5]   ;;  %p11517_p10 = scmp.ne.s32.totalorder %s11512_s28, 0 }
  0x2f   : > { %8040 = dma.vmem_to_smem (!%p9044_p6), %s632_s23, 16, %s8878_s5, [#allocation6]  }
  0x30   : > { %658 = sbr.rel (%p11517_p10) target bundleno = 3219 (0xc93), region = 96  ;;  %p11518_p11 = scmp.ne.s32.totalorder (!%p11517_p10), %s11513_s29, 0 }
  0x37   : > { %8850 = dma.done.wait (%p11518_p11), [#allocation4], 16  }
  0x38   : > { %8852 = vsyncadd (%p11518_p11), [#allocation4], 4294967280 }
  0x39   : > { %8854 = dma.done.wait (%p11518_p11), [#allocation6], 16  }
  0x3a   : > { %8856 = vsyncadd (%p11518_p11), [#allocation6], 4294967280 }
  0x3b   : > { %668 = sfence }
  0x3c   : > { %p742_p3 = scmp.lt.s32.totalorder %s8867_s2, 1  ;;  %s11519_s24 = sld [smem:[#allocation16_spill]] }
  0x3d   : > { %p7088_p4 = scmp.ne.s32.totalorder %s8867_s2, 0 }
  0x3e   : > { %s743_s30 = scalar_select %p742_p3, %s8867_s2, 1 }
  0x3f   : > { %774 = sbr.rel (%p7088_p4) target bundleno = 73 (0x49), region = 108  ;;  %s11520_s18 = sld [smem:[#allocation19_spill]] (!%p7088_p4) }
  0x40   : > { %s7803_s22 = sshll.u32 %s743_s30, 4  ;;  %s7087_s28 = sshll.u32 %s743_s30, 1 }
  0x41   : > { %s9074_s27 = scalar_lea.vmem %s11489_s19, %s7087_s28  ;;  %s11521_s30 = sld [smem:[#allocation20_spill]] (!%p7088_p4) }
  0x42   : > { %s9069_s0 = scalar_lea.vmem %s11519_s24, %s7803_s22 }
  0x45   : > { %v775_v0 = vld [vmem:[%s11520_s18] sm:$0xf] (!%p7088_p4) }
  0x46   : > { %776 = vst [vmem:[#allocation7] sm:$0xf] %v775_v0 }
  0x47   : > { %v777_v1 = vld [vmem:[%s11521_s30] sm:$0xf] }
  0x48   : > { %778 = vst [vmem:[#allocation8] sm:$0xf] %v777_v1 }
  0x49 PF: > { %s11522_s1 = sld [smem:[#allocation21_spill]]  ;;  %s7089_s28 = sshll.u32 %s8867_s2, 1  ;;  %v782_v7 = vlaneseq  ;;  %v8879_v20 = vmov 269488144   ;;  %v8880_v22 = vmov 1983009808  }
  0x4a   : > { %s790_s5 = sadd.s32 1, %s7089_s28  ;;  %s785_s22 = sld [smem:[#allocation2 + %s7089_s28]]  ;;  %v798_v21 = vunpack.c.l.s4 %v8879_v20  ;;  %v810_v23 = vunpack.c.l.s4 %v8880_v22  ;;  %v8120_v24 = vld [vmem:[%s11477_s7 + $0x4] ss:$12 sps:$4 sm:$0xff]   ;;  %v8122_v25 = vld [vmem:[%s11477_s7] ss:$12 sps:$4 sm:$0xff]  }
  0x4b   : > { %s791_s23 = sld [smem:[#allocation2 + %s790_s5]]  ;;  %v9105_v10 = vshrl.u32 %v782_v7, 7  ;;  %1175 = vmatprep.subr.bf16.mxu1 %v8120_v24  ;;  %v8124_v30 = vld [vmem:[%s11477_s7 + $0x1c] ss:$12 sps:$4 sm:$0xff]   ;;  %v8126_v31 = vld [vmem:[%s11477_s7 + $0x18] ss:$12 sps:$4 sm:$0xff]  }
  0x4c   : > { %v799_v28 = vunpack.c.0.s8 %v798_v21  ;;  %v811_v29 = vunpack.c.0.s8 %v810_v23  ;;  %1176 = vmatpush1.bf16.msra.mxu1 %v8122_v25  ;;  %v8128_v35 = vld [vmem:[%s11477_s7 + $0x34] ss:$12 sps:$4 sm:$0xff]   ;;  %v8130_v39 = vld [vmem:[%s11477_s7 + $0x30] ss:$12 sps:$4 sm:$0xff]   ;;  %v8132_v41 = vld [vmem:[%s11477_s7 + $0x4c] ss:$12 sps:$4 sm:$0xff]  }
  0x4d   : > { %vm784_vm0 = vcmp.eq.s32.totalorder %v9105_v10, 0  ;;  %vm789_vm1 = vcmp.eq.s32.totalorder %v9105_v10, 1  ;;  %1177 = vmatprep.subr.bf16.mxu1 %v8124_v30  ;;  %v8134_v44 = vld [vmem:[%s11477_s7 + $0x48] ss:$12 sps:$4 sm:$0xff]   ;;  %v8136_v47 = vld [vmem:[%s11477_s7 + $0x64] ss:$12 sps:$4 sm:$0xff]  }
  0x4e   : > { %v802_v33 = vsub.s32 %v799_v28, %v9105_v10  ;;  %v9156_v38 = vsub.s32 %v811_v29, %v9105_v10  ;;  %v8123_v46 = vld [vmem:[%s11477_s7 + $0x8] ss:$12 sps:$4 sm:$0xff]   ;;  %v8138_v49 = vld [vmem:[%s11477_s7 + $0x60] ss:$12 sps:$4 sm:$0xff]   ;;  %v8881_v52 = vmov 0.0   ;;  %v8882_v1 = vmov 0  }
  0x4f   : > { %v8104_v2 = vld [vmem:[%s11522_s1 + $0x40] sm:$0xff]   ;;  %v8106_v4 = vld [vmem:[%s11522_s1 + $0x48] sm:$0xff]   ;;  %v8108_v6 = vld [vmem:[%s11522_s1 + $0x50] sm:$0xff]   ;;  %1207 = vmatprep.mubr.bf16.mxu1 %v8882_v1  ;;  %vm8883_vm2 = vmmov 0   ;;  %vm1639_vm3 = vcmask 261120   ;;  %s8884_s25 = smov 56  }
  0x50   : > { %v8105_v3 = vld [vmem:[%s11522_s1] sm:$0xff]   ;;  %7807 = vmatprep.subr.bf16.mxu0 %v8104_v2  ;;  %v8107_v5 = vld [vmem:[%s11522_s1 + $0x8] sm:$0xff]   ;;  %v8109_v8 = vld [vmem:[%s11522_s1 + $0x10] sm:$0xff]   ;;  %v786_v13 = vstv %s785_s22  ;;  %1178 = vmatpush1.bf16.msra.mxu1 %v8126_v31  ;;  %s11500_s3 = smov 40   ;;  %s11499_s28 = smov 112   ;;  %vm1950_vm4 = vcmask 64512  }
  0x51   : > { %7808 = vmatpush3.bf16.msra.mxu0 %v8105_v3  ;;  %v8110_v9 = vld [vmem:[%s11522_s1 + $0x58] sm:$0xff]   ;;  %v8112_v12 = vld [vmem:[%s11522_s1 + $0x60] sm:$0xff]   ;;  %v792_v14 = vstv %s791_s23  ;;  %v787_v16 = vsel %vm784_vm0, %v786_v13, 0.0  ;;  %v8114_v17 = vld [vmem:[%s11522_s1 + $0x68] sm:$0xff]   ;;  %1179 = vmatprep.subr.bf16.mxu1 %v8128_v35  ;;  %s11523_s30 = sld [smem:[#allocation18_spill]]  ;;  %vm1828_vm5 = vcmask 457728  }
  0x52   : > { %7809 = vmatprep.subr.bf16.mxu0 %v8106_v4  ;;  %v8111_v11 = vld [vmem:[%s11522_s1 + $0x18] sm:$0xff]   ;;  %v8113_v15 = vld [vmem:[%s11522_s1 + $0x20] sm:$0xff]   ;;  %v793_v18 = vsel %vm789_vm1, %v792_v14, 0.0  ;;  %v8115_v19 = vld [vmem:[%s11522_s1 + $0x28] sm:$0xff]   ;;  %vm1837_vm6 = vcmask 326656   ;;  %vm1898_vm7 = vcmask 523264  }
  0x53   : > { %v8116_v26 = vld [vmem:[%s11522_s1 + $0x70] sm:$0xff]   ;;  %v794_v27 = vadd.f32 %v793_v18, %v787_v16  ;;  %v795_v34 = vld [vmem:[#allocation7] sm:$0xf]  ;;  %v8118_v36 = vld [vmem:[%s11522_s1 + $0x78] sm:$0xff]   ;;  %vm2048_vm8 = vcmask 125952   ;;  %vm2076_vm9 = vcmask 130048  }
  0x54   : > { %v8117_v32 = vld [vmem:[%s11522_s1 + $0x30] sm:$0xff]   ;;  %v8119_v42 = vld [vmem:[%s11522_s1 + $0x38] sm:$0xff]   ;;  %1180 = vmatpush1.bf16.msra.mxu1 %v8130_v39  ;;  %v8127_v53 = vld [vmem:[%s11477_s7 + $0x20] ss:$12 sps:$4 sm:$0xff]   ;;  %s11524_s24 = sld [smem:[#allocation17_spill]]  ;;  %vm2233_vm10 = vcmask 982016  }
  0x55   : > { %7810 = vmatpush3.bf16.msra.mxu0 %v8107_v5  ;;  %v9153_v37 = vrot.slane %v794_v27, %v802_v33  ;;  %1181 = vmatprep.subr.bf16.mxu1 %v8132_v41  ;;  %v8140_v51 = vld [vmem:[%s11477_s7 + $0x7c] ss:$12 sps:$4 sm:$0xff]   ;;  %v8142_v54 = vld [vmem:[%s11477_s7 + $0x78] ss:$12 sps:$4 sm:$0xff]   ;;  %v8143_v58 = vld [vmem:[%s11477_s7 + $0x80] ss:$12 sps:$4 sm:$0xff]  }
  0x56   : > { %7811 = vmatprep.subr.bf16.mxu0 %v8108_v6  ;;  %v8131_v55 = vld [vmem:[%s11477_s7 + $0x38] ss:$12 sps:$4 sm:$0xff]   ;;  %v8135_v56 = vld [vmem:[%s11477_s7 + $0x50] ss:$12 sps:$4 sm:$0xff]   ;;  %v8139_v57 = vld [vmem:[%s11477_s7 + $0x68] ss:$12 sps:$4 sm:$0xff]  }
  0x57   : > { %v805_v40 = vmul.f32 %v9153_v37, %v795_v34  ;;  %v8144_v59 = vld [vmem:[%s11477_s7 + $0x94] ss:$12 sps:$4 sm:$0xff]   ;;  %v8146_v60 = vld [vmem:[%s11477_s7 + $0x90] ss:$12 sps:$4 sm:$0xff]   ;;  %v8147_v61 = vld [vmem:[%s11477_s7 + $0x98] ss:$12 sps:$4 sm:$0xff]  }
  0x58   : > { %1182 = vmatpush1.bf16.msra.mxu1 %v8134_v44  ;;  %v8148_v62 = vld [vmem:[%s11477_s7 + $0xac] ss:$12 sps:$4 sm:$0xff]   ;;  %v8150_v63 = vld [vmem:[%s11477_s7 + $0xa8] ss:$12 sps:$4 sm:$0xff]   ;;  %v8151_v0 = vld [vmem:[%s11477_s7 + $0xb0] ss:$12 sps:$4 sm:$0xff]  }
  0x59   : > { %7812 = vmatpush3.bf16.msra.mxu0 %v8109_v8  ;;  %v815_v43 = vrot.slane %v805_v40, %v9156_v38  ;;  %1183 = vmatprep.subr.bf16.mxu1 %v8136_v47  ;;  %v8154_v2 = vld [vmem:[%s11479_s9 + $0x4] ss:$12 sps:$4 sm:$0xff]   ;;  %v7090_v5 = vld [vmem:[%s11476_s6] ss:$0 sm:$0xff]  ;;  %v8157_v16 = vld [vmem:[%s11479_s9 + $0x1c] ss:$12 sps:$4 sm:$0xff]  }
  0x5a   : > { %7813 = vmatprep.subr.bf16.mxu0 %v8110_v9  ;;  %v8196_v3 = vld [vmem:[%s11479_s9 + $0x184] ss:$12 sps:$4 sm:$0xff]   ;;  %v8152_v13 = vld [vmem:[%s11479_s9] ss:$12 sps:$4 sm:$0xff]   ;;  %v8161_v21 = vld [vmem:[%s11479_s9 + $0x48] ss:$12 sps:$4 sm:$0xff]  }
  0x5b   : > { %v816_v45 = vcombine.high %v815_v43, %v815_v43  ;;  %v9178_v48 = vpack.c.bf16 %v815_v43, %v815_v43  ;;  %v8194_v14 = vld [vmem:[%s11479_s9 + $0x180] ss:$12 sps:$4 sm:$0xff]   ;;  %v8166_v22 = vld [vmem:[%s11479_s9 + $0x64] ss:$12 sps:$4 sm:$0xff]   ;;  %v8169_v24 = vld [vmem:[%s11479_s9 + $0x7c] ss:$12 sps:$4 sm:$0xff]  }
  0x5c   : > { %1184 = vmatpush1.bf16.msra.mxu1 %v8138_v49  ;;  %v8160_v18 = vld [vmem:[%s11479_s9 + $0x34] ss:$12 sps:$4 sm:$0xff]   ;;  %v8163_v20 = vld [vmem:[%s11479_s9 + $0x4c] ss:$12 sps:$4 sm:$0xff]   ;;  %v8170_v27 = vld [vmem:[%s11479_s9 + $0x90] ss:$12 sps:$4 sm:$0xff]  }
  0x5d   : > { %7814 = vmatpush3.bf16.msra.mxu0 %v8111_v11  ;;  %v9183_v50 = vpack.c.bf16 %v816_v45, %v816_v45  ;;  %1185 = vmatprep.subr.bf16.mxu1 %v8140_v51  ;;  %v8164_v23 = vld [vmem:[%s11479_s9 + $0x60] ss:$12 sps:$4 sm:$0xff]   ;;  %v8167_v25 = vld [vmem:[%s11479_s9 + $0x78] ss:$12 sps:$4 sm:$0xff]   ;;  %v8173_v29 = vld [vmem:[%s11479_s9 + $0xa8] ss:$12 sps:$4 sm:$0xff]  }
  0x5e   : > { %7815 = vmatprep.subr.bf16.mxu0 %v8112_v12  ;;  %v8175_v28 = vld [vmem:[%s11479_s9 + $0xac] ss:$12 sps:$4 sm:$0xff]   ;;  %v8178_v30 = vld [vmem:[%s11479_s9 + $0xc4] ss:$12 sps:$4 sm:$0xff]   ;;  %v8184_v34 = vld [vmem:[%s11479_s9 + $0xf4] ss:$12 sps:$4 sm:$0xff]  }
  0x5f   : > { %988 = vmatprep.mubr.bf16.mxu0 %v9183_v50  ;;  %v8176_v31 = vld [vmem:[%s11479_s9 + $0xc0] ss:$12 sps:$4 sm:$0xff]   ;;  %v8179_v33 = vld [vmem:[%s11479_s9 + $0xd8] ss:$12 sps:$4 sm:$0xff]   ;;  %v8182_v35 = vld [vmem:[%s11479_s9 + $0xf0] ss:$12 sps:$4 sm:$0xff]  }
  0x60   : > { %1186 = vmatpush1.bf16.msra.mxu1 %v8142_v54  ;;  %v8185_v39 = vld [vmem:[%s11479_s9 + $0x108] ss:$12 sps:$4 sm:$0xff]   ;;  %v8190_v40 = vld [vmem:[%s11479_s9 + $0x124] ss:$12 sps:$4 sm:$0xff]   ;;  %v8188_v41 = vld [vmem:[%s11479_s9 + $0x120] ss:$12 sps:$4 sm:$0xff]  }
  0x61   : > { %7816 = vmatpush3.bf16.msra.mxu0 %v8113_v15  ;;  %1187 = vmatprep.subr.bf16.mxu1 %v8144_v59  ;;  %v8191_v43 = vld [vmem:[%s11479_s9 + $0x138] ss:$12 sps:$4 sm:$0xff]   ;;  %v8199_v44 = vld [vmem:[%s11479_s9 + $0x154] ss:$12 sps:$4 sm:$0xff]   ;;  %v8197_v45 = vld [vmem:[%s11479_s9 + $0x150] ss:$12 sps:$4 sm:$0xff]  }
  0x62   : > { %7817 = vmatprep.subr.bf16.mxu0 %v8114_v17  ;;  %v8155_v17 = vld [vmem:[%s11479_s9 + $0x18] ss:$12 sps:$4 sm:$0xff]   ;;  %v8203_v51 = vld [vmem:[%s11479_s9 + $0x168] ss:$12 sps:$4 sm:$0xff]   ;;  %v9354_v54 = vsub.s32 0, %v9105_v10  ;;  %s11525_s4 = smov 40  }
  0x63   : > { %v8200_v47 = vld [vmem:[%s11479_s9 + $0x198] ss:$12 sps:$4 sm:$0xff]   ;;  %s11526_s22 = smov 112   ;;  %s8889_s17 = smov 96   ;;  %vm2316_vm11 = vcmask 916480   ;;  %vm2366_vm12 = vcmask 785408  }
  0x64   : > { %1188 = vmatpush1.bf16.msra.mxu1 %v8146_v60  ;;  %v8205_v49 = vld [vmem:[%s11479_s9 + $0x16c] ss:$12 sps:$4 sm:$0xff]   ;;  %s7201_s18 = sshll.u32 %s8867_s2, 2  ;;  %vm3958_vm13 = vcmask 1040384   ;;  %vm2373_vm14 = vcmask 7168   ;;  %vm3954_vm15 = vcmask 15360  }
  0x65   : > { %7818 = vmatpush3.bf16.msra.mxu0 %v8115_v19  ;;  %1189 = vmatprep.subr.bf16.mxu1 %v8148_v62  ;;  %v8158_v19 = vld [vmem:[%s11479_s9 + $0x30] ss:$12 sps:$4 sm:$0xff]   ;;  %s2340_s23 = sadd.s32 1, %s7201_s18  ;;  %s11527_s1 = sadd.s32 4294967295, %s8875_s26  }
  0x66   : > { %7819 = vmatprep.subr.bf16.mxu0 %v8116_v26  ;;  %v8172_v26 = vld [vmem:[%s11479_s9 + $0x94] ss:$12 sps:$4 sm:$0xff]   ;;  %s10339_s2 = sld [smem:[#allocation5 + %s2340_s23]]  ;;  %p11411_p6 = scmp.eq.s32.totalorder %s11527_s1, 1 }
  0x68   : > { %1190 = vmatpush1.bf16.msra.mxu1 %v8150_v63 }
  0x69   : > { %7820 = vmatpush3.bf16.msra.mxu0 %v8117_v32  ;;  %1684 = vmatprep.subr.bf16.mxu1 %v8196_v3  ;;  %v8181_v32 = vld [vmem:[%s11479_s9 + $0xdc] ss:$12 sps:$4 sm:$0xff]  }
  0x6a   : > { %7821 = vmatprep.subr.bf16.mxu0 %v8118_v36  ;;  %v8187_v36 = vld [vmem:[%s11479_s9 + $0x10c] ss:$12 sps:$4 sm:$0xff]  }
  0x6d   : > { %7822 = vmatpush3.bf16.msra.mxu0 %v8119_v42  ;;  %v8193_v42 = vld [vmem:[%s11479_s9 + $0x13c] ss:$12 sps:$4 sm:$0xff]  }
  0x6e   : > { %7878 = vmatprep.subr.bf16.mxu0 %v8881_v52 }
  0x70   : > { %989 = vmatmul.mubr.bf16.vlgmr.msra.gmra.mrb[0].mxu0 %v9178_v48 }
  0x71   : > { %7879 = vmatpush3.bf16.msra.mxu0 %v8123_v46  ;;  %7894 = vmatprep.mubr.msk.bf16.mxu0 %vm8883_vm2, %v8881_v52  ;;  %v8202_v46 = vld [vmem:[%s11479_s9 + $0x19c] ss:$12 sps:$4 sm:$0xff]  }
  0x72   : > { %7880 = vmatprep.subr.bf16.mxu0 %v8881_v52 }
  0x75   : > { %7881 = vmatpush3.bf16.msra.mxu0 %v8127_v53  ;;  %v8206_v53 = vld [vmem:[%s11479_s9 + $0xc8] ss:$12 sps:$4 sm:$0xff]  }
  0x76   : > { %7882 = vmatprep.subr.bf16.mxu0 %v8881_v52 }
  0x79   : > { %7883 = vmatpush3.bf16.msra.mxu0 %v8131_v55  ;;  %v9357_v55 = vsub.s32 2, %v9105_v10 }
  0x7a   : > { %7884 = vmatprep.subr.bf16.mxu0 %v8881_v52 }
  0x7d   : > { %7885 = vmatpush3.bf16.msra.mxu0 %v8135_v56  ;;  %v1030_v56 = vld [vmem:[%s11478_s8] sm:$0x7] }
  0x7e   : > { %7886 = vmatprep.subr.bf16.mxu0 %v8881_v52  ;;  %v1043_v59 = vrot.slane %v1030_v56, %v9357_v55 }
  0x81   : > { %7887 = vmatpush3.bf16.msra.mxu0 %v8139_v57  ;;  %v9363_v57 = vsub.s32 1, %v9105_v10 }
  0x82   : > { %7888 = vmatprep.subr.bf16.mxu0 %v8881_v52 }
  0x83   : > { %v1039_v60 = vrot.slane %v1030_v56, %v9363_v57 }
  0x85   : > { %7889 = vmatpush3.bf16.msra.mxu0 %v8143_v58  ;;  %v1035_v58 = vrot.slane %v1030_v56, %v9354_v54 }
  0x86   : > { %7890 = vmatprep.subr.bf16.mxu0 %v8881_v52 }
  0x89   : > { %7891 = vmatpush3.bf16.msra.mxu0 %v8147_v61 }
  0x8a   : > { %7892 = vmatprep.subr.bf16.mxu0 %v8881_v52 }
  0x8d   : > { %7893 = vmatpush3.bf16.msra.mxu0 %v8151_v0 }
  0x8e   : > { %1643 = vmatprep.subr.bf16.mxu0 %v8154_v2 }
 0x143   : > { %v7823_v4 = vpop.f32.mrb[0].mxu0 }
 0x144   : > { %v7824_v6 = vpop.f32.mrb[1].mxu0 }
 0x145   : > { %v7825_v7 = vadd.f32 %v7824_v6, %v7823_v4  ;;  %v7826_v8 = vpop.f32.mrb[2].mxu0 }
 0x146   : > { %v7827_v9 = vpop.f32.mrb[3].mxu0 }
 0x147   : > { %v991_v11 = vadd.f32 %v7825_v7, %v7090_v5 }
 0x149   : > { %v996_v12 = vmax.f32 %v991_v11, 0.0 }
 0x14b   : > { %v997_v15 = vpack.c.bf16 %v996_v12, %v996_v12 }
 0x14d   : > { %1208 = vmatmul.mubr.bf16.vlgmr.msra.gmra.mrb[0].mxu1 %v997_v15  ;;  %7895 = vmatmul.mubr.bf16.vlgmr.msra.gmra.mrb[4].mxu0 %v997_v15  ;;  %v8207_v15 = vld [vmem:[%s11479_s9 + $0x8] ss:$12 sps:$4 sm:$0xff]  }
 0x14e   : > { %1644 = vmatpush1.bf16.msra.mxu0 %v8152_v13  ;;  %1685 = vmatpush1.bf16.msra.mxu1 %v8194_v14 }
 0x14f   : > { %1645 = vmatprep.subr.bf16.mxu0 %v8157_v16  ;;  %1716 = vmatprep.mubr.bf16.mxu1 %v8882_v1 }
 0x150   : > { %1686 = vmatprep.subr.bf16.mxu1 %v8202_v46 }
 0x152   : > { %1646 = vmatpush1.bf16.msra.mxu0 %v8155_v17  ;;  %1687 = vmatpush1.bf16.msra.mxu1 %v8200_v47  ;;  %v8208_v17 = vld [vmem:[%s11479_s9 + $0xe0] ss:$12 sps:$4 sm:$0xff]  }
 0x153   : > { %1647 = vmatprep.subr.bf16.mxu0 %v8160_v18  ;;  %7918 = vmatprep.subr.bf16.mxu1 %v8881_v52  ;;  %v8209_v18 = vld [vmem:[%s11479_s9 + $0x20] ss:$12 sps:$4 sm:$0xff]  }
 0x156   : > { %1648 = vmatpush1.bf16.msra.mxu0 %v8158_v19  ;;  %v8210_v19 = vld [vmem:[%s11479_s9 + $0xf8] ss:$12 sps:$4 sm:$0xff]  }
 0x157   : > { %1649 = vmatprep.subr.bf16.mxu0 %v8163_v20  ;;  %v8211_v20 = vld [vmem:[%s11479_s9 + $0x38] ss:$12 sps:$4 sm:$0xff]  }
 0x15a   : > { %1650 = vmatpush1.bf16.msra.mxu0 %v8161_v21  ;;  %v8212_v21 = vld [vmem:[%s11479_s9 + $0x110] ss:$12 sps:$4 sm:$0xff]  }
 0x15b   : > { %1651 = vmatprep.subr.bf16.mxu0 %v8166_v22  ;;  %v8213_v22 = vld [vmem:[%s11479_s9 + $0x50] ss:$12 sps:$4 sm:$0xff]  }
 0x15e   : > { %1652 = vmatpush1.bf16.msra.mxu0 %v8164_v23  ;;  %v8214_v23 = vld [vmem:[%s11479_s9 + $0x128] ss:$12 sps:$4 sm:$0xff]  }
 0x15f   : > { %1653 = vmatprep.subr.bf16.mxu0 %v8169_v24  ;;  %v8215_v24 = vld [vmem:[%s11479_s9 + $0x68] ss:$12 sps:$4 sm:$0xff]  }
 0x162   : > { %1654 = vmatpush1.bf16.msra.mxu0 %v8167_v25  ;;  %v8216_v25 = vld [vmem:[%s11479_s9 + $0x140] ss:$12 sps:$4 sm:$0xff]  }
 0x163   : > { %1655 = vmatprep.subr.bf16.mxu0 %v8172_v26  ;;  %v8217_v26 = vld [vmem:[%s11479_s9 + $0x80] ss:$12 sps:$4 sm:$0xff]  }
 0x166   : > { %1656 = vmatpush1.bf16.msra.mxu0 %v8170_v27  ;;  %v8218_v27 = vld [vmem:[%s11479_s9 + $0x158] ss:$12 sps:$4 sm:$0xff]  }
 0x167   : > { %1657 = vmatprep.subr.bf16.mxu0 %v8175_v28  ;;  %v8219_v28 = vld [vmem:[%s11479_s9 + $0x98] ss:$12 sps:$4 sm:$0xff]  }
 0x16a   : > { %1658 = vmatpush1.bf16.msra.mxu0 %v8173_v29  ;;  %v8220_v29 = vld [vmem:[%s11479_s9 + $0x170] ss:$12 sps:$4 sm:$0xff]  }
 0x16b   : > { %1659 = vmatprep.subr.bf16.mxu0 %v8178_v30  ;;  %v8221_v30 = vld [vmem:[%s11479_s9 + $0xb0] ss:$12 sps:$4 sm:$0xff]  }
 0x16e   : > { %1660 = vmatpush1.bf16.msra.mxu0 %v8176_v31  ;;  %v8222_v31 = vld [vmem:[%s11479_s9 + $0x188] ss:$12 sps:$4 sm:$0xff]  }
 0x16f   : > { %1661 = vmatprep.subr.bf16.mxu0 %v8181_v32  ;;  %v8223_v32 = vld [vmem:[%s11479_s9 + $0x1a0] ss:$12 sps:$4 sm:$0xff]  }
 0x172   : > { %1662 = vmatpush1.bf16.msra.mxu0 %v8179_v33  ;;  %v1334_v33 = vld [vmem:[%s11480_s10] sm:$0x7] }
 0x173   : > { %1663 = vmatprep.subr.bf16.mxu0 %v8184_v34  ;;  %v1339_v34 = vrot.slane %v1334_v33, %v9354_v54 }
 0x176   : > { %1664 = vmatpush1.bf16.msra.mxu0 %v8182_v35 }
 0x177   : > { %1665 = vmatprep.subr.bf16.mxu0 %v8187_v36  ;;  %v1343_v36 = vrot.slane %v1334_v33, %v9363_v57 }
 0x17a   : > { %1666 = vmatpush1.bf16.msra.mxu0 %v8185_v39 }
 0x17b   : > { %1667 = vmatprep.subr.bf16.mxu0 %v8190_v40 }
 0x17e   : > { %1668 = vmatpush1.bf16.msra.mxu0 %v8188_v41 }
 0x17f   : > { %1669 = vmatprep.subr.bf16.mxu0 %v8193_v42 }
 0x182   : > { %1670 = vmatpush1.bf16.msra.mxu0 %v8191_v43 }
 0x183   : > { %1671 = vmatprep.subr.bf16.mxu0 %v8199_v44 }
 0x186   : > { %1672 = vmatpush1.bf16.msra.mxu0 %v8197_v45 }
 0x187   : > { %1673 = vmatprep.subr.bf16.mxu0 %v8205_v49 }
 0x18a   : > { %1674 = vmatpush1.bf16.msra.mxu0 %v8203_v51 }
 0x18b   : > { %7838 = vmatprep.subr.bf16.mxu0 %v8206_v53 }
 0x220   : > { %v1209_v61 = vpop.f32.mrb[0].mxu1  ;;  %v1250_v62 = vpop.f32.mrb[4].mxu0 }
 0x221   : > { %v1210_v63 = vadd.f32 %v1209_v61, %v1035_v58  ;;  %v1251_v0 = vadd.f32 %v1250_v62, %v1043_v59  ;;  %v1211_v2 = vpop.f32.mrb[1].mxu1  ;;  %v7896_v3 = vpop.f32.mrb[5].mxu0  ;;  %v9448_v58 = vld [vmem:[%s9069_s0] sm:$0xff]  }
 0x222   : > { %v1212_v4 = vadd.f32 %v1211_v2, %v1039_v60  ;;  %v1213_v5 = vpop.f32.mrb[2].mxu1  ;;  %v1253_v6 = vpop.f32.mrb[6].mxu0  ;;  %v1955_v59 = vsel %vm1950_vm4, %v9448_v58, 0  ;;  %v1347_v2 = vrot.slane %v1334_v33, %v9357_v55 }
 0x223   : > { %v1256_v7 = vmax.f32 %v1210_v63, 0.0  ;;  %v1258_v8 = vmax.f32 %v1251_v0, 0.0  ;;  %v1214_v9 = vpop.f32.mrb[3].mxu1  ;;  %v7897_v11 = vpop.f32.mrb[7].mxu0 }
 0x224   : > { %v1257_v12 = vmax.f32 %v1212_v4, 0.0 }
 0x225   : > { %v1261_v13 = vpack.c.bf16 %v1258_v8, %v1258_v8  ;;  %v1259_v16 = vpack.c.bf16 %v1256_v7, %v1256_v7 }
 0x226   : > { %v1260_v14 = vpack.c.bf16 %v1257_v12, %v1257_v12  ;;  %v8226_v12 = vld [vmem:[%s11523_s30] sm:$0xff]  }
 0x227   : > { %7185 = vmatmul.mubr.msk.bf16.vlgmr.msra.gmra.mrb[4].mxu1 %vm1639_vm3, %v1261_v13 }
 0x228   : > { %1675 = vmatprep.mubr.bf16.mxu0 %v1260_v14  ;;  %7920 = vmatprep.mubr.msk.bf16.mxu1 %vm8883_vm2, %v8881_v52 }
 0x229   : > { %1676 = vmatmul.mubr.bf16.vlgmr.msra.gmra.mrb[8].mxu0 %v1259_v16  ;;  %7919 = vmatpush3.bf16.xpose.msra.mxu1 %v1955_v59 }
 0x22a   : > { %7839 = vmatpush3.bf16.msra.mxu0 %v8207_v15  ;;  %1757 = vmatprep.mubr.bf16.mxu0 %v1260_v14  ;;  %v8228_v14 = vld [vmem:[%s11523_s30 + $0x10] sm:$0xff]   ;;  %v8229_v15 = vld [vmem:[%s11523_s30 + $0x18] sm:$0xff]  }
 0x22b   : > { %7840 = vmatprep.subr.bf16.mxu0 %v8208_v17  ;;  %7924 = vmatprep.subr.bf16.mxu1 %v8881_v52 }
 0x22e   : > { %7841 = vmatpush3.bf16.msra.mxu0 %v8209_v18  ;;  %v8887_v18 = vmov 1934713408  }
 0x22f   : > { %7842 = vmatprep.subr.bf16.mxu0 %v8210_v19  ;;  %v1842_v19 = vunpack.c.l.s4 %v8887_v18 }
 0x232   : > { %7843 = vmatpush3.bf16.msra.mxu0 %v8211_v20  ;;  %v1843_v20 = vunpack.c.0.s8 %v1842_v19 }
 0x233   : > { %7844 = vmatprep.subr.bf16.mxu0 %v8212_v21 }
 0x236   : > { %7845 = vmatpush3.bf16.msra.mxu0 %v8213_v22 }
 0x237   : > { %7846 = vmatprep.subr.bf16.mxu0 %v8214_v23  ;;  %v9478_v23 = vsub.s32 %v1843_v20, %v9105_v10 }
 0x23a   : > { %7847 = vmatpush3.bf16.msra.mxu0 %v8215_v24 }
 0x23b   : > { %7848 = vmatprep.subr.bf16.mxu0 %v8216_v25 }
 0x23e   : > { %7849 = vmatpush3.bf16.msra.mxu0 %v8217_v26 }
 0x23f   : > { %7850 = vmatprep.subr.bf16.mxu0 %v8218_v27 }
 0x242   : > { %7851 = vmatpush3.bf16.msra.mxu0 %v8219_v28 }
 0x243   : > { %7852 = vmatprep.subr.bf16.mxu0 %v8220_v29 }
 0x246   : > { %7853 = vmatpush3.bf16.msra.mxu0 %v8221_v30  ;;  %v8225_v30 = vld [vmem:[%s9069_s0 + $0x8] sm:$0xff]   ;;  %s8888_s0 = smov 120  }
 0x247   : > { %7898 = vmatprep.subr.bf16.mxu0 %v8881_v52 }
 0x249   : > { %1758 = vmatmul.mubr.bf16.vlgmr.msra.gmra.mrb[12].mxu0 %v1259_v16 }
 0x24a   : > { %7899 = vmatpush3.bf16.msra.mxu0 %v8222_v31  ;;  %7902 = vmatprep.mubr.msk.bf16.mxu0 %vm8883_vm2, %v8881_v52 }
 0x24b   : > { %7900 = vmatprep.subr.bf16.mxu0 %v8881_v52 }
 0x24e   : > { %7901 = vmatpush3.bf16.msra.mxu0 %v8223_v32 }
 0x24f   : > { %7906 = vmatprep.subr.bf16.mxu0 %v8881_v52 }
 0x251   : > { %7903 = vmatmul.mubr.msk.bf16.vlgmr.msra.gmra.mrb[16].mxu0 %vm1639_vm3, %v1261_v13  ;;  %v8227_v13 = vld [vmem:[%s11523_s30 + $0x8] sm:$0xff]  }
 0x252   : > { %7914 = vmatprep.mubr.msk.bf16.mxu0 %vm8883_vm2, %v8881_v52  ;;  %7907 = vmatpush3.bf16.msra.mxu0 %v8226_v12 }
 0x253   : > { %7908 = vmatprep.subr.bf16.mxu0 %v8881_v52 }
 0x256   : > { %7909 = vmatpush3.bf16.msra.mxu0 %v8227_v13 }
 0x257   : > { %7910 = vmatprep.subr.bf16.mxu0 %v8881_v52 }
 0x25a   : > { %7911 = vmatpush3.bf16.msra.mxu0 %v8228_v14 }
 0x25b   : > { %7912 = vmatprep.subr.bf16.mxu0 %v8881_v52 }
 0x25e   : > { %7913 = vmatpush3.bf16.msra.mxu0 %v8229_v15 }
 0x25f   : > { %7930 = vmatprep.subr.bf16.mxu0 %v8881_v52 }
 0x2fa   : > { %v1718_v35 = vpop.f32.mrb[4].mxu1 }
 0x2fb   : > { %v1720_v39 = vpop.f32.mrb[5].mxu1 }
 0x2fc   : > { %v1677_v40 = vpop.f32.mrb[8].mxu0  ;;  %v1722_v41 = vpop.f32.mrb[6].mxu1 }
 0x2fd   : > { %v1678_v42 = vadd.f32 %v1677_v40, %v1339_v34  ;;  %v1679_v43 = vpop.f32.mrb[9].mxu0  ;;  %v1723_v44 = vpop.f32.mrb[7].mxu1 }
 0x2fe   : > { %v1680_v45 = vadd.f32 %v1679_v43, %v1343_v36  ;;  %v1681_v46 = vpop.f32.mrb[10].mxu0 }
 0x2ff   : > { %v9435_v47 = vadd.f32 %v1718_v35, %v1678_v42  ;;  %v1682_v49 = vpop.f32.mrb[11].mxu0  ;;  %v2006_v35 = vsel %vm1950_vm4, %v8225_v30, 0 }
 0x300   : > { %v9437_v51 = vadd.f32 %v1720_v39, %v1680_v45 }
 0x301   : > { %v1819_v53 = vpack.c.bf16 %v9435_v47, %v9435_v47 }
 0x302   : > { %v1820_v56 = vpack.c.bf16 %v9437_v51, %v9437_v51 }
 0x303   : > { %1824 = vrot.lane.b32.xlu0 %v1819_v53, %s8884_s25 }
 0x304   : > { %1833 = vrot.lane.b32.xlu1 %v1820_v56, %s11500_s3 }
 0x307   : > { %1826 = vrot.lane.b32.xlu0 %v1820_v56, %s8884_s25 }
 0x30b   : > { %1830 = vrot.lane.b32.xlu0 %v1820_v56, %s11499_s28 }
 0x31c   : > { %v7854_v60 = vpop.f32.mrb[12].mxu0 }
 0x31d   : > { %v7855_v61 = vpop.f32.mrb[13].mxu0 }
 0x31e   : > { %v7856_v62 = vadd.f32 %v7855_v61, %v7854_v60  ;;  %v7857_v63 = vpop.f32.mrb[14].mxu0 }
 0x31f   : > { %v7858_v0 = vpop.f32.mrb[15].mxu0 }
 0x320   : > { %v1760_v3 = vadd.f32 %v7856_v62, %v1347_v2 }
 0x324   : > { %v1799_v4 = vpop.f32.mrb[16].mxu0 }
 0x325   : > { %v9454_v5 = vadd.f32 %v1799_v4, %v1760_v3  ;;  %v7904_v6 = vpop.f32.mrb[17].mxu0 }
 0x326   : > { %v1802_v7 = vpop.f32.mrb[18].mxu0 }
 0x327   : > { %v1821_v8 = vpack.c.bf16 %v9454_v5, %v9454_v5  ;;  %v8099_v9 = vpack.i.bf16 %v9454_v5, %v9437_v51  ;;  %v7905_v11 = vpop.f32.mrb[19].mxu0 }
 0x329   : > { %1835 = vrot.lane.b32.xlu1 %v1821_v8, %s11500_s3 }
 0x375   : > { %v1825_v16 = vpop.permute.xlu0 %1824 }
 0x376   : > { %v1834_v22 = vpop.permute.xlu1 %1833 }
 0x379   : > { %v1827_v17 = vpop.permute.xlu0 %1826 }
 0x37a   : > { %v1829_v26 = vsel %vm1828_vm5, %v1825_v16, %v1827_v17 }
 0x37d   : > { %v1831_v21 = vpop.permute.xlu0 %1830 }
 0x37e   : > { %v1840_v24 = vcombine.low %v1819_v53, %v1831_v21 }
 0x380   : > { %v1847_v28 = vrot.slane %v1840_v24, %v9478_v23  ;;  %v8230_v24 = vld [vmem:[%s11524_s24] sm:$0xff]   ;;  %s7805_s24 = sadd.s32 2, %s7201_s18 }
 0x381   : > { %s2352_s5 = sadd.s32 1, %s7805_s24  ;;  %s10344_s3 = sld [smem:[#allocation5 + %s7805_s24]] }
 0x382   : > { %v1861_v32 = vshrl.u32 %v1847_v28, 16  ;;  %s10346_s28 = sld [smem:[#allocation5 + %s2352_s5]] }
 0x39b   : > { %v1836_v25 = vpop.permute.xlu1 %1835 }
 0x39c   : > { %v1838_v27 = vsel %vm1837_vm6, %v1834_v22, %v1836_v25 }
 0x39d   : > { %v1850_v29 = vcombine.low %v1829_v26, %v1838_v27 }
 0x39f   : > { %v1857_v31 = vrot.slane %v1850_v29, %v9478_v23 }
 0x3a1   : > { %v1860_v33 = vpack.i.b16 %v1857_v31, %v1847_v28  ;;  %v1862_v34 = vshrl.u32 %v1857_v31, 16 }
 0x3a3   : > { %7921 = vmatmul.mubr.msk.bf16.vlgmr.msra.gmra.mrb[8].mxu1 %vm1950_vm4, %v1860_v33  ;;  %v1863_v36 = vpack.i.b16 %v1862_v34, %v1861_v32 }
 0x3a4   : > { %7925 = vmatpush3.bf16.xpose.msra.mxu1 %v2006_v35  ;;  %7926 = vmatprep.mubr.msk.bf16.mxu1 %vm8883_vm2, %v8881_v52 }
 0x3a5   : > { %v1864_v39 = vcombine.low %v1860_v33, %v1863_v36  ;;  %7936 = vmatprep.subr.bf16.mxu1 %v8881_v52 }
 0x3a7   : > { %v1871_v40 = vrot.slane %v1864_v39, %v9156_v38 }
 0x3a9   : > { %1872 = vrot.lane.b32.xlu1 %v1871_v40, %s8888_s0 }
 0x3ab   : > { %7927 = vmatmul.mubr.msk.bf16.vlgmr.msra.gmra.mrb[12].mxu1 %vm1950_vm4, %v1863_v36 }
 0x3ac   : > { %7938 = vmatprep.mubr.msk.bf16.mxu1 %vm8883_vm2, %v8881_v52 }
 0x41b   : > { %v1873_v41 = vpop.permute.xlu1 %1872 }
 0x41c   : > { %7915 = vmatmul.mubr.msk.bf16.vlgmr.msra.gmra.mrb[20].mxu0 %vm1898_vm7, %v1873_v41 }
 0x41d   : > { %7932 = vmatprep.mubr.msk.bf16.mxu0 %vm8883_vm2, %v8881_v52 }
 0x476   : > { %v1991_v42 = vpop.f32.mrb[8].mxu1 }
 0x477   : > { %v7922_v43 = vpop.f32.mrb[9].mxu1 }
 0x478   : > { %v1994_v44 = vpop.f32.mrb[10].mxu1 }
 0x479   : > { %v7923_v45 = vpop.f32.mrb[11].mxu1 }
 0x47e   : > { %v2042_v46 = vpop.f32.mrb[12].mxu1 }
 0x47f   : > { %v7928_v49 = vpop.f32.mrb[13].mxu1 }
 0x480   : > { %v2045_v53 = vpop.f32.mrb[14].mxu1  ;;  %v8233_v49 = vld [vmem:[%s11481_s11 + $0x4] ss:$16 sps:$4 sm:$0xff]  }
 0x481   : > { %v7929_v56 = vpop.f32.mrb[15].mxu1  ;;  %v8234_v53 = vld [vmem:[%s11481_s11 + $0x8] ss:$16 sps:$4 sm:$0xff]  }
 0x482   : > { %v8236_v56 = vld [vmem:[%s11481_s11 + $0xc] ss:$16 sps:$4 sm:$0xff]  }
 0x4ef   : > { %v1936_v59 = vpop.f32.mrb[20].mxu0 }
 0x4f0   : > { %v1943_v60 = vcombine.high %v1936_v59, %v1936_v59  ;;  %v1992_v61 = vadd.f32 %v1991_v42, %v1936_v59  ;;  %v7916_v62 = vpop.f32.mrb[21].mxu0  ;;  %v8239_v59 = vld [vmem:[%s11481_s11 + $0x24] ss:$16 sps:$4 sm:$0xff]  }
 0x4f1   : > { %v1939_v63 = vpop.f32.mrb[22].mxu0  ;;  %v8240_v62 = vld [vmem:[%s11481_s11 + $0x28] ss:$16 sps:$4 sm:$0xff]  }
 0x4f2   : > { %v7917_v0 = vpop.f32.mrb[23].mxu0  ;;  %v2049_v2 = vsel %vm2048_vm8, %v1992_v61, -inf  ;;  %v2043_v3 = vadd.f32 %v2042_v46, %v1943_v60  ;;  %v8231_v46 = vld [vmem:[%s11481_s11] ss:$16 sps:$4 sm:$0xff]   ;;  %v8242_v60 = vld [vmem:[%s11481_s11 + $0x2c] ss:$16 sps:$4 sm:$0xff]  }
 0x4f3   : > { %2050 = vmax.xlane.f32.xlu0 %v2049_v2  ;;  %v8245_v63 = vld [vmem:[%s11481_s11 + $0x44] ss:$16 sps:$4 sm:$0xff]   ;;  %v8248_v0 = vld [vmem:[%s11481_s11 + $0x4c] ss:$16 sps:$4 sm:$0xff]   ;;  %v8243_v2 = vld [vmem:[%s11481_s11 + $0x40] ss:$16 sps:$4 sm:$0xff]  }
 0x4f4   : > { %v2052_v4 = vsel %vm2048_vm8, %v2043_v3, -inf }
 0x4f5   : > { %2053 = vmax.xlane.f32.xlu1 %v2052_v4  ;;  %v8251_v4 = vld [vmem:[%s11481_s11 + $0x64] ss:$16 sps:$4 sm:$0xff]  }
 0x506   : > { %2073 = vrot.lane.b32.xlu1 %v9448_v58, %s8888_s0 }
 0x580   : > { %v2051_v6 = vpop.xlane.xlu0 %2050 }
 0x581   : > { %v2055_v7 = vsub.f32 %v1992_v61, %v2051_v6  ;;  %v8237_v61 = vld [vmem:[%s11481_s11 + $0x20] ss:$16 sps:$4 sm:$0xff]   ;;  %v8254_v6 = vld [vmem:[%s11481_s11 + $0x6c] ss:$16 sps:$4 sm:$0xff]  }
 0x582   : > { %v2054_v8 = vpop.xlane.xlu1 %2053 }
 0x583   : > { %v2057_v11 = vmul.f32 1.442695, %v2055_v7  ;;  %v2056_v12 = vsub.f32 %v2043_v3, %v2054_v8  ;;  %v8246_v3 = vld [vmem:[%s11481_s11 + $0x48] ss:$16 sps:$4 sm:$0xff]   ;;  %v8249_v7 = vld [vmem:[%s11481_s11 + $0x60] ss:$16 sps:$4 sm:$0xff]  }
 0x584   : > { %v8252_v8 = vld [vmem:[%s11481_s11 + $0x68] ss:$16 sps:$4 sm:$0xff]  }
 0x585   : > { %8715 = vpow2.f32 %v2057_v11  ;;  %v2059_v13 = vmul.f32 1.442695, %v2056_v12  ;;  %v8257_v11 = vld [vmem:[%s11481_s11 + $0x84] ss:$16 sps:$4 sm:$0xff]   ;;  %v8260_v12 = vld [vmem:[%s11481_s11 + $0x8c] ss:$16 sps:$4 sm:$0xff]  }
 0x586   : > { %v2074_v18 = vpop.permute.xlu1 %2073 }
 0x587   : > { %8717 = vpow2.f32 %v2059_v13  ;;  %7931 = vmatpush3.bf16.msra.mxu0 %v2074_v18  ;;  %v8255_v13 = vld [vmem:[%s11481_s11 + $0x80] ss:$16 sps:$4 sm:$0xff]   ;;  %v8264_v18 = vld [vmem:[%s11481_s11 + $0xa8] ss:$16 sps:$4 sm:$0xff]  }
 0x588   : > { %7942 = vmatprep.subr.bf16.mxu0 %v8881_v52 }
 0x58f   : > { %v8716_v14 = vpop.eup %8715 }
 0x590   : > { %v2061_v15 = vsel %vm2048_vm8, %v8716_v14, 0.0 }
 0x591   : > { %v8718_v16 = vpop.eup %8717  ;;  %2062 = vadd.xlane.f32.xlu0 %v2061_v15  ;;  %v8263_v15 = vld [vmem:[%s11481_s11 + $0xa4] ss:$16 sps:$4 sm:$0xff]  }
 0x592   : > { %v2064_v17 = vsel %vm2048_vm8, %v8718_v16, 0.0 }
 0x595   : > { %2065 = vadd.xlane.f32.xlu0 %v2064_v17  ;;  %v8261_v17 = vld [vmem:[%s11481_s11 + $0xa0] ss:$16 sps:$4 sm:$0xff]  }
 0x5ab   : > { %2120 = vrot.lane.b32.xlu0 %v8225_v30, %s8888_s0 }
 0x61e   : > { %v2063_v58 = vpop.xlane.xlu0 %2062 }
 0x61f   : > { %8719 = vrcp.f32 %v2063_v58  ;;  %v8269_v58 = vld [vmem:[%s11481_s11 + $0xc4] ss:$16 sps:$4 sm:$0xff]  }
 0x622   : > { %v2066_v19 = vpop.xlane.xlu0 %2065 }
 0x623   : > { %8721 = vrcp.f32 %v2066_v19  ;;  %v8272_v19 = vld [vmem:[%s11481_s11 + $0xcc] ss:$16 sps:$4 sm:$0xff]  }
 0x626   : > { %v2121_v20 = vpop.permute.xlu0 %2120 }
 0x627   : > { %7937 = vmatpush3.bf16.msra.mxu1 %v2121_v20  ;;  %v8267_v20 = vld [vmem:[%s11481_s11 + $0xc0] ss:$16 sps:$4 sm:$0xff]  }
 0x628   : > { %3971 = vmatprep.subr.bf16.mxu1 %v8233_v49  ;;  %v8305_v49 = vld [vmem:[%s11481_s11 + $0x184] ss:$16 sps:$4 sm:$0xff]  }
 0x629   : > { %v8720_v21 = vpop.eup %8719 }
 0x62a   : > { %v2069_v22 = vmul.f32 %v8720_v21, %v8716_v14  ;;  %v8258_v14 = vld [vmem:[%s11481_s11 + $0x88] ss:$16 sps:$4 sm:$0xff]  }
 0x62b   : > { %v8270_v21 = vld [vmem:[%s11481_s11 + $0xc8] ss:$16 sps:$4 sm:$0xff]  }
 0x62c   : > { %v2071_v25 = vpack.c.bf16 %v2069_v22, %v2069_v22 }
 0x62d   : > { %v8722_v26 = vpop.eup %8721 }
 0x62e   : > { %v2070_v27 = vmul.f32 %v8722_v26, %v8718_v16  ;;  %7933 = vmatmul.mubr.msk.bf16.vlgmr.msra.gmra.mrb[24].mxu0 %vm2076_vm9, %v2071_v25  ;;  %v8266_v16 = vld [vmem:[%s11481_s11 + $0xac] ss:$16 sps:$4 sm:$0xff]   ;;  %v8273_v25 = vld [vmem:[%s11481_s11 + $0xe0] ss:$16 sps:$4 sm:$0xff]   ;;  %v8276_v26 = vld [vmem:[%s11481_s11 + $0xe8] ss:$16 sps:$4 sm:$0xff]  }
 0x62f   : > { %7943 = vmatpush3.bf16.msra.mxu0 %v8230_v24  ;;  %7944 = vmatprep.mubr.msk.bf16.mxu0 %vm8883_vm2, %v8881_v52  ;;  %v8278_v24 = vld [vmem:[%s11481_s11 + $0xec] ss:$16 sps:$4 sm:$0xff]  }
 0x630   : > { %v7198_v28 = vpack.c.bf16 %v2070_v27, %v2069_v22  ;;  %v2072_v29 = vpack.c.bf16 %v2070_v27, %v2070_v27  ;;  %4176 = vmatprep.subr.bf16.mxu0 %v8236_v56  ;;  %v8275_v22 = vld [vmem:[%s11481_s11 + $0xe4] ss:$16 sps:$4 sm:$0xff]   ;;  %v8303_v56 = vld [vmem:[%s11481_s11 + $0x180] ss:$16 sps:$4 sm:$0xff]  }
 0x631   : > { %v8281_v27 = vld [vmem:[%s11481_s11 + $0x104] ss:$16 sps:$4 sm:$0xff]  }
 0x632   : > { %7939 = vmatmul.mubr.msk.bf16.vlgmr.msra.gmra.mrb[16].mxu1 %vm2076_vm9, %v2072_v29  ;;  %v2175_v30 = vrot.slane %v7198_v28, %v9156_v38  ;;  %v8284_v28 = vld [vmem:[%s11481_s11 + $0x10c] ss:$16 sps:$4 sm:$0xff]   ;;  %v8279_v29 = vld [vmem:[%s11481_s11 + $0x100] ss:$16 sps:$4 sm:$0xff]  }
 0x633   : > { %3972 = vmatpush1.bf16.msra.mxu1 %v8231_v46  ;;  %v8300_v46 = vld [vmem:[%s11481_s11 + $0x168] ss:$16 sps:$4 sm:$0xff]  }
 0x634   : > { %3973 = vmatprep.subr.bf16.mxu1 %v8239_v59  ;;  %v8306_v59 = vld [vmem:[%s11481_s11 + $0x188] ss:$16 sps:$4 sm:$0xff]  }
 0x636   : > { %7945 = vmatmul.mubr.msk.bf16.vlgmr.msra.gmra.mrb[28].mxu0 %vm2076_vm9, %v2175_v30  ;;  %v8282_v30 = vld [vmem:[%s11481_s11 + $0x108] ss:$16 sps:$4 sm:$0xff]  }
 0x637   : > { %4177 = vmatpush1.bf16.msra.mxu0 %v8234_v53  ;;  %3974 = vmatpush1.bf16.msra.mxu1 %v8237_v61  ;;  %v8308_v53 = vld [vmem:[%s11481_s11 + $0x18c] ss:$16 sps:$4 sm:$0xff]  }
 0x638   : > { %4178 = vmatprep.subr.bf16.mxu0 %v8242_v60  ;;  %3975 = vmatprep.subr.bf16.mxu1 %v8245_v63  ;;  %v8311_v60 = vld [vmem:[%s11481_s11 + $0x1a4] ss:$16 sps:$4 sm:$0xff]   ;;  %v8314_v61 = vld [vmem:[%s11481_s11 + $0x1ac] ss:$16 sps:$4 sm:$0xff]   ;;  %v8312_v63 = vld [vmem:[%s11481_s11 + $0x1a8] ss:$16 sps:$4 sm:$0xff]  }
 0x63b   : > { %4179 = vmatpush1.bf16.msra.mxu0 %v8240_v62  ;;  %3976 = vmatpush1.bf16.msra.mxu1 %v8243_v2  ;;  %v8309_v62 = vld [vmem:[%s11481_s11 + $0x1a0] ss:$16 sps:$4 sm:$0xff]   ;;  %v8320_v2 = vld [vmem:[%s11481_s11 + $0x1cc] ss:$16 sps:$4 sm:$0xff]  }
 0x63c   : > { %4180 = vmatprep.subr.bf16.mxu0 %v8248_v0  ;;  %3977 = vmatprep.subr.bf16.mxu1 %v8251_v4  ;;  %v8317_v0 = vld [vmem:[%s11481_s11 + $0x1c4] ss:$16 sps:$4 sm:$0xff]   ;;  %v8318_v4 = vld [vmem:[%s11481_s11 + $0x1c8] ss:$16 sps:$4 sm:$0xff]  }
 0x63f   : > { %4181 = vmatpush1.bf16.msra.mxu0 %v8246_v3  ;;  %3978 = vmatpush1.bf16.msra.mxu1 %v8249_v7  ;;  %v8315_v3 = vld [vmem:[%s11481_s11 + $0x1c0] ss:$16 sps:$4 sm:$0xff]   ;;  %v8326_v7 = vld [vmem:[%s11481_s11 + $0x1ec] ss:$16 sps:$4 sm:$0xff]  }
 0x640   : > { %4182 = vmatprep.subr.bf16.mxu0 %v8254_v6  ;;  %3979 = vmatprep.subr.bf16.mxu1 %v8257_v11  ;;  %v8323_v6 = vld [vmem:[%s11481_s11 + $0x1e4] ss:$16 sps:$4 sm:$0xff]   ;;  %v8324_v11 = vld [vmem:[%s11481_s11 + $0x1e8] ss:$16 sps:$4 sm:$0xff]  }
 0x643   : > { %4183 = vmatpush1.bf16.msra.mxu0 %v8252_v8  ;;  %3980 = vmatpush1.bf16.msra.mxu1 %v8255_v13  ;;  %v8321_v8 = vld [vmem:[%s11481_s11 + $0x1e0] ss:$16 sps:$4 sm:$0xff]   ;;  %v8329_v13 = vld [vmem:[%s11481_s11 + $0x204] ss:$16 sps:$4 sm:$0xff]  }
 0x644   : > { %4184 = vmatprep.subr.bf16.mxu0 %v8260_v12  ;;  %3981 = vmatprep.subr.bf16.mxu1 %v8263_v15 }
 0x647   : > { %4185 = vmatpush1.bf16.msra.mxu0 %v8258_v14  ;;  %3982 = vmatpush1.bf16.msra.mxu1 %v8261_v17  ;;  %v8332_v14 = vld [vmem:[%s11481_s11 + $0x20c] ss:$16 sps:$4 sm:$0xff]  }
 0x648   : > { %4186 = vmatprep.subr.bf16.mxu0 %v8266_v16  ;;  %3983 = vmatprep.subr.bf16.mxu1 %v8269_v58 }
 0x64b   : > { %4187 = vmatpush1.bf16.msra.mxu0 %v8264_v18  ;;  %3984 = vmatpush1.bf16.msra.mxu1 %v8267_v20 }
 0x64c   : > { %4188 = vmatprep.subr.bf16.mxu0 %v8272_v19  ;;  %3985 = vmatprep.subr.bf16.mxu1 %v8275_v22 }
 0x64f   : > { %4189 = vmatpush1.bf16.msra.mxu0 %v8270_v21  ;;  %3986 = vmatpush1.bf16.msra.mxu1 %v8273_v25 }
 0x650   : > { %4190 = vmatprep.subr.bf16.mxu0 %v8278_v24  ;;  %3987 = vmatprep.subr.bf16.mxu1 %v8281_v27 }
 0x653   : > { %4191 = vmatpush1.bf16.msra.mxu0 %v8276_v26  ;;  %3988 = vmatpush1.bf16.msra.mxu1 %v8279_v29 }
 0x654   : > { %4192 = vmatprep.subr.bf16.mxu0 %v8284_v28 }
 0x657   : > { %4193 = vmatpush1.bf16.msra.mxu0 %v8282_v30 }
 0x701   : > { %v9511_v31 = vpop.f32.mrb[24].mxu0 }
 0x702   : > { %v7934_v32 = vpop.f32.mrb[25].mxu0 }
 0x703   : > { %v2117_v33 = vpop.f32.mrb[26].mxu0  ;;  %v8287_v32 = vld [vmem:[%s11481_s11 + $0x124] ss:$16 sps:$4 sm:$0xff]  }
 0x704   : > { %v7935_v34 = vpop.f32.mrb[27].mxu0  ;;  %v8290_v33 = vld [vmem:[%s11481_s11 + $0x12c] ss:$16 sps:$4 sm:$0xff]   ;;  %3989 = vmatprep.subr.bf16.mxu1 %v8287_v32 }
 0x705   : > { %v9513_v35 = vpop.f32.mrb[16].mxu1  ;;  %v8285_v34 = vld [vmem:[%s11481_s11 + $0x120] ss:$16 sps:$4 sm:$0xff]   ;;  %4194 = vmatprep.subr.bf16.mxu0 %v8290_v33 }
 0x706   : > { %v7940_v36 = vpop.f32.mrb[17].mxu1  ;;  %3990 = vmatpush1.bf16.msra.mxu1 %v8285_v34 }
 0x707   : > { %v2163_v39 = vpop.f32.mrb[18].mxu1  ;;  %v8288_v36 = vld [vmem:[%s11481_s11 + $0x128] ss:$16 sps:$4 sm:$0xff]  }
 0x708   : > { %v7941_v40 = vpop.f32.mrb[19].mxu1  ;;  %v8293_v39 = vld [vmem:[%s11481_s11 + $0x144] ss:$16 sps:$4 sm:$0xff]   ;;  %4195 = vmatpush1.bf16.msra.mxu0 %v8288_v36 }
 0x709   : > { %v2219_v41 = vpop.f32.mrb[28].mxu0  ;;  %v8296_v40 = vld [vmem:[%s11481_s11 + $0x14c] ss:$16 sps:$4 sm:$0xff]   ;;  %3991 = vmatprep.subr.bf16.mxu1 %v8293_v39 }
 0x70a   : > { %2227 = vrot.lane.b32.xlu1 %v2219_v41, %s8888_s0  ;;  %v7946_v42 = vpop.f32.mrb[29].mxu0  ;;  %v2226_v44 = vcombine.high %v2219_v41, %v2219_v41  ;;  %v8291_v41 = vld [vmem:[%s11481_s11 + $0x140] ss:$16 sps:$4 sm:$0xff]   ;;  %4196 = vmatprep.subr.bf16.mxu0 %v8296_v40 }
 0x70b   : > { %v2222_v43 = vpop.f32.mrb[30].mxu0  ;;  %v8294_v42 = vld [vmem:[%s11481_s11 + $0x148] ss:$16 sps:$4 sm:$0xff]   ;;  %3992 = vmatpush1.bf16.msra.mxu1 %v8291_v41  ;;  %v8327_v40 = vld [vmem:[%s11481_s11 + $0x200] ss:$16 sps:$4 sm:$0xff]  }
 0x70c   : > { %v7947_v45 = vpop.f32.mrb[31].mxu0  ;;  %v8299_v43 = vld [vmem:[%s11481_s11 + $0x164] ss:$16 sps:$4 sm:$0xff]   ;;  %4197 = vmatpush1.bf16.msra.mxu0 %v8294_v42  ;;  %v8330_v41 = vld [vmem:[%s11481_s11 + $0x208] ss:$16 sps:$4 sm:$0xff]  }
 0x70d   : > { %v8297_v45 = vld [vmem:[%s11481_s11 + $0x160] ss:$16 sps:$4 sm:$0xff]   ;;  %3993 = vmatprep.subr.bf16.mxu1 %v8299_v43 }
 0x70e   : > { %2229 = vrot.lane.b32.xlu1 %v2226_v44, %s8888_s0  ;;  %v8302_v44 = vld [vmem:[%s11481_s11 + $0x16c] ss:$16 sps:$4 sm:$0xff]  }
 0x70f   : > { %4198 = vmatprep.subr.bf16.mxu0 %v8302_v44  ;;  %3994 = vmatpush1.bf16.msra.mxu1 %v8297_v45 }
 0x710   : > { %4199 = vmatpush1.bf16.msra.mxu0 %v8300_v46  ;;  %3995 = vmatprep.subr.bf16.mxu1 %v8305_v49  ;;  %v8333_v46 = vld [vmem:[%s11481_s11 + $0x220] ss:$16 sps:$4 sm:$0xff]   ;;  %v8336_v49 = vld [vmem:[%s11481_s11 + $0x228] ss:$16 sps:$4 sm:$0xff]  }
 0x711   : > { %4200 = vmatprep.subr.bf16.mxu0 %v8308_v53 }
 0x713   : > { %3996 = vmatpush1.bf16.msra.mxu1 %v8303_v56 }
 0x714   : > { %4201 = vmatpush1.bf16.msra.mxu0 %v8306_v59  ;;  %3997 = vmatprep.subr.bf16.mxu1 %v8311_v60 }
 0x715   : > { %4202 = vmatprep.subr.bf16.mxu0 %v8314_v61 }
 0x717   : > { %3998 = vmatpush1.bf16.msra.mxu1 %v8309_v62  ;;  %v8341_v62 = vld [vmem:[%s11481_s11 + $0x244] ss:$16 sps:$4 sm:$0xff]  }
 0x718   : > { %4203 = vmatpush1.bf16.msra.mxu0 %v8312_v63  ;;  %3999 = vmatprep.subr.bf16.mxu1 %v8317_v0  ;;  %v8344_v63 = vld [vmem:[%s11481_s11 + $0x24c] ss:$16 sps:$4 sm:$0xff]  }
 0x719   : > { %4204 = vmatprep.subr.bf16.mxu0 %v8320_v2 }
 0x71b   : > { %4000 = vmatpush1.bf16.msra.mxu1 %v8315_v3  ;;  %v8339_v3 = vld [vmem:[%s11481_s11 + $0x240] ss:$16 sps:$4 sm:$0xff]  }
 0x71c   : > { %4205 = vmatpush1.bf16.msra.mxu0 %v8318_v4  ;;  %4001 = vmatprep.subr.bf16.mxu1 %v8323_v6  ;;  %v8342_v4 = vld [vmem:[%s11481_s11 + $0x248] ss:$16 sps:$4 sm:$0xff]   ;;  %v8347_v6 = vld [vmem:[%s11481_s11 + $0x264] ss:$16 sps:$4 sm:$0xff]  }
 0x71d   : > { %4206 = vmatprep.subr.bf16.mxu0 %v8326_v7  ;;  %v8350_v7 = vld [vmem:[%s11481_s11 + $0x26c] ss:$16 sps:$4 sm:$0xff]  }
 0x71f   : > { %4002 = vmatpush1.bf16.msra.mxu1 %v8321_v8  ;;  %v8345_v8 = vld [vmem:[%s11481_s11 + $0x260] ss:$16 sps:$4 sm:$0xff]  }
 0x720   : > { %4207 = vmatpush1.bf16.msra.mxu0 %v8324_v11  ;;  %4012 = vmatprep.subr.bf16.mxu1 %v8329_v13  ;;  %v8348_v11 = vld [vmem:[%s11481_s11 + $0x268] ss:$16 sps:$4 sm:$0xff]   ;;  %v8356_v13 = vld [vmem:[%s11481_s11 + $0x28c] ss:$16 sps:$4 sm:$0xff]  }
 0x721   : > { %4217 = vmatprep.subr.bf16.mxu0 %v8332_v14  ;;  %v8351_v14 = vld [vmem:[%s11481_s11 + $0x280] ss:$16 sps:$4 sm:$0xff]  }
 0x77c   : > { %v2228_v12 = vpop.permute.xlu1 %2227 }
 0x77d   : > { %v2234_v15 = vsel %vm2233_vm10, %v9511_v31, %v2228_v12  ;;  %v2274_v17 = vrot.slane %v2228_v12, %v9156_v38  ;;  %v8353_v12 = vld [vmem:[%s11481_s11 + $0x284] ss:$16 sps:$4 sm:$0xff]  }
 0x77e   : > { %v2241_v19 = vrot.slane %v2234_v15, %v9156_v38  ;;  %v8354_v15 = vld [vmem:[%s11481_s11 + $0x288] ss:$16 sps:$4 sm:$0xff]  }
 0x780   : > { %v2230_v16 = vpop.permute.xlu1 %2229 }
 0x781   : > { %v2242_v18 = vsel %vm2233_vm10, %v9513_v35, %v2230_v16  ;;  %v2281_v58 = vrot.slane %v2230_v16, %v9156_v38  ;;  %v8359_v16 = vld [vmem:[%s11481_s11 + $0x2a4] ss:$16 sps:$4 sm:$0xff]  }
 0x782   : > { %v2249_v20 = vrot.slane %v2242_v18, %v9156_v38  ;;  %v8357_v18 = vld [vmem:[%s11481_s11 + $0x2a0] ss:$16 sps:$4 sm:$0xff]  }
 0x783   : > { %v2282_v21 = vcombine.low %v2274_v17, %v2281_v58  ;;  %v2283_v22 = vcombine.high %v2274_v17, %v2281_v58  ;;  %v8362_v17 = vld [vmem:[%s11481_s11 + $0x2ac] ss:$16 sps:$4 sm:$0xff]   ;;  %v8360_v58 = vld [vmem:[%s11481_s11 + $0x2a8] ss:$16 sps:$4 sm:$0xff]  }
 0x784   : > { %v2250_v24 = vcombine.low %v2241_v19, %v2249_v20  ;;  %v2251_v25 = vcombine.high %v2241_v19, %v2249_v20  ;;  %v8365_v19 = vld [vmem:[%s11481_s11 + $0x2c4] ss:$16 sps:$4 sm:$0xff]   ;;  %v8368_v20 = vld [vmem:[%s11481_s11 + $0x2cc] ss:$16 sps:$4 sm:$0xff]  }
 0x785   : > { %v2290_v26 = vrot.slane %v2282_v21, %v9478_v23  ;;  %v2297_v31 = vrot.slane %v2283_v22, %v9478_v23  ;;  %v8363_v21 = vld [vmem:[%s11481_s11 + $0x2c0] ss:$16 sps:$4 sm:$0xff]   ;;  %v8366_v22 = vld [vmem:[%s11481_s11 + $0x2c8] ss:$16 sps:$4 sm:$0xff]  }
 0x786   : > { %v2265_v27 = vrot.slane %v2251_v25, %v9478_v23  ;;  %v2258_v28 = vrot.slane %v2250_v24, %v9478_v23  ;;  %v8371_v24 = vld [vmem:[%s11481_s11 + $0x2e4] ss:$16 sps:$4 sm:$0xff]   ;;  %v8374_v25 = vld [vmem:[%s11481_s11 + $0x2ec] ss:$16 sps:$4 sm:$0xff]  }
 0x787   : > { %v2298_v35 = vcombine.high %v2290_v26, %v8881_v52  ;;  %v2299_v29 = vcombine.high %v2297_v31, %v8881_v52 }
 0x788   : > { %v2266_v30 = vcombine.high %v2258_v28, %v8881_v52  ;;  %v2267_v32 = vcombine.high %v2265_v27, %v8881_v52  ;;  %v8089_v34 = vpack.i.bf16 %v2297_v31, %v2265_v27  ;;  %v2375_v5 = vpack.c.bf16 %v2258_v28, %v2258_v28  ;;  %v8372_v31 = vld [vmem:[%s11481_s11 + $0x2e8] ss:$16 sps:$4 sm:$0xff]   ;;  %v8377_v27 = vld [vmem:[%s11481_s11 + $0x304] ss:$16 sps:$4 sm:$0xff]   ;;  %v8380_v28 = vld [vmem:[%s11481_s11 + $0x30c] ss:$16 sps:$4 sm:$0xff]  }
 0x789   : > { %2304 = vrot.lane.b32.xlu1 %v2298_v35, %s8884_s25  ;;  %v8375_v35 = vld [vmem:[%s11481_s11 + $0x300] ss:$16 sps:$4 sm:$0xff]  }
 0x78a   : > { %2302 = vrot.lane.b32.xlu0 %v2266_v30, %s8884_s25  ;;  %v8094_v33 = vpack.i.bf16 %v2299_v29, %v2267_v32  ;;  %v8378_v29 = vld [vmem:[%s11481_s11 + $0x308] ss:$16 sps:$4 sm:$0xff]   ;;  %v8383_v30 = vld [vmem:[%s11481_s11 + $0x324] ss:$16 sps:$4 sm:$0xff]   ;;  %v8386_v32 = vld [vmem:[%s11481_s11 + $0x32c] ss:$16 sps:$4 sm:$0xff]  }
 0x78d   : > { %8095 = vrot.lane.b32.xlu1 %v8094_v33, %s11525_s4  ;;  %v8381_v33 = vld [vmem:[%s11481_s11 + $0x320] ss:$16 sps:$4 sm:$0xff]  }
 0x78e   : > { %8090 = vrot.lane.b32.xlu0 %v8089_v34, %s11526_s22  ;;  %v8384_v34 = vld [vmem:[%s11481_s11 + $0x328] ss:$16 sps:$4 sm:$0xff]  }
 0x791   : > { %8100 = vrot.lane.b32.xlu1 %v8099_v9, %s8889_s17  ;;  %v8338_v9 = vld [vmem:[%s11481_s11 + $0x22c] ss:$16 sps:$4 sm:$0xff]  }
 0x792   : > { %2360 = vrot.lane.b32.xlu0 %v9435_v47, %s8889_s17  ;;  %v8335_v47 = vld [vmem:[%s11481_s11 + $0x224] ss:$16 sps:$4 sm:$0xff]   ;;  %s10337_s17 = sld [smem:[#allocation5 + %s7201_s18]] }
 0x7fb   : > { %v9737_v23 = vpop.permute.xlu1 %2304 }
 0x7fc   : > { %v9739_v52 = vpop.permute.xlu0 %2302 }
 0x7fd   : > { %v2331_v36 = vsel %vm1828_vm5, %v2290_v26, %v9739_v52  ;;  %v8369_v26 = vld [vmem:[%s11481_s11 + $0x2e0] ss:$16 sps:$4 sm:$0xff]  }
 0x7fe   : > { %v2376_v39 = vpack.c.bf16 %v2331_v36, %v2331_v36  ;;  %v8389_v36 = vld [vmem:[%s11481_s11 + $0x344] ss:$16 sps:$4 sm:$0xff]  }
 0x7ff   : > { %v9749_v51 = vpop.permute.xlu1 %8095 }
 0x800   : > { %v8097_v42 = vunpack.i.l.bf16 %v9749_v51  ;;  %4003 = vmatprep.mubr.bf16.mxu1 %v2376_v39  ;;  %4208 = vmatprep.mubr.bf16.mxu0 %v2376_v39  ;;  %v9758_v43 = vpop.permute.xlu0 %8090  ;;  %v8392_v39 = vld [vmem:[%s11481_s11 + $0x34c] ss:$16 sps:$4 sm:$0xff]  }
 0x801   : > { %v8093_v44 = vunpack.i.h.bf16 %v9758_v43  ;;  %v8092_v45 = vunpack.i.l.bf16 %v9758_v43  ;;  %4004 = vmatmul.mubr.bf16.vlgmr.msra.gmra.mrb[20].mxu1 %v2375_v5  ;;  %4209 = vmatmul.mubr.bf16.vlgmr.msra.gmra.mrb[32].mxu0 %v2375_v5  ;;  %v8395_v5 = vld [vmem:[%s11481_s11 + $0x364] ss:$16 sps:$4 sm:$0xff]   ;;  %v8426_v43 = vld [vmem:[%s11481_s11 + $0x408] ss:$16 sps:$4 sm:$0xff]  }
 0x802   : > { %4013 = vmatpush1.bf16.msra.mxu1 %v8327_v40  ;;  %4218 = vmatpush1.bf16.msra.mxu0 %v8330_v41  ;;  %v8387_v40 = vld [vmem:[%s11481_s11 + $0x340] ss:$16 sps:$4 sm:$0xff]   ;;  %v8390_v41 = vld [vmem:[%s11481_s11 + $0x348] ss:$16 sps:$4 sm:$0xff]  }
 0x803   : > { %v9771_v53 = vsel %vm1837_vm6, %v8093_v44, %v8097_v42  ;;  %v9773_v56 = vpop.permute.xlu1 %8100  ;;  %4014 = vmatprep.subr.bf16.mxu1 %v8335_v47  ;;  %4219 = vmatprep.subr.bf16.mxu0 %v8338_v9  ;;  %v2317_v59 = vsel %vm2316_vm11, %v8092_v45, %v8093_v44  ;;  %v8398_v47 = vld [vmem:[%s11481_s11 + $0x36c] ss:$16 sps:$4 sm:$0xff]   ;;  %v8393_v9 = vld [vmem:[%s11481_s11 + $0x360] ss:$16 sps:$4 sm:$0xff]   ;;  %v8396_v44 = vld [vmem:[%s11481_s11 + $0x368] ss:$16 sps:$4 sm:$0xff]  }
 0x804   : > { %v8102_v60 = vunpack.i.l.bf16 %v9773_v56  ;;  %v9779_v61 = vpop.permute.xlu0 %2360  ;;  %v2378_v0 = vpack.c.bf16 %v2317_v59, %v2317_v59  ;;  %v8399_v59 = vld [vmem:[%s11481_s11 + $0x380] ss:$16 sps:$4 sm:$0xff]  }
 0x806   : > { %v9791_v2 = vsel %vm2366_vm12, %v9779_v61, %v8102_v60  ;;  %4015 = vmatpush1.bf16.msra.mxu1 %v8333_v46  ;;  %4220 = vmatpush1.bf16.msra.mxu0 %v8336_v49  ;;  %v8401_v46 = vld [vmem:[%s11481_s11 + $0x384] ss:$16 sps:$4 sm:$0xff]   ;;  %v8404_v49 = vld [vmem:[%s11481_s11 + $0x38c] ss:$16 sps:$4 sm:$0xff]  }
 0x807   : > { %4044 = vmatprep.mubr.bf16.mxu1 %v2378_v0  ;;  %4249 = vmatprep.mubr.bf16.mxu0 %v2378_v0  ;;  %v8410_v0 = vld [vmem:[%s11481_s11 + $0x3ac] ss:$16 sps:$4 sm:$0xff]  }
 0x808   : > { %4016 = vmatprep.subr.bf16.mxu1 %v8341_v62  ;;  %4221 = vmatprep.subr.bf16.mxu0 %v8344_v63  ;;  %v8402_v62 = vld [vmem:[%s11481_s11 + $0x388] ss:$16 sps:$4 sm:$0xff]   ;;  %v8407_v63 = vld [vmem:[%s11481_s11 + $0x3a4] ss:$16 sps:$4 sm:$0xff]  }
 0x80a   : > { %4017 = vmatpush1.bf16.msra.mxu1 %v8339_v3  ;;  %4222 = vmatpush1.bf16.msra.mxu0 %v8342_v4  ;;  %v8405_v3 = vld [vmem:[%s11481_s11 + $0x3a0] ss:$16 sps:$4 sm:$0xff]   ;;  %v8408_v4 = vld [vmem:[%s11481_s11 + $0x3a8] ss:$16 sps:$4 sm:$0xff]  }
 0x80b   : > { %4018 = vmatprep.subr.bf16.mxu1 %v8347_v6  ;;  %4223 = vmatprep.subr.bf16.mxu0 %v8350_v7  ;;  %v8413_v6 = vld [vmem:[%s11481_s11 + $0x3c4] ss:$16 sps:$4 sm:$0xff]   ;;  %v8416_v7 = vld [vmem:[%s11481_s11 + $0x3cc] ss:$16 sps:$4 sm:$0xff]  }
 0x80e   : > { %4019 = vmatpush1.bf16.msra.mxu1 %v8345_v8  ;;  %4224 = vmatpush1.bf16.msra.mxu0 %v8348_v11  ;;  %v8411_v8 = vld [vmem:[%s11481_s11 + $0x3c0] ss:$16 sps:$4 sm:$0xff]   ;;  %v8414_v11 = vld [vmem:[%s11481_s11 + $0x3c8] ss:$16 sps:$4 sm:$0xff]  }
 0x80f   : > { %4020 = vmatprep.subr.bf16.mxu1 %v8353_v12  ;;  %4225 = vmatprep.subr.bf16.mxu0 %v8356_v13  ;;  %v8419_v12 = vld [vmem:[%s11481_s11 + $0x3e4] ss:$16 sps:$4 sm:$0xff]   ;;  %v8422_v13 = vld [vmem:[%s11481_s11 + $0x3ec] ss:$16 sps:$4 sm:$0xff]  }
 0x812   : > { %4021 = vmatpush1.bf16.msra.mxu1 %v8351_v14  ;;  %4226 = vmatpush1.bf16.msra.mxu0 %v8354_v15  ;;  %v8098_v14 = vunpack.i.h.bf16 %v9749_v51  ;;  %v8417_v15 = vld [vmem:[%s11481_s11 + $0x3e0] ss:$16 sps:$4 sm:$0xff]   ;;  %v8431_v51 = vld [vmem:[%s11481_s11 + $0x424] ss:$16 sps:$4 sm:$0xff]  }
 0x813   : > { %4022 = vmatprep.subr.bf16.mxu1 %v8359_v16  ;;  %4227 = vmatprep.subr.bf16.mxu0 %v8362_v17  ;;  %v8420_v16 = vld [vmem:[%s11481_s11 + $0x3e8] ss:$16 sps:$4 sm:$0xff]   ;;  %v2307_v17 = vsel %vm1828_vm5, %v9739_v52, %v9737_v23  ;;  %v8423_v52 = vld [vmem:[%s11481_s11 + $0x400] ss:$16 sps:$4 sm:$0xff]  }
 0x816   : > { %4023 = vmatpush1.bf16.msra.mxu1 %v8357_v18  ;;  %4228 = vmatpush1.bf16.msra.mxu0 %v8360_v58  ;;  %v8425_v18 = vld [vmem:[%s11481_s11 + $0x404] ss:$16 sps:$4 sm:$0xff]   ;;  %v8428_v58 = vld [vmem:[%s11481_s11 + $0x40c] ss:$16 sps:$4 sm:$0xff]  }
 0x817   : > { %4024 = vmatprep.subr.bf16.mxu1 %v8365_v19  ;;  %4229 = vmatprep.subr.bf16.mxu0 %v8368_v20  ;;  %v2332_v19 = vsel %vm2316_vm11, %v2307_v17, %v8092_v45  ;;  %v2328_v20 = vsel %vm1837_vm6, %v8097_v42, %v8098_v14  ;;  %v8434_v42 = vld [vmem:[%s11481_s11 + $0x42c] ss:$16 sps:$4 sm:$0xff]   ;;  %v8483_v14 = vld [vmem:[%s11481_s11 + $0x540] ss:$16 sps:$4 sm:$0xff]  }
 0x818   : > { %v2372_v23 = vsel %vm2366_vm12, %v2328_v20, %v9779_v61  ;;  %v8429_v61 = vld [vmem:[%s11481_s11 + $0x420] ss:$16 sps:$4 sm:$0xff]   ;;  %v8494_v17 = vld [vmem:[%s11481_s11 + $0x56c] ss:$16 sps:$4 sm:$0xff]  }
 0x819   : > { %v2380_v45 = vpack.c.bf16 %v2372_v23, %v2372_v23  ;;  %v8500_v20 = vld [vmem:[%s11481_s11 + $0x58c] ss:$16 sps:$4 sm:$0xff]   ;;  %v8495_v23 = vld [vmem:[%s11481_s11 + $0x580] ss:$16 sps:$4 sm:$0xff]  }
 0x81a   : > { %4025 = vmatpush1.bf16.msra.mxu1 %v8363_v21  ;;  %4230 = vmatpush1.bf16.msra.mxu0 %v8366_v22  ;;  %v2377_v21 = vpack.c.bf16 %v2332_v19, %v2332_v19  ;;  %v8432_v22 = vld [vmem:[%s11481_s11 + $0x428] ss:$16 sps:$4 sm:$0xff]   ;;  %v8497_v19 = vld [vmem:[%s11481_s11 + $0x584] ss:$16 sps:$4 sm:$0xff]  }
 0x81b   : > { %4026 = vmatprep.subr.bf16.mxu1 %v8371_v24  ;;  %4231 = vmatprep.subr.bf16.mxu0 %v8374_v25  ;;  %v8437_v24 = vld [vmem:[%s11481_s11 + $0x444] ss:$16 sps:$4 sm:$0xff]   ;;  %v8440_v25 = vld [vmem:[%s11481_s11 + $0x44c] ss:$16 sps:$4 sm:$0xff]  }
 0x81e   : > { %4027 = vmatpush1.bf16.msra.mxu1 %v8369_v26  ;;  %4232 = vmatpush1.bf16.msra.mxu0 %v8372_v31  ;;  %v8435_v26 = vld [vmem:[%s11481_s11 + $0x440] ss:$16 sps:$4 sm:$0xff]   ;;  %v8438_v31 = vld [vmem:[%s11481_s11 + $0x448] ss:$16 sps:$4 sm:$0xff]  }
 0x81f   : > { %4028 = vmatprep.subr.bf16.mxu1 %v8377_v27  ;;  %4233 = vmatprep.subr.bf16.mxu0 %v8380_v28  ;;  %v8443_v27 = vld [vmem:[%s11481_s11 + $0x464] ss:$16 sps:$4 sm:$0xff]   ;;  %v8446_v28 = vld [vmem:[%s11481_s11 + $0x46c] ss:$16 sps:$4 sm:$0xff]  }
 0x822   : > { %4029 = vmatpush1.bf16.msra.mxu1 %v8375_v35  ;;  %4234 = vmatpush1.bf16.msra.mxu0 %v8378_v29  ;;  %v8441_v35 = vld [vmem:[%s11481_s11 + $0x460] ss:$16 sps:$4 sm:$0xff]   ;;  %v8444_v29 = vld [vmem:[%s11481_s11 + $0x468] ss:$16 sps:$4 sm:$0xff]  }
 0x823   : > { %4030 = vmatprep.subr.bf16.mxu1 %v8383_v30  ;;  %4235 = vmatprep.subr.bf16.mxu0 %v8386_v32  ;;  %v8449_v30 = vld [vmem:[%s11481_s11 + $0x484] ss:$16 sps:$4 sm:$0xff]   ;;  %v8452_v32 = vld [vmem:[%s11481_s11 + $0x48c] ss:$16 sps:$4 sm:$0xff]  }
 0x826   : > { %4031 = vmatpush1.bf16.msra.mxu1 %v8381_v33  ;;  %4236 = vmatpush1.bf16.msra.mxu0 %v8384_v34  ;;  %v8447_v33 = vld [vmem:[%s11481_s11 + $0x480] ss:$16 sps:$4 sm:$0xff]   ;;  %v8450_v34 = vld [vmem:[%s11481_s11 + $0x488] ss:$16 sps:$4 sm:$0xff]  }
 0x827   : > { %4032 = vmatprep.subr.bf16.mxu1 %v8389_v36  ;;  %4237 = vmatprep.subr.bf16.mxu0 %v8392_v39  ;;  %v8455_v36 = vld [vmem:[%s11481_s11 + $0x4a4] ss:$16 sps:$4 sm:$0xff]   ;;  %v8458_v39 = vld [vmem:[%s11481_s11 + $0x4ac] ss:$16 sps:$4 sm:$0xff]  }
 0x82a   : > { %4033 = vmatpush1.bf16.msra.mxu1 %v8387_v40  ;;  %4238 = vmatpush1.bf16.msra.mxu0 %v8390_v41  ;;  %v8453_v40 = vld [vmem:[%s11481_s11 + $0x4a0] ss:$16 sps:$4 sm:$0xff]   ;;  %v8456_v41 = vld [vmem:[%s11481_s11 + $0x4a8] ss:$16 sps:$4 sm:$0xff]  }
 0x82b   : > { %4034 = vmatprep.subr.bf16.mxu1 %v8395_v5  ;;  %4239 = vmatprep.subr.bf16.mxu0 %v8398_v47  ;;  %v8461_v5 = vld [vmem:[%s11481_s11 + $0x4c4] ss:$16 sps:$4 sm:$0xff]   ;;  %v8464_v47 = vld [vmem:[%s11481_s11 + $0x4cc] ss:$16 sps:$4 sm:$0xff]  }
 0x82e   : > { %4035 = vmatpush1.bf16.msra.mxu1 %v8393_v9  ;;  %4240 = vmatpush1.bf16.msra.mxu0 %v8396_v44  ;;  %v8459_v9 = vld [vmem:[%s11481_s11 + $0x4c0] ss:$16 sps:$4 sm:$0xff]   ;;  %v8462_v44 = vld [vmem:[%s11481_s11 + $0x4c8] ss:$16 sps:$4 sm:$0xff]  }
 0x82f   : > { %4036 = vmatprep.subr.bf16.mxu1 %v8401_v46  ;;  %4241 = vmatprep.subr.bf16.mxu0 %v8404_v49  ;;  %v8467_v46 = vld [vmem:[%s11481_s11 + $0x4e4] ss:$16 sps:$4 sm:$0xff]   ;;  %v8470_v49 = vld [vmem:[%s11481_s11 + $0x4ec] ss:$16 sps:$4 sm:$0xff]  }
 0x832   : > { %4037 = vmatpush1.bf16.msra.mxu1 %v8399_v59  ;;  %4242 = vmatpush1.bf16.msra.mxu0 %v8402_v62  ;;  %v8465_v59 = vld [vmem:[%s11481_s11 + $0x4e0] ss:$16 sps:$4 sm:$0xff]   ;;  %v8468_v62 = vld [vmem:[%s11481_s11 + $0x4e8] ss:$16 sps:$4 sm:$0xff]  }
 0x833   : > { %4038 = vmatprep.subr.bf16.mxu1 %v8407_v63  ;;  %4243 = vmatprep.subr.bf16.mxu0 %v8410_v0  ;;  %v8473_v63 = vld [vmem:[%s11481_s11 + $0x504] ss:$16 sps:$4 sm:$0xff]   ;;  %v8476_v0 = vld [vmem:[%s11481_s11 + $0x50c] ss:$16 sps:$4 sm:$0xff]  }
 0x836   : > { %4039 = vmatpush1.bf16.msra.mxu1 %v8405_v3  ;;  %4244 = vmatpush1.bf16.msra.mxu0 %v8408_v4  ;;  %v8471_v3 = vld [vmem:[%s11481_s11 + $0x500] ss:$16 sps:$4 sm:$0xff]   ;;  %v8474_v4 = vld [vmem:[%s11481_s11 + $0x508] ss:$16 sps:$4 sm:$0xff]  }
 0x837   : > { %4040 = vmatprep.subr.bf16.mxu1 %v8413_v6  ;;  %4245 = vmatprep.subr.bf16.mxu0 %v8416_v7  ;;  %v8479_v6 = vld [vmem:[%s11481_s11 + $0x524] ss:$16 sps:$4 sm:$0xff]   ;;  %v8482_v7 = vld [vmem:[%s11481_s11 + $0x52c] ss:$16 sps:$4 sm:$0xff]  }
 0x83a   : > { %4041 = vmatpush1.bf16.msra.mxu1 %v8411_v8  ;;  %4246 = vmatpush1.bf16.msra.mxu0 %v8414_v11  ;;  %v8477_v8 = vld [vmem:[%s11481_s11 + $0x520] ss:$16 sps:$4 sm:$0xff]   ;;  %v8480_v11 = vld [vmem:[%s11481_s11 + $0x528] ss:$16 sps:$4 sm:$0xff]  }
 0x83b   : > { %4042 = vmatprep.subr.bf16.mxu1 %v8419_v12  ;;  %4247 = vmatprep.subr.bf16.mxu0 %v8422_v13  ;;  %v8485_v12 = vld [vmem:[%s11481_s11 + $0x544] ss:$16 sps:$4 sm:$0xff]   ;;  %v8488_v13 = vld [vmem:[%s11481_s11 + $0x54c] ss:$16 sps:$4 sm:$0xff]  }
 0x83e   : > { %4043 = vmatpush1.bf16.msra.mxu1 %v8417_v15  ;;  %4248 = vmatpush1.bf16.msra.mxu0 %v8420_v16  ;;  %v8486_v15 = vld [vmem:[%s11481_s11 + $0x548] ss:$16 sps:$4 sm:$0xff]   ;;  %v8491_v16 = vld [vmem:[%s11481_s11 + $0x564] ss:$16 sps:$4 sm:$0xff]  }
 0x83f   : > { %4053 = vmatprep.subr.bf16.mxu1 %v8425_v18  ;;  %4258 = vmatprep.subr.bf16.mxu0 %v8428_v58  ;;  %v8489_v18 = vld [vmem:[%s11481_s11 + $0x560] ss:$16 sps:$4 sm:$0xff]   ;;  %v8492_v58 = vld [vmem:[%s11481_s11 + $0x568] ss:$16 sps:$4 sm:$0xff]  }
 0x841   : > { %4045 = vmatmul.mubr.bf16.vlgmr.msra.gmra.mrb[20].mxu1 %v2377_v21  ;;  %4250 = vmatmul.mubr.bf16.vlgmr.msra.gmra.mrb[32].mxu0 %v2377_v21  ;;  %v8503_v21 = vld [vmem:[%s11481_s11 + $0x5a4] ss:$16 sps:$4 sm:$0xff]  }
 0x842   : > { %4054 = vmatpush1.bf16.msra.mxu1 %v8423_v52  ;;  %4085 = vmatprep.mubr.bf16.mxu1 %v2380_v45  ;;  %v8498_v52 = vld [vmem:[%s11481_s11 + $0x588] ss:$16 sps:$4 sm:$0xff]  }
 0x843   : > { %4259 = vmatpush1.bf16.msra.mxu0 %v8426_v43  ;;  %4290 = vmatprep.mubr.bf16.mxu0 %v2380_v45  ;;  %v8506_v43 = vld [vmem:[%s11481_s11 + $0x5ac] ss:$16 sps:$4 sm:$0xff]   ;;  %v8501_v45 = vld [vmem:[%s11481_s11 + $0x5a0] ss:$16 sps:$4 sm:$0xff]  }
 0x844   : > { %4055 = vmatprep.subr.bf16.mxu1 %v8431_v51  ;;  %4260 = vmatprep.subr.bf16.mxu0 %v8434_v42  ;;  %v8504_v51 = vld [vmem:[%s11481_s11 + $0x5a8] ss:$16 sps:$4 sm:$0xff]   ;;  %v8509_v42 = vld [vmem:[%s11481_s11 + $0x5c4] ss:$16 sps:$4 sm:$0xff]  }
 0x846   : > { %4056 = vmatpush1.bf16.msra.mxu1 %v8429_v61  ;;  %v8512_v61 = vld [vmem:[%s11481_s11 + $0x5cc] ss:$16 sps:$4 sm:$0xff]  }
 0x847   : > { %4261 = vmatpush1.bf16.msra.mxu0 %v8432_v22  ;;  %4057 = vmatprep.subr.bf16.mxu1 %v8437_v24  ;;  %v8507_v22 = vld [vmem:[%s11481_s11 + $0x5c0] ss:$16 sps:$4 sm:$0xff]   ;;  %v8510_v24 = vld [vmem:[%s11481_s11 + $0x5c8] ss:$16 sps:$4 sm:$0xff]  }
 0x848   : > { %4262 = vmatprep.subr.bf16.mxu0 %v8440_v25  ;;  %v8515_v25 = vld [vmem:[%s11481_s11 + $0x5e4] ss:$16 sps:$4 sm:$0xff]  }
 0x84a   : > { %4058 = vmatpush1.bf16.msra.mxu1 %v8435_v26  ;;  %v8518_v26 = vld [vmem:[%s11481_s11 + $0x5ec] ss:$16 sps:$4 sm:$0xff]  }
 0x84b   : > { %4263 = vmatpush1.bf16.msra.mxu0 %v8438_v31  ;;  %4059 = vmatprep.subr.bf16.mxu1 %v8443_v27  ;;  %v8103_v31 = vunpack.i.h.bf16 %v9773_v56  ;;  %v8513_v27 = vld [vmem:[%s11481_s11 + $0x5e0] ss:$16 sps:$4 sm:$0xff]   ;;  %v8530_v56 = vld [vmem:[%s11481_s11 + $0x62c] ss:$16 sps:$4 sm:$0xff]  }
 0x84c   : > { %4264 = vmatprep.subr.bf16.mxu0 %v8446_v28  ;;  %v8516_v28 = vld [vmem:[%s11481_s11 + $0x5e8] ss:$16 sps:$4 sm:$0xff]  }
 0x84e   : > { %4060 = vmatpush1.bf16.msra.mxu1 %v8441_v35  ;;  %v8521_v35 = vld [vmem:[%s11481_s11 + $0x604] ss:$16 sps:$4 sm:$0xff]  }
 0x84f   : > { %4265 = vmatpush1.bf16.msra.mxu0 %v8444_v29  ;;  %4061 = vmatprep.subr.bf16.mxu1 %v8449_v30  ;;  %v8524_v29 = vld [vmem:[%s11481_s11 + $0x60c] ss:$16 sps:$4 sm:$0xff]   ;;  %v8519_v30 = vld [vmem:[%s11481_s11 + $0x600] ss:$16 sps:$4 sm:$0xff]  }
 0x850   : > { %4266 = vmatprep.subr.bf16.mxu0 %v8452_v32  ;;  %v2368_v32 = vsel %vm2366_vm12, %v8102_v60, %v8103_v31  ;;  %v8528_v60 = vld [vmem:[%s11481_s11 + $0x628] ss:$16 sps:$4 sm:$0xff]   ;;  %v8593_v31 = vld [vmem:[%s11481_s11 + $0x784] ss:$16 sps:$4 sm:$0xff]  }
 0x852   : > { %4062 = vmatpush1.bf16.msra.mxu1 %v8447_v33  ;;  %v2379_v33 = vpack.c.bf16 %v9771_v53, %v9771_v53  ;;  %v8525_v53 = vld [vmem:[%s11481_s11 + $0x620] ss:$16 sps:$4 sm:$0xff]  }
 0x853   : > { %4267 = vmatpush1.bf16.msra.mxu0 %v8450_v34  ;;  %4063 = vmatprep.subr.bf16.mxu1 %v8455_v36  ;;  %v8522_v34 = vld [vmem:[%s11481_s11 + $0x608] ss:$16 sps:$4 sm:$0xff]   ;;  %v8527_v36 = vld [vmem:[%s11481_s11 + $0x624] ss:$16 sps:$4 sm:$0xff]  }
 0x854   : > { %4268 = vmatprep.subr.bf16.mxu0 %v8458_v39  ;;  %v2382_v39 = vpack.c.bf16 %v2368_v32, %v2368_v32  ;;  %v8597_v32 = vld [vmem:[%s11481_s11 + $0x7a0] ss:$16 sps:$4 sm:$0xff]  }
 0x856   : > { %4064 = vmatpush1.bf16.msra.mxu1 %v8453_v40  ;;  %v8533_v40 = vld [vmem:[%s11481_s11 + $0x644] ss:$16 sps:$4 sm:$0xff]  }
 0x857   : > { %4269 = vmatpush1.bf16.msra.mxu0 %v8456_v41  ;;  %4065 = vmatprep.subr.bf16.mxu1 %v8461_v5  ;;  %v8536_v41 = vld [vmem:[%s11481_s11 + $0x64c] ss:$16 sps:$4 sm:$0xff]   ;;  %v8531_v5 = vld [vmem:[%s11481_s11 + $0x640] ss:$16 sps:$4 sm:$0xff]  }
 0x858   : > { %4270 = vmatprep.subr.bf16.mxu0 %v8464_v47  ;;  %v8534_v47 = vld [vmem:[%s11481_s11 + $0x648] ss:$16 sps:$4 sm:$0xff]  }
 0x85a   : > { %4066 = vmatpush1.bf16.msra.mxu1 %v8459_v9  ;;  %v8539_v9 = vld [vmem:[%s11481_s11 + $0x664] ss:$16 sps:$4 sm:$0xff]  }
 0x85b   : > { %4271 = vmatpush1.bf16.msra.mxu0 %v8462_v44  ;;  %4067 = vmatprep.subr.bf16.mxu1 %v8467_v46  ;;  %v8542_v44 = vld [vmem:[%s11481_s11 + $0x66c] ss:$16 sps:$4 sm:$0xff]   ;;  %v8537_v46 = vld [vmem:[%s11481_s11 + $0x660] ss:$16 sps:$4 sm:$0xff]  }
 0x85c   : > { %4272 = vmatprep.subr.bf16.mxu0 %v8470_v49  ;;  %v8540_v49 = vld [vmem:[%s11481_s11 + $0x668] ss:$16 sps:$4 sm:$0xff]  }
 0x85e   : > { %4068 = vmatpush1.bf16.msra.mxu1 %v8465_v59  ;;  %v8545_v59 = vld [vmem:[%s11481_s11 + $0x684] ss:$16 sps:$4 sm:$0xff]  }
 0x85f   : > { %4273 = vmatpush1.bf16.msra.mxu0 %v8468_v62  ;;  %4069 = vmatprep.subr.bf16.mxu1 %v8473_v63  ;;  %v8548_v62 = vld [vmem:[%s11481_s11 + $0x68c] ss:$16 sps:$4 sm:$0xff]   ;;  %v8543_v63 = vld [vmem:[%s11481_s11 + $0x680] ss:$16 sps:$4 sm:$0xff]  }
 0x860   : > { %4274 = vmatprep.subr.bf16.mxu0 %v8476_v0  ;;  %v8546_v0 = vld [vmem:[%s11481_s11 + $0x688] ss:$16 sps:$4 sm:$0xff]  }
 0x862   : > { %4070 = vmatpush1.bf16.msra.mxu1 %v8471_v3  ;;  %v8551_v3 = vld [vmem:[%s11481_s11 + $0x6a4] ss:$16 sps:$4 sm:$0xff]  }
 0x863   : > { %4275 = vmatpush1.bf16.msra.mxu0 %v8474_v4  ;;  %4071 = vmatprep.subr.bf16.mxu1 %v8479_v6  ;;  %v8554_v4 = vld [vmem:[%s11481_s11 + $0x6ac] ss:$16 sps:$4 sm:$0xff]   ;;  %v8549_v6 = vld [vmem:[%s11481_s11 + $0x6a0] ss:$16 sps:$4 sm:$0xff]  }
 0x864   : > { %4276 = vmatprep.subr.bf16.mxu0 %v8482_v7  ;;  %v8552_v7 = vld [vmem:[%s11481_s11 + $0x6a8] ss:$16 sps:$4 sm:$0xff]  }
 0x866   : > { %4072 = vmatpush1.bf16.msra.mxu1 %v8477_v8  ;;  %v8557_v8 = vld [vmem:[%s11481_s11 + $0x6c4] ss:$16 sps:$4 sm:$0xff]  }
 0x867   : > { %4277 = vmatpush1.bf16.msra.mxu0 %v8480_v11  ;;  %4073 = vmatprep.subr.bf16.mxu1 %v8485_v12  ;;  %v8560_v11 = vld [vmem:[%s11481_s11 + $0x6cc] ss:$16 sps:$4 sm:$0xff]   ;;  %v8555_v12 = vld [vmem:[%s11481_s11 + $0x6c0] ss:$16 sps:$4 sm:$0xff]  }
 0x868   : > { %4278 = vmatprep.subr.bf16.mxu0 %v8488_v13  ;;  %v8558_v13 = vld [vmem:[%s11481_s11 + $0x6c8] ss:$16 sps:$4 sm:$0xff]  }
 0x86a   : > { %4074 = vmatpush1.bf16.msra.mxu1 %v8483_v14  ;;  %v8563_v14 = vld [vmem:[%s11481_s11 + $0x6e4] ss:$16 sps:$4 sm:$0xff]  }
 0x86b   : > { %4279 = vmatpush1.bf16.msra.mxu0 %v8486_v15  ;;  %4075 = vmatprep.subr.bf16.mxu1 %v8491_v16  ;;  %v8566_v15 = vld [vmem:[%s11481_s11 + $0x6ec] ss:$16 sps:$4 sm:$0xff]   ;;  %v8561_v16 = vld [vmem:[%s11481_s11 + $0x6e0] ss:$16 sps:$4 sm:$0xff]  }
 0x86c   : > { %4280 = vmatprep.subr.bf16.mxu0 %v8494_v17  ;;  %v8564_v17 = vld [vmem:[%s11481_s11 + $0x6e8] ss:$16 sps:$4 sm:$0xff]  }
 0x86e   : > { %4076 = vmatpush1.bf16.msra.mxu1 %v8489_v18  ;;  %v8569_v18 = vld [vmem:[%s11481_s11 + $0x704] ss:$16 sps:$4 sm:$0xff]  }
 0x86f   : > { %4281 = vmatpush1.bf16.msra.mxu0 %v8492_v58  ;;  %4077 = vmatprep.subr.bf16.mxu1 %v8497_v19  ;;  %v8572_v58 = vld [vmem:[%s11481_s11 + $0x70c] ss:$16 sps:$4 sm:$0xff]   ;;  %v8567_v19 = vld [vmem:[%s11481_s11 + $0x700] ss:$16 sps:$4 sm:$0xff]  }
 0x870   : > { %4282 = vmatprep.subr.bf16.mxu0 %v8500_v20  ;;  %v8570_v20 = vld [vmem:[%s11481_s11 + $0x708] ss:$16 sps:$4 sm:$0xff]  }
 0x872   : > { %4078 = vmatpush1.bf16.msra.mxu1 %v8495_v23  ;;  %v8575_v23 = vld [vmem:[%s11481_s11 + $0x724] ss:$16 sps:$4 sm:$0xff]  }
 0x873   : > { %4283 = vmatpush1.bf16.msra.mxu0 %v8498_v52  ;;  %4079 = vmatprep.subr.bf16.mxu1 %v8503_v21  ;;  %v8578_v52 = vld [vmem:[%s11481_s11 + $0x72c] ss:$16 sps:$4 sm:$0xff]   ;;  %v8573_v21 = vld [vmem:[%s11481_s11 + $0x720] ss:$16 sps:$4 sm:$0xff]  }
 0x874   : > { %4284 = vmatprep.subr.bf16.mxu0 %v8506_v43  ;;  %v8576_v43 = vld [vmem:[%s11481_s11 + $0x728] ss:$16 sps:$4 sm:$0xff]  }
 0x876   : > { %4080 = vmatpush1.bf16.msra.mxu1 %v8501_v45  ;;  %v8581_v45 = vld [vmem:[%s11481_s11 + $0x744] ss:$16 sps:$4 sm:$0xff]  }
 0x877   : > { %4285 = vmatpush1.bf16.msra.mxu0 %v8504_v51  ;;  %4081 = vmatprep.subr.bf16.mxu1 %v8509_v42  ;;  %v8584_v51 = vld [vmem:[%s11481_s11 + $0x74c] ss:$16 sps:$4 sm:$0xff]   ;;  %v8579_v42 = vld [vmem:[%s11481_s11 + $0x740] ss:$16 sps:$4 sm:$0xff]  }
 0x878   : > { %4286 = vmatprep.subr.bf16.mxu0 %v8512_v61  ;;  %v8582_v61 = vld [vmem:[%s11481_s11 + $0x748] ss:$16 sps:$4 sm:$0xff]  }
 0x87a   : > { %4082 = vmatpush1.bf16.msra.mxu1 %v8507_v22  ;;  %v8587_v22 = vld [vmem:[%s11481_s11 + $0x764] ss:$16 sps:$4 sm:$0xff]  }
 0x87b   : > { %4287 = vmatpush1.bf16.msra.mxu0 %v8510_v24  ;;  %4083 = vmatprep.subr.bf16.mxu1 %v8515_v25  ;;  %v8590_v24 = vld [vmem:[%s11481_s11 + $0x76c] ss:$16 sps:$4 sm:$0xff]   ;;  %v8585_v25 = vld [vmem:[%s11481_s11 + $0x760] ss:$16 sps:$4 sm:$0xff]  }
 0x87c   : > { %4288 = vmatprep.subr.bf16.mxu0 %v8518_v26  ;;  %v8588_v26 = vld [vmem:[%s11481_s11 + $0x768] ss:$16 sps:$4 sm:$0xff]  }
 0x87e   : > { %4084 = vmatpush1.bf16.msra.mxu1 %v8513_v27  ;;  %v8596_v27 = vld [vmem:[%s11481_s11 + $0x78c] ss:$16 sps:$4 sm:$0xff]  }
 0x87f   : > { %4289 = vmatpush1.bf16.msra.mxu0 %v8516_v28  ;;  %4094 = vmatprep.subr.bf16.mxu1 %v8521_v35  ;;  %v8591_v28 = vld [vmem:[%s11481_s11 + $0x780] ss:$16 sps:$4 sm:$0xff]   ;;  %v8594_v35 = vld [vmem:[%s11481_s11 + $0x788] ss:$16 sps:$4 sm:$0xff]  }
 0x880   : > { %4299 = vmatprep.subr.bf16.mxu0 %v8524_v29  ;;  %v8599_v29 = vld [vmem:[%s11481_s11 + $0x7a4] ss:$16 sps:$4 sm:$0xff]  }
 0x881   : > { %4086 = vmatmul.mubr.bf16.vlgmr.msra.gmra.mrb[20].mxu1 %v2379_v33 }
 0x882   : > { %4291 = vmatmul.mubr.bf16.vlgmr.msra.gmra.mrb[32].mxu0 %v2379_v33  ;;  %4095 = vmatpush1.bf16.msra.mxu1 %v8519_v30  ;;  %v8602_v30 = vld [vmem:[%s11481_s11 + $0x7ac] ss:$16 sps:$4 sm:$0xff]   ;;  %v8600_v33 = vld [vmem:[%s11481_s11 + $0x7a8] ss:$16 sps:$4 sm:$0xff]  }
 0x883   : > { %4126 = vmatprep.mubr.bf16.mxu1 %v2382_v39  ;;  %4300 = vmatpush1.bf16.msra.mxu0 %v8522_v34  ;;  %v8605_v34 = vld [vmem:[%s11481_s11 + $0x7c4] ss:$16 sps:$4 sm:$0xff]  }
 0x884   : > { %4331 = vmatprep.mubr.bf16.mxu0 %v2382_v39  ;;  %4096 = vmatprep.subr.bf16.mxu1 %v8527_v36  ;;  %v8608_v36 = vld [vmem:[%s11481_s11 + $0x7cc] ss:$16 sps:$4 sm:$0xff]   ;;  %v8603_v39 = vld [vmem:[%s11481_s11 + $0x7c0] ss:$16 sps:$4 sm:$0xff]  }
 0x885   : > { %4301 = vmatprep.subr.bf16.mxu0 %v8530_v56  ;;  %v8606_v56 = vld [vmem:[%s11481_s11 + $0x7c8] ss:$16 sps:$4 sm:$0xff]  }
 0x886   : > { %4097 = vmatpush1.bf16.msra.mxu1 %v8525_v53  ;;  %v8611_v53 = vld [vmem:[%s11481_s11 + $0x7e4] ss:$16 sps:$4 sm:$0xff]  }
 0x887   : > { %4302 = vmatpush1.bf16.msra.mxu0 %v8528_v60  ;;  %4098 = vmatprep.subr.bf16.mxu1 %v8533_v40  ;;  %v2640_v60 = vld [vmem:[%s11481_s11 + $0x800] sm:$0x11]  ;;  %v8614_v40 = vld [vmem:[%s11481_s11 + $0x7ec] ss:$16 sps:$4 sm:$0xff]  }
 0x888   : > { %4303 = vmatprep.subr.bf16.mxu0 %v8536_v41  ;;  %v2641_v41 = vld [vmem:[%s11481_s11 + $0x808] sm:$0x11] }
 0x88a   : > { %4099 = vmatpush1.bf16.msra.mxu1 %v8531_v5  ;;  %v8609_v5 = vld [vmem:[%s11481_s11 + $0x7e0] ss:$16 sps:$4 sm:$0xff]  }
 0x88b   : > { %4304 = vmatpush1.bf16.msra.mxu0 %v8534_v47  ;;  %4100 = vmatprep.subr.bf16.mxu1 %v8539_v9  ;;  %v7459_v47 = vcombine.low %v2640_v60, %v2640_v60  ;;  %v8612_v9 = vld [vmem:[%s11481_s11 + $0x7e8] ss:$16 sps:$4 sm:$0xff]  }
 0x88c   : > { %4305 = vmatprep.subr.bf16.mxu0 %v8542_v44  ;;  %v7460_v44 = vcombine.high %v2640_v60, %v2640_v60  ;;  %v8669_v60 = vld [vmem:[%s11483_s13 + $0x104] ss:$8 sps:$4 sm:$0xff]  }
 0x88e   : > { %4101 = vmatpush1.bf16.msra.mxu1 %v8537_v46  ;;  %v7462_v46 = vcombine.high %v2641_v41, %v2641_v41 }
 0x88f   : > { %4306 = vmatpush1.bf16.msra.mxu0 %v8540_v49  ;;  %4102 = vmatprep.subr.bf16.mxu1 %v8545_v59  ;;  %v7461_v49 = vcombine.low %v2641_v41, %v2641_v41  ;;  %v2337_v59 = vstv %s10337_s17  ;;  %v4873_v41 = vld [vmem:[%s11485_s15 + $0x20] sm:$0xff] }
 0x890   : > { %4307 = vmatprep.subr.bf16.mxu0 %v8548_v62  ;;  %v2342_v62 = vstv %s10339_s2 }
 0x892   : > { %4103 = vmatpush1.bf16.msra.mxu1 %v8543_v63  ;;  %v2349_v63 = vstv %s10344_s3  ;;  %s8890_s3 = smov [#allocation8]  }
 0x893   : > { %4308 = vmatpush1.bf16.msra.mxu0 %v8546_v0  ;;  %4104 = vmatprep.subr.bf16.mxu1 %v8551_v3  ;;  %v2354_v0 = vstv %s10346_s28  ;;  %v2381_v3 = vpack.c.bf16 %v9791_v2, %v9791_v2  ;;  %v3966_v2 = vsel %vm3958_vm13, %v7461_v49, 0  ;;  %s6914_s28 = sshll.u32 %s8890_s3, 4  ;;  %s6915_s28 = int_to_ptr.vmem [resolvable:$true] %s6914_s28 }
 0x894   : > { %4309 = vmatprep.subr.bf16.mxu0 %v8554_v4  ;;  %v3960_v4 = vsel %vm3958_vm13, %v7459_v47, 0  ;;  %s8785_s5 = scalar_lea.vmem %s6915_s28, 64  ;;  %p8792_p0 = scmp.lt.s32.totalorder %s6915_s28, %s6915_s28 }
 0x895   : > { %p8786_p8 = scmp.ne.s32.totalorder %s6915_s28, %s8785_s5  ;;  %p8793_p1 = scmp.lt.s32.totalorder %s8785_s5, %s8785_s5 }
 0x896   : > { %4105 = vmatpush1.bf16.msra.mxu1 %v8549_v6  ;;  %v2338_v6 = vsel %vm784_vm0, %v2337_v59, 0.0  ;;  %v4885_v59 = vld [vmem:[%s11485_s15 + $0x80] sm:$0xff] }
 0x897   : > { %4310 = vmatpush1.bf16.msra.mxu0 %v8552_v7  ;;  %4106 = vmatprep.subr.bf16.mxu1 %v8557_v8  ;;  %v2343_v7 = vsel %vm789_vm1, %v2342_v62, 0.0  ;;  %v2350_v8 = vsel %vm784_vm0, %v2349_v63, 0.0  ;;  %v4889_v62 = vld [vmem:[%s11485_s15 + $0xa0] sm:$0xff]  ;;  %p8787_p12 = pnand %p8786_p8, %p11411_p6  ;;  %p8794_p2 = por %p8793_p1, %p8792_p0 }
 0x898   : > { %4311 = vmatprep.subr.bf16.mxu0 %v8560_v11  ;;  %v2355_v11 = vsel %vm789_vm1, %v2354_v0, 0.0  ;;  %v7548_v63 = vcombine.high %v4885_v59, %v4889_v62  ;;  %v7547_v0 = vcombine.low %v4885_v59, %v4889_v62 }
 0x899   : > { %p8788_p13 = pneg %p8787_p12 }
 0x89a   : > { %4107 = vmatpush1.bf16.msra.mxu1 %v8555_v12  ;;  %v8621_v12 = vld [vmem:[%s11483_s13 + $0x4] ss:$8 sps:$4 sm:$0xff]  }
 0x89b   : > { %4312 = vmatpush1.bf16.msra.mxu0 %v8558_v13  ;;  %4108 = vmatprep.subr.bf16.mxu1 %v8563_v14  ;;  %v2344_v13 = vadd.f32 %v2343_v7, %v2338_v6  ;;  %v2356_v14 = vadd.f32 %v2355_v11, %v2350_v8  ;;  %v4901_v8 = vld [vmem:[%s11485_s15 + $0x100] sm:$0xff]  ;;  %p8795_p5 = pnand %p8794_p2, %p8788_p13 }
 0x89c   : > { %4313 = vmatprep.subr.bf16.mxu0 %v8566_v15  ;;  %v4905_v11 = vld [vmem:[%s11485_s15 + $0x120] sm:$0xff] }
 0x89d   : > { %v2374_v15 = vsel %vm2373_vm14, %v2344_v13, %v2356_v14  ;;  %v4909_v13 = vld [vmem:[%s11485_s15 + $0x140] sm:$0xff] }
 0x89e   : > { %4109 = vmatpush1.bf16.msra.mxu1 %v8561_v16  ;;  %v2383_v16 = vpack.c.bf16 %v2374_v15, %v2374_v15  ;;  %v4913_v14 = vld [vmem:[%s11485_s15 + $0x160] sm:$0xff] }
 0x89f   : > { %4314 = vmatpush1.bf16.msra.mxu0 %v8564_v17  ;;  %4110 = vmatprep.subr.bf16.mxu1 %v8569_v18  ;;  %v8619_v17 = vld [vmem:[%s11483_s13] ss:$8 sps:$4 sm:$0xff]   ;;  %v8624_v18 = vld [vmem:[%s11483_s13 + $0x14] ss:$8 sps:$4 sm:$0xff]   ;;  %v7572_v15 = vcombine.high %v4909_v13, %v4913_v14 }
 0x8a0   : > { %4315 = vmatprep.subr.bf16.mxu0 %v8572_v58  ;;  %v8622_v58 = vld [vmem:[%s11483_s13 + $0x10] ss:$8 sps:$4 sm:$0xff]  }
 0x8a2   : > { %4111 = vmatpush1.bf16.msra.mxu1 %v8567_v19  ;;  %v8625_v19 = vld [vmem:[%s11483_s13 + $0x20] ss:$8 sps:$4 sm:$0xff]  }
 0x8a3   : > { %4316 = vmatpush1.bf16.msra.mxu0 %v8570_v20  ;;  %4112 = vmatprep.subr.bf16.mxu1 %v8575_v23  ;;  %v8630_v20 = vld [vmem:[%s11483_s13 + $0x34] ss:$8 sps:$4 sm:$0xff]   ;;  %v8628_v23 = vld [vmem:[%s11483_s13 + $0x30] ss:$8 sps:$4 sm:$0xff]  }
 0x8a4   : > { %4317 = vmatprep.subr.bf16.mxu0 %v8578_v52  ;;  %v8633_v52 = vld [vmem:[%s11483_s13 + $0x44] ss:$8 sps:$4 sm:$0xff]  }
 0x8a6   : > { %4113 = vmatpush1.bf16.msra.mxu1 %v8573_v21  ;;  %v8631_v21 = vld [vmem:[%s11483_s13 + $0x40] ss:$8 sps:$4 sm:$0xff]  }
 0x8a7   : > { %4318 = vmatpush1.bf16.msra.mxu0 %v8576_v43  ;;  %4114 = vmatprep.subr.bf16.mxu1 %v8581_v45  ;;  %v8636_v43 = vld [vmem:[%s11483_s13 + $0x54] ss:$8 sps:$4 sm:$0xff]   ;;  %v8634_v45 = vld [vmem:[%s11483_s13 + $0x50] ss:$8 sps:$4 sm:$0xff]  }
 0x8a8   : > { %4319 = vmatprep.subr.bf16.mxu0 %v8584_v51  ;;  %v8639_v51 = vld [vmem:[%s11483_s13 + $0x64] ss:$8 sps:$4 sm:$0xff]  }
 0x8aa   : > { %4115 = vmatpush1.bf16.msra.mxu1 %v8579_v42  ;;  %v8637_v42 = vld [vmem:[%s11483_s13 + $0x60] ss:$8 sps:$4 sm:$0xff]  }
 0x8ab   : > { %4320 = vmatpush1.bf16.msra.mxu0 %v8582_v61  ;;  %4116 = vmatprep.subr.bf16.mxu1 %v8587_v22  ;;  %v8642_v61 = vld [vmem:[%s11483_s13 + $0x74] ss:$8 sps:$4 sm:$0xff]   ;;  %v8640_v22 = vld [vmem:[%s11483_s13 + $0x70] ss:$8 sps:$4 sm:$0xff]  }
 0x8ac   : > { %4321 = vmatprep.subr.bf16.mxu0 %v8590_v24  ;;  %v8645_v24 = vld [vmem:[%s11483_s13 + $0x84] ss:$8 sps:$4 sm:$0xff]  }
 0x8ae   : > { %4117 = vmatpush1.bf16.msra.mxu1 %v8585_v25  ;;  %v8643_v25 = vld [vmem:[%s11483_s13 + $0x80] ss:$8 sps:$4 sm:$0xff]  }
 0x8af   : > { %4322 = vmatpush1.bf16.msra.mxu0 %v8588_v26  ;;  %4118 = vmatprep.subr.bf16.mxu1 %v8593_v31  ;;  %v8648_v26 = vld [vmem:[%s11483_s13 + $0x94] ss:$8 sps:$4 sm:$0xff]   ;;  %v8646_v31 = vld [vmem:[%s11483_s13 + $0x90] ss:$8 sps:$4 sm:$0xff]  }
 0x8b0   : > { %4323 = vmatprep.subr.bf16.mxu0 %v8596_v27  ;;  %v8651_v27 = vld [vmem:[%s11483_s13 + $0xa4] ss:$8 sps:$4 sm:$0xff]  }
 0x8b2   : > { %4119 = vmatpush1.bf16.msra.mxu1 %v8591_v28  ;;  %v8649_v28 = vld [vmem:[%s11483_s13 + $0xa0] ss:$8 sps:$4 sm:$0xff]  }
 0x8b3   : > { %4324 = vmatpush1.bf16.msra.mxu0 %v8594_v35  ;;  %4120 = vmatprep.subr.bf16.mxu1 %v8599_v29  ;;  %v8654_v35 = vld [vmem:[%s11483_s13 + $0xb4] ss:$8 sps:$4 sm:$0xff]   ;;  %v8652_v29 = vld [vmem:[%s11483_s13 + $0xb0] ss:$8 sps:$4 sm:$0xff]  }
 0x8b4   : > { %4325 = vmatprep.subr.bf16.mxu0 %v8602_v30  ;;  %v8657_v30 = vld [vmem:[%s11483_s13 + $0xc4] ss:$8 sps:$4 sm:$0xff]  }
 0x8b6   : > { %4121 = vmatpush1.bf16.msra.mxu1 %v8597_v32  ;;  %v8655_v32 = vld [vmem:[%s11483_s13 + $0xc0] ss:$8 sps:$4 sm:$0xff]  }
 0x8b7   : > { %4326 = vmatpush1.bf16.msra.mxu0 %v8600_v33  ;;  %4122 = vmatprep.subr.bf16.mxu1 %v8605_v34  ;;  %v8660_v33 = vld [vmem:[%s11483_s13 + $0xd4] ss:$8 sps:$4 sm:$0xff]   ;;  %v8658_v34 = vld [vmem:[%s11483_s13 + $0xd0] ss:$8 sps:$4 sm:$0xff]  }
 0x8b8   : > { %4327 = vmatprep.subr.bf16.mxu0 %v8608_v36  ;;  %v8663_v36 = vld [vmem:[%s11483_s13 + $0xe4] ss:$8 sps:$4 sm:$0xff]  }
 0x8ba   : > { %4123 = vmatpush1.bf16.msra.mxu1 %v8603_v39  ;;  %v8661_v39 = vld [vmem:[%s11483_s13 + $0xe0] ss:$8 sps:$4 sm:$0xff]  }
 0x8bb   : > { %4328 = vmatpush1.bf16.msra.mxu0 %v8606_v56  ;;  %4124 = vmatprep.subr.bf16.mxu1 %v8611_v53  ;;  %v8666_v56 = vld [vmem:[%s11483_s13 + $0xf4] ss:$8 sps:$4 sm:$0xff]   ;;  %v8664_v53 = vld [vmem:[%s11483_s13 + $0xf0] ss:$8 sps:$4 sm:$0xff]  }
 0x8bc   : > { %4329 = vmatprep.subr.bf16.mxu0 %v8614_v40  ;;  %v4869_v40 = vld [vmem:[%s11485_s15] sm:$0xff] }
 0x8bd   : > { %v7532_v47 = vcombine.high %v4869_v40, %v4873_v41 }
 0x8be   : > { %4125 = vmatpush1.bf16.msra.mxu1 %v8609_v5  ;;  %v7531_v5 = vcombine.low %v4869_v40, %v4873_v41 }
 0x8bf   : > { %4330 = vmatpush1.bf16.msra.mxu0 %v8612_v9  ;;  %7463 = vmatprep.subr.msk.bf16.mxu1 %vm3958_vm13, %v7460_v44  ;;  %v4877_v9 = vld [vmem:[%s11485_s15 + $0x40] sm:$0xff] }
 0x8c0   : > { %7465 = vmatprep.subr.msk.bf16.mxu0 %vm3958_vm13, %v7462_v46  ;;  %v4881_v44 = vld [vmem:[%s11485_s15 + $0x60] sm:$0xff] }
 0x8c1   : > { %4127 = vmatmul.mubr.bf16.vlgmr.msra.gmra.mrb[20].mxu1 %v2381_v3  ;;  %v7540_v46 = vcombine.high %v4877_v9, %v4881_v44  ;;  %v7539_v49 = vcombine.low %v4877_v9, %v4881_v44  ;;  %v4981_v9 = vld [vmem:[%s11485_s15 + $0x380] sm:$0xff] }
 0x8c2   : > { %4332 = vmatmul.mubr.bf16.vlgmr.msra.gmra.mrb[32].mxu0 %v2381_v3  ;;  %4136 = vmatpush1.bf16.msra.mxu1 %v3960_v4  ;;  %v4893_v3 = vld [vmem:[%s11485_s15 + $0xc0] sm:$0xff] }
 0x8c3   : > { %4341 = vmatpush1.bf16.msra.mxu0 %v3966_v2  ;;  %4167 = vmatprep.mubr.bf16.mxu1 %v8882_v1  ;;  %v4897_v4 = vld [vmem:[%s11485_s15 + $0xe0] sm:$0xff]  ;;  %v7564_v2 = vcombine.high %v4901_v8, %v4905_v11 }
 0x8c4   : > { %4372 = vmatprep.mubr.bf16.mxu0 %v8882_v1  ;;  %4785 = vmatprep.subr.bf16.mxu1 %v8621_v12  ;;  %v8627_v1 = vld [vmem:[%s11483_s13 + $0x24] ss:$8 sps:$4 sm:$0xff]   ;;  %v7556_v6 = vcombine.high %v4893_v3, %v4897_v4  ;;  %v7555_v7 = vcombine.low %v4893_v3, %v4897_v4  ;;  %v7563_v12 = vcombine.low %v4901_v8, %v4905_v11 }
 0x8c5   : > { %6447 = vmatprep.subr.bf16.mxu0 %v7532_v47  ;;  %v4985_v44 = vld [vmem:[%s11485_s15 + $0x3a0] sm:$0xff] }
 0x8c6   : > { %v7643_v3 = vcombine.low %v4981_v9, %v4985_v44 }
 0x8cd   : > { %7464 = vmatmul.mubr.msk.bf16.vlgmr.msra.gmra.mrb[20].mxu1 %vm3954_vm15, %v2383_v16 }
 0x8ce   : > { %7466 = vmatmul.mubr.msk.bf16.vlgmr.msra.gmra.mrb[32].mxu0 %vm3954_vm15, %v2383_v16  ;;  %4786 = vmatpush1.bf16.msra.mxu1 %v8619_v17  ;;  %v7571_v16 = vcombine.low %v4909_v13, %v4913_v14  ;;  %v4917_v17 = vld [vmem:[%s11485_s15 + $0x180] sm:$0xff] }
 0x8cf   : > { %4787 = vmatprep.subr.bf16.mxu1 %v8624_v18  ;;  %6448 = vmatpush1.bf16.msra.mxu0 %v7531_v5  ;;  %v4921_v18 = vld [vmem:[%s11485_s15 + $0x1a0] sm:$0xff] }
 0x8d0   : > { %6449 = vmatprep.subr.bf16.mxu0 %v7540_v46 }
 0x8d2   : > { %4788 = vmatpush1.bf16.msra.mxu1 %v8622_v58  ;;  %v7580_v58 = vcombine.high %v4917_v17, %v4921_v18 }
 0x8d3   : > { %4789 = vmatprep.subr.bf16.mxu1 %v8627_v1  ;;  %6450 = vmatpush1.bf16.msra.mxu0 %v7539_v49  ;;  %v7579_v1 = vcombine.low %v4917_v17, %v4921_v18  ;;  %v7644_v49 = vcombine.high %v4981_v9, %v4985_v44  ;;  %v8667_v17 = vld [vmem:[%s11483_s13 + $0x100] ss:$8 sps:$4 sm:$0xff]   ;;  %v8712_v44 = vld [vmem:[%s11483_s13 + $0x1f0] ss:$8 sps:$4 sm:$0xff]  }
 0x8d4   : > { %6451 = vmatprep.subr.bf16.mxu0 %v7548_v63  ;;  %v4874_v9 = vld [vmem:[%s11485_s15 + $0x28] sm:$0xff] }
 0x8d6   : > { %4790 = vmatpush1.bf16.msra.mxu1 %v8625_v19  ;;  %v4925_v19 = vld [vmem:[%s11485_s15 + $0x1c0] sm:$0xff] }
 0x8d7   : > { %4791 = vmatprep.subr.bf16.mxu1 %v8630_v20  ;;  %6452 = vmatpush1.bf16.msra.mxu0 %v7547_v0  ;;  %v4929_v20 = vld [vmem:[%s11485_s15 + $0x1e0] sm:$0xff] }
 0x8d8   : > { %6453 = vmatprep.subr.bf16.mxu0 %v7556_v6 }
 0x8da   : > { %4792 = vmatpush1.bf16.msra.mxu1 %v8628_v23  ;;  %v7588_v23 = vcombine.high %v4925_v19, %v4929_v20 }
 0x8db   : > { %4793 = vmatprep.subr.bf16.mxu1 %v8633_v52  ;;  %6454 = vmatpush1.bf16.msra.mxu0 %v7555_v7  ;;  %v7587_v52 = vcombine.low %v4925_v19, %v4929_v20  ;;  %v8670_v19 = vld [vmem:[%s11483_s13 + $0x110] ss:$8 sps:$4 sm:$0xff]   ;;  %v8675_v20 = vld [vmem:[%s11483_s13 + $0x124] ss:$8 sps:$4 sm:$0xff]  }
 0x8dc   : > { %6455 = vmatprep.subr.bf16.mxu0 %v7564_v2 }
 0x8de   : > { %4794 = vmatpush1.bf16.msra.mxu1 %v8631_v21  ;;  %v4933_v21 = vld [vmem:[%s11485_s15 + $0x200] sm:$0xff] }
 0x8df   : > { %4795 = vmatprep.subr.bf16.mxu1 %v8636_v43  ;;  %6456 = vmatpush1.bf16.msra.mxu0 %v7563_v12  ;;  %v4937_v43 = vld [vmem:[%s11485_s15 + $0x220] sm:$0xff] }
 0x8e0   : > { %6457 = vmatprep.subr.bf16.mxu0 %v7572_v15 }
 0x8e2   : > { %4796 = vmatpush1.bf16.msra.mxu1 %v8634_v45  ;;  %v7596_v45 = vcombine.high %v4933_v21, %v4937_v43 }
 0x8e3   : > { %4797 = vmatprep.subr.bf16.mxu1 %v8639_v51  ;;  %6458 = vmatpush1.bf16.msra.mxu0 %v7571_v16  ;;  %v7595_v51 = vcombine.low %v4933_v21, %v4937_v43  ;;  %v8676_v21 = vld [vmem:[%s11483_s13 + $0x130] ss:$8 sps:$4 sm:$0xff]   ;;  %v8681_v43 = vld [vmem:[%s11483_s13 + $0x144] ss:$8 sps:$4 sm:$0xff]  }
 0x8e4   : > { %6459 = vmatprep.subr.bf16.mxu0 %v7580_v58  ;;  %v8672_v58 = vld [vmem:[%s11483_s13 + $0x114] ss:$8 sps:$4 sm:$0xff]  }
 0x8e6   : > { %4798 = vmatpush1.bf16.msra.mxu1 %v8637_v42  ;;  %v4941_v42 = vld [vmem:[%s11485_s15 + $0x240] sm:$0xff] }
 0x8e7   : > { %4799 = vmatprep.subr.bf16.mxu1 %v8642_v61  ;;  %6460 = vmatpush1.bf16.msra.mxu0 %v7579_v1  ;;  %v4945_v61 = vld [vmem:[%s11485_s15 + $0x260] sm:$0xff] }
 0x8e8   : > { %6461 = vmatprep.subr.bf16.mxu0 %v7588_v23  ;;  %v8673_v23 = vld [vmem:[%s11483_s13 + $0x120] ss:$8 sps:$4 sm:$0xff]  }
 0x8ea   : > { %4800 = vmatpush1.bf16.msra.mxu1 %v8640_v22  ;;  %v7604_v22 = vcombine.high %v4941_v42, %v4945_v61 }
 0x8eb   : > { %4801 = vmatprep.subr.bf16.mxu1 %v8645_v24  ;;  %6462 = vmatpush1.bf16.msra.mxu0 %v7587_v52  ;;  %v7603_v24 = vcombine.low %v4941_v42, %v4945_v61  ;;  %v8678_v52 = vld [vmem:[%s11483_s13 + $0x134] ss:$8 sps:$4 sm:$0xff]   ;;  %v8682_v42 = vld [vmem:[%s11483_s13 + $0x150] ss:$8 sps:$4 sm:$0xff]   ;;  %v8687_v61 = vld [vmem:[%s11483_s13 + $0x164] ss:$8 sps:$4 sm:$0xff]  }
 0x8ec   : > { %6463 = vmatprep.subr.bf16.mxu0 %v7596_v45  ;;  %v8679_v45 = vld [vmem:[%s11483_s13 + $0x140] ss:$8 sps:$4 sm:$0xff]  }
 0x8ee   : > { %4802 = vmatpush1.bf16.msra.mxu1 %v8643_v25  ;;  %v4949_v25 = vld [vmem:[%s11485_s15 + $0x280] sm:$0xff] }
 0x8ef   : > { %4803 = vmatprep.subr.bf16.mxu1 %v8648_v26  ;;  %6464 = vmatpush1.bf16.msra.mxu0 %v7595_v51  ;;  %v4953_v26 = vld [vmem:[%s11485_s15 + $0x2a0] sm:$0xff]  ;;  %v8684_v51 = vld [vmem:[%s11483_s13 + $0x154] ss:$8 sps:$4 sm:$0xff]  }
 0x8f0   : > { %6465 = vmatprep.subr.bf16.mxu0 %v7604_v22  ;;  %v8685_v22 = vld [vmem:[%s11483_s13 + $0x160] ss:$8 sps:$4 sm:$0xff]  }
 0x8f2   : > { %4804 = vmatpush1.bf16.msra.mxu1 %v8646_v31  ;;  %v7612_v31 = vcombine.high %v4949_v25, %v4953_v26 }
 0x8f3   : > { %4805 = vmatprep.subr.bf16.mxu1 %v8651_v27  ;;  %6466 = vmatpush1.bf16.msra.mxu0 %v7603_v24  ;;  %v7611_v27 = vcombine.low %v4949_v25, %v4953_v26  ;;  %v8690_v24 = vld [vmem:[%s11483_s13 + $0x174] ss:$8 sps:$4 sm:$0xff]   ;;  %v8688_v25 = vld [vmem:[%s11483_s13 + $0x170] ss:$8 sps:$4 sm:$0xff]   ;;  %v8693_v26 = vld [vmem:[%s11483_s13 + $0x184] ss:$8 sps:$4 sm:$0xff]  }
 0x8f4   : > { %6467 = vmatprep.subr.bf16.mxu0 %v7612_v31  ;;  %v8691_v31 = vld [vmem:[%s11483_s13 + $0x180] ss:$8 sps:$4 sm:$0xff]  }
 0x8f6   : > { %4806 = vmatpush1.bf16.msra.mxu1 %v8649_v28  ;;  %v4957_v28 = vld [vmem:[%s11485_s15 + $0x2c0] sm:$0xff] }
 0x8f7   : > { %4807 = vmatprep.subr.bf16.mxu1 %v8654_v35  ;;  %v4961_v35 = vld [vmem:[%s11485_s15 + $0x2e0] sm:$0xff]  ;;  %6468 = vmatpush1.bf16.msra.mxu0 %v7611_v27  ;;  %v8696_v27 = vld [vmem:[%s11483_s13 + $0x194] ss:$8 sps:$4 sm:$0xff]  }
 0x8fa   : > { %4808 = vmatpush1.bf16.msra.mxu1 %v8652_v29  ;;  %v7620_v29 = vcombine.high %v4957_v28, %v4961_v35 }
 0x8fb   : > { %4809 = vmatprep.subr.bf16.mxu1 %v8657_v30  ;;  %v7619_v30 = vcombine.low %v4957_v28, %v4961_v35  ;;  %v8694_v28 = vld [vmem:[%s11483_s13 + $0x190] ss:$8 sps:$4 sm:$0xff]   ;;  %v8699_v35 = vld [vmem:[%s11483_s13 + $0x1a4] ss:$8 sps:$4 sm:$0xff]  }
 0x8fc   : > { %6469 = vmatprep.subr.bf16.mxu0 %v7620_v29  ;;  %v8697_v29 = vld [vmem:[%s11483_s13 + $0x1a0] ss:$8 sps:$4 sm:$0xff]  }
 0x8fd   : > { %6470 = vmatpush1.bf16.msra.mxu0 %v7619_v30  ;;  %v8702_v30 = vld [vmem:[%s11483_s13 + $0x1b4] ss:$8 sps:$4 sm:$0xff]  }
 0x8fe   : > { %4810 = vmatpush1.bf16.msra.mxu1 %v8655_v32  ;;  %v4965_v32 = vld [vmem:[%s11485_s15 + $0x300] sm:$0xff] }
 0x8ff   : > { %4811 = vmatprep.subr.bf16.mxu1 %v8660_v33  ;;  %v4969_v33 = vld [vmem:[%s11485_s15 + $0x320] sm:$0xff] }
 0x902   : > { %4812 = vmatpush1.bf16.msra.mxu1 %v8658_v34  ;;  %v7628_v34 = vcombine.high %v4965_v32, %v4969_v33 }
 0x903   : > { %4813 = vmatprep.subr.bf16.mxu1 %v8663_v36  ;;  %v7627_v36 = vcombine.low %v4965_v32, %v4969_v33  ;;  %v8700_v32 = vld [vmem:[%s11483_s13 + $0x1b0] ss:$8 sps:$4 sm:$0xff]   ;;  %v8705_v33 = vld [vmem:[%s11483_s13 + $0x1c4] ss:$8 sps:$4 sm:$0xff]  }
 0x904   : > { %6471 = vmatprep.subr.bf16.mxu0 %v7628_v34  ;;  %v8703_v34 = vld [vmem:[%s11483_s13 + $0x1c0] ss:$8 sps:$4 sm:$0xff]  }
 0x905   : > { %6472 = vmatpush1.bf16.msra.mxu0 %v7627_v36  ;;  %v8708_v36 = vld [vmem:[%s11483_s13 + $0x1d4] ss:$8 sps:$4 sm:$0xff]  }
 0x906   : > { %4814 = vmatpush1.bf16.msra.mxu1 %v8661_v39  ;;  %v10572_v39 = vld [vmem:[%s11482_s12] sm:$0xf] }
 0x907   : > { %4815 = vmatprep.subr.bf16.mxu1 %v8666_v56  ;;  %v4973_v56 = vld [vmem:[%s11485_s15 + $0x340] sm:$0xff]  ;;  %v2647_v41 = vrot.slane %v10572_v39, %v9354_v54  ;;  %v2651_v47 = vrot.slane %v10572_v39, %v9363_v57 }
 0x90a   : > { %4816 = vmatpush1.bf16.msra.mxu1 %v8664_v53  ;;  %v4977_v53 = vld [vmem:[%s11485_s15 + $0x360] sm:$0xff] }
 0x90b   : > { %4826 = vmatprep.subr.bf16.mxu1 %v8669_v60  ;;  %v2658_v60 = vsub.s32 3, %v9105_v10  ;;  %v7636_v40 = vcombine.high %v4973_v56, %v4977_v53  ;;  %v7635_v5 = vcombine.low %v4973_v56, %v4977_v53  ;;  %v8706_v56 = vld [vmem:[%s11483_s13 + $0x1d0] ss:$8 sps:$4 sm:$0xff]   ;;  %v2655_v53 = vrot.slane %v10572_v39, %v9357_v55 }
 0x90d   : > { %6473 = vmatprep.subr.bf16.mxu0 %v7636_v40  ;;  %v2659_v46 = vrot.slane %v10572_v39, %v2658_v60  ;;  %v8711_v40 = vld [vmem:[%s11483_s13 + $0x1e4] ss:$8 sps:$4 sm:$0xff]  }
 0x90e   : > { %6474 = vmatpush1.bf16.msra.mxu0 %v7635_v5  ;;  %v4870_v39 = vld [vmem:[%s11485_s15 + $0x8] sm:$0xff] }
 0x90f   : > { %6475 = vmatprep.subr.bf16.mxu0 %v7644_v49  ;;  %v7534_v49 = vcombine.high %v4870_v39, %v4874_v9 }
 0x912   : > { %6476 = vmatpush1.bf16.msra.mxu0 %v7643_v3 }
 0x9a0   : > { %v4169_v59 = vpop.f32.mrb[20].mxu1 }
 0x9a1   : > { %v7952_v62 = vadd.f32 %v4169_v59, %v2647_v41  ;;  %v10594_v63 = vpop.f32.mrb[32].mxu0  ;;  %v4171_v0 = vpop.f32.mrb[21].mxu1  ;;  %v8709_v41 = vld [vmem:[%s11483_s13 + $0x1e0] ss:$8 sps:$4 sm:$0xff]  }
 0x9a2   : > { %v7953_v4 = vadd.f32 %v4171_v0, %v2651_v47  ;;  %v4376_v6 = vpop.f32.mrb[33].mxu0  ;;  %v4173_v7 = vpop.f32.mrb[22].mxu1  ;;  %v7954_v5 = vadd.f32 %v10594_v63, %v2655_v53  ;;  %v8714_v47 = vld [vmem:[%s11483_s13 + $0x1f4] ss:$8 sps:$4 sm:$0xff]   ;;  %v4878_v59 = vld [vmem:[%s11485_s15 + $0x48] sm:$0xff]  ;;  %v7533_v63 = vcombine.low %v4870_v39, %v4874_v9 }
 0x9a3   : > { %v4381_v8 = vmax.f32 %v7952_v62, 0.0  ;;  %v7955_v11 = vadd.f32 %v4376_v6, %v2659_v46  ;;  %v4378_v2 = vpop.f32.mrb[34].mxu0  ;;  %v4174_v12 = vpop.f32.mrb[23].mxu1  ;;  %v4882_v62 = vld [vmem:[%s11485_s15 + $0x68] sm:$0xff] }
 0x9a4   : > { %v4382_v13 = vmax.f32 %v7953_v4, 0.0  ;;  %v4379_v14 = vpop.f32.mrb[35].mxu0  ;;  %v4383_v46 = vmax.f32 %v7954_v5, 0.0  ;;  %v7542_v3 = vcombine.high %v4878_v59, %v4882_v62  ;;  %v4886_v4 = vld [vmem:[%s11485_s15 + $0x88] sm:$0xff]  ;;  %v7541_v7 = vcombine.low %v4878_v59, %v4882_v62 }
 0x9a5   : > { %v4384_v15 = vmax.f32 %v7955_v11, 0.0  ;;  %v4385_v18 = vpack.c.bf16 %v4381_v8, %v4381_v8  ;;  %v4890_v6 = vld [vmem:[%s11485_s15 + $0xa8] sm:$0xff] }
 0x9a6   : > { %v4386_v16 = vpack.c.bf16 %v4382_v13, %v4382_v13  ;;  %v4387_v0 = vpack.c.bf16 %v4383_v46, %v4383_v46  ;;  %v7550_v8 = vcombine.high %v4886_v4, %v4890_v6  ;;  %v4894_v11 = vld [vmem:[%s11485_s15 + $0xc8] sm:$0xff]  ;;  %v7549_v12 = vcombine.low %v4886_v4, %v4890_v6 }
 0x9a7   : > { %v4388_v1 = vpack.c.bf16 %v4384_v15, %v4384_v15  ;;  %v4898_v2 = vld [vmem:[%s11485_s15 + $0xe8] sm:$0xff] }
 0x9a8   : > { %4817 = vmatprep.mubr.bf16.mxu1 %v4386_v16  ;;  %v7558_v13 = vcombine.high %v4894_v11, %v4898_v2  ;;  %v4902_v14 = vld [vmem:[%s11485_s15 + $0x108] sm:$0xff]  ;;  %v7557_v16 = vcombine.low %v4894_v11, %v4898_v2 }
 0x9a9   : > { %4818 = vmatmul.mubr.bf16.vlgmr.msra.gmra.mrb[24].mxu1 %v4385_v18  ;;  %v4906_v15 = vld [vmem:[%s11485_s15 + $0x128] sm:$0xff] }
 0x9aa   : > { %4827 = vmatpush1.bf16.msra.mxu1 %v8667_v17  ;;  %4858 = vmatprep.mubr.bf16.mxu1 %v4388_v1  ;;  %v7566_v17 = vcombine.high %v4902_v14, %v4906_v15  ;;  %v4910_v18 = vld [vmem:[%s11485_s15 + $0x148] sm:$0xff]  ;;  %v7565_v1 = vcombine.low %v4902_v14, %v4906_v15 }
 0x9ab   : > { %4828 = vmatprep.subr.bf16.mxu1 %v8672_v58  ;;  %v4914_v58 = vld [vmem:[%s11485_s15 + $0x168] sm:$0xff] }
 0x9ac   : > { %v4966_v53 = vld [vmem:[%s11485_s15 + $0x308] sm:$0xff] }
 0x9ad   : > { %v4978_v39 = vld [vmem:[%s11485_s15 + $0x368] sm:$0xff] }
 0x9ae   : > { %4829 = vmatpush1.bf16.msra.mxu1 %v8670_v19  ;;  %v7574_v19 = vcombine.high %v4910_v18, %v4914_v58  ;;  %v4982_v46 = vld [vmem:[%s11485_s15 + $0x388] sm:$0xff] }
 0x9af   : > { %4830 = vmatprep.subr.bf16.mxu1 %v8675_v20  ;;  %v4918_v20 = vld [vmem:[%s11485_s15 + $0x188] sm:$0xff] }
 0x9b0   : > { %v4990_v4 = vld [vmem:[%s11485_s15 + $0x3c8] sm:$0xff] }
 0x9b1   : > { %v4998_v14 = vld [vmem:[%s11485_s15 + $0x408] sm:$0xff] }
 0x9b2   : > { %4831 = vmatpush1.bf16.msra.mxu1 %v8673_v23  ;;  %v4922_v23 = vld [vmem:[%s11485_s15 + $0x1a8] sm:$0xff] }
 0x9b3   : > { %4832 = vmatprep.subr.bf16.mxu1 %v8678_v52  ;;  %v7573_v52 = vcombine.low %v4910_v18, %v4914_v58 }
 0x9b6   : > { %4833 = vmatpush1.bf16.msra.mxu1 %v8676_v21  ;;  %v7582_v21 = vcombine.high %v4918_v20, %v4922_v23 }
 0x9b7   : > { %4834 = vmatprep.subr.bf16.mxu1 %v8681_v43  ;;  %v4926_v43 = vld [vmem:[%s11485_s15 + $0x1c8] sm:$0xff] }
 0x9ba   : > { %4835 = vmatpush1.bf16.msra.mxu1 %v8679_v45  ;;  %v4930_v45 = vld [vmem:[%s11485_s15 + $0x1e8] sm:$0xff] }
 0x9bb   : > { %4836 = vmatprep.subr.bf16.mxu1 %v8684_v51  ;;  %v7581_v51 = vcombine.low %v4918_v20, %v4922_v23 }
 0x9be   : > { %4837 = vmatpush1.bf16.msra.mxu1 %v8682_v42  ;;  %v7590_v42 = vcombine.high %v4926_v43, %v4930_v45 }
 0x9bf   : > { %4838 = vmatprep.subr.bf16.mxu1 %v8687_v61  ;;  %v4934_v61 = vld [vmem:[%s11485_s15 + $0x208] sm:$0xff] }
 0x9c2   : > { %4839 = vmatpush1.bf16.msra.mxu1 %v8685_v22  ;;  %v4938_v22 = vld [vmem:[%s11485_s15 + $0x228] sm:$0xff] }
 0x9c3   : > { %4840 = vmatprep.subr.bf16.mxu1 %v8690_v24  ;;  %v7589_v24 = vcombine.low %v4926_v43, %v4930_v45  ;;  %v5005_v43 = vld [vmem:[%s11485_s15 + $0x440] sm:$0xff] }
 0x9c6   : > { %4841 = vmatpush1.bf16.msra.mxu1 %v8688_v25  ;;  %v7598_v25 = vcombine.high %v4934_v61, %v4938_v22 }
 0x9c7   : > { %4842 = vmatprep.subr.bf16.mxu1 %v8693_v26  ;;  %v4942_v26 = vld [vmem:[%s11485_s15 + $0x248] sm:$0xff] }
 0x9ca   : > { %4843 = vmatpush1.bf16.msra.mxu1 %v8691_v31  ;;  %v4946_v31 = vld [vmem:[%s11485_s15 + $0x268] sm:$0xff] }
 0x9cb   : > { %4844 = vmatprep.subr.bf16.mxu1 %v8696_v27  ;;  %v7597_v27 = vcombine.low %v4934_v61, %v4938_v22  ;;  %v5006_v61 = vld [vmem:[%s11485_s15 + $0x448] sm:$0xff] }
 0x9cc   : > { %v5010_v22 = vld [vmem:[%s11485_s15 + $0x468] sm:$0xff] }
 0x9ce   : > { %4845 = vmatpush1.bf16.msra.mxu1 %v8694_v28  ;;  %v7606_v28 = vcombine.high %v4942_v26, %v4946_v31 }
 0x9cf   : > { %4846 = vmatprep.subr.bf16.mxu1 %v8699_v35  ;;  %v4950_v35 = vld [vmem:[%s11485_s15 + $0x288] sm:$0xff] }
 0x9d2   : > { %4847 = vmatpush1.bf16.msra.mxu1 %v8697_v29  ;;  %v4954_v29 = vld [vmem:[%s11485_s15 + $0x2a8] sm:$0xff] }
 0x9d3   : > { %4848 = vmatprep.subr.bf16.mxu1 %v8702_v30  ;;  %v7605_v30 = vcombine.low %v4942_v26, %v4946_v31 }
 0x9d6   : > { %4849 = vmatpush1.bf16.msra.mxu1 %v8700_v32  ;;  %v7614_v32 = vcombine.high %v4950_v35, %v4954_v29 }
 0x9d7   : > { %4850 = vmatprep.subr.bf16.mxu1 %v8705_v33  ;;  %v4958_v33 = vld [vmem:[%s11485_s15 + $0x2c8] sm:$0xff] }
 0x9da   : > { %4851 = vmatpush1.bf16.msra.mxu1 %v8703_v34  ;;  %v4962_v34 = vld [vmem:[%s11485_s15 + $0x2e8] sm:$0xff] }
 0x9db   : > { %4852 = vmatprep.subr.bf16.mxu1 %v8708_v36  ;;  %v7613_v36 = vcombine.low %v4950_v35, %v4954_v29  ;;  %v5017_v35 = vld [vmem:[%s11485_s15 + $0x4a0] sm:$0xff]  ;;  %v5014_v29 = vld [vmem:[%s11485_s15 + $0x488] sm:$0xff] }
 0x9de   : > { %4853 = vmatpush1.bf16.msra.mxu1 %v8706_v56  ;;  %v7622_v56 = vcombine.high %v4958_v33, %v4962_v34 }
 0x9df   : > { %4854 = vmatprep.subr.bf16.mxu1 %v8711_v40  ;;  %v4970_v40 = vld [vmem:[%s11485_s15 + $0x328] sm:$0xff] }
 0x9e0   : > { %v7630_v5 = vcombine.high %v4966_v53, %v4970_v40  ;;  %v7629_v9 = vcombine.low %v4966_v53, %v4970_v40  ;;  %v5025_v53 = vld [vmem:[%s11485_s15 + $0x4e0] sm:$0xff]  ;;  %v5022_v40 = vld [vmem:[%s11485_s15 + $0x4c8] sm:$0xff] }
 0x9e2   : > { %4855 = vmatpush1.bf16.msra.mxu1 %v8709_v41  ;;  %v7621_v41 = vcombine.low %v4958_v33, %v4962_v34  ;;  %v7669_v33 = vcombine.low %v5006_v61, %v5010_v22 }
 0x9e3   : > { %4856 = vmatprep.subr.bf16.mxu1 %v8714_v47  ;;  %v4974_v47 = vld [vmem:[%s11485_s15 + $0x348] sm:$0xff] }
 0x9e4   : > { %v7637_v59 = vcombine.low %v4974_v47, %v4978_v39 }
 0x9e6   : > { %4857 = vmatpush1.bf16.msra.mxu1 %v8712_v44  ;;  %v7638_v44 = vcombine.high %v4974_v47, %v4978_v39 }
 0x9e7   : > { %6529 = vmatprep.subr.bf16.mxu1 %v7534_v49  ;;  %v4986_v49 = vld [vmem:[%s11485_s15 + $0x3a8] sm:$0xff] }
 0x9e8   : > { %v7646_v62 = vcombine.high %v4982_v46, %v4986_v49 }
 0x9e9   : > { %4859 = vmatmul.mubr.bf16.vlgmr.msra.gmra.mrb[24].mxu1 %v4387_v0  ;;  %v4989_v0 = vld [vmem:[%s11485_s15 + $0x3c0] sm:$0xff] }
 0x9ea   : > { %6530 = vmatpush1.bf16.msra.mxu1 %v7533_v63  ;;  %v7645_v63 = vcombine.low %v4982_v46, %v4986_v49  ;;  %v5033_v46 = vld [vmem:[%s11485_s15 + $0x520] sm:$0xff]  ;;  %v5030_v49 = vld [vmem:[%s11485_s15 + $0x508] sm:$0xff] }
 0x9eb   : > { %6531 = vmatprep.subr.bf16.mxu1 %v7542_v3  ;;  %v4993_v3 = vld [vmem:[%s11485_s15 + $0x3e0] sm:$0xff] }
 0x9ec   : > { %v7652_v6 = vcombine.high %v4989_v0, %v4993_v3 }
 0x9ee   : > { %6532 = vmatpush1.bf16.msra.mxu1 %v7541_v7  ;;  %v4994_v7 = vld [vmem:[%s11485_s15 + $0x3e8] sm:$0xff]  ;;  %6477 = vmatprep.subr.bf16.mxu0 %v7652_v6  ;;  %v5041_v6 = vld [vmem:[%s11485_s15 + $0x560] sm:$0xff] }
 0x9ef   : > { %6533 = vmatprep.subr.bf16.mxu1 %v7550_v8  ;;  %v7651_v8 = vcombine.low %v4989_v0, %v4993_v3  ;;  %v7653_v11 = vcombine.low %v4990_v4, %v4994_v7  ;;  %v7654_v2 = vcombine.high %v4990_v4, %v4994_v7  ;;  %v5037_v4 = vld [vmem:[%s11485_s15 + $0x540] sm:$0xff]  ;;  %v5038_v7 = vld [vmem:[%s11485_s15 + $0x548] sm:$0xff] }
 0x9f1   : > { %6478 = vmatpush1.bf16.msra.mxu0 %v7651_v8  ;;  %v5042_v8 = vld [vmem:[%s11485_s15 + $0x568] sm:$0xff] }
 0x9f2   : > { %6534 = vmatpush1.bf16.msra.mxu1 %v7549_v12  ;;  %v4997_v12 = vld [vmem:[%s11485_s15 + $0x400] sm:$0xff] }
 0x9f3   : > { %6535 = vmatprep.subr.bf16.mxu1 %v7558_v13  ;;  %v5001_v13 = vld [vmem:[%s11485_s15 + $0x420] sm:$0xff] }
 0x9f4   : > { %v7660_v15 = vcombine.high %v4997_v12, %v5001_v13 }
 0x9f6   : > { %6536 = vmatpush1.bf16.msra.mxu1 %v7557_v16  ;;  %v5002_v16 = vld [vmem:[%s11485_s15 + $0x428] sm:$0xff]  ;;  %6488 = vmatprep.subr.bf16.mxu0 %v7660_v15  ;;  %v5049_v15 = vld [vmem:[%s11485_s15 + $0x5a0] sm:$0xff] }
 0x9f7   : > { %6537 = vmatprep.subr.bf16.mxu1 %v7566_v17  ;;  %v7659_v17 = vcombine.low %v4997_v12, %v5001_v13  ;;  %v7661_v18 = vcombine.low %v4998_v14, %v5002_v16  ;;  %v7662_v58 = vcombine.high %v4998_v14, %v5002_v16  ;;  %v7700_v12 = vcombine.high %v5037_v4, %v5041_v6  ;;  %v5045_v14 = vld [vmem:[%s11485_s15 + $0x580] sm:$0xff]  ;;  %v5046_v16 = vld [vmem:[%s11485_s15 + $0x588] sm:$0xff] }
 0x9f8   : > { %v7702_v13 = vcombine.high %v5038_v7, %v5042_v8 }
 0x9fa   : > { %6538 = vmatpush1.bf16.msra.mxu1 %v7565_v1  ;;  %v4453_v1 = vld [vmem:[%s11484_s14] sm:$0x3] }
 0x9fb   : > { %6539 = vmatprep.subr.bf16.mxu1 %v7574_v19  ;;  %v4458_v19 = vrot.slane %v4453_v1, %v9354_v54  ;;  %v4462_v20 = vrot.slane %v4453_v1, %v9363_v57  ;;  %v7708_v1 = vcombine.high %v5045_v14, %v5049_v15 }
 0x9fe   : > { %6540 = vmatpush1.bf16.msra.mxu1 %v7573_v52 }
 0x9ff   : > { %6541 = vmatprep.subr.bf16.mxu1 %v7582_v21 }
 0xa02   : > { %6542 = vmatpush1.bf16.msra.mxu1 %v7581_v51 }
 0xa03   : > { %6543 = vmatprep.subr.bf16.mxu1 %v7590_v42  ;;  %v5009_v42 = vld [vmem:[%s11485_s15 + $0x460] sm:$0xff] }
 0xa04   : > { %v7668_v31 = vcombine.high %v5005_v43, %v5009_v42 }
 0xa06   : > { %6544 = vmatpush1.bf16.msra.mxu1 %v7589_v24 }
 0xa07   : > { %6545 = vmatprep.subr.bf16.mxu1 %v7598_v25 }
 0xa0a   : > { %6546 = vmatpush1.bf16.msra.mxu1 %v7597_v27  ;;  %v7670_v27 = vcombine.high %v5006_v61, %v5010_v22  ;;  %v5061_v61 = vld [vmem:[%s11485_s15 + $0x600] sm:$0xff] }
 0xa0b   : > { %6547 = vmatprep.subr.bf16.mxu1 %v7606_v28  ;;  %v5013_v28 = vld [vmem:[%s11485_s15 + $0x480] sm:$0xff] }
 0xa0c   : > { %v7676_v34 = vcombine.high %v5013_v28, %v5017_v35  ;;  %v5065_v22 = vld [vmem:[%s11485_s15 + $0x620] sm:$0xff] }
 0xa0e   : > { %6548 = vmatpush1.bf16.msra.mxu1 %v7605_v30  ;;  %v5018_v30 = vld [vmem:[%s11485_s15 + $0x4a8] sm:$0xff] }
 0xa0f   : > { %6549 = vmatprep.subr.bf16.mxu1 %v7614_v32  ;;  %v7667_v32 = vcombine.low %v5005_v43, %v5009_v42  ;;  %v7677_v47 = vcombine.low %v5014_v29, %v5018_v30  ;;  %v7707_v43 = vcombine.low %v5045_v14, %v5049_v15 }
 0xa12   : > { %6550 = vmatpush1.bf16.msra.mxu1 %v7613_v36  ;;  %v7678_v36 = vcombine.high %v5014_v29, %v5018_v30  ;;  %v5069_v30 = vld [vmem:[%s11485_s15 + $0x640] sm:$0xff] }
 0xa13   : > { %6551 = vmatprep.subr.bf16.mxu1 %v7622_v56  ;;  %v5021_v56 = vld [vmem:[%s11485_s15 + $0x4c0] sm:$0xff] }
 0xa14   : > { %v7684_v39 = vcombine.high %v5021_v56, %v5025_v53 }
 0xa16   : > { %6552 = vmatpush1.bf16.msra.mxu1 %v7621_v41  ;;  %v5026_v41 = vld [vmem:[%s11485_s15 + $0x4e8] sm:$0xff] }
 0xa17   : > { %6553 = vmatprep.subr.bf16.mxu1 %v7630_v5  ;;  %v7675_v5 = vcombine.low %v5013_v28, %v5017_v35  ;;  %v7724_v35 = vcombine.high %v5061_v61, %v5065_v22 }
 0xa1a   : > { %6554 = vmatpush1.bf16.msra.mxu1 %v7629_v9  ;;  %v7686_v9 = vcombine.high %v5022_v40, %v5026_v41 }
 0xa1b   : > { %6555 = vmatprep.subr.bf16.mxu1 %v7638_v44  ;;  %v5029_v44 = vld [vmem:[%s11485_s15 + $0x500] sm:$0xff] }
 0xa1c   : > { %v7692_v0 = vcombine.high %v5029_v44, %v5033_v46 }
 0xa1e   : > { %6556 = vmatpush1.bf16.msra.mxu1 %v7637_v59  ;;  %v5034_v59 = vld [vmem:[%s11485_s15 + $0x528] sm:$0xff] }
 0xa1f   : > { %6557 = vmatprep.subr.bf16.mxu1 %v7646_v62  ;;  %v7683_v62 = vcombine.low %v5021_v56, %v5025_v53  ;;  %v7694_v3 = vcombine.high %v5030_v49, %v5034_v59 }
 0xa22   : > { %6558 = vmatpush1.bf16.msra.mxu1 %v7645_v63  ;;  %v7685_v63 = vcombine.low %v5022_v40, %v5026_v41  ;;  %v5077_v41 = vld [vmem:[%s11485_s15 + $0x680] sm:$0xff] }
 0xa23   : > { %6559 = vmatprep.subr.bf16.mxu1 %v7654_v2  ;;  %v7693_v2 = vcombine.low %v5030_v49, %v5034_v59  ;;  %v5085_v59 = vld [vmem:[%s11485_s15 + $0x6c0] sm:$0xff] }
 0xa26   : > { %6560 = vmatpush1.bf16.msra.mxu1 %v7653_v11  ;;  %v7691_v11 = vcombine.low %v5029_v44, %v5033_v46 }
 0xa27   : > { %6570 = vmatprep.subr.bf16.mxu1 %v7662_v58  ;;  %v7701_v58 = vcombine.low %v5038_v7, %v5042_v8  ;;  %v5093_v8 = vld [vmem:[%s11485_s15 + $0x700] sm:$0xff] }
 0xabc   : > { %v4860_v23 = vpop.f32.mrb[24].mxu1 }
 0xabd   : > { %v7956_v52 = vadd.f32 %v4860_v23, %v4458_v19  ;;  %v4862_v21 = vpop.f32.mrb[25].mxu1  ;;  %v5057_v23 = vld [vmem:[%s11485_s15 + $0x5e0] sm:$0xff] }
 0xabe   : > { %v7957_v45 = vadd.f32 %v4862_v21, %v4462_v20  ;;  %v4864_v51 = vpop.f32.mrb[26].mxu1  ;;  %v5053_v20 = vld [vmem:[%s11485_s15 + $0x5c0] sm:$0xff]  ;;  %v5058_v21 = vld [vmem:[%s11485_s15 + $0x5e8] sm:$0xff] }
 0xabf   : > { %v4865_v24 = vpop.f32.mrb[27].mxu1  ;;  %v10825_v26 = vpack.c.bf16 %v7956_v52, %v7956_v52  ;;  %v5054_v52 = vld [vmem:[%s11485_s15 + $0x5c8] sm:$0xff]  ;;  %v7716_v51 = vcombine.high %v5053_v20, %v5057_v23 }
 0xac0   : > { %v10823_v25 = vpack.c.bf16 %v7957_v45, %v7957_v45  ;;  %v7718_v42 = vcombine.high %v5054_v52, %v5058_v21  ;;  %v5062_v24 = vld [vmem:[%s11485_s15 + $0x608] sm:$0xff]  ;;  %v7717_v28 = vcombine.low %v5054_v52, %v5058_v21  ;;  %v5109_v21 = vld [vmem:[%s11485_s15 + $0x780] sm:$0xff] }
 0xac2   : > { %6479 = vmatprep.mubr.bf16.mxu0 %v10823_v25  ;;  %6561 = vmatprep.mubr.bf16.mxu1 %v10823_v25 }
 0xac3   : > { %6480 = vmatmul.mubr.bf16.vlgmr.msra.gmra.mrb[36].mxu0 %v10825_v26  ;;  %6562 = vmatmul.mubr.bf16.vlgmr.msra.gmra.mrb[28].mxu1 %v10825_v26 }
 0xac4   : > { %6489 = vmatpush1.bf16.msra.mxu0 %v7659_v17  ;;  %6571 = vmatpush1.bf16.msra.mxu1 %v7661_v18  ;;  %v5050_v17 = vld [vmem:[%s11485_s15 + $0x5a8] sm:$0xff]  ;;  %v7699_v18 = vcombine.low %v5037_v4, %v5041_v6 }
 0xac5   : > { %6490 = vmatprep.subr.bf16.mxu0 %v7668_v31  ;;  %6572 = vmatprep.subr.bf16.mxu1 %v7670_v27  ;;  %v7710_v19 = vcombine.high %v5046_v16, %v5050_v17  ;;  %v7709_v45 = vcombine.low %v5046_v16, %v5050_v17  ;;  %v5066_v31 = vld [vmem:[%s11485_s15 + $0x628] sm:$0xff]  ;;  %v7715_v27 = vcombine.low %v5053_v20, %v5057_v23  ;;  %v5101_v17 = vld [vmem:[%s11485_s15 + $0x740] sm:$0xff] }
 0xac6   : > { %6520 = vmatprep.mubr.bf16.mxu0 %v9183_v50  ;;  %6602 = vmatprep.mubr.bf16.mxu1 %v9183_v50  ;;  %v7726_v29 = vcombine.high %v5062_v24, %v5066_v31  ;;  %v7725_v56 = vcombine.low %v5062_v24, %v5066_v31  ;;  %v5117_v31 = vld [vmem:[%s11485_s15 + $0x7c0] sm:$0xff] }
 0xac8   : > { %6491 = vmatpush1.bf16.msra.mxu0 %v7667_v32  ;;  %6573 = vmatpush1.bf16.msra.mxu1 %v7669_v33  ;;  %v5073_v32 = vld [vmem:[%s11485_s15 + $0x660] sm:$0xff]  ;;  %v5070_v33 = vld [vmem:[%s11485_s15 + $0x648] sm:$0xff] }
 0xac9   : > { %6492 = vmatprep.subr.bf16.mxu0 %v7676_v34  ;;  %6574 = vmatprep.subr.bf16.mxu1 %v7678_v36  ;;  %v5074_v34 = vld [vmem:[%s11485_s15 + $0x668] sm:$0xff]  ;;  %v7723_v36 = vcombine.low %v5061_v61, %v5065_v22  ;;  %v7732_v53 = vcombine.high %v5069_v30, %v5073_v32 }
 0xaca   : > { %v7734_v40 = vcombine.high %v5070_v33, %v5074_v34  ;;  %v7733_v44 = vcombine.low %v5070_v33, %v5074_v34  ;;  %v4871_v34 = vld [vmem:[%s11485_s15 + $0x10] sm:$0xff] }
 0xacc   : > { %6493 = vmatpush1.bf16.msra.mxu0 %v7675_v5  ;;  %6575 = vmatpush1.bf16.msra.mxu1 %v7677_v47  ;;  %v5081_v5 = vld [vmem:[%s11485_s15 + $0x6a0] sm:$0xff]  ;;  %v5078_v47 = vld [vmem:[%s11485_s15 + $0x688] sm:$0xff] }
 0xacd   : > { %6494 = vmatprep.subr.bf16.mxu0 %v7684_v39  ;;  %6576 = vmatprep.subr.bf16.mxu1 %v7686_v9  ;;  %v5082_v39 = vld [vmem:[%s11485_s15 + $0x6a8] sm:$0xff]  ;;  %v7731_v9 = vcombine.low %v5069_v30, %v5073_v32  ;;  %v7740_v46 = vcombine.high %v5077_v41, %v5081_v5 }
 0xace   : > { %v7742_v49 = vcombine.high %v5078_v47, %v5082_v39  ;;  %v7741_v4 = vcombine.low %v5078_v47, %v5082_v39  ;;  %v4879_v39 = vld [vmem:[%s11485_s15 + $0x50] sm:$0xff] }
 0xad0   : > { %6495 = vmatpush1.bf16.msra.mxu0 %v7683_v62  ;;  %6577 = vmatpush1.bf16.msra.mxu1 %v7685_v63  ;;  %v5089_v62 = vld [vmem:[%s11485_s15 + $0x6e0] sm:$0xff]  ;;  %v5086_v63 = vld [vmem:[%s11485_s15 + $0x6c8] sm:$0xff] }
 0xad1   : > { %6496 = vmatprep.subr.bf16.mxu0 %v7692_v0  ;;  %6578 = vmatprep.subr.bf16.mxu1 %v7694_v3  ;;  %v5090_v0 = vld [vmem:[%s11485_s15 + $0x6e8] sm:$0xff]  ;;  %v7739_v3 = vcombine.low %v5077_v41, %v5081_v5  ;;  %v7748_v6 = vcombine.high %v5085_v59, %v5089_v62 }
 0xad2   : > { %v7750_v7 = vcombine.high %v5086_v63, %v5090_v0  ;;  %v7749_v14 = vcombine.low %v5086_v63, %v5090_v0  ;;  %v4887_v0 = vld [vmem:[%s11485_s15 + $0x90] sm:$0xff] }
 0xad4   : > { %6497 = vmatpush1.bf16.msra.mxu0 %v7691_v11  ;;  %6579 = vmatpush1.bf16.msra.mxu1 %v7693_v2  ;;  %v5097_v11 = vld [vmem:[%s11485_s15 + $0x720] sm:$0xff]  ;;  %v5094_v2 = vld [vmem:[%s11485_s15 + $0x708] sm:$0xff] }
 0xad5   : > { %6498 = vmatprep.subr.bf16.mxu0 %v7700_v12  ;;  %6580 = vmatprep.subr.bf16.mxu1 %v7702_v13  ;;  %v5098_v12 = vld [vmem:[%s11485_s15 + $0x728] sm:$0xff]  ;;  %v7747_v13 = vcombine.low %v5085_v59, %v5089_v62  ;;  %v7756_v15 = vcombine.high %v5093_v8, %v5097_v11 }
 0xad6   : > { %v7758_v16 = vcombine.high %v5094_v2, %v5098_v12  ;;  %v7757_v20 = vcombine.low %v5094_v2, %v5098_v12  ;;  %v4895_v12 = vld [vmem:[%s11485_s15 + $0xd0] sm:$0xff] }
 0xad8   : > { %6499 = vmatpush1.bf16.msra.mxu0 %v7699_v18  ;;  %6581 = vmatpush1.bf16.msra.mxu1 %v7701_v58  ;;  %v5105_v18 = vld [vmem:[%s11485_s15 + $0x760] sm:$0xff]  ;;  %v5102_v58 = vld [vmem:[%s11485_s15 + $0x748] sm:$0xff] }
 0xad9   : > { %6500 = vmatprep.subr.bf16.mxu0 %v7708_v1  ;;  %6582 = vmatprep.subr.bf16.mxu1 %v7710_v19  ;;  %v5106_v1 = vld [vmem:[%s11485_s15 + $0x768] sm:$0xff]  ;;  %v7755_v19 = vcombine.low %v5093_v8, %v5097_v11  ;;  %v7764_v23 = vcombine.high %v5101_v17, %v5105_v18 }
 0xada   : > { %v7766_v52 = vcombine.high %v5102_v58, %v5106_v1  ;;  %v7765_v61 = vcombine.low %v5102_v58, %v5106_v1  ;;  %v4903_v58 = vld [vmem:[%s11485_s15 + $0x110] sm:$0xff] }
 0xadb   : > { %v4907_v1 = vld [vmem:[%s11485_s15 + $0x130] sm:$0xff] }
 0xadc   : > { %6501 = vmatpush1.bf16.msra.mxu0 %v7707_v43  ;;  %6583 = vmatpush1.bf16.msra.mxu1 %v7709_v45  ;;  %v5113_v43 = vld [vmem:[%s11485_s15 + $0x7a0] sm:$0xff]  ;;  %v5110_v45 = vld [vmem:[%s11485_s15 + $0x788] sm:$0xff] }
 0xadd   : > { %6502 = vmatprep.subr.bf16.mxu0 %v7716_v51  ;;  %6584 = vmatprep.subr.bf16.mxu1 %v7718_v42  ;;  %v5114_v51 = vld [vmem:[%s11485_s15 + $0x7a8] sm:$0xff]  ;;  %v7763_v42 = vcombine.low %v5101_v17, %v5105_v18  ;;  %v7772_v22 = vcombine.high %v5109_v21, %v5113_v43 }
 0xade   : > { %v7774_v24 = vcombine.high %v5110_v45, %v5114_v51  ;;  %v7773_v30 = vcombine.low %v5110_v45, %v5114_v51  ;;  %v4911_v45 = vld [vmem:[%s11485_s15 + $0x150] sm:$0xff] }
 0xadf   : > { %v4915_v51 = vld [vmem:[%s11485_s15 + $0x170] sm:$0xff] }
 0xae0   : > { %6503 = vmatpush1.bf16.msra.mxu0 %v7715_v27  ;;  %6585 = vmatpush1.bf16.msra.mxu1 %v7717_v28  ;;  %v5121_v27 = vld [vmem:[%s11485_s15 + $0x7e0] sm:$0xff]  ;;  %v5118_v28 = vld [vmem:[%s11485_s15 + $0x7c8] sm:$0xff] }
 0xae1   : > { %6504 = vmatprep.subr.bf16.mxu0 %v7724_v35  ;;  %6586 = vmatprep.subr.bf16.mxu1 %v7726_v29  ;;  %v5122_v35 = vld [vmem:[%s11485_s15 + $0x7e8] sm:$0xff]  ;;  %v7771_v29 = vcombine.low %v5109_v21, %v5113_v43  ;;  %v7780_v32 = vcombine.high %v5117_v31, %v5121_v27  ;;  %v7568_v21 = vcombine.high %v4903_v58, %v4907_v1 }
 0xae2   : > { %v7782_v33 = vcombine.high %v5118_v28, %v5122_v35  ;;  %v7781_v41 = vcombine.low %v5118_v28, %v5122_v35  ;;  %v4919_v28 = vld [vmem:[%s11485_s15 + $0x190] sm:$0xff] }
 0xae3   : > { %v4923_v35 = vld [vmem:[%s11485_s15 + $0x1b0] sm:$0xff] }
 0xae4   : > { %6505 = vmatpush1.bf16.msra.mxu0 %v7723_v36  ;;  %6587 = vmatpush1.bf16.msra.mxu1 %v7725_v56  ;;  %v4875_v36 = vld [vmem:[%s11485_s15 + $0x30] sm:$0xff]  ;;  %v4872_v56 = vld [vmem:[%s11485_s15 + $0x18] sm:$0xff] }
 0xae5   : > { %6506 = vmatprep.subr.bf16.mxu0 %v7732_v53  ;;  %6588 = vmatprep.subr.bf16.mxu1 %v7734_v40  ;;  %v4876_v53 = vld [vmem:[%s11485_s15 + $0x38] sm:$0xff]  ;;  %v7779_v40 = vcombine.low %v5117_v31, %v5121_v27  ;;  %v7536_v5 = vcombine.high %v4871_v34, %v4875_v36  ;;  %v7576_v31 = vcombine.high %v4911_v45, %v4915_v51 }
 0xae6   : > { %v7538_v47 = vcombine.high %v4872_v56, %v4876_v53  ;;  %v7537_v59 = vcombine.low %v4872_v56, %v4876_v53  ;;  %v4927_v56 = vld [vmem:[%s11485_s15 + $0x1d0] sm:$0xff] }
 0xae7   : > { %v4931_v53 = vld [vmem:[%s11485_s15 + $0x1f0] sm:$0xff] }
 0xae8   : > { %6507 = vmatpush1.bf16.msra.mxu0 %v7731_v9  ;;  %6589 = vmatpush1.bf16.msra.mxu1 %v7733_v44  ;;  %v4883_v9 = vld [vmem:[%s11485_s15 + $0x70] sm:$0xff]  ;;  %v4880_v44 = vld [vmem:[%s11485_s15 + $0x58] sm:$0xff] }
 0xae9   : > { %6508 = vmatprep.subr.bf16.mxu0 %v7740_v46  ;;  %6590 = vmatprep.subr.bf16.mxu1 %v7742_v49  ;;  %v4884_v46 = vld [vmem:[%s11485_s15 + $0x78] sm:$0xff]  ;;  %v7535_v49 = vcombine.low %v4871_v34, %v4875_v36  ;;  %v7544_v62 = vcombine.high %v4879_v39, %v4883_v9  ;;  %v7584_v34 = vcombine.high %v4919_v28, %v4923_v35 }
 0xaea   : > { %v7546_v63 = vcombine.high %v4880_v44, %v4884_v46  ;;  %v7545_v8 = vcombine.low %v4880_v44, %v4884_v46  ;;  %v4935_v44 = vld [vmem:[%s11485_s15 + $0x210] sm:$0xff] }
 0xaeb   : > { %v4939_v46 = vld [vmem:[%s11485_s15 + $0x230] sm:$0xff] }
 0xaec   : > { %6509 = vmatpush1.bf16.msra.mxu0 %v7739_v3  ;;  %6591 = vmatpush1.bf16.msra.mxu1 %v7741_v4  ;;  %v4891_v3 = vld [vmem:[%s11485_s15 + $0xb0] sm:$0xff]  ;;  %v4888_v4 = vld [vmem:[%s11485_s15 + $0x98] sm:$0xff] }
 0xaed   : > { %6510 = vmatprep.subr.bf16.mxu0 %v7748_v6  ;;  %6592 = vmatprep.subr.bf16.mxu1 %v7750_v7  ;;  %v4892_v6 = vld [vmem:[%s11485_s15 + $0xb8] sm:$0xff]  ;;  %v7543_v7 = vcombine.low %v4879_v39, %v4883_v9  ;;  %v7552_v11 = vcombine.high %v4887_v0, %v4891_v3  ;;  %v7592_v39 = vcombine.high %v4927_v56, %v4931_v53 }
 0xaee   : > { %v7554_v2 = vcombine.high %v4888_v4, %v4892_v6 }
 0xaf0   : > { %6511 = vmatpush1.bf16.msra.mxu0 %v7747_v13  ;;  %6593 = vmatpush1.bf16.msra.mxu1 %v7749_v14  ;;  %v4899_v13 = vld [vmem:[%s11485_s15 + $0xf0] sm:$0xff]  ;;  %v4896_v14 = vld [vmem:[%s11485_s15 + $0xd8] sm:$0xff] }
 0xaf1   : > { %6512 = vmatprep.subr.bf16.mxu0 %v7756_v15  ;;  %6594 = vmatprep.subr.bf16.mxu1 %v7758_v16  ;;  %v7551_v15 = vcombine.low %v4887_v0, %v4891_v3  ;;  %v7553_v16 = vcombine.low %v4888_v4, %v4892_v6  ;;  %v7560_v17 = vcombine.high %v4895_v12, %v4899_v13  ;;  %v4943_v4 = vld [vmem:[%s11485_s15 + $0x250] sm:$0xff] }
 0xaf2   : > { %v7600_v0 = vcombine.high %v4935_v44, %v4939_v46  ;;  %v4947_v6 = vld [vmem:[%s11485_s15 + $0x270] sm:$0xff] }
 0xaf4   : > { %6513 = vmatpush1.bf16.msra.mxu0 %v7755_v19  ;;  %6595 = vmatpush1.bf16.msra.mxu1 %v7757_v20  ;;  %v4904_v19 = vld [vmem:[%s11485_s15 + $0x118] sm:$0xff] }
 0xaf5   : > { %6514 = vmatprep.subr.bf16.mxu0 %v7764_v23  ;;  %6596 = vmatprep.subr.bf16.mxu1 %v7766_v52  ;;  %v4908_v20 = vld [vmem:[%s11485_s15 + $0x138] sm:$0xff]  ;;  %v7559_v23 = vcombine.low %v4895_v12, %v4899_v13  ;;  %v7608_v12 = vcombine.high %v4943_v4, %v4947_v6 }
 0xaf6   : > { %v7570_v43 = vcombine.high %v4904_v19, %v4908_v20 }
 0xaf8   : > { %6515 = vmatpush1.bf16.msra.mxu0 %v7763_v42  ;;  %6597 = vmatpush1.bf16.msra.mxu1 %v7765_v61  ;;  %v4912_v42 = vld [vmem:[%s11485_s15 + $0x158] sm:$0xff] }
 0xaf9   : > { %6516 = vmatprep.subr.bf16.mxu0 %v7772_v22  ;;  %6598 = vmatprep.subr.bf16.mxu1 %v7774_v24  ;;  %v4916_v61 = vld [vmem:[%s11485_s15 + $0x178] sm:$0xff]  ;;  %v7567_v22 = vcombine.low %v4903_v58, %v4907_v1  ;;  %v7569_v24 = vcombine.low %v4904_v19, %v4908_v20  ;;  %v4959_v19 = vld [vmem:[%s11485_s15 + $0x2d0] sm:$0xff] }
 0xafa   : > { %v7578_v27 = vcombine.high %v4912_v42, %v4916_v61  ;;  %v4963_v20 = vld [vmem:[%s11485_s15 + $0x2f0] sm:$0xff] }
 0xafc   : > { %6517 = vmatpush1.bf16.msra.mxu0 %v7771_v29  ;;  %6599 = vmatpush1.bf16.msra.mxu1 %v7773_v30  ;;  %v4920_v29 = vld [vmem:[%s11485_s15 + $0x198] sm:$0xff] }
 0xafd   : > { %6518 = vmatprep.subr.bf16.mxu0 %v7780_v32  ;;  %6600 = vmatprep.subr.bf16.mxu1 %v7782_v33  ;;  %v4924_v30 = vld [vmem:[%s11485_s15 + $0x1b8] sm:$0xff]  ;;  %v7575_v32 = vcombine.low %v4911_v45, %v4915_v51  ;;  %v7577_v33 = vcombine.low %v4912_v42, %v4916_v61  ;;  %v7624_v45 = vcombine.high %v4959_v19, %v4963_v20  ;;  %v4967_v42 = vld [vmem:[%s11485_s15 + $0x310] sm:$0xff] }
 0xafe   : > { %v7586_v36 = vcombine.high %v4920_v29, %v4924_v30  ;;  %v4971_v61 = vld [vmem:[%s11485_s15 + $0x330] sm:$0xff] }
 0xb00   : > { %6519 = vmatpush1.bf16.msra.mxu0 %v7779_v40  ;;  %6601 = vmatpush1.bf16.msra.mxu1 %v7781_v41  ;;  %v4928_v40 = vld [vmem:[%s11485_s15 + $0x1d8] sm:$0xff] }
 0xb01   : > { %6611 = vmatprep.subr.bf16.mxu0 %v7536_v5  ;;  %6693 = vmatprep.subr.bf16.mxu1 %v7538_v47  ;;  %v4932_v41 = vld [vmem:[%s11485_s15 + $0x1f8] sm:$0xff]  ;;  %v7583_v5 = vcombine.low %v4919_v28, %v4923_v35  ;;  %v7585_v47 = vcombine.low %v4920_v29, %v4924_v30  ;;  %v7632_v28 = vcombine.high %v4967_v42, %v4971_v61  ;;  %v4975_v29 = vld [vmem:[%s11485_s15 + $0x350] sm:$0xff] }
 0xb02   : > { %v7594_v9 = vcombine.high %v4928_v40, %v4932_v41  ;;  %v4979_v30 = vld [vmem:[%s11485_s15 + $0x370] sm:$0xff] }
 0xb03   : > { %6521 = vmatmul.mubr.bf16.vlgmr.msra.gmra.mrb[36].mxu0 %v9178_v48  ;;  %6603 = vmatmul.mubr.bf16.vlgmr.msra.gmra.mrb[28].mxu1 %v9178_v48 }
 0xb04   : > { %6612 = vmatpush1.bf16.msra.mxu0 %v7535_v49  ;;  %6643 = vmatprep.mubr.bf16.mxu0 %v10823_v25  ;;  %v4936_v49 = vld [vmem:[%s11485_s15 + $0x218] sm:$0xff] }
 0xb05   : > { %6694 = vmatpush1.bf16.msra.mxu1 %v7537_v59  ;;  %6725 = vmatprep.mubr.bf16.mxu1 %v10823_v25  ;;  %v4900_v25 = vld [vmem:[%s11485_s15 + $0xf8] sm:$0xff] }
 0xb06   : > { %6613 = vmatprep.subr.bf16.mxu0 %v7544_v62  ;;  %6695 = vmatprep.subr.bf16.mxu1 %v7546_v63  ;;  %v7562_v18 = vcombine.high %v4896_v14, %v4900_v25  ;;  %v7561_v52 = vcombine.low %v4896_v14, %v4900_v25  ;;  %v4940_v59 = vld [vmem:[%s11485_s15 + $0x238] sm:$0xff]  ;;  %v7591_v62 = vcombine.low %v4927_v56, %v4931_v53  ;;  %v4951_v14 = vld [vmem:[%s11485_s15 + $0x290] sm:$0xff] }
 0xb07   : > { %v7593_v63 = vcombine.low %v4928_v40, %v4932_v41  ;;  %v7602_v3 = vcombine.high %v4936_v49, %v4940_v59  ;;  %v4955_v25 = vld [vmem:[%s11485_s15 + $0x2b0] sm:$0xff]  ;;  %v7640_v56 = vcombine.high %v4975_v29, %v4979_v30 }
 0xb08   : > { %6614 = vmatpush1.bf16.msra.mxu0 %v7543_v7  ;;  %v4944_v7 = vld [vmem:[%s11485_s15 + $0x258] sm:$0xff]  ;;  %v7616_v58 = vcombine.high %v4951_v14, %v4955_v25  ;;  %v4983_v40 = vld [vmem:[%s11485_s15 + $0x390] sm:$0xff] }
 0xb09   : > { %6696 = vmatpush1.bf16.msra.mxu1 %v7545_v8  ;;  %6615 = vmatprep.subr.bf16.mxu0 %v7552_v11  ;;  %v4948_v8 = vld [vmem:[%s11485_s15 + $0x278] sm:$0xff]  ;;  %v7599_v11 = vcombine.low %v4935_v44, %v4939_v46  ;;  %v4987_v41 = vld [vmem:[%s11485_s15 + $0x3b0] sm:$0xff] }
 0xb0a   : > { %6697 = vmatprep.subr.bf16.mxu1 %v7554_v2  ;;  %v7601_v2 = vcombine.low %v4936_v49, %v4940_v59  ;;  %v7610_v13 = vcombine.high %v4944_v7, %v4948_v8  ;;  %v7648_v44 = vcombine.high %v4983_v40, %v4987_v41  ;;  %v4991_v49 = vld [vmem:[%s11485_s15 + $0x3d0] sm:$0xff] }
 0xb0b   : > { %v4995_v59 = vld [vmem:[%s11485_s15 + $0x3f0] sm:$0xff] }
 0xb0c   : > { %6616 = vmatpush1.bf16.msra.mxu0 %v7551_v15  ;;  %v4952_v15 = vld [vmem:[%s11485_s15 + $0x298] sm:$0xff] }
 0xb0d   : > { %6698 = vmatpush1.bf16.msra.mxu1 %v7553_v16  ;;  %6617 = vmatprep.subr.bf16.mxu0 %v7560_v17  ;;  %v4956_v16 = vld [vmem:[%s11485_s15 + $0x2b8] sm:$0xff]  ;;  %v7607_v17 = vcombine.low %v4943_v4, %v4947_v6  ;;  %v7656_v4 = vcombine.high %v4991_v49, %v4995_v59 }
 0xb0e   : > { %6699 = vmatprep.subr.bf16.mxu1 %v7562_v18  ;;  %v7609_v18 = vcombine.low %v4944_v7, %v4948_v8  ;;  %v7618_v1 = vcombine.high %v4952_v15, %v4956_v16  ;;  %v4999_v7 = vld [vmem:[%s11485_s15 + $0x410] sm:$0xff] }
 0xb0f   : > { %v5003_v8 = vld [vmem:[%s11485_s15 + $0x430] sm:$0xff] }
 0xb10   : > { %6618 = vmatpush1.bf16.msra.mxu0 %v7559_v23  ;;  %v4960_v23 = vld [vmem:[%s11485_s15 + $0x2d8] sm:$0xff] }
 0xb11   : > { %6700 = vmatpush1.bf16.msra.mxu1 %v7561_v52  ;;  %6619 = vmatprep.subr.bf16.mxu0 %v7568_v21  ;;  %v4964_v52 = vld [vmem:[%s11485_s15 + $0x2f8] sm:$0xff]  ;;  %v7615_v21 = vcombine.low %v4951_v14, %v4955_v25  ;;  %v7664_v14 = vcombine.high %v4999_v7, %v5003_v8 }
 0xb12   : > { %6701 = vmatprep.subr.bf16.mxu1 %v7570_v43  ;;  %v7617_v43 = vcombine.low %v4952_v15, %v4956_v16  ;;  %v7626_v51 = vcombine.high %v4960_v23, %v4964_v52  ;;  %v5007_v15 = vld [vmem:[%s11485_s15 + $0x450] sm:$0xff] }
 0xb13   : > { %v5011_v16 = vld [vmem:[%s11485_s15 + $0x470] sm:$0xff] }
 0xb14   : > { %6620 = vmatpush1.bf16.msra.mxu0 %v7567_v22  ;;  %v4968_v22 = vld [vmem:[%s11485_s15 + $0x318] sm:$0xff] }
 0xb15   : > { %6702 = vmatpush1.bf16.msra.mxu1 %v7569_v24  ;;  %6621 = vmatprep.subr.bf16.mxu0 %v7576_v31  ;;  %v4972_v24 = vld [vmem:[%s11485_s15 + $0x338] sm:$0xff]  ;;  %v7623_v31 = vcombine.low %v4959_v19, %v4963_v20  ;;  %v7672_v19 = vcombine.high %v5007_v15, %v5011_v16 }
 0xb16   : > { %6703 = vmatprep.subr.bf16.mxu1 %v7578_v27  ;;  %v7625_v27 = vcombine.low %v4960_v23, %v4964_v52  ;;  %v7634_v35 = vcombine.high %v4968_v22, %v4972_v24  ;;  %v5015_v23 = vld [vmem:[%s11485_s15 + $0x490] sm:$0xff] }
 0xb17   : > { %v5019_v52 = vld [vmem:[%s11485_s15 + $0x4b0] sm:$0xff] }
 0xb18   : > { %6622 = vmatpush1.bf16.msra.mxu0 %v7575_v32  ;;  %v4976_v32 = vld [vmem:[%s11485_s15 + $0x358] sm:$0xff] }
 0xb19   : > { %6704 = vmatpush1.bf16.msra.mxu1 %v7577_v33  ;;  %6623 = vmatprep.subr.bf16.mxu0 %v7584_v34  ;;  %v4980_v33 = vld [vmem:[%s11485_s15 + $0x378] sm:$0xff]  ;;  %v7631_v34 = vcombine.low %v4967_v42, %v4971_v61  ;;  %v7680_v42 = vcombine.high %v5015_v23, %v5019_v52 }
 0xb1a   : > { %6705 = vmatprep.subr.bf16.mxu1 %v7586_v36  ;;  %v7633_v36 = vcombine.low %v4968_v22, %v4972_v24  ;;  %v7642_v53 = vcombine.high %v4976_v32, %v4980_v33  ;;  %v5023_v22 = vld [vmem:[%s11485_s15 + $0x4d0] sm:$0xff] }
 0xb1b   : > { %v5027_v24 = vld [vmem:[%s11485_s15 + $0x4f0] sm:$0xff] }
 0xb1c   : > { %6624 = vmatpush1.bf16.msra.mxu0 %v7583_v5  ;;  %v4984_v5 = vld [vmem:[%s11485_s15 + $0x398] sm:$0xff] }
 0xb1d   : > { %6706 = vmatpush1.bf16.msra.mxu1 %v7585_v47  ;;  %6625 = vmatprep.subr.bf16.mxu0 %v7592_v39  ;;  %v4988_v47 = vld [vmem:[%s11485_s15 + $0x3b8] sm:$0xff]  ;;  %v7639_v39 = vcombine.low %v4975_v29, %v4979_v30  ;;  %v5031_v30 = vld [vmem:[%s11485_s15 + $0x510] sm:$0xff] }
 0xb1e   : > { %6707 = vmatprep.subr.bf16.mxu1 %v7594_v9  ;;  %v7641_v9 = vcombine.low %v4976_v32, %v4980_v33  ;;  %v7650_v46 = vcombine.high %v4984_v5, %v4988_v47  ;;  %v5035_v32 = vld [vmem:[%s11485_s15 + $0x530] sm:$0xff]  ;;  %v5036_v33 = vld [vmem:[%s11485_s15 + $0x538] sm:$0xff] }
 0xb20   : > { %6626 = vmatpush1.bf16.msra.mxu0 %v7591_v62  ;;  %v4992_v62 = vld [vmem:[%s11485_s15 + $0x3d8] sm:$0xff] }
 0xb21   : > { %6708 = vmatpush1.bf16.msra.mxu1 %v7593_v63  ;;  %6627 = vmatprep.subr.bf16.mxu0 %v7600_v0  ;;  %v4996_v63 = vld [vmem:[%s11485_s15 + $0x3f8] sm:$0xff]  ;;  %v7647_v0 = vcombine.low %v4983_v40, %v4987_v41  ;;  %v5039_v40 = vld [vmem:[%s11485_s15 + $0x550] sm:$0xff] }
 0xb22   : > { %6709 = vmatprep.subr.bf16.mxu1 %v7602_v3  ;;  %v7649_v3 = vcombine.low %v4984_v5, %v4988_v47  ;;  %v7658_v6 = vcombine.high %v4992_v62, %v4996_v63  ;;  %v5043_v41 = vld [vmem:[%s11485_s15 + $0x570] sm:$0xff]  ;;  %v5040_v5 = vld [vmem:[%s11485_s15 + $0x558] sm:$0xff] }
 0xb23   : > { %v5044_v47 = vld [vmem:[%s11485_s15 + $0x578] sm:$0xff] }
 0xb24   : > { %6628 = vmatpush1.bf16.msra.mxu0 %v7599_v11  ;;  %v5000_v11 = vld [vmem:[%s11485_s15 + $0x418] sm:$0xff] }
 0xb25   : > { %6710 = vmatpush1.bf16.msra.mxu1 %v7601_v2  ;;  %6629 = vmatprep.subr.bf16.mxu0 %v7608_v12  ;;  %v5004_v2 = vld [vmem:[%s11485_s15 + $0x438] sm:$0xff]  ;;  %v7655_v12 = vcombine.low %v4991_v49, %v4995_v59  ;;  %v5047_v49 = vld [vmem:[%s11485_s15 + $0x590] sm:$0xff] }
 0xb26   : > { %6711 = vmatprep.subr.bf16.mxu1 %v7610_v13  ;;  %v7657_v13 = vcombine.low %v4992_v62, %v4996_v63  ;;  %v7666_v25 = vcombine.high %v5000_v11, %v5004_v2  ;;  %v5051_v59 = vld [vmem:[%s11485_s15 + $0x5b0] sm:$0xff]  ;;  %v5048_v62 = vld [vmem:[%s11485_s15 + $0x598] sm:$0xff] }
 0xb27   : > { %v5052_v63 = vld [vmem:[%s11485_s15 + $0x5b8] sm:$0xff] }
 0xb28   : > { %6630 = vmatpush1.bf16.msra.mxu0 %v7607_v17  ;;  %v5008_v17 = vld [vmem:[%s11485_s15 + $0x458] sm:$0xff] }
 0xb29   : > { %6712 = vmatpush1.bf16.msra.mxu1 %v7609_v18  ;;  %6631 = vmatprep.subr.bf16.mxu0 %v7616_v58  ;;  %v5012_v18 = vld [vmem:[%s11485_s15 + $0x478] sm:$0xff]  ;;  %v7663_v58 = vcombine.low %v4999_v7, %v5003_v8  ;;  %v5055_v7 = vld [vmem:[%s11485_s15 + $0x5d0] sm:$0xff] }
 0xb2a   : > { %6713 = vmatprep.subr.bf16.mxu1 %v7618_v1  ;;  %v7665_v1 = vcombine.low %v5000_v11, %v5004_v2  ;;  %v7674_v20 = vcombine.high %v5008_v17, %v5012_v18  ;;  %v5059_v8 = vld [vmem:[%s11485_s15 + $0x5f0] sm:$0xff]  ;;  %v5056_v11 = vld [vmem:[%s11485_s15 + $0x5d8] sm:$0xff] }
 0xb2b   : > { %v5060_v2 = vld [vmem:[%s11485_s15 + $0x5f8] sm:$0xff] }
 0xb2c   : > { %6632 = vmatpush1.bf16.msra.mxu0 %v7615_v21  ;;  %v5016_v21 = vld [vmem:[%s11485_s15 + $0x498] sm:$0xff] }
 0xb2d   : > { %6714 = vmatpush1.bf16.msra.mxu1 %v7617_v43  ;;  %6633 = vmatprep.subr.bf16.mxu0 %v7624_v45  ;;  %v5020_v43 = vld [vmem:[%s11485_s15 + $0x4b8] sm:$0xff]  ;;  %v7671_v45 = vcombine.low %v5007_v15, %v5011_v16  ;;  %v5063_v15 = vld [vmem:[%s11485_s15 + $0x610] sm:$0xff] }
 0xb2e   : > { %6715 = vmatprep.subr.bf16.mxu1 %v7626_v51  ;;  %v7673_v51 = vcombine.low %v5008_v17, %v5012_v18  ;;  %v7682_v61 = vcombine.high %v5016_v21, %v5020_v43  ;;  %v5067_v16 = vld [vmem:[%s11485_s15 + $0x630] sm:$0xff]  ;;  %v5064_v17 = vld [vmem:[%s11485_s15 + $0x618] sm:$0xff] }
 0xb2f   : > { %v5068_v18 = vld [vmem:[%s11485_s15 + $0x638] sm:$0xff] }
 0xb30   : > { %6634 = vmatpush1.bf16.msra.mxu0 %v7623_v31  ;;  %v5028_v31 = vld [vmem:[%s11485_s15 + $0x4f8] sm:$0xff] }
 0xb31   : > { %6716 = vmatpush1.bf16.msra.mxu1 %v7625_v27  ;;  %6635 = vmatprep.subr.bf16.mxu0 %v7632_v28  ;;  %v7679_v27 = vcombine.low %v5015_v23, %v5019_v52  ;;  %v7681_v28 = vcombine.low %v5016_v21, %v5020_v43  ;;  %v5071_v23 = vld [vmem:[%s11485_s15 + $0x650] sm:$0xff]  ;;  %v5072_v21 = vld [vmem:[%s11485_s15 + $0x658] sm:$0xff] }
 0xb32   : > { %6717 = vmatprep.subr.bf16.mxu1 %v7634_v35  ;;  %v7688_v35 = vcombine.high %v5023_v22, %v5027_v24  ;;  %v5075_v52 = vld [vmem:[%s11485_s15 + $0x670] sm:$0xff]  ;;  %v5076_v43 = vld [vmem:[%s11485_s15 + $0x678] sm:$0xff] }
 0xb34   : > { %6636 = vmatpush1.bf16.msra.mxu0 %v7631_v34  ;;  %v7687_v34 = vcombine.low %v5023_v22, %v5027_v24  ;;  %v5079_v22 = vld [vmem:[%s11485_s15 + $0x690] sm:$0xff] }
 0xb35   : > { %6718 = vmatpush1.bf16.msra.mxu1 %v7633_v36  ;;  %6637 = vmatprep.subr.bf16.mxu0 %v7640_v56  ;;  %v7696_v56 = vcombine.high %v5031_v30, %v5035_v32  ;;  %v5083_v24 = vld [vmem:[%s11485_s15 + $0x6b0] sm:$0xff] }
 0xb36   : > { %6719 = vmatprep.subr.bf16.mxu1 %v7642_v53 }
 0xb38   : > { %6638 = vmatpush1.bf16.msra.mxu0 %v7639_v39  ;;  %v7695_v39 = vcombine.low %v5031_v30, %v5035_v32  ;;  %v5087_v30 = vld [vmem:[%s11485_s15 + $0x6d0] sm:$0xff] }
 0xb39   : > { %6720 = vmatpush1.bf16.msra.mxu1 %v7641_v9  ;;  %6639 = vmatprep.subr.bf16.mxu0 %v7648_v44  ;;  %v7704_v44 = vcombine.high %v5039_v40, %v5043_v41  ;;  %v5091_v32 = vld [vmem:[%s11485_s15 + $0x6f0] sm:$0xff] }
 0xb3a   : > { %6721 = vmatprep.subr.bf16.mxu1 %v7650_v46  ;;  %v7706_v46 = vcombine.high %v5040_v5, %v5044_v47 }
 0xb3c   : > { %6640 = vmatpush1.bf16.msra.mxu0 %v7647_v0  ;;  %v7703_v0 = vcombine.low %v5039_v40, %v5043_v41  ;;  %v5095_v40 = vld [vmem:[%s11485_s15 + $0x710] sm:$0xff] }
 0xb3d   : > { %6722 = vmatpush1.bf16.msra.mxu1 %v7649_v3  ;;  %6641 = vmatprep.subr.bf16.mxu0 %v7656_v4  ;;  %v7705_v3 = vcombine.low %v5040_v5, %v5044_v47  ;;  %v7712_v4 = vcombine.high %v5047_v49, %v5051_v59  ;;  %v5099_v41 = vld [vmem:[%s11485_s15 + $0x730] sm:$0xff]  ;;  %v5096_v5 = vld [vmem:[%s11485_s15 + $0x718] sm:$0xff] }
 0xb3e   : > { %6723 = vmatprep.subr.bf16.mxu1 %v7658_v6  ;;  %v7714_v6 = vcombine.high %v5048_v62, %v5052_v63  ;;  %v5100_v47 = vld [vmem:[%s11485_s15 + $0x738] sm:$0xff] }
 0xb40   : > { %6642 = vmatpush1.bf16.msra.mxu0 %v7655_v12  ;;  %v7711_v12 = vcombine.low %v5047_v49, %v5051_v59  ;;  %v5103_v49 = vld [vmem:[%s11485_s15 + $0x750] sm:$0xff] }
 0xb41   : > { %6724 = vmatpush1.bf16.msra.mxu1 %v7657_v13  ;;  %6652 = vmatprep.subr.bf16.mxu0 %v7664_v14  ;;  %v7713_v13 = vcombine.low %v5048_v62, %v5052_v63  ;;  %v7720_v14 = vcombine.high %v5055_v7, %v5059_v8  ;;  %v5107_v59 = vld [vmem:[%s11485_s15 + $0x770] sm:$0xff]  ;;  %v5104_v62 = vld [vmem:[%s11485_s15 + $0x758] sm:$0xff] }
 0xb42   : > { %6734 = vmatprep.subr.bf16.mxu1 %v7666_v25  ;;  %v7722_v25 = vcombine.high %v5056_v11, %v5060_v2  ;;  %v5108_v63 = vld [vmem:[%s11485_s15 + $0x778] sm:$0xff] }
 0xb43   : > { %6644 = vmatmul.mubr.bf16.vlgmr.msra.gmra.mrb[40].mxu0 %v10825_v26 }
 0xb44   : > { %6726 = vmatmul.mubr.bf16.vlgmr.msra.gmra.mrb[32].mxu1 %v10825_v26  ;;  %6653 = vmatpush1.bf16.msra.mxu0 %v7663_v58  ;;  %v5024_v26 = vld [vmem:[%s11485_s15 + $0x4d8] sm:$0xff]  ;;  %v7719_v58 = vcombine.low %v5055_v7, %v5059_v8  ;;  %v5111_v7 = vld [vmem:[%s11485_s15 + $0x790] sm:$0xff] }
 0xb45   : > { %6735 = vmatpush1.bf16.msra.mxu1 %v7665_v1  ;;  %6654 = vmatprep.subr.bf16.mxu0 %v7672_v19  ;;  %v7690_v29 = vcombine.high %v5024_v26, %v5028_v31  ;;  %v7689_v36 = vcombine.low %v5024_v26, %v5028_v31  ;;  %v7721_v1 = vcombine.low %v5056_v11, %v5060_v2  ;;  %v5080_v26 = vld [vmem:[%s11485_s15 + $0x698] sm:$0xff]  ;;  %v5115_v8 = vld [vmem:[%s11485_s15 + $0x7b0] sm:$0xff] }
 0xb46   : > { %6736 = vmatprep.subr.bf16.mxu1 %v7674_v20  ;;  %6684 = vmatprep.mubr.bf16.mxu0 %v9183_v50  ;;  %v7728_v19 = vcombine.high %v5063_v15, %v5067_v16  ;;  %v7730_v20 = vcombine.high %v5064_v17, %v5068_v18  ;;  %v5084_v31 = vld [vmem:[%s11485_s15 + $0x6b8] sm:$0xff] }
 0xb47   : > { %6766 = vmatprep.mubr.bf16.mxu1 %v9183_v50  ;;  %v5032_v50 = vld [vmem:[%s11485_s15 + $0x518] sm:$0xff] }
 0xb48   : > { %6655 = vmatpush1.bf16.msra.mxu0 %v7671_v45  ;;  %v7698_v53 = vcombine.high %v5032_v50, %v5036_v33  ;;  %v7697_v9 = vcombine.low %v5032_v50, %v5036_v33  ;;  %v7727_v45 = vcombine.low %v5063_v15, %v5067_v16  ;;  %v5088_v50 = vld [vmem:[%s11485_s15 + $0x6d8] sm:$0xff]  ;;  %v5119_v15 = vld [vmem:[%s11485_s15 + $0x7d0] sm:$0xff] }
 0xb49   : > { %6737 = vmatpush1.bf16.msra.mxu1 %v7673_v51  ;;  %6656 = vmatprep.subr.bf16.mxu0 %v7680_v42  ;;  %v7729_v51 = vcombine.low %v5064_v17, %v5068_v18  ;;  %v7736_v42 = vcombine.high %v5071_v23, %v5075_v52  ;;  %v5092_v33 = vld [vmem:[%s11485_s15 + $0x6f8] sm:$0xff]  ;;  %v5123_v16 = vld [vmem:[%s11485_s15 + $0x7f0] sm:$0xff] }
 0xb4a   : > { %6738 = vmatprep.subr.bf16.mxu1 %v7682_v61  ;;  %v7738_v61 = vcombine.high %v5072_v21, %v5076_v43  ;;  %v5112_v11 = vld [vmem:[%s11485_s15 + $0x798] sm:$0xff] }
 0xb4b   : > { %v5116_v2 = vld [vmem:[%s11485_s15 + $0x7b8] sm:$0xff] }
 0xb4c   : > { %6657 = vmatpush1.bf16.msra.mxu0 %v7679_v27  ;;  %v7735_v27 = vcombine.low %v5071_v23, %v5075_v52  ;;  %v5120_v17 = vld [vmem:[%s11485_s15 + $0x7d8] sm:$0xff]  ;;  %v7783_v23 = vcombine.low %v5119_v15, %v5123_v16 }
 0xb4d   : > { %6739 = vmatpush1.bf16.msra.mxu1 %v7681_v28  ;;  %6658 = vmatprep.subr.bf16.mxu0 %v7688_v35  ;;  %v7737_v28 = vcombine.low %v5072_v21, %v5076_v43  ;;  %v7744_v35 = vcombine.high %v5079_v22, %v5083_v24  ;;  %v5124_v18 = vld [vmem:[%s11485_s15 + $0x7f8] sm:$0xff] }
 0xb4e   : > { %6740 = vmatprep.subr.bf16.mxu1 %v7690_v29  ;;  %v7746_v29 = vcombine.high %v5080_v26, %v5084_v31  ;;  %v7785_v52 = vcombine.low %v5120_v17, %v5124_v18 }
 0xb50   : > { %6659 = vmatpush1.bf16.msra.mxu0 %v7687_v34  ;;  %v7743_v34 = vcombine.low %v5079_v22, %v5083_v24 }
 0xb51   : > { %6741 = vmatpush1.bf16.msra.mxu1 %v7689_v36  ;;  %6660 = vmatprep.subr.bf16.mxu0 %v7696_v56  ;;  %v7745_v36 = vcombine.low %v5080_v26, %v5084_v31  ;;  %v7752_v56 = vcombine.high %v5087_v30, %v5091_v32  ;;  %v5125_v26 = vld [vmem:[%s11486_s16] sm:$0xff] }
 0xb52   : > { %6742 = vmatprep.subr.bf16.mxu1 %v7698_v53  ;;  %v7754_v53 = vcombine.high %v5088_v50, %v5092_v33  ;;  %v5130_v31 = vrot.slane %v5125_v26, %v9354_v54 }
 0xb54   : > { %6661 = vmatpush1.bf16.msra.mxu0 %v7695_v39  ;;  %v7751_v39 = vcombine.low %v5087_v30, %v5091_v32 }
 0xb55   : > { %6743 = vmatpush1.bf16.msra.mxu1 %v7697_v9  ;;  %6662 = vmatprep.subr.bf16.mxu0 %v7704_v44  ;;  %v7753_v9 = vcombine.low %v5088_v50, %v5092_v33  ;;  %v7760_v44 = vcombine.high %v5095_v40, %v5099_v41 }
 0xb56   : > { %6744 = vmatprep.subr.bf16.mxu1 %v7706_v46  ;;  %v7762_v46 = vcombine.high %v5096_v5, %v5100_v47 }
 0xb58   : > { %6663 = vmatpush1.bf16.msra.mxu0 %v7703_v0  ;;  %v7759_v0 = vcombine.low %v5095_v40, %v5099_v41 }
 0xb59   : > { %6745 = vmatpush1.bf16.msra.mxu1 %v7705_v3  ;;  %6664 = vmatprep.subr.bf16.mxu0 %v7712_v4  ;;  %v7761_v3 = vcombine.low %v5096_v5, %v5100_v47  ;;  %v7768_v4 = vcombine.high %v5103_v49, %v5107_v59  ;;  %v5157_v5 = vsub.s32 7, %v9105_v10 }
 0xb5a   : > { %6746 = vmatprep.subr.bf16.mxu1 %v7714_v6  ;;  %v7770_v6 = vcombine.high %v5104_v62, %v5108_v63 }
 0xb5c   : > { %6665 = vmatpush1.bf16.msra.mxu0 %v7711_v12  ;;  %v7767_v12 = vcombine.low %v5103_v49, %v5107_v59  ;;  %v5158_v59 = vrot.slane %v5125_v26, %v5157_v5 }
 0xb5d   : > { %6747 = vmatpush1.bf16.msra.mxu1 %v7713_v13  ;;  %6666 = vmatprep.subr.bf16.mxu0 %v7720_v14  ;;  %v7769_v13 = vcombine.low %v5104_v62, %v5108_v63  ;;  %v7776_v14 = vcombine.high %v5111_v7, %v5115_v8  ;;  %v806_v62 = vld [vmem:[#allocation8] sm:$0xf] }
 0xb5e   : > { %6748 = vmatprep.subr.bf16.mxu1 %v7722_v25  ;;  %v7778_v25 = vcombine.high %v5112_v11, %v5116_v2 }
 0xb60   : > { %6667 = vmatpush1.bf16.msra.mxu0 %v7719_v58  ;;  %v7775_v58 = vcombine.low %v5111_v7, %v5115_v8 }
 0xb61   : > { %6749 = vmatpush1.bf16.msra.mxu1 %v7721_v1  ;;  %6668 = vmatprep.subr.bf16.mxu0 %v7728_v19  ;;  %v7777_v1 = vcombine.low %v5112_v11, %v5116_v2  ;;  %v7784_v19 = vcombine.high %v5119_v15, %v5123_v16  ;;  %v807_v2 = vmul.f32 %v806_v62, %v9153_v37 }
 0xb62   : > { %6750 = vmatprep.subr.bf16.mxu1 %v7730_v20  ;;  %v7786_v20 = vcombine.high %v5120_v17, %v5124_v18 }
 0xb63   : > { %v6820_v17 = vrot.slane %v807_v2, %v9156_v38 }
 0xb64   : > { %6669 = vmatpush1.bf16.msra.mxu0 %v7727_v45 }
 0xb65   : > { %6751 = vmatpush1.bf16.msra.mxu1 %v7729_v51  ;;  %6670 = vmatprep.subr.bf16.mxu0 %v7736_v42 }
 0xb66   : > { %6752 = vmatprep.subr.bf16.mxu1 %v7738_v61 }
 0xb68   : > { %6671 = vmatpush1.bf16.msra.mxu0 %v7735_v27  ;;  %v5138_v27 = vrot.slane %v5125_v26, %v9357_v55  ;;  %v5145_v55 = vsub.s32 4, %v9105_v10 }
 0xb69   : > { %6753 = vmatpush1.bf16.msra.mxu1 %v7737_v28  ;;  %6672 = vmatprep.subr.bf16.mxu0 %v7744_v35  ;;  %v5134_v28 = vrot.slane %v5125_v26, %v9363_v57 }
 0xb6a   : > { %6754 = vmatprep.subr.bf16.mxu1 %v7746_v29 }
 0xb6c   : > { %6673 = vmatpush1.bf16.msra.mxu0 %v7743_v34 }
 0xb6d   : > { %6755 = vmatpush1.bf16.msra.mxu1 %v7745_v36  ;;  %6674 = vmatprep.subr.bf16.mxu0 %v7752_v56 }
 0xb6e   : > { %6756 = vmatprep.subr.bf16.mxu1 %v7754_v53  ;;  %v5153_v53 = vsub.s32 6, %v9105_v10 }
 0xb70   : > { %6675 = vmatpush1.bf16.msra.mxu0 %v7751_v39 }
 0xb71   : > { %6757 = vmatpush1.bf16.msra.mxu1 %v7753_v9  ;;  %6676 = vmatprep.subr.bf16.mxu0 %v7760_v44  ;;  %v5146_v9 = vrot.slane %v5125_v26, %v5145_v55 }
 0xb72   : > { %6758 = vmatprep.subr.bf16.mxu1 %v7762_v46  ;;  %v5154_v46 = vrot.slane %v5125_v26, %v5153_v53 }
 0xb74   : > { %6677 = vmatpush1.bf16.msra.mxu0 %v7759_v0 }
 0xb75   : > { %6759 = vmatpush1.bf16.msra.mxu1 %v7761_v3  ;;  %6678 = vmatprep.subr.bf16.mxu0 %v7768_v4 }
 0xb76   : > { %6760 = vmatprep.subr.bf16.mxu1 %v7770_v6 }
 0xb78   : > { %6679 = vmatpush1.bf16.msra.mxu0 %v7767_v12 }
 0xb79   : > { %6761 = vmatpush1.bf16.msra.mxu1 %v7769_v13  ;;  %6680 = vmatprep.subr.bf16.mxu0 %v7776_v14 }
 0xb7a   : > { %6762 = vmatprep.subr.bf16.mxu1 %v7778_v25 }
 0xb7c   : > { %6681 = vmatpush1.bf16.msra.mxu0 %v7775_v58 }
 0xb7d   : > { %6763 = vmatpush1.bf16.msra.mxu1 %v7777_v1  ;;  %6682 = vmatprep.subr.bf16.mxu0 %v7784_v19  ;;  %v6821_v19 = vcombine.high %v6820_v17, %v6820_v17 }
 0xb7e   : > { %6764 = vmatprep.subr.bf16.mxu1 %v7786_v20 }
 0xb80   : > { %6683 = vmatpush1.bf16.msra.mxu0 %v7783_v23 }
 0xb81   : > { %6765 = vmatpush1.bf16.msra.mxu1 %v7785_v52 }
 0xb83   : > { %6685 = vmatmul.mubr.bf16.vlgmr.msra.gmra.mrb[40].mxu0 %v9178_v48 }
 0xb84   : > { %6767 = vmatmul.mubr.bf16.vlgmr.msra.gmra.mrb[32].mxu1 %v9178_v48  ;;  %v5142_v48 = vrot.slane %v5125_v26, %v2658_v60  ;;  %v5149_v60 = vsub.s32 5, %v9105_v10 }
 0xb86   : > { %v5150_v49 = vrot.slane %v5125_v26, %v5149_v60 }
 0xbd6   : > { %v6522_v21 = vpop.f32.mrb[36].mxu0  ;;  %v6604_v43 = vpop.f32.mrb[28].mxu1 }
 0xbd7   : > { %v6524_v45 = vpop.f32.mrb[37].mxu0  ;;  %v6606_v51 = vpop.f32.mrb[29].mxu1  ;;  %v7958_v35 = vadd.f32 %v6522_v21, %v5130_v31  ;;  %v7960_v29 = vadd.f32 %v6604_v43, %v5138_v27 }
 0xbd8   : > { %v6526_v42 = vpop.f32.mrb[38].mxu0  ;;  %v6608_v61 = vpop.f32.mrb[30].mxu1  ;;  %v7959_v30 = vadd.f32 %v6524_v45, %v5134_v28  ;;  %v7961_v32 = vadd.f32 %v6606_v51, %v5142_v48 }
 0xbd9   : > { %v6527_v22 = vpop.f32.mrb[39].mxu0  ;;  %v6609_v24 = vpop.f32.mrb[31].mxu1  ;;  %v7787_v50 = vmul.f32 -1.442695, %v7958_v35  ;;  %v7789_v33 = vmul.f32 -1.442695, %v7960_v29 }
 0xbda   : > { %v7788_v34 = vmul.f32 -1.442695, %v7959_v30  ;;  %v7790_v36 = vmul.f32 -1.442695, %v7961_v32 }
 0xbdb   : > { %8723 = vpow2.f32 %v7787_v50 }
 0xbdc   : > { %8725 = vpow2.f32 %v7789_v33 }
 0xbdd   : > { %8727 = vpow2.f32 %v7788_v34 }
 0xbde   : > { %8729 = vpow2.f32 %v7790_v36 }
 0xbe5   : > { %v8724_v54 = vpop.eup %8723 }
 0xbe6   : > { %v8726_v56 = vpop.eup %8725  ;;  %v6781_v41 = vadd.f32 1.0, %v8724_v54 }
 0xbe7   : > { %v8728_v57 = vpop.eup %8727  ;;  %v6793_v47 = vadd.f32 1.0, %v8726_v56 }
 0xbe8   : > { %v8730_v40 = vpop.eup %8729  ;;  %v6782_v39 = vadd.f32 1.0, %v8728_v57  ;;  %8731 = vrcp.f32 %v6781_v41 }
 0xbe9   : > { %v6794_v44 = vadd.f32 1.0, %v8730_v40  ;;  %8733 = vrcp.f32 %v6793_v47 }
 0xbea   : > { %8735 = vrcp.f32 %v6782_v39 }
 0xbeb   : > { %8737 = vrcp.f32 %v6794_v44 }
 0xbf2   : > { %v8732_v18 = vpop.eup %8731 }
 0xbf3   : > { %v8734_v58 = vpop.eup %8733 }
 0xbf4   : > { %v8736_v1 = vpop.eup %8735  ;;  %v6824_v52 = vmul.f32 %v8734_v58, %v6820_v17 }
 0xbf5   : > { %v8738_v20 = vpop.eup %8737 }
 0xbf6   : > { %v6825_v43 = vmul.f32 %v8738_v20, %v6821_v19 }
 0xc56   : > { %v6686_v63 = vpop.f32.mrb[40].mxu0 }
 0xc57   : > { %v7962_v0 = vadd.f32 %v6686_v63, %v5146_v9  ;;  %v6768_v3 = vpop.f32.mrb[32].mxu1  ;;  %v6688_v4 = vpop.f32.mrb[41].mxu0 }
 0xc58   : > { %v7964_v6 = vadd.f32 %v6768_v3, %v5154_v46  ;;  %v7963_v7 = vadd.f32 %v6688_v4, %v5150_v49  ;;  %v6770_v8 = vpop.f32.mrb[33].mxu1  ;;  %v6690_v11 = vpop.f32.mrb[42].mxu0 }
 0xc59   : > { %8739 = vtanh.f32 %v7962_v0  ;;  %v7965_v12 = vadd.f32 %v6770_v8, %v5158_v59  ;;  %v6772_v13 = vpop.f32.mrb[34].mxu1  ;;  %v6691_v14 = vpop.f32.mrb[43].mxu0 }
 0xc5a   : > { %v7791_v25 = vmul.f32 -1.442695, %v7964_v6  ;;  %8741 = vtanh.f32 %v7963_v7  ;;  %v6773_v15 = vpop.f32.mrb[35].mxu1 }
 0xc5b   : > { %v7792_v16 = vmul.f32 -1.442695, %v7965_v12 }
 0xc5c   : > { %8743 = vpow2.f32 %v7791_v25 }
 0xc5d   : > { %8745 = vpow2.f32 %v7792_v16 }
 0xc63   : > { %v8740_v23 = vpop.eup %8739 }
 0xc64   : > { %v8742_v37 = vpop.eup %8741  ;;  %v6826_v21 = vmul.f32 %v8740_v23, %v8732_v18 }
 0xc65   : > { %v6827_v45 = vmul.f32 %v8742_v37, %v8736_v1 }
 0xc66   : > { %v8744_v51 = vpop.eup %8743  ;;  %v6828_v42 = vadd.f32 %v6826_v21, %v6824_v52 }
 0xc67   : > { %v8746_v61 = vpop.eup %8745  ;;  %v6807_v22 = vadd.f32 1.0, %v8744_v51  ;;  %v6829_v38 = vadd.f32 %v6827_v45, %v6825_v43 }
 0xc68   : > { %8747 = vtanh.f32 %v6828_v42  ;;  %v6808_v24 = vadd.f32 1.0, %v8746_v61 }
 0xc69   : > { %8749 = vrcp.f32 %v6807_v22  ;;  %v6869_v26 = vcombine.low %v6828_v42, %v6829_v38 }
 0xc6a   : > { %8751 = vtanh.f32 %v6829_v38 }
 0xc6b   : > { %8753 = vrcp.f32 %v6808_v24  ;;  %7796 = vst.sshfl [vmem:[#allocation8] sm:$0x33 pattern:$0x76325410] %v6869_v26 }
 0xc6c   : > { %8798 = shalt.err (!%p8795_p5)
}
 0xc6d   : > { %s8799_s0 = scalar_lea.hbm %s11491_s21, 64 }
 0xc6e   : > { %p8800_p7 = scmp.ne.s32.totalorder %s11491_s21, %s8799_s0  ;;  %p8805_p11 = scmp.lt.u32.totalorder %s8799_s0, %s11491_s21 }
 0xc70   : > { %p8801_p9 = pnand %p8800_p7, %p11411_p6 }
 0xc72   : > { %p8802_p10 = pneg %p8801_p9 }
 0xc74   : > { %p8807_p3 = pnand %p8805_p11, %p8802_p10 }
 0xc76   : > { %8810 = shalt.err (!%p8807_p3)
}
 0xc77   : > { %8029 = dma.vmem_to_hbm [thread:$0]  (%p11411_p6), %s6915_s28, 64, %s11491_s21, [#allocation9]   ;;  %v8891_v31 = vmov 1966171168   ;;  %v8748_v28 = vpop.eup %8747 }
 0xc78   : > { %v6840_v27 = vunpack.c.l.s4 %v8891_v31  ;;  %v8750_v35 = vpop.eup %8749  ;;  %s8892_s3 = smov [#allocation7]  }
 0xc79   : > { %v8752_v29 = vpop.eup %8751  ;;  %v6832_v30 = vmul.f32 %v8750_v35, %v8748_v28  ;;  %s6900_s1 = sshll.u32 %s8892_s3, 4  ;;  %s6901_s1 = int_to_ptr.vmem [resolvable:$true] %s6900_s1 }
 0xc7a   : > { %v6841_v48 = vunpack.c.0.s8 %v6840_v27  ;;  %v8754_v32 = vpop.eup %8753  ;;  %s8811_s28 = scalar_lea.vmem %s6901_s1, 64  ;;  %p8818_p13 = scmp.lt.s32.totalorder %s6901_s1, %s6901_s1 }
 0xc7b   : > { %v6833_v50 = vmul.f32 %v8754_v32, %v8752_v29  ;;  %p8812_p4 = scmp.ne.s32.totalorder %s6901_s1, %s8811_s28  ;;  %p8819_p0 = scmp.lt.s32.totalorder %s8811_s28, %s8811_s28 }
 0xc7c   : > { %v6844_v33 = vsub.s32 %v6841_v48, %v9105_v10 }
 0xc7d   : > { %v7793_v34 = vpack.c.bf16 %v6833_v50, %v6832_v30  ;;  %v6857_v36 = vcombine.low %v6832_v30, %v6833_v50  ;;  %p8813_p8 = pnand %p8812_p4, %p11411_p6  ;;  %p8820_p1 = por %p8819_p0, %p8818_p13 }
 0xc7f   : > { %v6845_v54 = vrot.slane %v7793_v34, %v6844_v33  ;;  %7795 = vst.sshfl [vmem:[#allocation7] sm:$0x33 pattern:$0x76325410] %v6857_v36  ;;  %p8814_p12 = pneg %p8813_p8 }
 0xc81   : > { %p8821_p2 = pnand %p8820_p1, %p8814_p12 }
 0xc83   : > { %8824 = shalt.err (!%p8821_p2)
}
 0xc84   : > { %s8825_s29 = scalar_lea.hbm %s11490_s20, 64 }
 0xc85   : > { %p8826_p5 = scmp.ne.s32.totalorder %s11490_s20, %s8825_s29  ;;  %p8831_p10 = scmp.lt.u32.totalorder %s8825_s29, %s11490_s20 }
 0xc87   : > { %p8827_p7 = pnand %p8826_p5, %p11411_p6 }
 0xc89   : > { %p8828_p9 = pneg %p8827_p7 }
 0xc8b   : > { %p8833_p11 = pnand %p8831_p10, %p8828_p9 }
 0xc8d   : > { %8836 = shalt.err (!%p8833_p11)
}
 0xc8e   : > { %8027 = dma.vmem_to_hbm [thread:$0]  (%p11411_p6), %s6901_s1, 64, %s11490_s20, [#allocation3]   ;;  %7794 = vst.sshfl [vmem:[%s9074_s27] sm:$0x5 pattern:$0x73625140] %v6845_v54 }
 0xc8f   : > { %8858 = dma.done.wait (%p11411_p6), [#allocation3], 64  }
 0xc90   : > { %8860 = vsyncadd (%p11411_p6), [#allocation3], 4294967232 }
 0xc91   : > { %8862 = dma.done.wait (%p11411_p6), [#allocation9], 64  }
 0xc92   : > { %8864 = vsyncadd (%p11411_p6), [#allocation9], 4294967232 }
 0xc93 PF: > { %s36_s26 = sadd.s32 1, %s8875_s26   ;;  %s11529_s2 = sld [smem:[#allocation14_spill]] }
 0xc94   : > { %p33_p3 = scmp.ge.s32.totalorder %s36_s26, 4   ;;  %s11530_s25 = sld [smem:[#allocation15_spill]] }
 0xc96   :  { %35 = sbr.rel (!%p33_p3) target bundleno = 14 (0xe), region = 164 }
 0xc9d   :  { %6942 = vsyncpa [#allocation3], 1 }
 0xc9e   :  { %6944 = vsyncpa [#allocation3 + $0x1], 1 }
 0xc9f   :  { %6945 = vsyncpa [#allocation9], 1 }
 0xca0   :  { %6946 = vsyncpa [#allocation4], 1 }
 0xca1   :  { %6948 = vsyncpa [#allocation4 + $0x1], 1 }
 0xca2   :  { %6949 = vsyncpa [#allocation6], 1 }

</bundles_post_ra>
